<compile_context>
chip_gen: v7x
topology: tpu7x:2x2x1
jax: 0.10.0
libtpu: 0.0.40
codegen_flags: <defaults>
</compile_context>

<pallas_src>
import jax
import jax.numpy as jnp
from jax.experimental import pallas as pl
from jax.experimental.pallas import tpu as pltpu

HP = 128           # padded hidden width for every layer (lane-aligned gates)
DP = 128           # padded input-feature width
NGATE = 4 * HP     # i | f | g | o, each HP lanes


# ----------------------------------------------------------------------------
# Fused LSTMAE kernel (4 LSTM layers + Linear)
# ----------------------------------------------------------------------------
def _lstmae_kernel(x_ref, w1x_ref, w1h_ref, b1_ref,
                   w2x_hbm, w2h_hbm, b2_ref,
                   w3x_hbm, w3h_hbm, b3_ref,
                   w4x_hbm, w4h_hbm, b4_ref,
                   wl_hbm, bl_ref,
                   out_ref,
                   zx_scr, h4_scr,
                   w2x_v, w2h_v, w3x_v, w3h_v, w4x_v, w4h_v, wl_v,
                   dma_sem):
    T, BP, _ = zx_scr.shape

    # ---- Kick off async DMAs of the later-layer weights (overlap with the
    # hoisted layer-1 projection; the Linear weight overlaps the whole loop).
    hbm_to_vmem = [(w2x_hbm, w2x_v), (w2h_hbm, w2h_v),
                   (w3x_hbm, w3x_v), (w3h_hbm, w3h_v),
                   (w4x_hbm, w4x_v), (w4h_hbm, w4h_v),
                   (wl_hbm, wl_v)]
    copies = []
    for i, (src, dst) in enumerate(hbm_to_vmem):
        cp = pltpu.make_async_copy(src, dst, dma_sem.at[i])
        cp.start()
        copies.append(cp)

    # ---- Hoisted layer-1 input projection (+ combined bias) for ALL steps:
    # one (T*BP, DP) @ (DP, 4*HP) bf16 matmul with f32 accumulation.
    zx = (jnp.dot(x_ref[...], w1x_ref[...],
                  preferred_element_type=jnp.float32) + b1_ref[...])
    zx_scr[...] = zx.reshape(T, BP, NGATE)

    # ---- Hoist bias broadcasts out of the unrolled time loop.
    b2b = jnp.broadcast_to(b2_ref[...], (BP, NGATE))
    b3b = jnp.broadcast_to(b3_ref[...], (BP, NGATE))
    b4b = jnp.broadcast_to(b4_ref[...], (BP, NGATE))

    # Layer 2-4 weights must be resident before t=0; Linear can wait longer.
    for cp in copies[:6]:
        cp.wait()

    def lstm_cell(z, c):
        # PyTorch gate order [i, f, g, o]; each gate is a 128-lane view.
        i = jax.nn.sigmoid(z[:, 0 * HP:1 * HP])
        f = jax.nn.sigmoid(z[:, 1 * HP:2 * HP])
        g = jnp.tanh(z[:, 2 * HP:3 * HP])
        o = jax.nn.sigmoid(z[:, 3 * HP:4 * HP])
        c_new = f * c + i * g
        h_new = o * jnp.tanh(c_new)
        return h_new, c_new

    def mm(a_f32, w_ref):
        # bf16 operands, f32 accumulation on the MXU.
        return jnp.dot(a_f32.astype(jnp.bfloat16), w_ref[...],
                       preferred_element_type=jnp.float32)

    def step(t, carry):
        h1, c1, h2, c2, h3, c3, h4, c4 = carry
        # Layer 1: x-projection precomputed; only the recurrent matmul here.
        z1 = zx_scr[t] + mm(h1, w1h_ref)
        h1, c1 = lstm_cell(z1, c1)
        # Layers 2-4: split input/recurrent matmuls (no concatenate copy).
        z2 = mm(h1, w2x_v) + mm(h2, w2h_v) + b2b
        h2, c2 = lstm_cell(z2, c2)
        z3 = mm(h2, w3x_v) + mm(h3, w3h_v) + b3b
        h3, c3 = lstm_cell(z3, c3)
        z4 = mm(h3, w4x_v) + mm(h4, w4h_v) + b4b
        h4, c4 = lstm_cell(z4, c4)
        h4_scr[t] = h4
        return (h1, c1, h2, c2, h3, c3, h4, c4)

    z0 = jnp.zeros((BP, HP), jnp.float32)
    # Fully unrolled: gives the scheduler the whole dependency graph, so the
    # 4-layer wavefront overlap across time steps falls out of the SSA deps.
    _ = jax.lax.fori_loop(0, T, step, (z0,) * 8, unroll=True)

    # ---- Final Linear over all T*BP rows at once; lane-dense 128-wide out.
    copies[6].wait()
    h4_all = h4_scr[...].reshape(T * BP, HP).astype(jnp.bfloat16)
    y = (jnp.dot(h4_all, wl_v[...], preferred_element_type=jnp.float32)
         + bl_ref[...])
    out_ref[...] = y.astype(out_ref.dtype)


# ----------------------------------------------------------------------------
# Wrapper
# ----------------------------------------------------------------------------
@jax.jit
def lstmae_forward(x, packed):
    """x: (T, B, D) float32; packed: tuple from pack_params()."""
    T, B, D = x.shape
    BP = max(8, ((B + 7) // 8) * 8)            # sublane-pad the batch

    x_pad = (jnp.zeros((T, BP, DP), jnp.bfloat16)
             .at[:, :B, :D].set(x.astype(jnp.bfloat16)))
    x2d = x_pad.reshape(T * BP, DP)            # lane-dense 2-D slab

    vmem = pl.BlockSpec(memory_space=pltpu.MemorySpace.VMEM)
    hbm = pl.BlockSpec(memory_space=pl.ANY)    # manual-DMA weights

    out = pl.pallas_call(
        _lstmae_kernel,
        out_shape=jax.ShapeDtypeStruct((T * BP, HP), jnp.float32),
        in_specs=[vmem, vmem, vmem, vmem,      # x, w1x, w1h, b1
                  hbm, hbm, vmem,              # w2x, w2h, b2
                  hbm, hbm, vmem,              # w3x, w3h, b3
                  hbm, hbm, vmem,              # w4x, w4h, b4
                  hbm, vmem],                  # wl, bl
        out_specs=vmem,
        scratch_shapes=[
            pltpu.VMEM((T, BP, NGATE), jnp.float32),   # hoisted layer-1 x-proj
            pltpu.VMEM((T, BP, HP), jnp.float32),      # layer-4 hidden history
            pltpu.VMEM((HP, NGATE), jnp.bfloat16),     # w2x
            pltpu.VMEM((HP, NGATE), jnp.bfloat16),     # w2h
            pltpu.VMEM((HP, NGATE), jnp.bfloat16),     # w3x
            pltpu.VMEM((HP, NGATE), jnp.bfloat16),     # w3h
            pltpu.VMEM((HP, NGATE), jnp.bfloat16),     # w4x
            pltpu.VMEM((HP, NGATE), jnp.bfloat16),     # w4h
            pltpu.VMEM((HP, HP), jnp.bfloat16),        # wl
            pltpu.SemaphoreType.DMA((7,)),
        ],
        compiler_params=pltpu.CompilerParams(
            vmem_limit_bytes=32 * 1024 * 1024),
    )(x2d, *packed)

    return out.reshape(T, BP, HP)[:, :B, :D]


# ----------------------------------------------------------------------------
# Parameter init (PyTorch-style uniform(-1/sqrt(H), 1/sqrt(H))) + packing
# ----------------------------------------------------------------------------
def init_lstm_params(key, d_in, hidden):
    k = 1.0 / jnp.sqrt(hidden)
    k_ih, k_hh, k_bih, k_bhh = jax.random.split(key, 4)
    # Stored already transposed: (d_in, 4H), (H, 4H); gate order [i, f, g, o].
    w_ih = jax.random.uniform(k_ih, (d_in, 4 * hidden), jnp.float32, -k, k)
    w_hh = jax.random.uniform(k_hh, (hidden, 4 * hidden), jnp.float32, -k, k)
    b_ih = jax.random.uniform(k_bih, (4 * hidden,), jnp.float32, -k, k)
    b_hh = jax.random.uniform(k_bhh, (4 * hidden,), jnp.float32, -k, k)
    bias = (b_ih + b_hh).reshape(1, 4 * hidden)
    return w_ih, w_hh, bias


def init_linear_params(key, d_in, d_out):
    k = 1.0 / jnp.sqrt(d_in)
    k_w, k_b = jax.random.split(key)
    w = jax.random.uniform(k_w, (d_in, d_out), jnp.float32, -k, k)
    b = jax.random.uniform(k_b, (1, d_out), jnp.float32, -k, k)
    return w, b


def _pad_gate_cols(w, h):
    """(rows, 4h) -> (rows, 4*HP): each gate block zero-padded to HP lanes."""
    rows = w.shape[0]
    w4 = w.reshape(rows, 4, h)
    out = jnp.zeros((rows, 4, HP), w.dtype).at[:, :, :h].set(w4)
    return out.reshape(rows, 4 * HP)


def _pad_rows(w, rows_p):
    return jnp.zeros((rows_p,) + w.shape[1:], w.dtype).at[:w.shape[0]].set(w)


def pack_params(params):
    """Pad the per-layer params into the fused-kernel layout (weights bf16).

    Padded gate columns have zero weight and bias, so with zero initial state
    the padded hidden/cell lanes stay exactly 0 for all time (zeros are exact
    in bf16) -> numerically matching the unpadded model up to bf16 rounding.
    """
    (p1, p2, p3, p4, (lw, lb)) = params

    def pack_lstm(w_ih, w_hh, bias, h, din_pad):
        w_x = _pad_rows(_pad_gate_cols(w_ih, h), din_pad).astype(jnp.bfloat16)
        w_h = _pad_rows(_pad_gate_cols(w_hh, h), HP).astype(jnp.bfloat16)
        b = _pad_gate_cols(bias, h)                 # bias stays f32
        return w_x, w_h, b

    w1x, w1h, b1 = pack_lstm(*p1, h=128, din_pad=DP)   # layer 1: D   -> 128
    w2x, w2h, b2 = pack_lstm(*p2, h=64, din_pad=HP)    # layer 2: 128 -> 64
    w3x, w3h, b3 = pack_lstm(*p3, h=64, din_pad=HP)    # layer 3: 64  -> 64
    w4x, w4h, b4 = pack_lstm(*p4, h=128, din_pad=HP)   # layer 4: 64  -> 128

    d_out = lw.shape[1]
    wl = (jnp.zeros((HP, HP), jnp.float32).at[:, :d_out].set(lw)
          .astype(jnp.bfloat16))
    bl = jnp.zeros((1, HP), jnp.float32).at[:, :d_out].set(lb)
    return (w1x, w1h, b1, w2x, w2h, b2, w3x, w3h, b3, w4x, w4h, b4, wl, bl)


# ----------------------------------------------------------------------------
# Pure-JAX f32 reference (correctness check, uses unpadded f32 params)
# ----------------------------------------------------------------------------
def lstm_layer_ref(x, w_ih, w_hh, bias):
    T, B, _ = x.shape
    H = w_hh.shape[0]

    def step(carry, x_t):
        h, c = carry
        z = x_t @ w_ih + h @ w_hh + bias
        i = jax.nn.sigmoid(z[:, 0 * H:1 * H])
        f = jax.nn.sigmoid(z[:, 1 * H:2 * H])
        g = jnp.tanh(z[:, 2 * H:3 * H])
        o = jax.nn.sigmoid(z[:, 3 * H:4 * H])
        c = f * c + i * g
        h = o * jnp.tanh(c)
        return (h, c), h

    init = (jnp.zeros((B, H), jnp.float32), jnp.zeros((B, H), jnp.float32))
    _, hs = jax.lax.scan(step, init, x)
    return hs


def lstmae_forward_ref(x, params):
    (p1, p2, p3, p4, (lw, lb)) = params
    h = lstm_layer_ref(x, *p1)
    h = lstm_layer_ref(h, *p2)
    h = lstm_layer_ref(h, *p3)
    h = lstm_layer_ref(h, *p4)
    return h @ lw + lb


# ----------------------------------------------------------------------------
if __name__ == "__main__":
    DIM = 8     # feature dimension of LSTMAE(dimension=DIM)
    T = 8       # sequence length
    B = 2       # batch size

    key = jax.random.PRNGKey(0)
    kx, k1, k2, k3, k4, k5 = jax.random.split(key, 6)

    x = jax.random.normal(kx, (T, B, DIM), jnp.float32)

    params = (
        init_lstm_params(k1, DIM, 128),
        init_lstm_params(k2, 128, 64),
        init_lstm_params(k3, 64, 64),
        init_lstm_params(k4, 64, 128),
        init_linear_params(k5, 128, DIM),
    )
    packed = pack_params(params)

    out = lstmae_forward(x, packed)
    out = jax.block_until_ready(out)

    ref = lstmae_forward_ref(x, params)
    assert out.shape == (T, B, DIM), out.shape
    max_err = float(jnp.max(jnp.abs(out - ref)))
    # bf16 matmul operands with f32 accumulation: loosened tolerance vs f32 ref
    assert max_err < 4e-2, f"max abs err {max_err} vs f32 reference"

    print("KERNEL_OK")
</pallas_src>

<mosaic_0001>
module attributes {stable_mosaic.version = 11 : i64} {
  func.func @_lstmae_kernel(%arg0: memref<64x128xbf16, #tpu.memory_space<vmem>>, %arg1: memref<128x512xbf16, #tpu.memory_space<vmem>>, %arg2: memref<128x512xbf16, #tpu.memory_space<vmem>>, %arg3: memref<1x512xf32, #tpu.memory_space<vmem>>, %arg4: memref<128x512xbf16, #tpu.memory_space<any>>, %arg5: memref<128x512xbf16, #tpu.memory_space<any>>, %arg6: memref<1x512xf32, #tpu.memory_space<vmem>>, %arg7: memref<128x512xbf16, #tpu.memory_space<any>>, %arg8: memref<128x512xbf16, #tpu.memory_space<any>>, %arg9: memref<1x512xf32, #tpu.memory_space<vmem>>, %arg10: memref<128x512xbf16, #tpu.memory_space<any>>, %arg11: memref<128x512xbf16, #tpu.memory_space<any>>, %arg12: memref<1x512xf32, #tpu.memory_space<vmem>>, %arg13: memref<128x128xbf16, #tpu.memory_space<any>>, %arg14: memref<1x128xf32, #tpu.memory_space<vmem>>, %arg15: memref<64x128xf32, #tpu.memory_space<vmem>>, %arg16: memref<8x8x512xf32, #tpu.memory_space<vmem>>, %arg17: memref<8x8x128xf32, #tpu.memory_space<vmem>>, %arg18: memref<128x512xbf16, #tpu.memory_space<vmem>>, %arg19: memref<128x512xbf16, #tpu.memory_space<vmem>>, %arg20: memref<128x512xbf16, #tpu.memory_space<vmem>>, %arg21: memref<128x512xbf16, #tpu.memory_space<vmem>>, %arg22: memref<128x512xbf16, #tpu.memory_space<vmem>>, %arg23: memref<128x512xbf16, #tpu.memory_space<vmem>>, %arg24: memref<128x128xbf16, #tpu.memory_space<vmem>>, %arg25: memref<7x!tpu.dma_semaphore, #tpu.memory_space<semaphore_mem>>) attributes {dimension_semantics = [], scalar_prefetch = 0 : i64, scratch_operands = 10 : i64, tpu.core_type = #tpu.core_type<tc>} {
    %c0_i32 = arith.constant 0 : i32
    %0 = tpu.memref_slice %arg25[%c0_i32] : memref<7x!tpu.dma_semaphore, #tpu.memory_space<semaphore_mem>> -> memref<1x!tpu.dma_semaphore, #tpu.memory_space<semaphore_mem>>
    %1 = tpu.memref_squeeze %0 : memref<1x!tpu.dma_semaphore, #tpu.memory_space<semaphore_mem>> -> memref<!tpu.dma_semaphore, #tpu.memory_space<semaphore_mem>>
    tpu.enqueue_dma source(%arg4 : memref<128x512xbf16, #tpu.memory_space<any>>) target(%arg18 : memref<128x512xbf16, #tpu.memory_space<vmem>>) target_semaphore(%1 : memref<!tpu.dma_semaphore, #tpu.memory_space<semaphore_mem>>)
    %c1_i32 = arith.constant 1 : i32
    %2 = tpu.memref_slice %arg25[%c1_i32] : memref<7x!tpu.dma_semaphore, #tpu.memory_space<semaphore_mem>> -> memref<1x!tpu.dma_semaphore, #tpu.memory_space<semaphore_mem>>
    %3 = tpu.memref_squeeze %2 : memref<1x!tpu.dma_semaphore, #tpu.memory_space<semaphore_mem>> -> memref<!tpu.dma_semaphore, #tpu.memory_space<semaphore_mem>>
    tpu.enqueue_dma source(%arg5 : memref<128x512xbf16, #tpu.memory_space<any>>) target(%arg19 : memref<128x512xbf16, #tpu.memory_space<vmem>>) target_semaphore(%3 : memref<!tpu.dma_semaphore, #tpu.memory_space<semaphore_mem>>)
    %c2_i32 = arith.constant 2 : i32
    %4 = tpu.memref_slice %arg25[%c2_i32] : memref<7x!tpu.dma_semaphore, #tpu.memory_space<semaphore_mem>> -> memref<1x!tpu.dma_semaphore, #tpu.memory_space<semaphore_mem>>
    %5 = tpu.memref_squeeze %4 : memref<1x!tpu.dma_semaphore, #tpu.memory_space<semaphore_mem>> -> memref<!tpu.dma_semaphore, #tpu.memory_space<semaphore_mem>>
    tpu.enqueue_dma source(%arg7 : memref<128x512xbf16, #tpu.memory_space<any>>) target(%arg20 : memref<128x512xbf16, #tpu.memory_space<vmem>>) target_semaphore(%5 : memref<!tpu.dma_semaphore, #tpu.memory_space<semaphore_mem>>)
    %c3_i32 = arith.constant 3 : i32
    %6 = tpu.memref_slice %arg25[%c3_i32] : memref<7x!tpu.dma_semaphore, #tpu.memory_space<semaphore_mem>> -> memref<1x!tpu.dma_semaphore, #tpu.memory_space<semaphore_mem>>
    %7 = tpu.memref_squeeze %6 : memref<1x!tpu.dma_semaphore, #tpu.memory_space<semaphore_mem>> -> memref<!tpu.dma_semaphore, #tpu.memory_space<semaphore_mem>>
    tpu.enqueue_dma source(%arg8 : memref<128x512xbf16, #tpu.memory_space<any>>) target(%arg21 : memref<128x512xbf16, #tpu.memory_space<vmem>>) target_semaphore(%7 : memref<!tpu.dma_semaphore, #tpu.memory_space<semaphore_mem>>)
    %c4_i32 = arith.constant 4 : i32
    %8 = tpu.memref_slice %arg25[%c4_i32] : memref<7x!tpu.dma_semaphore, #tpu.memory_space<semaphore_mem>> -> memref<1x!tpu.dma_semaphore, #tpu.memory_space<semaphore_mem>>
    %9 = tpu.memref_squeeze %8 : memref<1x!tpu.dma_semaphore, #tpu.memory_space<semaphore_mem>> -> memref<!tpu.dma_semaphore, #tpu.memory_space<semaphore_mem>>
    tpu.enqueue_dma source(%arg10 : memref<128x512xbf16, #tpu.memory_space<any>>) target(%arg22 : memref<128x512xbf16, #tpu.memory_space<vmem>>) target_semaphore(%9 : memref<!tpu.dma_semaphore, #tpu.memory_space<semaphore_mem>>)
    %c5_i32 = arith.constant 5 : i32
    %10 = tpu.memref_slice %arg25[%c5_i32] : memref<7x!tpu.dma_semaphore, #tpu.memory_space<semaphore_mem>> -> memref<1x!tpu.dma_semaphore, #tpu.memory_space<semaphore_mem>>
    %11 = tpu.memref_squeeze %10 : memref<1x!tpu.dma_semaphore, #tpu.memory_space<semaphore_mem>> -> memref<!tpu.dma_semaphore, #tpu.memory_space<semaphore_mem>>
    tpu.enqueue_dma source(%arg11 : memref<128x512xbf16, #tpu.memory_space<any>>) target(%arg23 : memref<128x512xbf16, #tpu.memory_space<vmem>>) target_semaphore(%11 : memref<!tpu.dma_semaphore, #tpu.memory_space<semaphore_mem>>)
    %c6_i32 = arith.constant 6 : i32
    %12 = tpu.memref_slice %arg25[%c6_i32] : memref<7x!tpu.dma_semaphore, #tpu.memory_space<semaphore_mem>> -> memref<1x!tpu.dma_semaphore, #tpu.memory_space<semaphore_mem>>
    %13 = tpu.memref_squeeze %12 : memref<1x!tpu.dma_semaphore, #tpu.memory_space<semaphore_mem>> -> memref<!tpu.dma_semaphore, #tpu.memory_space<semaphore_mem>>
    tpu.enqueue_dma source(%arg13 : memref<128x128xbf16, #tpu.memory_space<any>>) target(%arg24 : memref<128x128xbf16, #tpu.memory_space<vmem>>) target_semaphore(%13 : memref<!tpu.dma_semaphore, #tpu.memory_space<semaphore_mem>>)
    %c0 = arith.constant 0 : index
    %c0_0 = arith.constant 0 : index
    %14 = vector.load %arg0[%c0, %c0_0] : memref<64x128xbf16, #tpu.memory_space<vmem>>, vector<64x128xbf16>
    %c0_1 = arith.constant 0 : index
    %c0_2 = arith.constant 0 : index
    %15 = vector.load %arg1[%c0_1, %c0_2] : memref<128x512xbf16, #tpu.memory_space<vmem>>, vector<128x512xbf16>
    %cst = arith.constant dense<0.000000e+00> : vector<64x512xf32>
    %16 = tpu.matmul %14, %15, %cst {dimension_numbers = #tpu.dot_dimension_numbers<[1], [0], [0], [1], [0, 0, 1, 1], [], []>} : vector<64x128xbf16>, vector<128x512xbf16>, vector<64x512xf32> -> vector<64x512xf32>
    %c0_3 = arith.constant 0 : index
    %c0_4 = arith.constant 0 : index
    %17 = vector.load %arg3[%c0_3, %c0_4] : memref<1x512xf32, #tpu.memory_space<vmem>>, vector<1x512xf32>
    %18 = vector.broadcast %17 : vector<1x512xf32> to vector<64x512xf32>
    %19 = arith.addf %16, %18 : vector<64x512xf32>
    %20 = vector.shape_cast %19 : vector<64x512xf32> to vector<8x8x512xf32>
    %c0_5 = arith.constant 0 : index
    %c0_6 = arith.constant 0 : index
    %c0_7 = arith.constant 0 : index
    %21 = vector.load %arg16[%c0_5, %c0_6, %c0_7] : memref<8x8x512xf32, #tpu.memory_space<vmem>>, vector<8x8x512xf32>
    tpu.vector_store %arg16[%c0_5, %c0_6, %c0_7], %20 {strides = array<i32>} : memref<8x8x512xf32, #tpu.memory_space<vmem>>, vector<8x8x512xf32>,
    %c0_8 = arith.constant 0 : index
    %c0_9 = arith.constant 0 : index
    %22 = vector.load %arg6[%c0_8, %c0_9] : memref<1x512xf32, #tpu.memory_space<vmem>>, vector<1x512xf32>
    %23 = vector.shape_cast %22 : vector<1x512xf32> to vector<1x512xf32>
    %24 = vector.broadcast %23 : vector<1x512xf32> to vector<8x512xf32>
    %c0_10 = arith.constant 0 : index
    %c0_11 = arith.constant 0 : index
    %25 = vector.load %arg9[%c0_10, %c0_11] : memref<1x512xf32, #tpu.memory_space<vmem>>, vector<1x512xf32>
    %26 = vector.shape_cast %25 : vector<1x512xf32> to vector<1x512xf32>
    %27 = vector.broadcast %26 : vector<1x512xf32> to vector<8x512xf32>
    %c0_12 = arith.constant 0 : index
    %c0_13 = arith.constant 0 : index
    %28 = vector.load %arg12[%c0_12, %c0_13] : memref<1x512xf32, #tpu.memory_space<vmem>>, vector<1x512xf32>
    %29 = vector.shape_cast %28 : vector<1x512xf32> to vector<1x512xf32>
    %30 = vector.broadcast %29 : vector<1x512xf32> to vector<8x512xf32>
    %c0_i32_14 = arith.constant 0 : i32
    %31 = tpu.memref_slice %arg25[%c0_i32_14] : memref<7x!tpu.dma_semaphore, #tpu.memory_space<semaphore_mem>> -> memref<1x!tpu.dma_semaphore, #tpu.memory_space<semaphore_mem>>
    %32 = tpu.memref_squeeze %31 : memref<1x!tpu.dma_semaphore, #tpu.memory_space<semaphore_mem>> -> memref<!tpu.dma_semaphore, #tpu.memory_space<semaphore_mem>>
    tpu.wait_dma2 semaphore(%32 : memref<!tpu.dma_semaphore, #tpu.memory_space<semaphore_mem>>) src(%arg4 : memref<128x512xbf16, #tpu.memory_space<any>>) dst(%arg18 : memref<128x512xbf16, #tpu.memory_space<vmem>>)
    %c1_i32_15 = arith.constant 1 : i32
    %33 = tpu.memref_slice %arg25[%c1_i32_15] : memref<7x!tpu.dma_semaphore, #tpu.memory_space<semaphore_mem>> -> memref<1x!tpu.dma_semaphore, #tpu.memory_space<semaphore_mem>>
    %34 = tpu.memref_squeeze %33 : memref<1x!tpu.dma_semaphore, #tpu.memory_space<semaphore_mem>> -> memref<!tpu.dma_semaphore, #tpu.memory_space<semaphore_mem>>
    tpu.wait_dma2 semaphore(%34 : memref<!tpu.dma_semaphore, #tpu.memory_space<semaphore_mem>>) src(%arg5 : memref<128x512xbf16, #tpu.memory_space<any>>) dst(%arg19 : memref<128x512xbf16, #tpu.memory_space<vmem>>)
    %c2_i32_16 = arith.constant 2 : i32
    %35 = tpu.memref_slice %arg25[%c2_i32_16] : memref<7x!tpu.dma_semaphore, #tpu.memory_space<semaphore_mem>> -> memref<1x!tpu.dma_semaphore, #tpu.memory_space<semaphore_mem>>
    %36 = tpu.memref_squeeze %35 : memref<1x!tpu.dma_semaphore, #tpu.memory_space<semaphore_mem>> -> memref<!tpu.dma_semaphore, #tpu.memory_space<semaphore_mem>>
    tpu.wait_dma2 semaphore(%36 : memref<!tpu.dma_semaphore, #tpu.memory_space<semaphore_mem>>) src(%arg7 : memref<128x512xbf16, #tpu.memory_space<any>>) dst(%arg20 : memref<128x512xbf16, #tpu.memory_space<vmem>>)
    %c3_i32_17 = arith.constant 3 : i32
    %37 = tpu.memref_slice %arg25[%c3_i32_17] : memref<7x!tpu.dma_semaphore, #tpu.memory_space<semaphore_mem>> -> memref<1x!tpu.dma_semaphore, #tpu.memory_space<semaphore_mem>>
    %38 = tpu.memref_squeeze %37 : memref<1x!tpu.dma_semaphore, #tpu.memory_space<semaphore_mem>> -> memref<!tpu.dma_semaphore, #tpu.memory_space<semaphore_mem>>
    tpu.wait_dma2 semaphore(%38 : memref<!tpu.dma_semaphore, #tpu.memory_space<semaphore_mem>>) src(%arg8 : memref<128x512xbf16, #tpu.memory_space<any>>) dst(%arg21 : memref<128x512xbf16, #tpu.memory_space<vmem>>)
    %c4_i32_18 = arith.constant 4 : i32
    %39 = tpu.memref_slice %arg25[%c4_i32_18] : memref<7x!tpu.dma_semaphore, #tpu.memory_space<semaphore_mem>> -> memref<1x!tpu.dma_semaphore, #tpu.memory_space<semaphore_mem>>
    %40 = tpu.memref_squeeze %39 : memref<1x!tpu.dma_semaphore, #tpu.memory_space<semaphore_mem>> -> memref<!tpu.dma_semaphore, #tpu.memory_space<semaphore_mem>>
    tpu.wait_dma2 semaphore(%40 : memref<!tpu.dma_semaphore, #tpu.memory_space<semaphore_mem>>) src(%arg10 : memref<128x512xbf16, #tpu.memory_space<any>>) dst(%arg22 : memref<128x512xbf16, #tpu.memory_space<vmem>>)
    %c5_i32_19 = arith.constant 5 : i32
    %41 = tpu.memref_slice %arg25[%c5_i32_19] : memref<7x!tpu.dma_semaphore, #tpu.memory_space<semaphore_mem>> -> memref<1x!tpu.dma_semaphore, #tpu.memory_space<semaphore_mem>>
    %42 = tpu.memref_squeeze %41 : memref<1x!tpu.dma_semaphore, #tpu.memory_space<semaphore_mem>> -> memref<!tpu.dma_semaphore, #tpu.memory_space<semaphore_mem>>
    tpu.wait_dma2 semaphore(%42 : memref<!tpu.dma_semaphore, #tpu.memory_space<semaphore_mem>>) src(%arg11 : memref<128x512xbf16, #tpu.memory_space<any>>) dst(%arg23 : memref<128x512xbf16, #tpu.memory_space<vmem>>)
    %cst_20 = arith.constant 0.000000e+00 : f32
    %43 = vector.broadcast %cst_20 : f32 to vector<8x128xf32>
    %c0_i32_21 = arith.constant 0 : i32
    %44 = arith.index_cast %c0_i32_21 : i32 to index
    %c0_22 = arith.constant 0 : index
    %c0_23 = arith.constant 0 : index
    %45 = vector.load %arg16[%44, %c0_22, %c0_23] : memref<8x8x512xf32, #tpu.memory_space<vmem>>, vector<1x8x512xf32>
    %46 = vector.shape_cast %45 : vector<1x8x512xf32> to vector<8x512xf32>
    %47 = arith.truncf %43 : vector<8x128xf32> to vector<8x128xbf16>
    %c0_24 = arith.constant 0 : index
    %c0_25 = arith.constant 0 : index
    %48 = vector.load %arg2[%c0_24, %c0_25] : memref<128x512xbf16, #tpu.memory_space<vmem>>, vector<128x512xbf16>
    %cst_26 = arith.constant dense<0.000000e+00> : vector<8x512xf32>
    %49 = tpu.matmul %47, %48, %cst_26 {dimension_numbers = #tpu.dot_dimension_numbers<[1], [0], [0], [1], [0, 0, 1, 1], [], []>} : vector<8x128xbf16>, vector<128x512xbf16>, vector<8x512xf32> -> vector<8x512xf32>
    %50 = arith.addf %46, %49 : vector<8x512xf32>
    %51 = vector.extract_strided_slice %50 {offsets = [0, 0], sizes = [8, 128], strides = [1, 1]} : vector<8x512xf32> to vector<8x128xf32>
    %52 = arith.negf %51 : vector<8x128xf32>
    %53 = math.exp %52 : vector<8x128xf32>
    %cst_27 = arith.constant 1.000000e+00 : f32
    %54 = vector.broadcast %cst_27 : f32 to vector<8x128xf32>
    %55 = arith.addf %54, %53 : vector<8x128xf32>
    %56 = arith.divf %54, %55 : vector<8x128xf32>
    %57 = vector.extract_strided_slice %50 {offsets = [0, 128], sizes = [8, 128], strides = [1, 1]} : vector<8x512xf32> to vector<8x128xf32>
    %58 = arith.negf %57 : vector<8x128xf32>
    %59 = math.exp %58 : vector<8x128xf32>
    %cst_28 = arith.constant 1.000000e+00 : f32
    %60 = vector.broadcast %cst_28 : f32 to vector<8x128xf32>
    %61 = arith.addf %60, %59 : vector<8x128xf32>
    %62 = arith.divf %60, %61 : vector<8x128xf32>
    %63 = vector.extract_strided_slice %50 {offsets = [0, 256], sizes = [8, 128], strides = [1, 1]} : vector<8x512xf32> to vector<8x128xf32>
    %64 = math.tanh %63 : vector<8x128xf32>
    %65 = vector.extract_strided_slice %50 {offsets = [0, 384], sizes = [8, 128], strides = [1, 1]} : vector<8x512xf32> to vector<8x128xf32>
    %66 = arith.negf %65 : vector<8x128xf32>
    %67 = math.exp %66 : vector<8x128xf32>
    %cst_29 = arith.constant 1.000000e+00 : f32
    %68 = vector.broadcast %cst_29 : f32 to vector<8x128xf32>
    %69 = arith.addf %68, %67 : vector<8x128xf32>
    %70 = arith.divf %68, %69 : vector<8x128xf32>
    %71 = arith.mulf %62, %43 : vector<8x128xf32>
    %72 = arith.mulf %56, %64 : vector<8x128xf32>
    %73 = arith.addf %71, %72 : vector<8x128xf32>
    %74 = math.tanh %73 : vector<8x128xf32>
    %75 = arith.mulf %70, %74 : vector<8x128xf32>
    %76 = arith.truncf %75 : vector<8x128xf32> to vector<8x128xbf16>
    %c0_30 = arith.constant 0 : index
    %c0_31 = arith.constant 0 : index
    %77 = vector.load %arg18[%c0_30, %c0_31] : memref<128x512xbf16, #tpu.memory_space<vmem>>, vector<128x512xbf16>
    %cst_32 = arith.constant dense<0.000000e+00> : vector<8x512xf32>
    %78 = tpu.matmul %76, %77, %cst_32 {dimension_numbers = #tpu.dot_dimension_numbers<[1], [0], [0], [1], [0, 0, 1, 1], [], []>} : vector<8x128xbf16>, vector<128x512xbf16>, vector<8x512xf32> -> vector<8x512xf32>
    %79 = arith.truncf %43 : vector<8x128xf32> to vector<8x128xbf16>
    %c0_33 = arith.constant 0 : index
    %c0_34 = arith.constant 0 : index
    %80 = vector.load %arg19[%c0_33, %c0_34] : memref<128x512xbf16, #tpu.memory_space<vmem>>, vector<128x512xbf16>
    %cst_35 = arith.constant dense<0.000000e+00> : vector<8x512xf32>
    %81 = tpu.matmul %79, %80, %cst_35 {dimension_numbers = #tpu.dot_dimension_numbers<[1], [0], [0], [1], [0, 0, 1, 1], [], []>} : vector<8x128xbf16>, vector<128x512xbf16>, vector<8x512xf32> -> vector<8x512xf32>
    %82 = arith.addf %78, %81 : vector<8x512xf32>
    %83 = arith.addf %82, %24 : vector<8x512xf32>
    %84 = vector.extract_strided_slice %83 {offsets = [0, 0], sizes = [8, 128], strides = [1, 1]} : vector<8x512xf32> to vector<8x128xf32>
    %85 = arith.negf %84 : vector<8x128xf32>
    %86 = math.exp %85 : vector<8x128xf32>
    %cst_36 = arith.constant 1.000000e+00 : f32
    %87 = vector.broadcast %cst_36 : f32 to vector<8x128xf32>
    %88 = arith.addf %87, %86 : vector<8x128xf32>
    %89 = arith.divf %87, %88 : vector<8x128xf32>
    %90 = vector.extract_strided_slice %83 {offsets = [0, 128], sizes = [8, 128], strides = [1, 1]} : vector<8x512xf32> to vector<8x128xf32>
    %91 = arith.negf %90 : vector<8x128xf32>
    %92 = math.exp %91 : vector<8x128xf32>
    %cst_37 = arith.constant 1.000000e+00 : f32
    %93 = vector.broadcast %cst_37 : f32 to vector<8x128xf32>
    %94 = arith.addf %93, %92 : vector<8x128xf32>
    %95 = arith.divf %93, %94 : vector<8x128xf32>
    %96 = vector.extract_strided_slice %83 {offsets = [0, 256], sizes = [8, 128], strides = [1, 1]} : vector<8x512xf32> to vector<8x128xf32>
    %97 = math.tanh %96 : vector<8x128xf32>
    %98 = vector.extract_strided_slice %83 {offsets = [0, 384], sizes = [8, 128], strides = [1, 1]} : vector<8x512xf32> to vector<8x128xf32>
    %99 = arith.negf %98 : vector<8x128xf32>
    %100 = math.exp %99 : vector<8x128xf32>
    %cst_38 = arith.constant 1.000000e+00 : f32
    %101 = vector.broadcast %cst_38 : f32 to vector<8x128xf32>
    %102 = arith.addf %101, %100 : vector<8x128xf32>
    %103 = arith.divf %101, %102 : vector<8x128xf32>
    %104 = arith.mulf %95, %43 : vector<8x128xf32>
    %105 = arith.mulf %89, %97 : vector<8x128xf32>
    %106 = arith.addf %104, %105 : vector<8x128xf32>
    %107 = math.tanh %106 : vector<8x128xf32>
    %108 = arith.mulf %103, %107 : vector<8x128xf32>
    %109 = arith.truncf %108 : vector<8x128xf32> to vector<8x128xbf16>
    %c0_39 = arith.constant 0 : index
    %c0_40 = arith.constant 0 : index
    %110 = vector.load %arg20[%c0_39, %c0_40] : memref<128x512xbf16, #tpu.memory_space<vmem>>, vector<128x512xbf16>
    %cst_41 = arith.constant dense<0.000000e+00> : vector<8x512xf32>
    %111 = tpu.matmul %109, %110, %cst_41 {dimension_numbers = #tpu.dot_dimension_numbers<[1], [0], [0], [1], [0, 0, 1, 1], [], []>} : vector<8x128xbf16>, vector<128x512xbf16>, vector<8x512xf32> -> vector<8x512xf32>
    %112 = arith.truncf %43 : vector<8x128xf32> to vector<8x128xbf16>
    %c0_42 = arith.constant 0 : index
    %c0_43 = arith.constant 0 : index
    %113 = vector.load %arg21[%c0_42, %c0_43] : memref<128x512xbf16, #tpu.memory_space<vmem>>, vector<128x512xbf16>
    %cst_44 = arith.constant dense<0.000000e+00> : vector<8x512xf32>
    %114 = tpu.matmul %112, %113, %cst_44 {dimension_numbers = #tpu.dot_dimension_numbers<[1], [0], [0], [1], [0, 0, 1, 1], [], []>} : vector<8x128xbf16>, vector<128x512xbf16>, vector<8x512xf32> -> vector<8x512xf32>
    %115 = arith.addf %111, %114 : vector<8x512xf32>
    %116 = arith.addf %115, %27 : vector<8x512xf32>
    %117 = vector.extract_strided_slice %116 {offsets = [0, 0], sizes = [8, 128], strides = [1, 1]} : vector<8x512xf32> to vector<8x128xf32>
    %118 = arith.negf %117 : vector<8x128xf32>
    %119 = math.exp %118 : vector<8x128xf32>
    %cst_45 = arith.constant 1.000000e+00 : f32
    %120 = vector.broadcast %cst_45 : f32 to vector<8x128xf32>
    %121 = arith.addf %120, %119 : vector<8x128xf32>
    %122 = arith.divf %120, %121 : vector<8x128xf32>
    %123 = vector.extract_strided_slice %116 {offsets = [0, 128], sizes = [8, 128], strides = [1, 1]} : vector<8x512xf32> to vector<8x128xf32>
    %124 = arith.negf %123 : vector<8x128xf32>
    %125 = math.exp %124 : vector<8x128xf32>
    %cst_46 = arith.constant 1.000000e+00 : f32
    %126 = vector.broadcast %cst_46 : f32 to vector<8x128xf32>
    %127 = arith.addf %126, %125 : vector<8x128xf32>
    %128 = arith.divf %126, %127 : vector<8x128xf32>
    %129 = vector.extract_strided_slice %116 {offsets = [0, 256], sizes = [8, 128], strides = [1, 1]} : vector<8x512xf32> to vector<8x128xf32>
    %130 = math.tanh %129 : vector<8x128xf32>
    %131 = vector.extract_strided_slice %116 {offsets = [0, 384], sizes = [8, 128], strides = [1, 1]} : vector<8x512xf32> to vector<8x128xf32>
    %132 = arith.negf %131 : vector<8x128xf32>
    %133 = math.exp %132 : vector<8x128xf32>
    %cst_47 = arith.constant 1.000000e+00 : f32
    %134 = vector.broadcast %cst_47 : f32 to vector<8x128xf32>
    %135 = arith.addf %134, %133 : vector<8x128xf32>
    %136 = arith.divf %134, %135 : vector<8x128xf32>
    %137 = arith.mulf %128, %43 : vector<8x128xf32>
    %138 = arith.mulf %122, %130 : vector<8x128xf32>
    %139 = arith.addf %137, %138 : vector<8x128xf32>
    %140 = math.tanh %139 : vector<8x128xf32>
    %141 = arith.mulf %136, %140 : vector<8x128xf32>
    %142 = arith.truncf %141 : vector<8x128xf32> to vector<8x128xbf16>
    %c0_48 = arith.constant 0 : index
    %c0_49 = arith.constant 0 : index
    %143 = vector.load %arg22[%c0_48, %c0_49] : memref<128x512xbf16, #tpu.memory_space<vmem>>, vector<128x512xbf16>
    %cst_50 = arith.constant dense<0.000000e+00> : vector<8x512xf32>
    %144 = tpu.matmul %142, %143, %cst_50 {dimension_numbers = #tpu.dot_dimension_numbers<[1], [0], [0], [1], [0, 0, 1, 1], [], []>} : vector<8x128xbf16>, vector<128x512xbf16>, vector<8x512xf32> -> vector<8x512xf32>
    %145 = arith.truncf %43 : vector<8x128xf32> to vector<8x128xbf16>
    %c0_51 = arith.constant 0 : index
    %c0_52 = arith.constant 0 : index
    %146 = vector.load %arg23[%c0_51, %c0_52] : memref<128x512xbf16, #tpu.memory_space<vmem>>, vector<128x512xbf16>
    %cst_53 = arith.constant dense<0.000000e+00> : vector<8x512xf32>
    %147 = tpu.matmul %145, %146, %cst_53 {dimension_numbers = #tpu.dot_dimension_numbers<[1], [0], [0], [1], [0, 0, 1, 1], [], []>} : vector<8x128xbf16>, vector<128x512xbf16>, vector<8x512xf32> -> vector<8x512xf32>
    %148 = arith.addf %144, %147 : vector<8x512xf32>
    %149 = arith.addf %148, %30 : vector<8x512xf32>
    %150 = vector.extract_strided_slice %149 {offsets = [0, 0], sizes = [8, 128], strides = [1, 1]} : vector<8x512xf32> to vector<8x128xf32>
    %151 = arith.negf %150 : vector<8x128xf32>
    %152 = math.exp %151 : vector<8x128xf32>
    %cst_54 = arith.constant 1.000000e+00 : f32
    %153 = vector.broadcast %cst_54 : f32 to vector<8x128xf32>
    %154 = arith.addf %153, %152 : vector<8x128xf32>
    %155 = arith.divf %153, %154 : vector<8x128xf32>
    %156 = vector.extract_strided_slice %149 {offsets = [0, 128], sizes = [8, 128], strides = [1, 1]} : vector<8x512xf32> to vector<8x128xf32>
    %157 = arith.negf %156 : vector<8x128xf32>
    %158 = math.exp %157 : vector<8x128xf32>
    %cst_55 = arith.constant 1.000000e+00 : f32
    %159 = vector.broadcast %cst_55 : f32 to vector<8x128xf32>
    %160 = arith.addf %159, %158 : vector<8x128xf32>
    %161 = arith.divf %159, %160 : vector<8x128xf32>
    %162 = vector.extract_strided_slice %149 {offsets = [0, 256], sizes = [8, 128], strides = [1, 1]} : vector<8x512xf32> to vector<8x128xf32>
    %163 = math.tanh %162 : vector<8x128xf32>
    %164 = vector.extract_strided_slice %149 {offsets = [0, 384], sizes = [8, 128], strides = [1, 1]} : vector<8x512xf32> to vector<8x128xf32>
    %165 = arith.negf %164 : vector<8x128xf32>
    %166 = math.exp %165 : vector<8x128xf32>
    %cst_56 = arith.constant 1.000000e+00 : f32
    %167 = vector.broadcast %cst_56 : f32 to vector<8x128xf32>
    %168 = arith.addf %167, %166 : vector<8x128xf32>
    %169 = arith.divf %167, %168 : vector<8x128xf32>
    %170 = arith.mulf %161, %43 : vector<8x128xf32>
    %171 = arith.mulf %155, %163 : vector<8x128xf32>
    %172 = arith.addf %170, %171 : vector<8x128xf32>
    %173 = math.tanh %172 : vector<8x128xf32>
    %174 = arith.mulf %169, %173 : vector<8x128xf32>
    %175 = arith.index_cast %c0_i32_21 : i32 to index
    %c0_57 = arith.constant 0 : index
    %c0_58 = arith.constant 0 : index
    %176 = vector.load %arg17[%175, %c0_57, %c0_58] : memref<8x8x128xf32, #tpu.memory_space<vmem>>, vector<1x8x128xf32>
    %177 = vector.shape_cast %176 : vector<1x8x128xf32> to vector<8x128xf32>
    %178 = vector.shape_cast %174 : vector<8x128xf32> to vector<1x8x128xf32>
    tpu.vector_store %arg17[%175, %c0_57, %c0_58], %178 {strides = array<i32>} : memref<8x8x128xf32, #tpu.memory_space<vmem>>, vector<1x8x128xf32>,
    %c1_i32_59 = arith.constant 1 : i32
    %179 = arith.index_cast %c1_i32_59 : i32 to index
    %c0_60 = arith.constant 0 : index
    %c0_61 = arith.constant 0 : index
    %180 = vector.load %arg16[%179, %c0_60, %c0_61] : memref<8x8x512xf32, #tpu.memory_space<vmem>>, vector<1x8x512xf32>
    %181 = vector.shape_cast %180 : vector<1x8x512xf32> to vector<8x512xf32>
    %182 = arith.truncf %75 : vector<8x128xf32> to vector<8x128xbf16>
    %c0_62 = arith.constant 0 : index
    %c0_63 = arith.constant 0 : index
    %183 = vector.load %arg2[%c0_62, %c0_63] : memref<128x512xbf16, #tpu.memory_space<vmem>>, vector<128x512xbf16>
    %cst_64 = arith.constant dense<0.000000e+00> : vector<8x512xf32>
    %184 = tpu.matmul %182, %183, %cst_64 {dimension_numbers = #tpu.dot_dimension_numbers<[1], [0], [0], [1], [0, 0, 1, 1], [], []>} : vector<8x128xbf16>, vector<128x512xbf16>, vector<8x512xf32> -> vector<8x512xf32>
    %185 = arith.addf %181, %184 : vector<8x512xf32>
    %186 = vector.extract_strided_slice %185 {offsets = [0, 0], sizes = [8, 128], strides = [1, 1]} : vector<8x512xf32> to vector<8x128xf32>
    %187 = arith.negf %186 : vector<8x128xf32>
    %188 = math.exp %187 : vector<8x128xf32>
    %cst_65 = arith.constant 1.000000e+00 : f32
    %189 = vector.broadcast %cst_65 : f32 to vector<8x128xf32>
    %190 = arith.addf %189, %188 : vector<8x128xf32>
    %191 = arith.divf %189, %190 : vector<8x128xf32>
    %192 = vector.extract_strided_slice %185 {offsets = [0, 128], sizes = [8, 128], strides = [1, 1]} : vector<8x512xf32> to vector<8x128xf32>
    %193 = arith.negf %192 : vector<8x128xf32>
    %194 = math.exp %193 : vector<8x128xf32>
    %cst_66 = arith.constant 1.000000e+00 : f32
    %195 = vector.broadcast %cst_66 : f32 to vector<8x128xf32>
    %196 = arith.addf %195, %194 : vector<8x128xf32>
    %197 = arith.divf %195, %196 : vector<8x128xf32>
    %198 = vector.extract_strided_slice %185 {offsets = [0, 256], sizes = [8, 128], strides = [1, 1]} : vector<8x512xf32> to vector<8x128xf32>
    %199 = math.tanh %198 : vector<8x128xf32>
    %200 = vector.extract_strided_slice %185 {offsets = [0, 384], sizes = [8, 128], strides = [1, 1]} : vector<8x512xf32> to vector<8x128xf32>
    %201 = arith.negf %200 : vector<8x128xf32>
    %202 = math.exp %201 : vector<8x128xf32>
    %cst_67 = arith.constant 1.000000e+00 : f32
    %203 = vector.broadcast %cst_67 : f32 to vector<8x128xf32>
    %204 = arith.addf %203, %202 : vector<8x128xf32>
    %205 = arith.divf %203, %204 : vector<8x128xf32>
    %206 = arith.mulf %197, %73 : vector<8x128xf32>
    %207 = arith.mulf %191, %199 : vector<8x128xf32>
    %208 = arith.addf %206, %207 : vector<8x128xf32>
    %209 = math.tanh %208 : vector<8x128xf32>
    %210 = arith.mulf %205, %209 : vector<8x128xf32>
    %211 = arith.truncf %210 : vector<8x128xf32> to vector<8x128xbf16>
    %c0_68 = arith.constant 0 : index
    %c0_69 = arith.constant 0 : index
    %212 = vector.load %arg18[%c0_68, %c0_69] : memref<128x512xbf16, #tpu.memory_space<vmem>>, vector<128x512xbf16>
    %cst_70 = arith.constant dense<0.000000e+00> : vector<8x512xf32>
    %213 = tpu.matmul %211, %212, %cst_70 {dimension_numbers = #tpu.dot_dimension_numbers<[1], [0], [0], [1], [0, 0, 1, 1], [], []>} : vector<8x128xbf16>, vector<128x512xbf16>, vector<8x512xf32> -> vector<8x512xf32>
    %214 = arith.truncf %108 : vector<8x128xf32> to vector<8x128xbf16>
    %c0_71 = arith.constant 0 : index
    %c0_72 = arith.constant 0 : index
    %215 = vector.load %arg19[%c0_71, %c0_72] : memref<128x512xbf16, #tpu.memory_space<vmem>>, vector<128x512xbf16>
    %cst_73 = arith.constant dense<0.000000e+00> : vector<8x512xf32>
    %216 = tpu.matmul %214, %215, %cst_73 {dimension_numbers = #tpu.dot_dimension_numbers<[1], [0], [0], [1], [0, 0, 1, 1], [], []>} : vector<8x128xbf16>, vector<128x512xbf16>, vector<8x512xf32> -> vector<8x512xf32>
    %217 = arith.addf %213, %216 : vector<8x512xf32>
    %218 = arith.addf %217, %24 : vector<8x512xf32>
    %219 = vector.extract_strided_slice %218 {offsets = [0, 0], sizes = [8, 128], strides = [1, 1]} : vector<8x512xf32> to vector<8x128xf32>
    %220 = arith.negf %219 : vector<8x128xf32>
    %221 = math.exp %220 : vector<8x128xf32>
    %cst_74 = arith.constant 1.000000e+00 : f32
    %222 = vector.broadcast %cst_74 : f32 to vector<8x128xf32>
    %223 = arith.addf %222, %221 : vector<8x128xf32>
    %224 = arith.divf %222, %223 : vector<8x128xf32>
    %225 = vector.extract_strided_slice %218 {offsets = [0, 128], sizes = [8, 128], strides = [1, 1]} : vector<8x512xf32> to vector<8x128xf32>
    %226 = arith.negf %225 : vector<8x128xf32>
    %227 = math.exp %226 : vector<8x128xf32>
    %cst_75 = arith.constant 1.000000e+00 : f32
    %228 = vector.broadcast %cst_75 : f32 to vector<8x128xf32>
    %229 = arith.addf %228, %227 : vector<8x128xf32>
    %230 = arith.divf %228, %229 : vector<8x128xf32>
    %231 = vector.extract_strided_slice %218 {offsets = [0, 256], sizes = [8, 128], strides = [1, 1]} : vector<8x512xf32> to vector<8x128xf32>
    %232 = math.tanh %231 : vector<8x128xf32>
    %233 = vector.extract_strided_slice %218 {offsets = [0, 384], sizes = [8, 128], strides = [1, 1]} : vector<8x512xf32> to vector<8x128xf32>
    %234 = arith.negf %233 : vector<8x128xf32>
    %235 = math.exp %234 : vector<8x128xf32>
    %cst_76 = arith.constant 1.000000e+00 : f32
    %236 = vector.broadcast %cst_76 : f32 to vector<8x128xf32>
    %237 = arith.addf %236, %235 : vector<8x128xf32>
    %238 = arith.divf %236, %237 : vector<8x128xf32>
    %239 = arith.mulf %230, %106 : vector<8x128xf32>
    %240 = arith.mulf %224, %232 : vector<8x128xf32>
    %241 = arith.addf %239, %240 : vector<8x128xf32>
    %242 = math.tanh %241 : vector<8x128xf32>
    %243 = arith.mulf %238, %242 : vector<8x128xf32>
    %244 = arith.truncf %243 : vector<8x128xf32> to vector<8x128xbf16>
    %c0_77 = arith.constant 0 : index
    %c0_78 = arith.constant 0 : index
    %245 = vector.load %arg20[%c0_77, %c0_78] : memref<128x512xbf16, #tpu.memory_space<vmem>>, vector<128x512xbf16>
    %cst_79 = arith.constant dense<0.000000e+00> : vector<8x512xf32>
    %246 = tpu.matmul %244, %245, %cst_79 {dimension_numbers = #tpu.dot_dimension_numbers<[1], [0], [0], [1], [0, 0, 1, 1], [], []>} : vector<8x128xbf16>, vector<128x512xbf16>, vector<8x512xf32> -> vector<8x512xf32>
    %247 = arith.truncf %141 : vector<8x128xf32> to vector<8x128xbf16>
    %c0_80 = arith.constant 0 : index
    %c0_81 = arith.constant 0 : index
    %248 = vector.load %arg21[%c0_80, %c0_81] : memref<128x512xbf16, #tpu.memory_space<vmem>>, vector<128x512xbf16>
    %cst_82 = arith.constant dense<0.000000e+00> : vector<8x512xf32>
    %249 = tpu.matmul %247, %248, %cst_82 {dimension_numbers = #tpu.dot_dimension_numbers<[1], [0], [0], [1], [0, 0, 1, 1], [], []>} : vector<8x128xbf16>, vector<128x512xbf16>, vector<8x512xf32> -> vector<8x512xf32>
    %250 = arith.addf %246, %249 : vector<8x512xf32>
    %251 = arith.addf %250, %27 : vector<8x512xf32>
    %252 = vector.extract_strided_slice %251 {offsets = [0, 0], sizes = [8, 128], strides = [1, 1]} : vector<8x512xf32> to vector<8x128xf32>
    %253 = arith.negf %252 : vector<8x128xf32>
    %254 = math.exp %253 : vector<8x128xf32>
    %cst_83 = arith.constant 1.000000e+00 : f32
    %255 = vector.broadcast %cst_83 : f32 to vector<8x128xf32>
    %256 = arith.addf %255, %254 : vector<8x128xf32>
    %257 = arith.divf %255, %256 : vector<8x128xf32>
    %258 = vector.extract_strided_slice %251 {offsets = [0, 128], sizes = [8, 128], strides = [1, 1]} : vector<8x512xf32> to vector<8x128xf32>
    %259 = arith.negf %258 : vector<8x128xf32>
    %260 = math.exp %259 : vector<8x128xf32>
    %cst_84 = arith.constant 1.000000e+00 : f32
    %261 = vector.broadcast %cst_84 : f32 to vector<8x128xf32>
    %262 = arith.addf %261, %260 : vector<8x128xf32>
    %263 = arith.divf %261, %262 : vector<8x128xf32>
    %264 = vector.extract_strided_slice %251 {offsets = [0, 256], sizes = [8, 128], strides = [1, 1]} : vector<8x512xf32> to vector<8x128xf32>
    %265 = math.tanh %264 : vector<8x128xf32>
    %266 = vector.extract_strided_slice %251 {offsets = [0, 384], sizes = [8, 128], strides = [1, 1]} : vector<8x512xf32> to vector<8x128xf32>
    %267 = arith.negf %266 : vector<8x128xf32>
    %268 = math.exp %267 : vector<8x128xf32>
    %cst_85 = arith.constant 1.000000e+00 : f32
    %269 = vector.broadcast %cst_85 : f32 to vector<8x128xf32>
    %270 = arith.addf %269, %268 : vector<8x128xf32>
    %271 = arith.divf %269, %270 : vector<8x128xf32>
    %272 = arith.mulf %263, %139 : vector<8x128xf32>
    %273 = arith.mulf %257, %265 : vector<8x128xf32>
    %274 = arith.addf %272, %273 : vector<8x128xf32>
    %275 = math.tanh %274 : vector<8x128xf32>
    %276 = arith.mulf %271, %275 : vector<8x128xf32>
    %277 = arith.truncf %276 : vector<8x128xf32> to vector<8x128xbf16>
    %c0_86 = arith.constant 0 : index
    %c0_87 = arith.constant 0 : index
    %278 = vector.load %arg22[%c0_86, %c0_87] : memref<128x512xbf16, #tpu.memory_space<vmem>>, vector<128x512xbf16>
    %cst_88 = arith.constant dense<0.000000e+00> : vector<8x512xf32>
    %279 = tpu.matmul %277, %278, %cst_88 {dimension_numbers = #tpu.dot_dimension_numbers<[1], [0], [0], [1], [0, 0, 1, 1], [], []>} : vector<8x128xbf16>, vector<128x512xbf16>, vector<8x512xf32> -> vector<8x512xf32>
    %280 = arith.truncf %174 : vector<8x128xf32> to vector<8x128xbf16>
    %c0_89 = arith.constant 0 : index
    %c0_90 = arith.constant 0 : index
    %281 = vector.load %arg23[%c0_89, %c0_90] : memref<128x512xbf16, #tpu.memory_space<vmem>>, vector<128x512xbf16>
    %cst_91 = arith.constant dense<0.000000e+00> : vector<8x512xf32>
    %282 = tpu.matmul %280, %281, %cst_91 {dimension_numbers = #tpu.dot_dimension_numbers<[1], [0], [0], [1], [0, 0, 1, 1], [], []>} : vector<8x128xbf16>, vector<128x512xbf16>, vector<8x512xf32> -> vector<8x512xf32>
    %283 = arith.addf %279, %282 : vector<8x512xf32>
    %284 = arith.addf %283, %30 : vector<8x512xf32>
    %285 = vector.extract_strided_slice %284 {offsets = [0, 0], sizes = [8, 128], strides = [1, 1]} : vector<8x512xf32> to vector<8x128xf32>
    %286 = arith.negf %285 : vector<8x128xf32>
    %287 = math.exp %286 : vector<8x128xf32>
    %cst_92 = arith.constant 1.000000e+00 : f32
    %288 = vector.broadcast %cst_92 : f32 to vector<8x128xf32>
    %289 = arith.addf %288, %287 : vector<8x128xf32>
    %290 = arith.divf %288, %289 : vector<8x128xf32>
    %291 = vector.extract_strided_slice %284 {offsets = [0, 128], sizes = [8, 128], strides = [1, 1]} : vector<8x512xf32> to vector<8x128xf32>
    %292 = arith.negf %291 : vector<8x128xf32>
    %293 = math.exp %292 : vector<8x128xf32>
    %cst_93 = arith.constant 1.000000e+00 : f32
    %294 = vector.broadcast %cst_93 : f32 to vector<8x128xf32>
    %295 = arith.addf %294, %293 : vector<8x128xf32>
    %296 = arith.divf %294, %295 : vector<8x128xf32>
    %297 = vector.extract_strided_slice %284 {offsets = [0, 256], sizes = [8, 128], strides = [1, 1]} : vector<8x512xf32> to vector<8x128xf32>
    %298 = math.tanh %297 : vector<8x128xf32>
    %299 = vector.extract_strided_slice %284 {offsets = [0, 384], sizes = [8, 128], strides = [1, 1]} : vector<8x512xf32> to vector<8x128xf32>
    %300 = arith.negf %299 : vector<8x128xf32>
    %301 = math.exp %300 : vector<8x128xf32>
    %cst_94 = arith.constant 1.000000e+00 : f32
    %302 = vector.broadcast %cst_94 : f32 to vector<8x128xf32>
    %303 = arith.addf %302, %301 : vector<8x128xf32>
    %304 = arith.divf %302, %303 : vector<8x128xf32>
    %305 = arith.mulf %296, %172 : vector<8x128xf32>
    %306 = arith.mulf %290, %298 : vector<8x128xf32>
    %307 = arith.addf %305, %306 : vector<8x128xf32>
    %308 = math.tanh %307 : vector<8x128xf32>
    %309 = arith.mulf %304, %308 : vector<8x128xf32>
    %310 = arith.index_cast %c1_i32_59 : i32 to index
    %c0_95 = arith.constant 0 : index
    %c0_96 = arith.constant 0 : index
    %311 = vector.load %arg17[%310, %c0_95, %c0_96] : memref<8x8x128xf32, #tpu.memory_space<vmem>>, vector<1x8x128xf32>
    %312 = vector.shape_cast %311 : vector<1x8x128xf32> to vector<8x128xf32>
    %313 = vector.shape_cast %309 : vector<8x128xf32> to vector<1x8x128xf32>
    tpu.vector_store %arg17[%310, %c0_95, %c0_96], %313 {strides = array<i32>} : memref<8x8x128xf32, #tpu.memory_space<vmem>>, vector<1x8x128xf32>,
    %c2_i32_97 = arith.constant 2 : i32
    %314 = arith.index_cast %c2_i32_97 : i32 to index
    %c0_98 = arith.constant 0 : index
    %c0_99 = arith.constant 0 : index
    %315 = vector.load %arg16[%314, %c0_98, %c0_99] : memref<8x8x512xf32, #tpu.memory_space<vmem>>, vector<1x8x512xf32>
    %316 = vector.shape_cast %315 : vector<1x8x512xf32> to vector<8x512xf32>
    %317 = arith.truncf %210 : vector<8x128xf32> to vector<8x128xbf16>
    %c0_100 = arith.constant 0 : index
    %c0_101 = arith.constant 0 : index
    %318 = vector.load %arg2[%c0_100, %c0_101] : memref<128x512xbf16, #tpu.memory_space<vmem>>, vector<128x512xbf16>
    %cst_102 = arith.constant dense<0.000000e+00> : vector<8x512xf32>
    %319 = tpu.matmul %317, %318, %cst_102 {dimension_numbers = #tpu.dot_dimension_numbers<[1], [0], [0], [1], [0, 0, 1, 1], [], []>} : vector<8x128xbf16>, vector<128x512xbf16>, vector<8x512xf32> -> vector<8x512xf32>
    %320 = arith.addf %316, %319 : vector<8x512xf32>
    %321 = vector.extract_strided_slice %320 {offsets = [0, 0], sizes = [8, 128], strides = [1, 1]} : vector<8x512xf32> to vector<8x128xf32>
    %322 = arith.negf %321 : vector<8x128xf32>
    %323 = math.exp %322 : vector<8x128xf32>
    %cst_103 = arith.constant 1.000000e+00 : f32
    %324 = vector.broadcast %cst_103 : f32 to vector<8x128xf32>
    %325 = arith.addf %324, %323 : vector<8x128xf32>
    %326 = arith.divf %324, %325 : vector<8x128xf32>
    %327 = vector.extract_strided_slice %320 {offsets = [0, 128], sizes = [8, 128], strides = [1, 1]} : vector<8x512xf32> to vector<8x128xf32>
    %328 = arith.negf %327 : vector<8x128xf32>
    %329 = math.exp %328 : vector<8x128xf32>
    %cst_104 = arith.constant 1.000000e+00 : f32
    %330 = vector.broadcast %cst_104 : f32 to vector<8x128xf32>
    %331 = arith.addf %330, %329 : vector<8x128xf32>
    %332 = arith.divf %330, %331 : vector<8x128xf32>
    %333 = vector.extract_strided_slice %320 {offsets = [0, 256], sizes = [8, 128], strides = [1, 1]} : vector<8x512xf32> to vector<8x128xf32>
    %334 = math.tanh %333 : vector<8x128xf32>
    %335 = vector.extract_strided_slice %320 {offsets = [0, 384], sizes = [8, 128], strides = [1, 1]} : vector<8x512xf32> to vector<8x128xf32>
    %336 = arith.negf %335 : vector<8x128xf32>
    %337 = math.exp %336 : vector<8x128xf32>
    %cst_105 = arith.constant 1.000000e+00 : f32
    %338 = vector.broadcast %cst_105 : f32 to vector<8x128xf32>
    %339 = arith.addf %338, %337 : vector<8x128xf32>
    %340 = arith.divf %338, %339 : vector<8x128xf32>
    %341 = arith.mulf %332, %208 : vector<8x128xf32>
    %342 = arith.mulf %326, %334 : vector<8x128xf32>
    %343 = arith.addf %341, %342 : vector<8x128xf32>
    %344 = math.tanh %343 : vector<8x128xf32>
    %345 = arith.mulf %340, %344 : vector<8x128xf32>
    %346 = arith.truncf %345 : vector<8x128xf32> to vector<8x128xbf16>
    %c0_106 = arith.constant 0 : index
    %c0_107 = arith.constant 0 : index
    %347 = vector.load %arg18[%c0_106, %c0_107] : memref<128x512xbf16, #tpu.memory_space<vmem>>, vector<128x512xbf16>
    %cst_108 = arith.constant dense<0.000000e+00> : vector<8x512xf32>
    %348 = tpu.matmul %346, %347, %cst_108 {dimension_numbers = #tpu.dot_dimension_numbers<[1], [0], [0], [1], [0, 0, 1, 1], [], []>} : vector<8x128xbf16>, vector<128x512xbf16>, vector<8x512xf32> -> vector<8x512xf32>
    %349 = arith.truncf %243 : vector<8x128xf32> to vector<8x128xbf16>
    %c0_109 = arith.constant 0 : index
    %c0_110 = arith.constant 0 : index
    %350 = vector.load %arg19[%c0_109, %c0_110] : memref<128x512xbf16, #tpu.memory_space<vmem>>, vector<128x512xbf16>
    %cst_111 = arith.constant dense<0.000000e+00> : vector<8x512xf32>
    %351 = tpu.matmul %349, %350, %cst_111 {dimension_numbers = #tpu.dot_dimension_numbers<[1], [0], [0], [1], [0, 0, 1, 1], [], []>} : vector<8x128xbf16>, vector<128x512xbf16>, vector<8x512xf32> -> vector<8x512xf32>
    %352 = arith.addf %348, %351 : vector<8x512xf32>
    %353 = arith.addf %352, %24 : vector<8x512xf32>
    %354 = vector.extract_strided_slice %353 {offsets = [0, 0], sizes = [8, 128], strides = [1, 1]} : vector<8x512xf32> to vector<8x128xf32>
    %355 = arith.negf %354 : vector<8x128xf32>
    %356 = math.exp %355 : vector<8x128xf32>
    %cst_112 = arith.constant 1.000000e+00 : f32
    %357 = vector.broadcast %cst_112 : f32 to vector<8x128xf32>
    %358 = arith.addf %357, %356 : vector<8x128xf32>
    %359 = arith.divf %357, %358 : vector<8x128xf32>
    %360 = vector.extract_strided_slice %353 {offsets = [0, 128], sizes = [8, 128], strides = [1, 1]} : vector<8x512xf32> to vector<8x128xf32>
    %361 = arith.negf %360 : vector<8x128xf32>
    %362 = math.exp %361 : vector<8x128xf32>
    %cst_113 = arith.constant 1.000000e+00 : f32
    %363 = vector.broadcast %cst_113 : f32 to vector<8x128xf32>
    %364 = arith.addf %363, %362 : vector<8x128xf32>
    %365 = arith.divf %363, %364 : vector<8x128xf32>
    %366 = vector.extract_strided_slice %353 {offsets = [0, 256], sizes = [8, 128], strides = [1, 1]} : vector<8x512xf32> to vector<8x128xf32>
    %367 = math.tanh %366 : vector<8x128xf32>
    %368 = vector.extract_strided_slice %353 {offsets = [0, 384], sizes = [8, 128], strides = [1, 1]} : vector<8x512xf32> to vector<8x128xf32>
    %369 = arith.negf %368 : vector<8x128xf32>
    %370 = math.exp %369 : vector<8x128xf32>
    %cst_114 = arith.constant 1.000000e+00 : f32
    %371 = vector.broadcast %cst_114 : f32 to vector<8x128xf32>
    %372 = arith.addf %371, %370 : vector<8x128xf32>
    %373 = arith.divf %371, %372 : vector<8x128xf32>
    %374 = arith.mulf %365, %241 : vector<8x128xf32>
    %375 = arith.mulf %359, %367 : vector<8x128xf32>
    %376 = arith.addf %374, %375 : vector<8x128xf32>
    %377 = math.tanh %376 : vector<8x128xf32>
    %378 = arith.mulf %373, %377 : vector<8x128xf32>
    %379 = arith.truncf %378 : vector<8x128xf32> to vector<8x128xbf16>
    %c0_115 = arith.constant 0 : index
    %c0_116 = arith.constant 0 : index
    %380 = vector.load %arg20[%c0_115, %c0_116] : memref<128x512xbf16, #tpu.memory_space<vmem>>, vector<128x512xbf16>
    %cst_117 = arith.constant dense<0.000000e+00> : vector<8x512xf32>
    %381 = tpu.matmul %379, %380, %cst_117 {dimension_numbers = #tpu.dot_dimension_numbers<[1], [0], [0], [1], [0, 0, 1, 1], [], []>} : vector<8x128xbf16>, vector<128x512xbf16>, vector<8x512xf32> -> vector<8x512xf32>
    %382 = arith.truncf %276 : vector<8x128xf32> to vector<8x128xbf16>
    %c0_118 = arith.constant 0 : index
    %c0_119 = arith.constant 0 : index
    %383 = vector.load %arg21[%c0_118, %c0_119] : memref<128x512xbf16, #tpu.memory_space<vmem>>, vector<128x512xbf16>
    %cst_120 = arith.constant dense<0.000000e+00> : vector<8x512xf32>
    %384 = tpu.matmul %382, %383, %cst_120 {dimension_numbers = #tpu.dot_dimension_numbers<[1], [0], [0], [1], [0, 0, 1, 1], [], []>} : vector<8x128xbf16>, vector<128x512xbf16>, vector<8x512xf32> -> vector<8x512xf32>
    %385 = arith.addf %381, %384 : vector<8x512xf32>
    %386 = arith.addf %385, %27 : vector<8x512xf32>
    %387 = vector.extract_strided_slice %386 {offsets = [0, 0], sizes = [8, 128], strides = [1, 1]} : vector<8x512xf32> to vector<8x128xf32>
    %388 = arith.negf %387 : vector<8x128xf32>
    %389 = math.exp %388 : vector<8x128xf32>
    %cst_121 = arith.constant 1.000000e+00 : f32
    %390 = vector.broadcast %cst_121 : f32 to vector<8x128xf32>
    %391 = arith.addf %390, %389 : vector<8x128xf32>
    %392 = arith.divf %390, %391 : vector<8x128xf32>
    %393 = vector.extract_strided_slice %386 {offsets = [0, 128], sizes = [8, 128], strides = [1, 1]} : vector<8x512xf32> to vector<8x128xf32>
    %394 = arith.negf %393 : vector<8x128xf32>
    %395 = math.exp %394 : vector<8x128xf32>
    %cst_122 = arith.constant 1.000000e+00 : f32
    %396 = vector.broadcast %cst_122 : f32 to vector<8x128xf32>
    %397 = arith.addf %396, %395 : vector<8x128xf32>
    %398 = arith.divf %396, %397 : vector<8x128xf32>
    %399 = vector.extract_strided_slice %386 {offsets = [0, 256], sizes = [8, 128], strides = [1, 1]} : vector<8x512xf32> to vector<8x128xf32>
    %400 = math.tanh %399 : vector<8x128xf32>
    %401 = vector.extract_strided_slice %386 {offsets = [0, 384], sizes = [8, 128], strides = [1, 1]} : vector<8x512xf32> to vector<8x128xf32>
    %402 = arith.negf %401 : vector<8x128xf32>
    %403 = math.exp %402 : vector<8x128xf32>
    %cst_123 = arith.constant 1.000000e+00 : f32
    %404 = vector.broadcast %cst_123 : f32 to vector<8x128xf32>
    %405 = arith.addf %404, %403 : vector<8x128xf32>
    %406 = arith.divf %404, %405 : vector<8x128xf32>
    %407 = arith.mulf %398, %274 : vector<8x128xf32>
    %408 = arith.mulf %392, %400 : vector<8x128xf32>
    %409 = arith.addf %407, %408 : vector<8x128xf32>
    %410 = math.tanh %409 : vector<8x128xf32>
    %411 = arith.mulf %406, %410 : vector<8x128xf32>
    %412 = arith.truncf %411 : vector<8x128xf32> to vector<8x128xbf16>
    %c0_124 = arith.constant 0 : index
    %c0_125 = arith.constant 0 : index
    %413 = vector.load %arg22[%c0_124, %c0_125] : memref<128x512xbf16, #tpu.memory_space<vmem>>, vector<128x512xbf16>
    %cst_126 = arith.constant dense<0.000000e+00> : vector<8x512xf32>
    %414 = tpu.matmul %412, %413, %cst_126 {dimension_numbers = #tpu.dot_dimension_numbers<[1], [0], [0], [1], [0, 0, 1, 1], [], []>} : vector<8x128xbf16>, vector<128x512xbf16>, vector<8x512xf32> -> vector<8x512xf32>
    %415 = arith.truncf %309 : vector<8x128xf32> to vector<8x128xbf16>
    %c0_127 = arith.constant 0 : index
    %c0_128 = arith.constant 0 : index
    %416 = vector.load %arg23[%c0_127, %c0_128] : memref<128x512xbf16, #tpu.memory_space<vmem>>, vector<128x512xbf16>
    %cst_129 = arith.constant dense<0.000000e+00> : vector<8x512xf32>
    %417 = tpu.matmul %415, %416, %cst_129 {dimension_numbers = #tpu.dot_dimension_numbers<[1], [0], [0], [1], [0, 0, 1, 1], [], []>} : vector<8x128xbf16>, vector<128x512xbf16>, vector<8x512xf32> -> vector<8x512xf32>
    %418 = arith.addf %414, %417 : vector<8x512xf32>
    %419 = arith.addf %418, %30 : vector<8x512xf32>
    %420 = vector.extract_strided_slice %419 {offsets = [0, 0], sizes = [8, 128], strides = [1, 1]} : vector<8x512xf32> to vector<8x128xf32>
    %421 = arith.negf %420 : vector<8x128xf32>
    %422 = math.exp %421 : vector<8x128xf32>
    %cst_130 = arith.constant 1.000000e+00 : f32
    %423 = vector.broadcast %cst_130 : f32 to vector<8x128xf32>
    %424 = arith.addf %423, %422 : vector<8x128xf32>
    %425 = arith.divf %423, %424 : vector<8x128xf32>
    %426 = vector.extract_strided_slice %419 {offsets = [0, 128], sizes = [8, 128], strides = [1, 1]} : vector<8x512xf32> to vector<8x128xf32>
    %427 = arith.negf %426 : vector<8x128xf32>
    %428 = math.exp %427 : vector<8x128xf32>
    %cst_131 = arith.constant 1.000000e+00 : f32
    %429 = vector.broadcast %cst_131 : f32 to vector<8x128xf32>
    %430 = arith.addf %429, %428 : vector<8x128xf32>
    %431 = arith.divf %429, %430 : vector<8x128xf32>
    %432 = vector.extract_strided_slice %419 {offsets = [0, 256], sizes = [8, 128], strides = [1, 1]} : vector<8x512xf32> to vector<8x128xf32>
    %433 = math.tanh %432 : vector<8x128xf32>
    %434 = vector.extract_strided_slice %419 {offsets = [0, 384], sizes = [8, 128], strides = [1, 1]} : vector<8x512xf32> to vector<8x128xf32>
    %435 = arith.negf %434 : vector<8x128xf32>
    %436 = math.exp %435 : vector<8x128xf32>
    %cst_132 = arith.constant 1.000000e+00 : f32
    %437 = vector.broadcast %cst_132 : f32 to vector<8x128xf32>
    %438 = arith.addf %437, %436 : vector<8x128xf32>
    %439 = arith.divf %437, %438 : vector<8x128xf32>
    %440 = arith.mulf %431, %307 : vector<8x128xf32>
    %441 = arith.mulf %425, %433 : vector<8x128xf32>
    %442 = arith.addf %440, %441 : vector<8x128xf32>
    %443 = math.tanh %442 : vector<8x128xf32>
    %444 = arith.mulf %439, %443 : vector<8x128xf32>
    %445 = arith.index_cast %c2_i32_97 : i32 to index
    %c0_133 = arith.constant 0 : index
    %c0_134 = arith.constant 0 : index
    %446 = vector.load %arg17[%445, %c0_133, %c0_134] : memref<8x8x128xf32, #tpu.memory_space<vmem>>, vector<1x8x128xf32>
    %447 = vector.shape_cast %446 : vector<1x8x128xf32> to vector<8x128xf32>
    %448 = vector.shape_cast %444 : vector<8x128xf32> to vector<1x8x128xf32>
    tpu.vector_store %arg17[%445, %c0_133, %c0_134], %448 {strides = array<i32>} : memref<8x8x128xf32, #tpu.memory_space<vmem>>, vector<1x8x128xf32>,
    %c3_i32_135 = arith.constant 3 : i32
    %449 = arith.index_cast %c3_i32_135 : i32 to index
    %c0_136 = arith.constant 0 : index
    %c0_137 = arith.constant 0 : index
    %450 = vector.load %arg16[%449, %c0_136, %c0_137] : memref<8x8x512xf32, #tpu.memory_space<vmem>>, vector<1x8x512xf32>
    %451 = vector.shape_cast %450 : vector<1x8x512xf32> to vector<8x512xf32>
    %452 = arith.truncf %345 : vector<8x128xf32> to vector<8x128xbf16>
    %c0_138 = arith.constant 0 : index
    %c0_139 = arith.constant 0 : index
    %453 = vector.load %arg2[%c0_138, %c0_139] : memref<128x512xbf16, #tpu.memory_space<vmem>>, vector<128x512xbf16>
    %cst_140 = arith.constant dense<0.000000e+00> : vector<8x512xf32>
    %454 = tpu.matmul %452, %453, %cst_140 {dimension_numbers = #tpu.dot_dimension_numbers<[1], [0], [0], [1], [0, 0, 1, 1], [], []>} : vector<8x128xbf16>, vector<128x512xbf16>, vector<8x512xf32> -> vector<8x512xf32>
    %455 = arith.addf %451, %454 : vector<8x512xf32>
    %456 = vector.extract_strided_slice %455 {offsets = [0, 0], sizes = [8, 128], strides = [1, 1]} : vector<8x512xf32> to vector<8x128xf32>
    %457 = arith.negf %456 : vector<8x128xf32>
    %458 = math.exp %457 : vector<8x128xf32>
    %cst_141 = arith.constant 1.000000e+00 : f32
    %459 = vector.broadcast %cst_141 : f32 to vector<8x128xf32>
    %460 = arith.addf %459, %458 : vector<8x128xf32>
    %461 = arith.divf %459, %460 : vector<8x128xf32>
    %462 = vector.extract_strided_slice %455 {offsets = [0, 128], sizes = [8, 128], strides = [1, 1]} : vector<8x512xf32> to vector<8x128xf32>
    %463 = arith.negf %462 : vector<8x128xf32>
    %464 = math.exp %463 : vector<8x128xf32>
    %cst_142 = arith.constant 1.000000e+00 : f32
    %465 = vector.broadcast %cst_142 : f32 to vector<8x128xf32>
    %466 = arith.addf %465, %464 : vector<8x128xf32>
    %467 = arith.divf %465, %466 : vector<8x128xf32>
    %468 = vector.extract_strided_slice %455 {offsets = [0, 256], sizes = [8, 128], strides = [1, 1]} : vector<8x512xf32> to vector<8x128xf32>
    %469 = math.tanh %468 : vector<8x128xf32>
    %470 = vector.extract_strided_slice %455 {offsets = [0, 384], sizes = [8, 128], strides = [1, 1]} : vector<8x512xf32> to vector<8x128xf32>
    %471 = arith.negf %470 : vector<8x128xf32>
    %472 = math.exp %471 : vector<8x128xf32>
    %cst_143 = arith.constant 1.000000e+00 : f32
    %473 = vector.broadcast %cst_143 : f32 to vector<8x128xf32>
    %474 = arith.addf %473, %472 : vector<8x128xf32>
    %475 = arith.divf %473, %474 : vector<8x128xf32>
    %476 = arith.mulf %467, %343 : vector<8x128xf32>
    %477 = arith.mulf %461, %469 : vector<8x128xf32>
    %478 = arith.addf %476, %477 : vector<8x128xf32>
    %479 = math.tanh %478 : vector<8x128xf32>
    %480 = arith.mulf %475, %479 : vector<8x128xf32>
    %481 = arith.truncf %480 : vector<8x128xf32> to vector<8x128xbf16>
    %c0_144 = arith.constant 0 : index
    %c0_145 = arith.constant 0 : index
    %482 = vector.load %arg18[%c0_144, %c0_145] : memref<128x512xbf16, #tpu.memory_space<vmem>>, vector<128x512xbf16>
    %cst_146 = arith.constant dense<0.000000e+00> : vector<8x512xf32>
    %483 = tpu.matmul %481, %482, %cst_146 {dimension_numbers = #tpu.dot_dimension_numbers<[1], [0], [0], [1], [0, 0, 1, 1], [], []>} : vector<8x128xbf16>, vector<128x512xbf16>, vector<8x512xf32> -> vector<8x512xf32>
    %484 = arith.truncf %378 : vector<8x128xf32> to vector<8x128xbf16>
    %c0_147 = arith.constant 0 : index
    %c0_148 = arith.constant 0 : index
    %485 = vector.load %arg19[%c0_147, %c0_148] : memref<128x512xbf16, #tpu.memory_space<vmem>>, vector<128x512xbf16>
    %cst_149 = arith.constant dense<0.000000e+00> : vector<8x512xf32>
    %486 = tpu.matmul %484, %485, %cst_149 {dimension_numbers = #tpu.dot_dimension_numbers<[1], [0], [0], [1], [0, 0, 1, 1], [], []>} : vector<8x128xbf16>, vector<128x512xbf16>, vector<8x512xf32> -> vector<8x512xf32>
    %487 = arith.addf %483, %486 : vector<8x512xf32>
    %488 = arith.addf %487, %24 : vector<8x512xf32>
    %489 = vector.extract_strided_slice %488 {offsets = [0, 0], sizes = [8, 128], strides = [1, 1]} : vector<8x512xf32> to vector<8x128xf32>
    %490 = arith.negf %489 : vector<8x128xf32>
    %491 = math.exp %490 : vector<8x128xf32>
    %cst_150 = arith.constant 1.000000e+00 : f32
    %492 = vector.broadcast %cst_150 : f32 to vector<8x128xf32>
    %493 = arith.addf %492, %491 : vector<8x128xf32>
    %494 = arith.divf %492, %493 : vector<8x128xf32>
    %495 = vector.extract_strided_slice %488 {offsets = [0, 128], sizes = [8, 128], strides = [1, 1]} : vector<8x512xf32> to vector<8x128xf32>
    %496 = arith.negf %495 : vector<8x128xf32>
    %497 = math.exp %496 : vector<8x128xf32>
    %cst_151 = arith.constant 1.000000e+00 : f32
    %498 = vector.broadcast %cst_151 : f32 to vector<8x128xf32>
    %499 = arith.addf %498, %497 : vector<8x128xf32>
    %500 = arith.divf %498, %499 : vector<8x128xf32>
    %501 = vector.extract_strided_slice %488 {offsets = [0, 256], sizes = [8, 128], strides = [1, 1]} : vector<8x512xf32> to vector<8x128xf32>
    %502 = math.tanh %501 : vector<8x128xf32>
    %503 = vector.extract_strided_slice %488 {offsets = [0, 384], sizes = [8, 128], strides = [1, 1]} : vector<8x512xf32> to vector<8x128xf32>
    %504 = arith.negf %503 : vector<8x128xf32>
    %505 = math.exp %504 : vector<8x128xf32>
    %cst_152 = arith.constant 1.000000e+00 : f32
    %506 = vector.broadcast %cst_152 : f32 to vector<8x128xf32>
    %507 = arith.addf %506, %505 : vector<8x128xf32>
    %508 = arith.divf %506, %507 : vector<8x128xf32>
    %509 = arith.mulf %500, %376 : vector<8x128xf32>
    %510 = arith.mulf %494, %502 : vector<8x128xf32>
    %511 = arith.addf %509, %510 : vector<8x128xf32>
    %512 = math.tanh %511 : vector<8x128xf32>
    %513 = arith.mulf %508, %512 : vector<8x128xf32>
    %514 = arith.truncf %513 : vector<8x128xf32> to vector<8x128xbf16>
    %c0_153 = arith.constant 0 : index
    %c0_154 = arith.constant 0 : index
    %515 = vector.load %arg20[%c0_153, %c0_154] : memref<128x512xbf16, #tpu.memory_space<vmem>>, vector<128x512xbf16>
    %cst_155 = arith.constant dense<0.000000e+00> : vector<8x512xf32>
    %516 = tpu.matmul %514, %515, %cst_155 {dimension_numbers = #tpu.dot_dimension_numbers<[1], [0], [0], [1], [0, 0, 1, 1], [], []>} : vector<8x128xbf16>, vector<128x512xbf16>, vector<8x512xf32> -> vector<8x512xf32>
    %517 = arith.truncf %411 : vector<8x128xf32> to vector<8x128xbf16>
    %c0_156 = arith.constant 0 : index
    %c0_157 = arith.constant 0 : index
    %518 = vector.load %arg21[%c0_156, %c0_157] : memref<128x512xbf16, #tpu.memory_space<vmem>>, vector<128x512xbf16>
    %cst_158 = arith.constant dense<0.000000e+00> : vector<8x512xf32>
    %519 = tpu.matmul %517, %518, %cst_158 {dimension_numbers = #tpu.dot_dimension_numbers<[1], [0], [0], [1], [0, 0, 1, 1], [], []>} : vector<8x128xbf16>, vector<128x512xbf16>, vector<8x512xf32> -> vector<8x512xf32>
    %520 = arith.addf %516, %519 : vector<8x512xf32>
    %521 = arith.addf %520, %27 : vector<8x512xf32>
    %522 = vector.extract_strided_slice %521 {offsets = [0, 0], sizes = [8, 128], strides = [1, 1]} : vector<8x512xf32> to vector<8x128xf32>
    %523 = arith.negf %522 : vector<8x128xf32>
    %524 = math.exp %523 : vector<8x128xf32>
    %cst_159 = arith.constant 1.000000e+00 : f32
    %525 = vector.broadcast %cst_159 : f32 to vector<8x128xf32>
    %526 = arith.addf %525, %524 : vector<8x128xf32>
    %527 = arith.divf %525, %526 : vector<8x128xf32>
    %528 = vector.extract_strided_slice %521 {offsets = [0, 128], sizes = [8, 128], strides = [1, 1]} : vector<8x512xf32> to vector<8x128xf32>
    %529 = arith.negf %528 : vector<8x128xf32>
    %530 = math.exp %529 : vector<8x128xf32>
    %cst_160 = arith.constant 1.000000e+00 : f32
    %531 = vector.broadcast %cst_160 : f32 to vector<8x128xf32>
    %532 = arith.addf %531, %530 : vector<8x128xf32>
    %533 = arith.divf %531, %532 : vector<8x128xf32>
    %534 = vector.extract_strided_slice %521 {offsets = [0, 256], sizes = [8, 128], strides = [1, 1]} : vector<8x512xf32> to vector<8x128xf32>
    %535 = math.tanh %534 : vector<8x128xf32>
    %536 = vector.extract_strided_slice %521 {offsets = [0, 384], sizes = [8, 128], strides = [1, 1]} : vector<8x512xf32> to vector<8x128xf32>
    %537 = arith.negf %536 : vector<8x128xf32>
    %538 = math.exp %537 : vector<8x128xf32>
    %cst_161 = arith.constant 1.000000e+00 : f32
    %539 = vector.broadcast %cst_161 : f32 to vector<8x128xf32>
    %540 = arith.addf %539, %538 : vector<8x128xf32>
    %541 = arith.divf %539, %540 : vector<8x128xf32>
    %542 = arith.mulf %533, %409 : vector<8x128xf32>
    %543 = arith.mulf %527, %535 : vector<8x128xf32>
    %544 = arith.addf %542, %543 : vector<8x128xf32>
    %545 = math.tanh %544 : vector<8x128xf32>
    %546 = arith.mulf %541, %545 : vector<8x128xf32>
    %547 = arith.truncf %546 : vector<8x128xf32> to vector<8x128xbf16>
    %c0_162 = arith.constant 0 : index
    %c0_163 = arith.constant 0 : index
    %548 = vector.load %arg22[%c0_162, %c0_163] : memref<128x512xbf16, #tpu.memory_space<vmem>>, vector<128x512xbf16>
    %cst_164 = arith.constant dense<0.000000e+00> : vector<8x512xf32>
    %549 = tpu.matmul %547, %548, %cst_164 {dimension_numbers = #tpu.dot_dimension_numbers<[1], [0], [0], [1], [0, 0, 1, 1], [], []>} : vector<8x128xbf16>, vector<128x512xbf16>, vector<8x512xf32> -> vector<8x512xf32>
    %550 = arith.truncf %444 : vector<8x128xf32> to vector<8x128xbf16>
    %c0_165 = arith.constant 0 : index
    %c0_166 = arith.constant 0 : index
    %551 = vector.load %arg23[%c0_165, %c0_166] : memref<128x512xbf16, #tpu.memory_space<vmem>>, vector<128x512xbf16>
    %cst_167 = arith.constant dense<0.000000e+00> : vector<8x512xf32>
    %552 = tpu.matmul %550, %551, %cst_167 {dimension_numbers = #tpu.dot_dimension_numbers<[1], [0], [0], [1], [0, 0, 1, 1], [], []>} : vector<8x128xbf16>, vector<128x512xbf16>, vector<8x512xf32> -> vector<8x512xf32>
    %553 = arith.addf %549, %552 : vector<8x512xf32>
    %554 = arith.addf %553, %30 : vector<8x512xf32>
    %555 = vector.extract_strided_slice %554 {offsets = [0, 0], sizes = [8, 128], strides = [1, 1]} : vector<8x512xf32> to vector<8x128xf32>
    %556 = arith.negf %555 : vector<8x128xf32>
    %557 = math.exp %556 : vector<8x128xf32>
    %cst_168 = arith.constant 1.000000e+00 : f32
    %558 = vector.broadcast %cst_168 : f32 to vector<8x128xf32>
    %559 = arith.addf %558, %557 : vector<8x128xf32>
    %560 = arith.divf %558, %559 : vector<8x128xf32>
    %561 = vector.extract_strided_slice %554 {offsets = [0, 128], sizes = [8, 128], strides = [1, 1]} : vector<8x512xf32> to vector<8x128xf32>
    %562 = arith.negf %561 : vector<8x128xf32>
    %563 = math.exp %562 : vector<8x128xf32>
    %cst_169 = arith.constant 1.000000e+00 : f32
    %564 = vector.broadcast %cst_169 : f32 to vector<8x128xf32>
    %565 = arith.addf %564, %563 : vector<8x128xf32>
    %566 = arith.divf %564, %565 : vector<8x128xf32>
    %567 = vector.extract_strided_slice %554 {offsets = [0, 256], sizes = [8, 128], strides = [1, 1]} : vector<8x512xf32> to vector<8x128xf32>
    %568 = math.tanh %567 : vector<8x128xf32>
    %569 = vector.extract_strided_slice %554 {offsets = [0, 384], sizes = [8, 128], strides = [1, 1]} : vector<8x512xf32> to vector<8x128xf32>
    %570 = arith.negf %569 : vector<8x128xf32>
    %571 = math.exp %570 : vector<8x128xf32>
    %cst_170 = arith.constant 1.000000e+00 : f32
    %572 = vector.broadcast %cst_170 : f32 to vector<8x128xf32>
    %573 = arith.addf %572, %571 : vector<8x128xf32>
    %574 = arith.divf %572, %573 : vector<8x128xf32>
    %575 = arith.mulf %566, %442 : vector<8x128xf32>
    %576 = arith.mulf %560, %568 : vector<8x128xf32>
    %577 = arith.addf %575, %576 : vector<8x128xf32>
    %578 = math.tanh %577 : vector<8x128xf32>
    %579 = arith.mulf %574, %578 : vector<8x128xf32>
    %580 = arith.index_cast %c3_i32_135 : i32 to index
    %c0_171 = arith.constant 0 : index
    %c0_172 = arith.constant 0 : index
    %581 = vector.load %arg17[%580, %c0_171, %c0_172] : memref<8x8x128xf32, #tpu.memory_space<vmem>>, vector<1x8x128xf32>
    %582 = vector.shape_cast %581 : vector<1x8x128xf32> to vector<8x128xf32>
    %583 = vector.shape_cast %579 : vector<8x128xf32> to vector<1x8x128xf32>
    tpu.vector_store %arg17[%580, %c0_171, %c0_172], %583 {strides = array<i32>} : memref<8x8x128xf32, #tpu.memory_space<vmem>>, vector<1x8x128xf32>,
    %c4_i32_173 = arith.constant 4 : i32
    %584 = arith.index_cast %c4_i32_173 : i32 to index
    %c0_174 = arith.constant 0 : index
    %c0_175 = arith.constant 0 : index
    %585 = vector.load %arg16[%584, %c0_174, %c0_175] : memref<8x8x512xf32, #tpu.memory_space<vmem>>, vector<1x8x512xf32>
    %586 = vector.shape_cast %585 : vector<1x8x512xf32> to vector<8x512xf32>
    %587 = arith.truncf %480 : vector<8x128xf32> to vector<8x128xbf16>
    %c0_176 = arith.constant 0 : index
    %c0_177 = arith.constant 0 : index
    %588 = vector.load %arg2[%c0_176, %c0_177] : memref<128x512xbf16, #tpu.memory_space<vmem>>, vector<128x512xbf16>
    %cst_178 = arith.constant dense<0.000000e+00> : vector<8x512xf32>
    %589 = tpu.matmul %587, %588, %cst_178 {dimension_numbers = #tpu.dot_dimension_numbers<[1], [0], [0], [1], [0, 0, 1, 1], [], []>} : vector<8x128xbf16>, vector<128x512xbf16>, vector<8x512xf32> -> vector<8x512xf32>
    %590 = arith.addf %586, %589 : vector<8x512xf32>
    %591 = vector.extract_strided_slice %590 {offsets = [0, 0], sizes = [8, 128], strides = [1, 1]} : vector<8x512xf32> to vector<8x128xf32>
    %592 = arith.negf %591 : vector<8x128xf32>
    %593 = math.exp %592 : vector<8x128xf32>
    %cst_179 = arith.constant 1.000000e+00 : f32
    %594 = vector.broadcast %cst_179 : f32 to vector<8x128xf32>
    %595 = arith.addf %594, %593 : vector<8x128xf32>
    %596 = arith.divf %594, %595 : vector<8x128xf32>
    %597 = vector.extract_strided_slice %590 {offsets = [0, 128], sizes = [8, 128], strides = [1, 1]} : vector<8x512xf32> to vector<8x128xf32>
    %598 = arith.negf %597 : vector<8x128xf32>
    %599 = math.exp %598 : vector<8x128xf32>
    %cst_180 = arith.constant 1.000000e+00 : f32
    %600 = vector.broadcast %cst_180 : f32 to vector<8x128xf32>
    %601 = arith.addf %600, %599 : vector<8x128xf32>
    %602 = arith.divf %600, %601 : vector<8x128xf32>
    %603 = vector.extract_strided_slice %590 {offsets = [0, 256], sizes = [8, 128], strides = [1, 1]} : vector<8x512xf32> to vector<8x128xf32>
    %604 = math.tanh %603 : vector<8x128xf32>
    %605 = vector.extract_strided_slice %590 {offsets = [0, 384], sizes = [8, 128], strides = [1, 1]} : vector<8x512xf32> to vector<8x128xf32>
    %606 = arith.negf %605 : vector<8x128xf32>
    %607 = math.exp %606 : vector<8x128xf32>
    %cst_181 = arith.constant 1.000000e+00 : f32
    %608 = vector.broadcast %cst_181 : f32 to vector<8x128xf32>
    %609 = arith.addf %608, %607 : vector<8x128xf32>
    %610 = arith.divf %608, %609 : vector<8x128xf32>
    %611 = arith.mulf %602, %478 : vector<8x128xf32>
    %612 = arith.mulf %596, %604 : vector<8x128xf32>
    %613 = arith.addf %611, %612 : vector<8x128xf32>
    %614 = math.tanh %613 : vector<8x128xf32>
    %615 = arith.mulf %610, %614 : vector<8x128xf32>
    %616 = arith.truncf %615 : vector<8x128xf32> to vector<8x128xbf16>
    %c0_182 = arith.constant 0 : index
    %c0_183 = arith.constant 0 : index
    %617 = vector.load %arg18[%c0_182, %c0_183] : memref<128x512xbf16, #tpu.memory_space<vmem>>, vector<128x512xbf16>
    %cst_184 = arith.constant dense<0.000000e+00> : vector<8x512xf32>
    %618 = tpu.matmul %616, %617, %cst_184 {dimension_numbers = #tpu.dot_dimension_numbers<[1], [0], [0], [1], [0, 0, 1, 1], [], []>} : vector<8x128xbf16>, vector<128x512xbf16>, vector<8x512xf32> -> vector<8x512xf32>
    %619 = arith.truncf %513 : vector<8x128xf32> to vector<8x128xbf16>
    %c0_185 = arith.constant 0 : index
    %c0_186 = arith.constant 0 : index
    %620 = vector.load %arg19[%c0_185, %c0_186] : memref<128x512xbf16, #tpu.memory_space<vmem>>, vector<128x512xbf16>
    %cst_187 = arith.constant dense<0.000000e+00> : vector<8x512xf32>
    %621 = tpu.matmul %619, %620, %cst_187 {dimension_numbers = #tpu.dot_dimension_numbers<[1], [0], [0], [1], [0, 0, 1, 1], [], []>} : vector<8x128xbf16>, vector<128x512xbf16>, vector<8x512xf32> -> vector<8x512xf32>
    %622 = arith.addf %618, %621 : vector<8x512xf32>
    %623 = arith.addf %622, %24 : vector<8x512xf32>
    %624 = vector.extract_strided_slice %623 {offsets = [0, 0], sizes = [8, 128], strides = [1, 1]} : vector<8x512xf32> to vector<8x128xf32>
    %625 = arith.negf %624 : vector<8x128xf32>
    %626 = math.exp %625 : vector<8x128xf32>
    %cst_188 = arith.constant 1.000000e+00 : f32
    %627 = vector.broadcast %cst_188 : f32 to vector<8x128xf32>
    %628 = arith.addf %627, %626 : vector<8x128xf32>
    %629 = arith.divf %627, %628 : vector<8x128xf32>
    %630 = vector.extract_strided_slice %623 {offsets = [0, 128], sizes = [8, 128], strides = [1, 1]} : vector<8x512xf32> to vector<8x128xf32>
    %631 = arith.negf %630 : vector<8x128xf32>
    %632 = math.exp %631 : vector<8x128xf32>
    %cst_189 = arith.constant 1.000000e+00 : f32
    %633 = vector.broadcast %cst_189 : f32 to vector<8x128xf32>
    %634 = arith.addf %633, %632 : vector<8x128xf32>
    %635 = arith.divf %633, %634 : vector<8x128xf32>
    %636 = vector.extract_strided_slice %623 {offsets = [0, 256], sizes = [8, 128], strides = [1, 1]} : vector<8x512xf32> to vector<8x128xf32>
    %637 = math.tanh %636 : vector<8x128xf32>
    %638 = vector.extract_strided_slice %623 {offsets = [0, 384], sizes = [8, 128], strides = [1, 1]} : vector<8x512xf32> to vector<8x128xf32>
    %639 = arith.negf %638 : vector<8x128xf32>
    %640 = math.exp %639 : vector<8x128xf32>
    %cst_190 = arith.constant 1.000000e+00 : f32
    %641 = vector.broadcast %cst_190 : f32 to vector<8x128xf32>
    %642 = arith.addf %641, %640 : vector<8x128xf32>
    %643 = arith.divf %641, %642 : vector<8x128xf32>
    %644 = arith.mulf %635, %511 : vector<8x128xf32>
    %645 = arith.mulf %629, %637 : vector<8x128xf32>
    %646 = arith.addf %644, %645 : vector<8x128xf32>
    %647 = math.tanh %646 : vector<8x128xf32>
    %648 = arith.mulf %643, %647 : vector<8x128xf32>
    %649 = arith.truncf %648 : vector<8x128xf32> to vector<8x128xbf16>
    %c0_191 = arith.constant 0 : index
    %c0_192 = arith.constant 0 : index
    %650 = vector.load %arg20[%c0_191, %c0_192] : memref<128x512xbf16, #tpu.memory_space<vmem>>, vector<128x512xbf16>
    %cst_193 = arith.constant dense<0.000000e+00> : vector<8x512xf32>
    %651 = tpu.matmul %649, %650, %cst_193 {dimension_numbers = #tpu.dot_dimension_numbers<[1], [0], [0], [1], [0, 0, 1, 1], [], []>} : vector<8x128xbf16>, vector<128x512xbf16>, vector<8x512xf32> -> vector<8x512xf32>
    %652 = arith.truncf %546 : vector<8x128xf32> to vector<8x128xbf16>
    %c0_194 = arith.constant 0 : index
    %c0_195 = arith.constant 0 : index
    %653 = vector.load %arg21[%c0_194, %c0_195] : memref<128x512xbf16, #tpu.memory_space<vmem>>, vector<128x512xbf16>
    %cst_196 = arith.constant dense<0.000000e+00> : vector<8x512xf32>
    %654 = tpu.matmul %652, %653, %cst_196 {dimension_numbers = #tpu.dot_dimension_numbers<[1], [0], [0], [1], [0, 0, 1, 1], [], []>} : vector<8x128xbf16>, vector<128x512xbf16>, vector<8x512xf32> -> vector<8x512xf32>
    %655 = arith.addf %651, %654 : vector<8x512xf32>
    %656 = arith.addf %655, %27 : vector<8x512xf32>
    %657 = vector.extract_strided_slice %656 {offsets = [0, 0], sizes = [8, 128], strides = [1, 1]} : vector<8x512xf32> to vector<8x128xf32>
    %658 = arith.negf %657 : vector<8x128xf32>
    %659 = math.exp %658 : vector<8x128xf32>
    %cst_197 = arith.constant 1.000000e+00 : f32
    %660 = vector.broadcast %cst_197 : f32 to vector<8x128xf32>
    %661 = arith.addf %660, %659 : vector<8x128xf32>
    %662 = arith.divf %660, %661 : vector<8x128xf32>
    %663 = vector.extract_strided_slice %656 {offsets = [0, 128], sizes = [8, 128], strides = [1, 1]} : vector<8x512xf32> to vector<8x128xf32>
    %664 = arith.negf %663 : vector<8x128xf32>
    %665 = math.exp %664 : vector<8x128xf32>
    %cst_198 = arith.constant 1.000000e+00 : f32
    %666 = vector.broadcast %cst_198 : f32 to vector<8x128xf32>
    %667 = arith.addf %666, %665 : vector<8x128xf32>
    %668 = arith.divf %666, %667 : vector<8x128xf32>
    %669 = vector.extract_strided_slice %656 {offsets = [0, 256], sizes = [8, 128], strides = [1, 1]} : vector<8x512xf32> to vector<8x128xf32>
    %670 = math.tanh %669 : vector<8x128xf32>
    %671 = vector.extract_strided_slice %656 {offsets = [0, 384], sizes = [8, 128], strides = [1, 1]} : vector<8x512xf32> to vector<8x128xf32>
    %672 = arith.negf %671 : vector<8x128xf32>
    %673 = math.exp %672 : vector<8x128xf32>
    %cst_199 = arith.constant 1.000000e+00 : f32
    %674 = vector.broadcast %cst_199 : f32 to vector<8x128xf32>
    %675 = arith.addf %674, %673 : vector<8x128xf32>
    %676 = arith.divf %674, %675 : vector<8x128xf32>
    %677 = arith.mulf %668, %544 : vector<8x128xf32>
    %678 = arith.mulf %662, %670 : vector<8x128xf32>
    %679 = arith.addf %677, %678 : vector<8x128xf32>
    %680 = math.tanh %679 : vector<8x128xf32>
    %681 = arith.mulf %676, %680 : vector<8x128xf32>
    %682 = arith.truncf %681 : vector<8x128xf32> to vector<8x128xbf16>
    %c0_200 = arith.constant 0 : index
    %c0_201 = arith.constant 0 : index
    %683 = vector.load %arg22[%c0_200, %c0_201] : memref<128x512xbf16, #tpu.memory_space<vmem>>, vector<128x512xbf16>
    %cst_202 = arith.constant dense<0.000000e+00> : vector<8x512xf32>
    %684 = tpu.matmul %682, %683, %cst_202 {dimension_numbers = #tpu.dot_dimension_numbers<[1], [0], [0], [1], [0, 0, 1, 1], [], []>} : vector<8x128xbf16>, vector<128x512xbf16>, vector<8x512xf32> -> vector<8x512xf32>
    %685 = arith.truncf %579 : vector<8x128xf32> to vector<8x128xbf16>
    %c0_203 = arith.constant 0 : index
    %c0_204 = arith.constant 0 : index
    %686 = vector.load %arg23[%c0_203, %c0_204] : memref<128x512xbf16, #tpu.memory_space<vmem>>, vector<128x512xbf16>
    %cst_205 = arith.constant dense<0.000000e+00> : vector<8x512xf32>
    %687 = tpu.matmul %685, %686, %cst_205 {dimension_numbers = #tpu.dot_dimension_numbers<[1], [0], [0], [1], [0, 0, 1, 1], [], []>} : vector<8x128xbf16>, vector<128x512xbf16>, vector<8x512xf32> -> vector<8x512xf32>
    %688 = arith.addf %684, %687 : vector<8x512xf32>
    %689 = arith.addf %688, %30 : vector<8x512xf32>
    %690 = vector.extract_strided_slice %689 {offsets = [0, 0], sizes = [8, 128], strides = [1, 1]} : vector<8x512xf32> to vector<8x128xf32>
    %691 = arith.negf %690 : vector<8x128xf32>
    %692 = math.exp %691 : vector<8x128xf32>
    %cst_206 = arith.constant 1.000000e+00 : f32
    %693 = vector.broadcast %cst_206 : f32 to vector<8x128xf32>
    %694 = arith.addf %693, %692 : vector<8x128xf32>
    %695 = arith.divf %693, %694 : vector<8x128xf32>
    %696 = vector.extract_strided_slice %689 {offsets = [0, 128], sizes = [8, 128], strides = [1, 1]} : vector<8x512xf32> to vector<8x128xf32>
    %697 = arith.negf %696 : vector<8x128xf32>
    %698 = math.exp %697 : vector<8x128xf32>
    %cst_207 = arith.constant 1.000000e+00 : f32
    %699 = vector.broadcast %cst_207 : f32 to vector<8x128xf32>
    %700 = arith.addf %699, %698 : vector<8x128xf32>
    %701 = arith.divf %699, %700 : vector<8x128xf32>
    %702 = vector.extract_strided_slice %689 {offsets = [0, 256], sizes = [8, 128], strides = [1, 1]} : vector<8x512xf32> to vector<8x128xf32>
    %703 = math.tanh %702 : vector<8x128xf32>
    %704 = vector.extract_strided_slice %689 {offsets = [0, 384], sizes = [8, 128], strides = [1, 1]} : vector<8x512xf32> to vector<8x128xf32>
    %705 = arith.negf %704 : vector<8x128xf32>
    %706 = math.exp %705 : vector<8x128xf32>
    %cst_208 = arith.constant 1.000000e+00 : f32
    %707 = vector.broadcast %cst_208 : f32 to vector<8x128xf32>
    %708 = arith.addf %707, %706 : vector<8x128xf32>
    %709 = arith.divf %707, %708 : vector<8x128xf32>
    %710 = arith.mulf %701, %577 : vector<8x128xf32>
    %711 = arith.mulf %695, %703 : vector<8x128xf32>
    %712 = arith.addf %710, %711 : vector<8x128xf32>
    %713 = math.tanh %712 : vector<8x128xf32>
    %714 = arith.mulf %709, %713 : vector<8x128xf32>
    %715 = arith.index_cast %c4_i32_173 : i32 to index
    %c0_209 = arith.constant 0 : index
    %c0_210 = arith.constant 0 : index
    %716 = vector.load %arg17[%715, %c0_209, %c0_210] : memref<8x8x128xf32, #tpu.memory_space<vmem>>, vector<1x8x128xf32>
    %717 = vector.shape_cast %716 : vector<1x8x128xf32> to vector<8x128xf32>
    %718 = vector.shape_cast %714 : vector<8x128xf32> to vector<1x8x128xf32>
    tpu.vector_store %arg17[%715, %c0_209, %c0_210], %718 {strides = array<i32>} : memref<8x8x128xf32, #tpu.memory_space<vmem>>, vector<1x8x128xf32>,
    %c5_i32_211 = arith.constant 5 : i32
    %719 = arith.index_cast %c5_i32_211 : i32 to index
    %c0_212 = arith.constant 0 : index
    %c0_213 = arith.constant 0 : index
    %720 = vector.load %arg16[%719, %c0_212, %c0_213] : memref<8x8x512xf32, #tpu.memory_space<vmem>>, vector<1x8x512xf32>
    %721 = vector.shape_cast %720 : vector<1x8x512xf32> to vector<8x512xf32>
    %722 = arith.truncf %615 : vector<8x128xf32> to vector<8x128xbf16>
    %c0_214 = arith.constant 0 : index
    %c0_215 = arith.constant 0 : index
    %723 = vector.load %arg2[%c0_214, %c0_215] : memref<128x512xbf16, #tpu.memory_space<vmem>>, vector<128x512xbf16>
    %cst_216 = arith.constant dense<0.000000e+00> : vector<8x512xf32>
    %724 = tpu.matmul %722, %723, %cst_216 {dimension_numbers = #tpu.dot_dimension_numbers<[1], [0], [0], [1], [0, 0, 1, 1], [], []>} : vector<8x128xbf16>, vector<128x512xbf16>, vector<8x512xf32> -> vector<8x512xf32>
    %725 = arith.addf %721, %724 : vector<8x512xf32>
    %726 = vector.extract_strided_slice %725 {offsets = [0, 0], sizes = [8, 128], strides = [1, 1]} : vector<8x512xf32> to vector<8x128xf32>
    %727 = arith.negf %726 : vector<8x128xf32>
    %728 = math.exp %727 : vector<8x128xf32>
    %cst_217 = arith.constant 1.000000e+00 : f32
    %729 = vector.broadcast %cst_217 : f32 to vector<8x128xf32>
    %730 = arith.addf %729, %728 : vector<8x128xf32>
    %731 = arith.divf %729, %730 : vector<8x128xf32>
    %732 = vector.extract_strided_slice %725 {offsets = [0, 128], sizes = [8, 128], strides = [1, 1]} : vector<8x512xf32> to vector<8x128xf32>
    %733 = arith.negf %732 : vector<8x128xf32>
    %734 = math.exp %733 : vector<8x128xf32>
    %cst_218 = arith.constant 1.000000e+00 : f32
    %735 = vector.broadcast %cst_218 : f32 to vector<8x128xf32>
    %736 = arith.addf %735, %734 : vector<8x128xf32>
    %737 = arith.divf %735, %736 : vector<8x128xf32>
    %738 = vector.extract_strided_slice %725 {offsets = [0, 256], sizes = [8, 128], strides = [1, 1]} : vector<8x512xf32> to vector<8x128xf32>
    %739 = math.tanh %738 : vector<8x128xf32>
    %740 = vector.extract_strided_slice %725 {offsets = [0, 384], sizes = [8, 128], strides = [1, 1]} : vector<8x512xf32> to vector<8x128xf32>
    %741 = arith.negf %740 : vector<8x128xf32>
    %742 = math.exp %741 : vector<8x128xf32>
    %cst_219 = arith.constant 1.000000e+00 : f32
    %743 = vector.broadcast %cst_219 : f32 to vector<8x128xf32>
    %744 = arith.addf %743, %742 : vector<8x128xf32>
    %745 = arith.divf %743, %744 : vector<8x128xf32>
    %746 = arith.mulf %737, %613 : vector<8x128xf32>
    %747 = arith.mulf %731, %739 : vector<8x128xf32>
    %748 = arith.addf %746, %747 : vector<8x128xf32>
    %749 = math.tanh %748 : vector<8x128xf32>
    %750 = arith.mulf %745, %749 : vector<8x128xf32>
    %751 = arith.truncf %750 : vector<8x128xf32> to vector<8x128xbf16>
    %c0_220 = arith.constant 0 : index
    %c0_221 = arith.constant 0 : index
    %752 = vector.load %arg18[%c0_220, %c0_221] : memref<128x512xbf16, #tpu.memory_space<vmem>>, vector<128x512xbf16>
    %cst_222 = arith.constant dense<0.000000e+00> : vector<8x512xf32>
    %753 = tpu.matmul %751, %752, %cst_222 {dimension_numbers = #tpu.dot_dimension_numbers<[1], [0], [0], [1], [0, 0, 1, 1], [], []>} : vector<8x128xbf16>, vector<128x512xbf16>, vector<8x512xf32> -> vector<8x512xf32>
    %754 = arith.truncf %648 : vector<8x128xf32> to vector<8x128xbf16>
    %c0_223 = arith.constant 0 : index
    %c0_224 = arith.constant 0 : index
    %755 = vector.load %arg19[%c0_223, %c0_224] : memref<128x512xbf16, #tpu.memory_space<vmem>>, vector<128x512xbf16>
    %cst_225 = arith.constant dense<0.000000e+00> : vector<8x512xf32>
    %756 = tpu.matmul %754, %755, %cst_225 {dimension_numbers = #tpu.dot_dimension_numbers<[1], [0], [0], [1], [0, 0, 1, 1], [], []>} : vector<8x128xbf16>, vector<128x512xbf16>, vector<8x512xf32> -> vector<8x512xf32>
    %757 = arith.addf %753, %756 : vector<8x512xf32>
    %758 = arith.addf %757, %24 : vector<8x512xf32>
    %759 = vector.extract_strided_slice %758 {offsets = [0, 0], sizes = [8, 128], strides = [1, 1]} : vector<8x512xf32> to vector<8x128xf32>
    %760 = arith.negf %759 : vector<8x128xf32>
    %761 = math.exp %760 : vector<8x128xf32>
    %cst_226 = arith.constant 1.000000e+00 : f32
    %762 = vector.broadcast %cst_226 : f32 to vector<8x128xf32>
    %763 = arith.addf %762, %761 : vector<8x128xf32>
    %764 = arith.divf %762, %763 : vector<8x128xf32>
    %765 = vector.extract_strided_slice %758 {offsets = [0, 128], sizes = [8, 128], strides = [1, 1]} : vector<8x512xf32> to vector<8x128xf32>
    %766 = arith.negf %765 : vector<8x128xf32>
    %767 = math.exp %766 : vector<8x128xf32>
    %cst_227 = arith.constant 1.000000e+00 : f32
    %768 = vector.broadcast %cst_227 : f32 to vector<8x128xf32>
    %769 = arith.addf %768, %767 : vector<8x128xf32>
    %770 = arith.divf %768, %769 : vector<8x128xf32>
    %771 = vector.extract_strided_slice %758 {offsets = [0, 256], sizes = [8, 128], strides = [1, 1]} : vector<8x512xf32> to vector<8x128xf32>
    %772 = math.tanh %771 : vector<8x128xf32>
    %773 = vector.extract_strided_slice %758 {offsets = [0, 384], sizes = [8, 128], strides = [1, 1]} : vector<8x512xf32> to vector<8x128xf32>
    %774 = arith.negf %773 : vector<8x128xf32>
    %775 = math.exp %774 : vector<8x128xf32>
    %cst_228 = arith.constant 1.000000e+00 : f32
    %776 = vector.broadcast %cst_228 : f32 to vector<8x128xf32>
    %777 = arith.addf %776, %775 : vector<8x128xf32>
    %778 = arith.divf %776, %777 : vector<8x128xf32>
    %779 = arith.mulf %770, %646 : vector<8x128xf32>
    %780 = arith.mulf %764, %772 : vector<8x128xf32>
    %781 = arith.addf %779, %780 : vector<8x128xf32>
    %782 = math.tanh %781 : vector<8x128xf32>
    %783 = arith.mulf %778, %782 : vector<8x128xf32>
    %784 = arith.truncf %783 : vector<8x128xf32> to vector<8x128xbf16>
    %c0_229 = arith.constant 0 : index
    %c0_230 = arith.constant 0 : index
    %785 = vector.load %arg20[%c0_229, %c0_230] : memref<128x512xbf16, #tpu.memory_space<vmem>>, vector<128x512xbf16>
    %cst_231 = arith.constant dense<0.000000e+00> : vector<8x512xf32>
    %786 = tpu.matmul %784, %785, %cst_231 {dimension_numbers = #tpu.dot_dimension_numbers<[1], [0], [0], [1], [0, 0, 1, 1], [], []>} : vector<8x128xbf16>, vector<128x512xbf16>, vector<8x512xf32> -> vector<8x512xf32>
    %787 = arith.truncf %681 : vector<8x128xf32> to vector<8x128xbf16>
    %c0_232 = arith.constant 0 : index
    %c0_233 = arith.constant 0 : index
    %788 = vector.load %arg21[%c0_232, %c0_233] : memref<128x512xbf16, #tpu.memory_space<vmem>>, vector<128x512xbf16>
    %cst_234 = arith.constant dense<0.000000e+00> : vector<8x512xf32>
    %789 = tpu.matmul %787, %788, %cst_234 {dimension_numbers = #tpu.dot_dimension_numbers<[1], [0], [0], [1], [0, 0, 1, 1], [], []>} : vector<8x128xbf16>, vector<128x512xbf16>, vector<8x512xf32> -> vector<8x512xf32>
    %790 = arith.addf %786, %789 : vector<8x512xf32>
    %791 = arith.addf %790, %27 : vector<8x512xf32>
    %792 = vector.extract_strided_slice %791 {offsets = [0, 0], sizes = [8, 128], strides = [1, 1]} : vector<8x512xf32> to vector<8x128xf32>
    %793 = arith.negf %792 : vector<8x128xf32>
    %794 = math.exp %793 : vector<8x128xf32>
    %cst_235 = arith.constant 1.000000e+00 : f32
    %795 = vector.broadcast %cst_235 : f32 to vector<8x128xf32>
    %796 = arith.addf %795, %794 : vector<8x128xf32>
    %797 = arith.divf %795, %796 : vector<8x128xf32>
    %798 = vector.extract_strided_slice %791 {offsets = [0, 128], sizes = [8, 128], strides = [1, 1]} : vector<8x512xf32> to vector<8x128xf32>
    %799 = arith.negf %798 : vector<8x128xf32>
    %800 = math.exp %799 : vector<8x128xf32>
    %cst_236 = arith.constant 1.000000e+00 : f32
    %801 = vector.broadcast %cst_236 : f32 to vector<8x128xf32>
    %802 = arith.addf %801, %800 : vector<8x128xf32>
    %803 = arith.divf %801, %802 : vector<8x128xf32>
    %804 = vector.extract_strided_slice %791 {offsets = [0, 256], sizes = [8, 128], strides = [1, 1]} : vector<8x512xf32> to vector<8x128xf32>
    %805 = math.tanh %804 : vector<8x128xf32>
    %806 = vector.extract_strided_slice %791 {offsets = [0, 384], sizes = [8, 128], strides = [1, 1]} : vector<8x512xf32> to vector<8x128xf32>
    %807 = arith.negf %806 : vector<8x128xf32>
    %808 = math.exp %807 : vector<8x128xf32>
    %cst_237 = arith.constant 1.000000e+00 : f32
    %809 = vector.broadcast %cst_237 : f32 to vector<8x128xf32>
    %810 = arith.addf %809, %808 : vector<8x128xf32>
    %811 = arith.divf %809, %810 : vector<8x128xf32>
    %812 = arith.mulf %803, %679 : vector<8x128xf32>
    %813 = arith.mulf %797, %805 : vector<8x128xf32>
    %814 = arith.addf %812, %813 : vector<8x128xf32>
    %815 = math.tanh %814 : vector<8x128xf32>
    %816 = arith.mulf %811, %815 : vector<8x128xf32>
    %817 = arith.truncf %816 : vector<8x128xf32> to vector<8x128xbf16>
    %c0_238 = arith.constant 0 : index
    %c0_239 = arith.constant 0 : index
    %818 = vector.load %arg22[%c0_238, %c0_239] : memref<128x512xbf16, #tpu.memory_space<vmem>>, vector<128x512xbf16>
    %cst_240 = arith.constant dense<0.000000e+00> : vector<8x512xf32>
    %819 = tpu.matmul %817, %818, %cst_240 {dimension_numbers = #tpu.dot_dimension_numbers<[1], [0], [0], [1], [0, 0, 1, 1], [], []>} : vector<8x128xbf16>, vector<128x512xbf16>, vector<8x512xf32> -> vector<8x512xf32>
    %820 = arith.truncf %714 : vector<8x128xf32> to vector<8x128xbf16>
    %c0_241 = arith.constant 0 : index
    %c0_242 = arith.constant 0 : index
    %821 = vector.load %arg23[%c0_241, %c0_242] : memref<128x512xbf16, #tpu.memory_space<vmem>>, vector<128x512xbf16>
    %cst_243 = arith.constant dense<0.000000e+00> : vector<8x512xf32>
    %822 = tpu.matmul %820, %821, %cst_243 {dimension_numbers = #tpu.dot_dimension_numbers<[1], [0], [0], [1], [0, 0, 1, 1], [], []>} : vector<8x128xbf16>, vector<128x512xbf16>, vector<8x512xf32> -> vector<8x512xf32>
    %823 = arith.addf %819, %822 : vector<8x512xf32>
    %824 = arith.addf %823, %30 : vector<8x512xf32>
    %825 = vector.extract_strided_slice %824 {offsets = [0, 0], sizes = [8, 128], strides = [1, 1]} : vector<8x512xf32> to vector<8x128xf32>
    %826 = arith.negf %825 : vector<8x128xf32>
    %827 = math.exp %826 : vector<8x128xf32>
    %cst_244 = arith.constant 1.000000e+00 : f32
    %828 = vector.broadcast %cst_244 : f32 to vector<8x128xf32>
    %829 = arith.addf %828, %827 : vector<8x128xf32>
    %830 = arith.divf %828, %829 : vector<8x128xf32>
    %831 = vector.extract_strided_slice %824 {offsets = [0, 128], sizes = [8, 128], strides = [1, 1]} : vector<8x512xf32> to vector<8x128xf32>
    %832 = arith.negf %831 : vector<8x128xf32>
    %833 = math.exp %832 : vector<8x128xf32>
    %cst_245 = arith.constant 1.000000e+00 : f32
    %834 = vector.broadcast %cst_245 : f32 to vector<8x128xf32>
    %835 = arith.addf %834, %833 : vector<8x128xf32>
    %836 = arith.divf %834, %835 : vector<8x128xf32>
    %837 = vector.extract_strided_slice %824 {offsets = [0, 256], sizes = [8, 128], strides = [1, 1]} : vector<8x512xf32> to vector<8x128xf32>
    %838 = math.tanh %837 : vector<8x128xf32>
    %839 = vector.extract_strided_slice %824 {offsets = [0, 384], sizes = [8, 128], strides = [1, 1]} : vector<8x512xf32> to vector<8x128xf32>
    %840 = arith.negf %839 : vector<8x128xf32>
    %841 = math.exp %840 : vector<8x128xf32>
    %cst_246 = arith.constant 1.000000e+00 : f32
    %842 = vector.broadcast %cst_246 : f32 to vector<8x128xf32>
    %843 = arith.addf %842, %841 : vector<8x128xf32>
    %844 = arith.divf %842, %843 : vector<8x128xf32>
    %845 = arith.mulf %836, %712 : vector<8x128xf32>
    %846 = arith.mulf %830, %838 : vector<8x128xf32>
    %847 = arith.addf %845, %846 : vector<8x128xf32>
    %848 = math.tanh %847 : vector<8x128xf32>
    %849 = arith.mulf %844, %848 : vector<8x128xf32>
    %850 = arith.index_cast %c5_i32_211 : i32 to index
    %c0_247 = arith.constant 0 : index
    %c0_248 = arith.constant 0 : index
    %851 = vector.load %arg17[%850, %c0_247, %c0_248] : memref<8x8x128xf32, #tpu.memory_space<vmem>>, vector<1x8x128xf32>
    %852 = vector.shape_cast %851 : vector<1x8x128xf32> to vector<8x128xf32>
    %853 = vector.shape_cast %849 : vector<8x128xf32> to vector<1x8x128xf32>
    tpu.vector_store %arg17[%850, %c0_247, %c0_248], %853 {strides = array<i32>} : memref<8x8x128xf32, #tpu.memory_space<vmem>>, vector<1x8x128xf32>,
    %c6_i32_249 = arith.constant 6 : i32
    %854 = arith.index_cast %c6_i32_249 : i32 to index
    %c0_250 = arith.constant 0 : index
    %c0_251 = arith.constant 0 : index
    %855 = vector.load %arg16[%854, %c0_250, %c0_251] : memref<8x8x512xf32, #tpu.memory_space<vmem>>, vector<1x8x512xf32>
    %856 = vector.shape_cast %855 : vector<1x8x512xf32> to vector<8x512xf32>
    %857 = arith.truncf %750 : vector<8x128xf32> to vector<8x128xbf16>
    %c0_252 = arith.constant 0 : index
    %c0_253 = arith.constant 0 : index
    %858 = vector.load %arg2[%c0_252, %c0_253] : memref<128x512xbf16, #tpu.memory_space<vmem>>, vector<128x512xbf16>
    %cst_254 = arith.constant dense<0.000000e+00> : vector<8x512xf32>
    %859 = tpu.matmul %857, %858, %cst_254 {dimension_numbers = #tpu.dot_dimension_numbers<[1], [0], [0], [1], [0, 0, 1, 1], [], []>} : vector<8x128xbf16>, vector<128x512xbf16>, vector<8x512xf32> -> vector<8x512xf32>
    %860 = arith.addf %856, %859 : vector<8x512xf32>
    %861 = vector.extract_strided_slice %860 {offsets = [0, 0], sizes = [8, 128], strides = [1, 1]} : vector<8x512xf32> to vector<8x128xf32>
    %862 = arith.negf %861 : vector<8x128xf32>
    %863 = math.exp %862 : vector<8x128xf32>
    %cst_255 = arith.constant 1.000000e+00 : f32
    %864 = vector.broadcast %cst_255 : f32 to vector<8x128xf32>
    %865 = arith.addf %864, %863 : vector<8x128xf32>
    %866 = arith.divf %864, %865 : vector<8x128xf32>
    %867 = vector.extract_strided_slice %860 {offsets = [0, 128], sizes = [8, 128], strides = [1, 1]} : vector<8x512xf32> to vector<8x128xf32>
    %868 = arith.negf %867 : vector<8x128xf32>
    %869 = math.exp %868 : vector<8x128xf32>
    %cst_256 = arith.constant 1.000000e+00 : f32
    %870 = vector.broadcast %cst_256 : f32 to vector<8x128xf32>
    %871 = arith.addf %870, %869 : vector<8x128xf32>
    %872 = arith.divf %870, %871 : vector<8x128xf32>
    %873 = vector.extract_strided_slice %860 {offsets = [0, 256], sizes = [8, 128], strides = [1, 1]} : vector<8x512xf32> to vector<8x128xf32>
    %874 = math.tanh %873 : vector<8x128xf32>
    %875 = vector.extract_strided_slice %860 {offsets = [0, 384], sizes = [8, 128], strides = [1, 1]} : vector<8x512xf32> to vector<8x128xf32>
    %876 = arith.negf %875 : vector<8x128xf32>
    %877 = math.exp %876 : vector<8x128xf32>
    %cst_257 = arith.constant 1.000000e+00 : f32
    %878 = vector.broadcast %cst_257 : f32 to vector<8x128xf32>
    %879 = arith.addf %878, %877 : vector<8x128xf32>
    %880 = arith.divf %878, %879 : vector<8x128xf32>
    %881 = arith.mulf %872, %748 : vector<8x128xf32>
    %882 = arith.mulf %866, %874 : vector<8x128xf32>
    %883 = arith.addf %881, %882 : vector<8x128xf32>
    %884 = math.tanh %883 : vector<8x128xf32>
    %885 = arith.mulf %880, %884 : vector<8x128xf32>
    %886 = arith.truncf %885 : vector<8x128xf32> to vector<8x128xbf16>
    %c0_258 = arith.constant 0 : index
    %c0_259 = arith.constant 0 : index
    %887 = vector.load %arg18[%c0_258, %c0_259] : memref<128x512xbf16, #tpu.memory_space<vmem>>, vector<128x512xbf16>
    %cst_260 = arith.constant dense<0.000000e+00> : vector<8x512xf32>
    %888 = tpu.matmul %886, %887, %cst_260 {dimension_numbers = #tpu.dot_dimension_numbers<[1], [0], [0], [1], [0, 0, 1, 1], [], []>} : vector<8x128xbf16>, vector<128x512xbf16>, vector<8x512xf32> -> vector<8x512xf32>
    %889 = arith.truncf %783 : vector<8x128xf32> to vector<8x128xbf16>
    %c0_261 = arith.constant 0 : index
    %c0_262 = arith.constant 0 : index
    %890 = vector.load %arg19[%c0_261, %c0_262] : memref<128x512xbf16, #tpu.memory_space<vmem>>, vector<128x512xbf16>
    %cst_263 = arith.constant dense<0.000000e+00> : vector<8x512xf32>
    %891 = tpu.matmul %889, %890, %cst_263 {dimension_numbers = #tpu.dot_dimension_numbers<[1], [0], [0], [1], [0, 0, 1, 1], [], []>} : vector<8x128xbf16>, vector<128x512xbf16>, vector<8x512xf32> -> vector<8x512xf32>
    %892 = arith.addf %888, %891 : vector<8x512xf32>
    %893 = arith.addf %892, %24 : vector<8x512xf32>
    %894 = vector.extract_strided_slice %893 {offsets = [0, 0], sizes = [8, 128], strides = [1, 1]} : vector<8x512xf32> to vector<8x128xf32>
    %895 = arith.negf %894 : vector<8x128xf32>
    %896 = math.exp %895 : vector<8x128xf32>
    %cst_264 = arith.constant 1.000000e+00 : f32
    %897 = vector.broadcast %cst_264 : f32 to vector<8x128xf32>
    %898 = arith.addf %897, %896 : vector<8x128xf32>
    %899 = arith.divf %897, %898 : vector<8x128xf32>
    %900 = vector.extract_strided_slice %893 {offsets = [0, 128], sizes = [8, 128], strides = [1, 1]} : vector<8x512xf32> to vector<8x128xf32>
    %901 = arith.negf %900 : vector<8x128xf32>
    %902 = math.exp %901 : vector<8x128xf32>
    %cst_265 = arith.constant 1.000000e+00 : f32
    %903 = vector.broadcast %cst_265 : f32 to vector<8x128xf32>
    %904 = arith.addf %903, %902 : vector<8x128xf32>
    %905 = arith.divf %903, %904 : vector<8x128xf32>
    %906 = vector.extract_strided_slice %893 {offsets = [0, 256], sizes = [8, 128], strides = [1, 1]} : vector<8x512xf32> to vector<8x128xf32>
    %907 = math.tanh %906 : vector<8x128xf32>
    %908 = vector.extract_strided_slice %893 {offsets = [0, 384], sizes = [8, 128], strides = [1, 1]} : vector<8x512xf32> to vector<8x128xf32>
    %909 = arith.negf %908 : vector<8x128xf32>
    %910 = math.exp %909 : vector<8x128xf32>
    %cst_266 = arith.constant 1.000000e+00 : f32
    %911 = vector.broadcast %cst_266 : f32 to vector<8x128xf32>
    %912 = arith.addf %911, %910 : vector<8x128xf32>
    %913 = arith.divf %911, %912 : vector<8x128xf32>
    %914 = arith.mulf %905, %781 : vector<8x128xf32>
    %915 = arith.mulf %899, %907 : vector<8x128xf32>
    %916 = arith.addf %914, %915 : vector<8x128xf32>
    %917 = math.tanh %916 : vector<8x128xf32>
    %918 = arith.mulf %913, %917 : vector<8x128xf32>
    %919 = arith.truncf %918 : vector<8x128xf32> to vector<8x128xbf16>
    %c0_267 = arith.constant 0 : index
    %c0_268 = arith.constant 0 : index
    %920 = vector.load %arg20[%c0_267, %c0_268] : memref<128x512xbf16, #tpu.memory_space<vmem>>, vector<128x512xbf16>
    %cst_269 = arith.constant dense<0.000000e+00> : vector<8x512xf32>
    %921 = tpu.matmul %919, %920, %cst_269 {dimension_numbers = #tpu.dot_dimension_numbers<[1], [0], [0], [1], [0, 0, 1, 1], [], []>} : vector<8x128xbf16>, vector<128x512xbf16>, vector<8x512xf32> -> vector<8x512xf32>
    %922 = arith.truncf %816 : vector<8x128xf32> to vector<8x128xbf16>
    %c0_270 = arith.constant 0 : index
    %c0_271 = arith.constant 0 : index
    %923 = vector.load %arg21[%c0_270, %c0_271] : memref<128x512xbf16, #tpu.memory_space<vmem>>, vector<128x512xbf16>
    %cst_272 = arith.constant dense<0.000000e+00> : vector<8x512xf32>
    %924 = tpu.matmul %922, %923, %cst_272 {dimension_numbers = #tpu.dot_dimension_numbers<[1], [0], [0], [1], [0, 0, 1, 1], [], []>} : vector<8x128xbf16>, vector<128x512xbf16>, vector<8x512xf32> -> vector<8x512xf32>
    %925 = arith.addf %921, %924 : vector<8x512xf32>
    %926 = arith.addf %925, %27 : vector<8x512xf32>
    %927 = vector.extract_strided_slice %926 {offsets = [0, 0], sizes = [8, 128], strides = [1, 1]} : vector<8x512xf32> to vector<8x128xf32>
    %928 = arith.negf %927 : vector<8x128xf32>
    %929 = math.exp %928 : vector<8x128xf32>
    %cst_273 = arith.constant 1.000000e+00 : f32
    %930 = vector.broadcast %cst_273 : f32 to vector<8x128xf32>
    %931 = arith.addf %930, %929 : vector<8x128xf32>
    %932 = arith.divf %930, %931 : vector<8x128xf32>
    %933 = vector.extract_strided_slice %926 {offsets = [0, 128], sizes = [8, 128], strides = [1, 1]} : vector<8x512xf32> to vector<8x128xf32>
    %934 = arith.negf %933 : vector<8x128xf32>
    %935 = math.exp %934 : vector<8x128xf32>
    %cst_274 = arith.constant 1.000000e+00 : f32
    %936 = vector.broadcast %cst_274 : f32 to vector<8x128xf32>
    %937 = arith.addf %936, %935 : vector<8x128xf32>
    %938 = arith.divf %936, %937 : vector<8x128xf32>
    %939 = vector.extract_strided_slice %926 {offsets = [0, 256], sizes = [8, 128], strides = [1, 1]} : vector<8x512xf32> to vector<8x128xf32>
    %940 = math.tanh %939 : vector<8x128xf32>
    %941 = vector.extract_strided_slice %926 {offsets = [0, 384], sizes = [8, 128], strides = [1, 1]} : vector<8x512xf32> to vector<8x128xf32>
    %942 = arith.negf %941 : vector<8x128xf32>
    %943 = math.exp %942 : vector<8x128xf32>
    %cst_275 = arith.constant 1.000000e+00 : f32
    %944 = vector.broadcast %cst_275 : f32 to vector<8x128xf32>
    %945 = arith.addf %944, %943 : vector<8x128xf32>
    %946 = arith.divf %944, %945 : vector<8x128xf32>
    %947 = arith.mulf %938, %814 : vector<8x128xf32>
    %948 = arith.mulf %932, %940 : vector<8x128xf32>
    %949 = arith.addf %947, %948 : vector<8x128xf32>
    %950 = math.tanh %949 : vector<8x128xf32>
    %951 = arith.mulf %946, %950 : vector<8x128xf32>
    %952 = arith.truncf %951 : vector<8x128xf32> to vector<8x128xbf16>
    %c0_276 = arith.constant 0 : index
    %c0_277 = arith.constant 0 : index
    %953 = vector.load %arg22[%c0_276, %c0_277] : memref<128x512xbf16, #tpu.memory_space<vmem>>, vector<128x512xbf16>
    %cst_278 = arith.constant dense<0.000000e+00> : vector<8x512xf32>
    %954 = tpu.matmul %952, %953, %cst_278 {dimension_numbers = #tpu.dot_dimension_numbers<[1], [0], [0], [1], [0, 0, 1, 1], [], []>} : vector<8x128xbf16>, vector<128x512xbf16>, vector<8x512xf32> -> vector<8x512xf32>
    %955 = arith.truncf %849 : vector<8x128xf32> to vector<8x128xbf16>
    %c0_279 = arith.constant 0 : index
    %c0_280 = arith.constant 0 : index
    %956 = vector.load %arg23[%c0_279, %c0_280] : memref<128x512xbf16, #tpu.memory_space<vmem>>, vector<128x512xbf16>
    %cst_281 = arith.constant dense<0.000000e+00> : vector<8x512xf32>
    %957 = tpu.matmul %955, %956, %cst_281 {dimension_numbers = #tpu.dot_dimension_numbers<[1], [0], [0], [1], [0, 0, 1, 1], [], []>} : vector<8x128xbf16>, vector<128x512xbf16>, vector<8x512xf32> -> vector<8x512xf32>
    %958 = arith.addf %954, %957 : vector<8x512xf32>
    %959 = arith.addf %958, %30 : vector<8x512xf32>
    %960 = vector.extract_strided_slice %959 {offsets = [0, 0], sizes = [8, 128], strides = [1, 1]} : vector<8x512xf32> to vector<8x128xf32>
    %961 = arith.negf %960 : vector<8x128xf32>
    %962 = math.exp %961 : vector<8x128xf32>
    %cst_282 = arith.constant 1.000000e+00 : f32
    %963 = vector.broadcast %cst_282 : f32 to vector<8x128xf32>
    %964 = arith.addf %963, %962 : vector<8x128xf32>
    %965 = arith.divf %963, %964 : vector<8x128xf32>
    %966 = vector.extract_strided_slice %959 {offsets = [0, 128], sizes = [8, 128], strides = [1, 1]} : vector<8x512xf32> to vector<8x128xf32>
    %967 = arith.negf %966 : vector<8x128xf32>
    %968 = math.exp %967 : vector<8x128xf32>
    %cst_283 = arith.constant 1.000000e+00 : f32
    %969 = vector.broadcast %cst_283 : f32 to vector<8x128xf32>
    %970 = arith.addf %969, %968 : vector<8x128xf32>
    %971 = arith.divf %969, %970 : vector<8x128xf32>
    %972 = vector.extract_strided_slice %959 {offsets = [0, 256], sizes = [8, 128], strides = [1, 1]} : vector<8x512xf32> to vector<8x128xf32>
    %973 = math.tanh %972 : vector<8x128xf32>
    %974 = vector.extract_strided_slice %959 {offsets = [0, 384], sizes = [8, 128], strides = [1, 1]} : vector<8x512xf32> to vector<8x128xf32>
    %975 = arith.negf %974 : vector<8x128xf32>
    %976 = math.exp %975 : vector<8x128xf32>
    %cst_284 = arith.constant 1.000000e+00 : f32
    %977 = vector.broadcast %cst_284 : f32 to vector<8x128xf32>
    %978 = arith.addf %977, %976 : vector<8x128xf32>
    %979 = arith.divf %977, %978 : vector<8x128xf32>
    %980 = arith.mulf %971, %847 : vector<8x128xf32>
    %981 = arith.mulf %965, %973 : vector<8x128xf32>
    %982 = arith.addf %980, %981 : vector<8x128xf32>
    %983 = math.tanh %982 : vector<8x128xf32>
    %984 = arith.mulf %979, %983 : vector<8x128xf32>
    %985 = arith.index_cast %c6_i32_249 : i32 to index
    %c0_285 = arith.constant 0 : index
    %c0_286 = arith.constant 0 : index
    %986 = vector.load %arg17[%985, %c0_285, %c0_286] : memref<8x8x128xf32, #tpu.memory_space<vmem>>, vector<1x8x128xf32>
    %987 = vector.shape_cast %986 : vector<1x8x128xf32> to vector<8x128xf32>
    %988 = vector.shape_cast %984 : vector<8x128xf32> to vector<1x8x128xf32>
    tpu.vector_store %arg17[%985, %c0_285, %c0_286], %988 {strides = array<i32>} : memref<8x8x128xf32, #tpu.memory_space<vmem>>, vector<1x8x128xf32>,
    %c7_i32 = arith.constant 7 : i32
    %989 = arith.index_cast %c7_i32 : i32 to index
    %c0_287 = arith.constant 0 : index
    %c0_288 = arith.constant 0 : index
    %990 = vector.load %arg16[%989, %c0_287, %c0_288] : memref<8x8x512xf32, #tpu.memory_space<vmem>>, vector<1x8x512xf32>
    %991 = vector.shape_cast %990 : vector<1x8x512xf32> to vector<8x512xf32>
    %992 = arith.truncf %885 : vector<8x128xf32> to vector<8x128xbf16>
    %c0_289 = arith.constant 0 : index
    %c0_290 = arith.constant 0 : index
    %993 = vector.load %arg2[%c0_289, %c0_290] : memref<128x512xbf16, #tpu.memory_space<vmem>>, vector<128x512xbf16>
    %cst_291 = arith.constant dense<0.000000e+00> : vector<8x512xf32>
    %994 = tpu.matmul %992, %993, %cst_291 {dimension_numbers = #tpu.dot_dimension_numbers<[1], [0], [0], [1], [0, 0, 1, 1], [], []>} : vector<8x128xbf16>, vector<128x512xbf16>, vector<8x512xf32> -> vector<8x512xf32>
    %995 = arith.addf %991, %994 : vector<8x512xf32>
    %996 = vector.extract_strided_slice %995 {offsets = [0, 0], sizes = [8, 128], strides = [1, 1]} : vector<8x512xf32> to vector<8x128xf32>
    %997 = arith.negf %996 : vector<8x128xf32>
    %998 = math.exp %997 : vector<8x128xf32>
    %cst_292 = arith.constant 1.000000e+00 : f32
    %999 = vector.broadcast %cst_292 : f32 to vector<8x128xf32>
    %1000 = arith.addf %999, %998 : vector<8x128xf32>
    %1001 = arith.divf %999, %1000 : vector<8x128xf32>
    %1002 = vector.extract_strided_slice %995 {offsets = [0, 128], sizes = [8, 128], strides = [1, 1]} : vector<8x512xf32> to vector<8x128xf32>
    %1003 = arith.negf %1002 : vector<8x128xf32>
    %1004 = math.exp %1003 : vector<8x128xf32>
    %cst_293 = arith.constant 1.000000e+00 : f32
    %1005 = vector.broadcast %cst_293 : f32 to vector<8x128xf32>
    %1006 = arith.addf %1005, %1004 : vector<8x128xf32>
    %1007 = arith.divf %1005, %1006 : vector<8x128xf32>
    %1008 = vector.extract_strided_slice %995 {offsets = [0, 256], sizes = [8, 128], strides = [1, 1]} : vector<8x512xf32> to vector<8x128xf32>
    %1009 = math.tanh %1008 : vector<8x128xf32>
    %1010 = vector.extract_strided_slice %995 {offsets = [0, 384], sizes = [8, 128], strides = [1, 1]} : vector<8x512xf32> to vector<8x128xf32>
    %1011 = arith.negf %1010 : vector<8x128xf32>
    %1012 = math.exp %1011 : vector<8x128xf32>
    %cst_294 = arith.constant 1.000000e+00 : f32
    %1013 = vector.broadcast %cst_294 : f32 to vector<8x128xf32>
    %1014 = arith.addf %1013, %1012 : vector<8x128xf32>
    %1015 = arith.divf %1013, %1014 : vector<8x128xf32>
    %1016 = arith.mulf %1007, %883 : vector<8x128xf32>
    %1017 = arith.mulf %1001, %1009 : vector<8x128xf32>
    %1018 = arith.addf %1016, %1017 : vector<8x128xf32>
    %1019 = math.tanh %1018 : vector<8x128xf32>
    %1020 = arith.mulf %1015, %1019 : vector<8x128xf32>
    %1021 = arith.truncf %1020 : vector<8x128xf32> to vector<8x128xbf16>
    %c0_295 = arith.constant 0 : index
    %c0_296 = arith.constant 0 : index
    %1022 = vector.load %arg18[%c0_295, %c0_296] : memref<128x512xbf16, #tpu.memory_space<vmem>>, vector<128x512xbf16>
    %cst_297 = arith.constant dense<0.000000e+00> : vector<8x512xf32>
    %1023 = tpu.matmul %1021, %1022, %cst_297 {dimension_numbers = #tpu.dot_dimension_numbers<[1], [0], [0], [1], [0, 0, 1, 1], [], []>} : vector<8x128xbf16>, vector<128x512xbf16>, vector<8x512xf32> -> vector<8x512xf32>
    %1024 = arith.truncf %918 : vector<8x128xf32> to vector<8x128xbf16>
    %c0_298 = arith.constant 0 : index
    %c0_299 = arith.constant 0 : index
    %1025 = vector.load %arg19[%c0_298, %c0_299] : memref<128x512xbf16, #tpu.memory_space<vmem>>, vector<128x512xbf16>
    %cst_300 = arith.constant dense<0.000000e+00> : vector<8x512xf32>
    %1026 = tpu.matmul %1024, %1025, %cst_300 {dimension_numbers = #tpu.dot_dimension_numbers<[1], [0], [0], [1], [0, 0, 1, 1], [], []>} : vector<8x128xbf16>, vector<128x512xbf16>, vector<8x512xf32> -> vector<8x512xf32>
    %1027 = arith.addf %1023, %1026 : vector<8x512xf32>
    %1028 = arith.addf %1027, %24 : vector<8x512xf32>
    %1029 = vector.extract_strided_slice %1028 {offsets = [0, 0], sizes = [8, 128], strides = [1, 1]} : vector<8x512xf32> to vector<8x128xf32>
    %1030 = arith.negf %1029 : vector<8x128xf32>
    %1031 = math.exp %1030 : vector<8x128xf32>
    %cst_301 = arith.constant 1.000000e+00 : f32
    %1032 = vector.broadcast %cst_301 : f32 to vector<8x128xf32>
    %1033 = arith.addf %1032, %1031 : vector<8x128xf32>
    %1034 = arith.divf %1032, %1033 : vector<8x128xf32>
    %1035 = vector.extract_strided_slice %1028 {offsets = [0, 128], sizes = [8, 128], strides = [1, 1]} : vector<8x512xf32> to vector<8x128xf32>
    %1036 = arith.negf %1035 : vector<8x128xf32>
    %1037 = math.exp %1036 : vector<8x128xf32>
    %cst_302 = arith.constant 1.000000e+00 : f32
    %1038 = vector.broadcast %cst_302 : f32 to vector<8x128xf32>
    %1039 = arith.addf %1038, %1037 : vector<8x128xf32>
    %1040 = arith.divf %1038, %1039 : vector<8x128xf32>
    %1041 = vector.extract_strided_slice %1028 {offsets = [0, 256], sizes = [8, 128], strides = [1, 1]} : vector<8x512xf32> to vector<8x128xf32>
    %1042 = math.tanh %1041 : vector<8x128xf32>
    %1043 = vector.extract_strided_slice %1028 {offsets = [0, 384], sizes = [8, 128], strides = [1, 1]} : vector<8x512xf32> to vector<8x128xf32>
    %1044 = arith.negf %1043 : vector<8x128xf32>
    %1045 = math.exp %1044 : vector<8x128xf32>
    %cst_303 = arith.constant 1.000000e+00 : f32
    %1046 = vector.broadcast %cst_303 : f32 to vector<8x128xf32>
    %1047 = arith.addf %1046, %1045 : vector<8x128xf32>
    %1048 = arith.divf %1046, %1047 : vector<8x128xf32>
    %1049 = arith.mulf %1040, %916 : vector<8x128xf32>
    %1050 = arith.mulf %1034, %1042 : vector<8x128xf32>
    %1051 = arith.addf %1049, %1050 : vector<8x128xf32>
    %1052 = math.tanh %1051 : vector<8x128xf32>
    %1053 = arith.mulf %1048, %1052 : vector<8x128xf32>
    %1054 = arith.truncf %1053 : vector<8x128xf32> to vector<8x128xbf16>
    %c0_304 = arith.constant 0 : index
    %c0_305 = arith.constant 0 : index
    %1055 = vector.load %arg20[%c0_304, %c0_305] : memref<128x512xbf16, #tpu.memory_space<vmem>>, vector<128x512xbf16>
    %cst_306 = arith.constant dense<0.000000e+00> : vector<8x512xf32>
    %1056 = tpu.matmul %1054, %1055, %cst_306 {dimension_numbers = #tpu.dot_dimension_numbers<[1], [0], [0], [1], [0, 0, 1, 1], [], []>} : vector<8x128xbf16>, vector<128x512xbf16>, vector<8x512xf32> -> vector<8x512xf32>
    %1057 = arith.truncf %951 : vector<8x128xf32> to vector<8x128xbf16>
    %c0_307 = arith.constant 0 : index
    %c0_308 = arith.constant 0 : index
    %1058 = vector.load %arg21[%c0_307, %c0_308] : memref<128x512xbf16, #tpu.memory_space<vmem>>, vector<128x512xbf16>
    %cst_309 = arith.constant dense<0.000000e+00> : vector<8x512xf32>
    %1059 = tpu.matmul %1057, %1058, %cst_309 {dimension_numbers = #tpu.dot_dimension_numbers<[1], [0], [0], [1], [0, 0, 1, 1], [], []>} : vector<8x128xbf16>, vector<128x512xbf16>, vector<8x512xf32> -> vector<8x512xf32>
    %1060 = arith.addf %1056, %1059 : vector<8x512xf32>
    %1061 = arith.addf %1060, %27 : vector<8x512xf32>
    %1062 = vector.extract_strided_slice %1061 {offsets = [0, 0], sizes = [8, 128], strides = [1, 1]} : vector<8x512xf32> to vector<8x128xf32>
    %1063 = arith.negf %1062 : vector<8x128xf32>
    %1064 = math.exp %1063 : vector<8x128xf32>
    %cst_310 = arith.constant 1.000000e+00 : f32
    %1065 = vector.broadcast %cst_310 : f32 to vector<8x128xf32>
    %1066 = arith.addf %1065, %1064 : vector<8x128xf32>
    %1067 = arith.divf %1065, %1066 : vector<8x128xf32>
    %1068 = vector.extract_strided_slice %1061 {offsets = [0, 128], sizes = [8, 128], strides = [1, 1]} : vector<8x512xf32> to vector<8x128xf32>
    %1069 = arith.negf %1068 : vector<8x128xf32>
    %1070 = math.exp %1069 : vector<8x128xf32>
    %cst_311 = arith.constant 1.000000e+00 : f32
    %1071 = vector.broadcast %cst_311 : f32 to vector<8x128xf32>
    %1072 = arith.addf %1071, %1070 : vector<8x128xf32>
    %1073 = arith.divf %1071, %1072 : vector<8x128xf32>
    %1074 = vector.extract_strided_slice %1061 {offsets = [0, 256], sizes = [8, 128], strides = [1, 1]} : vector<8x512xf32> to vector<8x128xf32>
    %1075 = math.tanh %1074 : vector<8x128xf32>
    %1076 = vector.extract_strided_slice %1061 {offsets = [0, 384], sizes = [8, 128], strides = [1, 1]} : vector<8x512xf32> to vector<8x128xf32>
    %1077 = arith.negf %1076 : vector<8x128xf32>
    %1078 = math.exp %1077 : vector<8x128xf32>
    %cst_312 = arith.constant 1.000000e+00 : f32
    %1079 = vector.broadcast %cst_312 : f32 to vector<8x128xf32>
    %1080 = arith.addf %1079, %1078 : vector<8x128xf32>
    %1081 = arith.divf %1079, %1080 : vector<8x128xf32>
    %1082 = arith.mulf %1073, %949 : vector<8x128xf32>
    %1083 = arith.mulf %1067, %1075 : vector<8x128xf32>
    %1084 = arith.addf %1082, %1083 : vector<8x128xf32>
    %1085 = math.tanh %1084 : vector<8x128xf32>
    %1086 = arith.mulf %1081, %1085 : vector<8x128xf32>
    %1087 = arith.truncf %1086 : vector<8x128xf32> to vector<8x128xbf16>
    %c0_313 = arith.constant 0 : index
    %c0_314 = arith.constant 0 : index
    %1088 = vector.load %arg22[%c0_313, %c0_314] : memref<128x512xbf16, #tpu.memory_space<vmem>>, vector<128x512xbf16>
    %cst_315 = arith.constant dense<0.000000e+00> : vector<8x512xf32>
    %1089 = tpu.matmul %1087, %1088, %cst_315 {dimension_numbers = #tpu.dot_dimension_numbers<[1], [0], [0], [1], [0, 0, 1, 1], [], []>} : vector<8x128xbf16>, vector<128x512xbf16>, vector<8x512xf32> -> vector<8x512xf32>
    %1090 = arith.truncf %984 : vector<8x128xf32> to vector<8x128xbf16>
    %c0_316 = arith.constant 0 : index
    %c0_317 = arith.constant 0 : index
    %1091 = vector.load %arg23[%c0_316, %c0_317] : memref<128x512xbf16, #tpu.memory_space<vmem>>, vector<128x512xbf16>
    %cst_318 = arith.constant dense<0.000000e+00> : vector<8x512xf32>
    %1092 = tpu.matmul %1090, %1091, %cst_318 {dimension_numbers = #tpu.dot_dimension_numbers<[1], [0], [0], [1], [0, 0, 1, 1], [], []>} : vector<8x128xbf16>, vector<128x512xbf16>, vector<8x512xf32> -> vector<8x512xf32>
    %1093 = arith.addf %1089, %1092 : vector<8x512xf32>
    %1094 = arith.addf %1093, %30 : vector<8x512xf32>
    %1095 = vector.extract_strided_slice %1094 {offsets = [0, 0], sizes = [8, 128], strides = [1, 1]} : vector<8x512xf32> to vector<8x128xf32>
    %1096 = arith.negf %1095 : vector<8x128xf32>
    %1097 = math.exp %1096 : vector<8x128xf32>
    %cst_319 = arith.constant 1.000000e+00 : f32
    %1098 = vector.broadcast %cst_319 : f32 to vector<8x128xf32>
    %1099 = arith.addf %1098, %1097 : vector<8x128xf32>
    %1100 = arith.divf %1098, %1099 : vector<8x128xf32>
    %1101 = vector.extract_strided_slice %1094 {offsets = [0, 128], sizes = [8, 128], strides = [1, 1]} : vector<8x512xf32> to vector<8x128xf32>
    %1102 = arith.negf %1101 : vector<8x128xf32>
    %1103 = math.exp %1102 : vector<8x128xf32>
    %cst_320 = arith.constant 1.000000e+00 : f32
    %1104 = vector.broadcast %cst_320 : f32 to vector<8x128xf32>
    %1105 = arith.addf %1104, %1103 : vector<8x128xf32>
    %1106 = arith.divf %1104, %1105 : vector<8x128xf32>
    %1107 = vector.extract_strided_slice %1094 {offsets = [0, 256], sizes = [8, 128], strides = [1, 1]} : vector<8x512xf32> to vector<8x128xf32>
    %1108 = math.tanh %1107 : vector<8x128xf32>
    %1109 = vector.extract_strided_slice %1094 {offsets = [0, 384], sizes = [8, 128], strides = [1, 1]} : vector<8x512xf32> to vector<8x128xf32>
    %1110 = arith.negf %1109 : vector<8x128xf32>
    %1111 = math.exp %1110 : vector<8x128xf32>
    %cst_321 = arith.constant 1.000000e+00 : f32
    %1112 = vector.broadcast %cst_321 : f32 to vector<8x128xf32>
    %1113 = arith.addf %1112, %1111 : vector<8x128xf32>
    %1114 = arith.divf %1112, %1113 : vector<8x128xf32>
    %1115 = arith.mulf %1106, %982 : vector<8x128xf32>
    %1116 = arith.mulf %1100, %1108 : vector<8x128xf32>
    %1117 = arith.addf %1115, %1116 : vector<8x128xf32>
    %1118 = math.tanh %1117 : vector<8x128xf32>
    %1119 = arith.mulf %1114, %1118 : vector<8x128xf32>
    %1120 = arith.index_cast %c7_i32 : i32 to index
    %c0_322 = arith.constant 0 : index
    %c0_323 = arith.constant 0 : index
    %1121 = vector.load %arg17[%1120, %c0_322, %c0_323] : memref<8x8x128xf32, #tpu.memory_space<vmem>>, vector<1x8x128xf32>
    %1122 = vector.shape_cast %1121 : vector<1x8x128xf32> to vector<8x128xf32>
    %1123 = vector.shape_cast %1119 : vector<8x128xf32> to vector<1x8x128xf32>
    tpu.vector_store %arg17[%1120, %c0_322, %c0_323], %1123 {strides = array<i32>} : memref<8x8x128xf32, #tpu.memory_space<vmem>>, vector<1x8x128xf32>,
    %c8_i32 = arith.constant 8 : i32
    %c6_i32_324 = arith.constant 6 : i32
    %1124 = tpu.memref_slice %arg25[%c6_i32_324] : memref<7x!tpu.dma_semaphore, #tpu.memory_space<semaphore_mem>> -> memref<1x!tpu.dma_semaphore, #tpu.memory_space<semaphore_mem>>
    %1125 = tpu.memref_squeeze %1124 : memref<1x!tpu.dma_semaphore, #tpu.memory_space<semaphore_mem>> -> memref<!tpu.dma_semaphore, #tpu.memory_space<semaphore_mem>>
    tpu.wait_dma2 semaphore(%1125 : memref<!tpu.dma_semaphore, #tpu.memory_space<semaphore_mem>>) src(%arg13 : memref<128x128xbf16, #tpu.memory_space<any>>) dst(%arg24 : memref<128x128xbf16, #tpu.memory_space<vmem>>)
    %c0_325 = arith.constant 0 : index
    %c0_326 = arith.constant 0 : index
    %c0_327 = arith.constant 0 : index
    %1126 = vector.load %arg17[%c0_325, %c0_326, %c0_327] : memref<8x8x128xf32, #tpu.memory_space<vmem>>, vector<8x8x128xf32>
    %1127 = vector.shape_cast %1126 : vector<8x8x128xf32> to vector<64x128xf32>
    %1128 = arith.truncf %1127 : vector<64x128xf32> to vector<64x128xbf16>
    %c0_328 = arith.constant 0 : index
    %c0_329 = arith.constant 0 : index
    %1129 = vector.load %arg24[%c0_328, %c0_329] : memref<128x128xbf16, #tpu.memory_space<vmem>>, vector<128x128xbf16>
    %cst_330 = arith.constant dense<0.000000e+00> : vector<64x128xf32>
    %1130 = tpu.matmul %1128, %1129, %cst_330 {dimension_numbers = #tpu.dot_dimension_numbers<[1], [0], [0], [1], [0, 0, 1, 1], [], []>} : vector<64x128xbf16>, vector<128x128xbf16>, vector<64x128xf32> -> vector<64x128xf32>
    %c0_331 = arith.constant 0 : index
    %c0_332 = arith.constant 0 : index
    %1131 = vector.load %arg14[%c0_331, %c0_332] : memref<1x128xf32, #tpu.memory_space<vmem>>, vector<1x128xf32>
    %1132 = vector.broadcast %1131 : vector<1x128xf32> to vector<64x128xf32>
    %1133 = arith.addf %1130, %1132 : vector<64x128xf32>
    %c0_333 = arith.constant 0 : index
    %c0_334 = arith.constant 0 : index
    %1134 = vector.load %arg15[%c0_333, %c0_334] : memref<64x128xf32, #tpu.memory_space<vmem>>, vector<64x128xf32>
    tpu.vector_store %arg15[%c0_333, %c0_334], %1133 {strides = array<i32>} : memref<64x128xf32, #tpu.memory_space<vmem>>, vector<64x128xf32>,
    return
  }
}

</mosaic_0001>

<bundles_post_ra>
// kernel: lstmae_forward.1
= control target key start
LH: loop header
LB: loop body
LE: loop exit
PB: predicated region body
PF: predicated region fallthrough
CT: control target
= control target key end

     0   :  { %20 = vsyncpa [#allocation13], 0  ;;  %s12365_s0 = inlined_call_operand.vmem [shape: bf16[64,128], index: 0, kind: input, shape index: {}]   ;;  %s12366_s1 = inlined_call_operand.hbm [shape: bf16[128,512], index: 1, kind: input, shape index: {}]   ;;  %s12367_s2 = inlined_call_operand.hbm [shape: bf16[128,512], index: 2, kind: input, shape index: {}]   ;;  %s12368_s3 = inlined_call_operand.vmem [shape: f32[1,512], index: 3, kind: input, shape index: {}]   ;;  %s12369_s4 = inlined_call_operand.hbm [shape: bf16[128,512], index: 4, kind: input, shape index: {}]   ;;  %s12370_s5 = inlined_call_operand.hbm [shape: bf16[128,512], index: 5, kind: input, shape index: {}]   ;;  %s12371_s6 = inlined_call_operand.vmem [shape: f32[1,512], index: 6, kind: input, shape index: {}]   ;;  %s12372_s7 = inlined_call_operand.hbm [shape: bf16[128,512], index: 7, kind: input, shape index: {}]   ;;  %s12373_s8 = inlined_call_operand.hbm [shape: bf16[128,512], index: 8, kind: input, shape index: {}]   ;;  %s12374_s9 = inlined_call_operand.vmem [shape: f32[1,512], index: 9, kind: input, shape index: {}]   ;;  %s12375_s10 = inlined_call_operand.hbm [shape: bf16[128,512], index: 10, kind: input, shape index: {}]   ;;  %s12376_s11 = inlined_call_operand.hbm [shape: bf16[128,512], index: 11, kind: input, shape index: {}]   ;;  %s12377_s12 = inlined_call_operand.vmem [shape: f32[1,512], index: 12, kind: input, shape index: {}]   ;;  %s12378_s13 = inlined_call_operand.vmem [shape: bf16[128,128], index: 13, kind: input, shape index: {}]   ;;  %s12379_s14 = inlined_call_operand.vmem [shape: f32[1,128], index: 14, kind: input, shape index: {}]   ;;  %s12380_s15 = inlined_call_operand.vmem [shape: f32[64,128], index: 15, kind: output, shape index: {}]  }
   0x1   :  { %21 = vsyncpa [#allocation15], 0  ;;  %s11128_s18 = smov [#allocation12]   ;;  %s11066_s22 = scalar_lea.hbm %s12366_s1, 4096 }
   0x2   :  { %s29_s19 = sshll.u32 %s11128_s18, 4  ;;  %p11067_p0 = scmp.ne.s32.totalorder %s12366_s1, %s11066_s22  ;;  %s30_s19 = int_to_ptr.vmem [resolvable:$true] %s29_s19 }
   0x3   :  { %p11070_p1 = scmp.lt.u32.totalorder %s11066_s22, %s12366_s1 }
   0x5   :  { %p11072_p2 = pnand %p11070_p1, %p11067_p0 }
   0x7   :  { %11075 = shalt.err (!%p11072_p2)
}
   0x8   :  { %s11076_s27 = scalar_lea.vmem %s30_s19, 4096  ;;  %p11081_p4 = scmp.lt.s32.totalorder %s30_s19, %s30_s19 }
   0x9   :  { %p11077_p3 = scmp.ne.s32.totalorder %s30_s19, %s11076_s27  ;;  %p11082_p5 = scmp.lt.s32.totalorder %s11076_s27, %s11076_s27 }
   0xb   :  { %p11083_p6 = por %p11082_p5, %p11081_p4 }
   0xd   :  { %p11084_p7 = pnand %p11083_p6, %p11077_p3 }
   0xf   :  { %11087 = shalt.err (!%p11084_p7)
}
  0x10   :  { %s11129_s28 = smov 256   ;;  %s11130_s29 = smov 16  }
  0x11   :  { %35 = dma.hbm_to_vmem [thread:$0]  %s12366_s1, 4096, %s30_s19, [#allocation13], %s11129_s28, %s11129_s28, %s11130_s29  }
  0x12   :  { %s11131_s17 = smov [#allocation14]   ;;  %s11088_s22 = scalar_lea.hbm %s12367_s2, 4096 }
  0x13   :  { %s41_s18 = sshll.u32 %s11131_s17, 4  ;;  %p11089_p8 = scmp.ne.s32.totalorder %s12367_s2, %s11088_s22  ;;  %s42_s18 = int_to_ptr.vmem [resolvable:$true] %s41_s18 }
  0x14   :  { %p11092_p9 = scmp.lt.u32.totalorder %s11088_s22, %s12367_s2 }
  0x16   :  { %p11094_p10 = pnand %p11092_p9, %p11089_p8 }
  0x18   :  { %11097 = shalt.err (!%p11094_p10)
}
  0x19   :  { %s11098_s27 = scalar_lea.vmem %s42_s18, 4096  ;;  %p11103_p12 = scmp.lt.s32.totalorder %s42_s18, %s42_s18 }
  0x1a   :  { %p11099_p11 = scmp.ne.s32.totalorder %s42_s18, %s11098_s27  ;;  %p11104_p13 = scmp.lt.s32.totalorder %s11098_s27, %s11098_s27 }
  0x1c   :  { %p11105_p0 = por %p11104_p13, %p11103_p12 }
  0x1e   :  { %p11106_p1 = pnand %p11105_p0, %p11099_p11 }
  0x20   :  { %11109 = shalt.err (!%p11106_p1)
}
  0x21   :  { %47 = dma.hbm_to_vmem [thread:$0]  %s12367_s2, 4096, %s42_s18, [#allocation15], %s11129_s28, %s11129_s28, %s11130_s29  }
  0x22   :  { %11110 = dma.done.wait [#allocation13], 4096  }
  0x23   :  { %11111 = vsyncadd [#allocation13], 4294963200 }
  0x24   :  { %11112 = dma.done.wait [#allocation15], 4096  }
  0x25   :  { %11113 = vsyncadd [#allocation15], 4294963200  ;;  %s69_s30 = sld [smem:[#allocation0]]   ;;  %s11132_s16 = smov 512  }
  0x26   :  { %81 = sst [smem:[#allocation17]] %s11132_s16  ;;  %s11133_s17 = smov 4  }
  0x27   :  { %83 = sst [smem:[#allocation17 + $0x1]] %s11132_s16  ;;  %s11134_s20 = smov 64  }
  0x28   :  { %85 = sst [smem:[#allocation17 + $0x2]] %s11133_s17  ;;  %s11135_s21 = smov 128  }
  0x29   :  { %87 = sst [smem:[#allocation17 + $0x3]] %s11134_s20  ;;  %s11136_s2 = smov 2  }
  0x2a   :  { %89 = sst [smem:[#allocation17 + $0x4]] %s11135_s21  ;;  %s11137_s29 = smov [#allocation4]  }
  0x2b   :  { %91 = sst [smem:[#allocation17 + $0x5]] %s11136_s2  ;;  %s77_s18 = sshll.u32 %s11137_s29, 4  ;;  %s78_s18 = int_to_ptr.vmem [resolvable:$true] %s77_s18 }
  0x2c   :  { %s9646_s22 = sshll.u32 %s69_s30, 26  ;;  %93 = sst [smem:[#allocation17 + $0x6]] %s11129_s28 }
  0x2d   :  { %s11271_s23 = sadd.s32 134217728, %s9646_s22  ;;  %95 = sst [smem:[#allocation17 + $0x7]] %s11134_s20 }
  0x2e   :  { %97 = sst [smem:[#allocation17 + $0x8]] %s11133_s17  ;;  %s11138_s24 = smov [#allocation11]  }
  0x2f   :  { %s11139_s25 = smov [#allocation16]   ;;  %s11140_s1 = smov [#allocation5]  }
  0x30   :  { %99 = dma.general %s12369_s4, 4096, %s78_s18, %s11138_s24, %s11139_s25, [#allocation17], %s11271_s23, 0  }
  0x31   :  { %116 = sst [smem:[#allocation19]] %s11132_s16  ;;  %s112_s19 = sshll.u32 %s11140_s1, 4  ;;  %s113_s19 = int_to_ptr.vmem [resolvable:$true] %s112_s19 }
  0x32   :  { %118 = sst [smem:[#allocation19 + $0x1]] %s11132_s16  ;;  %s11141_s4 = smov [#allocation11 + $0x1]  }
  0x33   :  { %120 = sst [smem:[#allocation19 + $0x2]] %s11133_s17  ;;  %s11142_s30 = smov [#allocation18]  }
  0x34   :  { %122 = sst [smem:[#allocation19 + $0x3]] %s11134_s20  ;;  %s11143_s22 = smov [#allocation6]  }
  0x35   :  { %124 = sst [smem:[#allocation19 + $0x4]] %s11135_s21  ;;  %s147_s24 = sshll.u32 %s11143_s22, 4  ;;  %s148_s24 = int_to_ptr.vmem [resolvable:$true] %s147_s24 }
  0x36   :  { %126 = sst [smem:[#allocation19 + $0x5]] %s11136_s2  ;;  %s11145_s25 = smov [#allocation20]  }
  0x37   :  { %128 = sst [smem:[#allocation19 + $0x6]] %s11129_s28  ;;  %s11146_s1 = smov [#allocation7]  }
  0x38   :  { %130 = sst [smem:[#allocation19 + $0x7]] %s11134_s20  ;;  %s11149_s18 = smov [#allocation8]  }
  0x39   :  { %132 = sst [smem:[#allocation19 + $0x8]] %s11133_s17  ;;  %s217_s22 = sshll.u32 %s11149_s18, 4  ;;  %s218_s22 = int_to_ptr.vmem [resolvable:$true] %s217_s22 }
  0x3a   :  { %134 = dma.general %s12370_s5, 4096, %s113_s19, %s11141_s4, %s11142_s30, [#allocation19], %s11271_s23, 0  }
  0x3b   :  { %151 = sst [smem:[#allocation21]] %s11132_s16  ;;  %s11144_s5 = smov [#allocation11 + $0x2]  }
  0x3c   :  { %153 = sst [smem:[#allocation21 + $0x1]] %s11132_s16  ;;  %s182_s19 = sshll.u32 %s11146_s1, 4  ;;  %s183_s19 = int_to_ptr.vmem [resolvable:$true] %s182_s19 }
  0x3d   :  { %155 = sst [smem:[#allocation21 + $0x2]] %s11133_s17  ;;  %s11148_s4 = smov [#allocation22]  }
  0x3e   :  { %157 = sst [smem:[#allocation21 + $0x3]] %s11134_s20  ;;  %s11152_s26 = smov [#allocation9]  }
  0x3f   :  { %159 = sst [smem:[#allocation21 + $0x4]] %s11135_s21  ;;  %s252_s27 = sshll.u32 %s11152_s26, 4  ;;  %s253_s27 = int_to_ptr.vmem [resolvable:$true] %s252_s27 }
  0x40   :  { %161 = sst [smem:[#allocation21 + $0x5]] %s11136_s2  ;;  %s11154_s1 = smov [#allocation26]  }
  0x41   :  { %163 = sst [smem:[#allocation21 + $0x6]] %s11129_s28 }
  0x42   :  { %165 = sst [smem:[#allocation21 + $0x7]] %s11134_s20 }
  0x43   :  { %167 = sst [smem:[#allocation21 + $0x8]] %s11133_s17 }
  0x44   :  { %169 = dma.general %s12372_s7, 4096, %s148_s24, %s11144_s5, %s11145_s25, [#allocation21], %s11271_s23, 0  }
  0x45   :  { %186 = sst [smem:[#allocation23]] %s11132_s16  ;;  %s11147_s7 = smov [#allocation11 + $0x3]  }
  0x46   :  { %188 = sst [smem:[#allocation23 + $0x1]] %s11132_s16  ;;  %s11151_s24 = smov [#allocation24]  }
  0x47   :  { %190 = sst [smem:[#allocation23 + $0x2]] %s11133_s17 }
  0x48   :  { %192 = sst [smem:[#allocation23 + $0x3]] %s11134_s20 }
  0x49   :  { %194 = sst [smem:[#allocation23 + $0x4]] %s11135_s21 }
  0x4a   :  { %196 = sst [smem:[#allocation23 + $0x5]] %s11136_s2 }
  0x4b   :  { %198 = sst [smem:[#allocation23 + $0x6]] %s11129_s28 }
  0x4c   :  { %200 = sst [smem:[#allocation23 + $0x7]] %s11134_s20 }
  0x4d   :  { %202 = sst [smem:[#allocation23 + $0x8]] %s11133_s17 }
  0x4e   :  { %204 = dma.general %s12373_s8, 4096, %s183_s19, %s11147_s7, %s11148_s4, [#allocation23], %s11271_s23, 0  }
  0x4f   :  { %221 = sst [smem:[#allocation25]] %s11132_s16  ;;  %s11150_s8 = smov [#allocation11 + $0x4]  }
  0x50   :  { %223 = sst [smem:[#allocation25 + $0x1]] %s11132_s16 }
  0x51   :  { %225 = sst [smem:[#allocation25 + $0x2]] %s11133_s17 }
  0x52   :  { %227 = sst [smem:[#allocation25 + $0x3]] %s11134_s20 }
  0x53   :  { %229 = sst [smem:[#allocation25 + $0x4]] %s11135_s21 }
  0x54   :  { %231 = sst [smem:[#allocation25 + $0x5]] %s11136_s2 }
  0x55   :  { %233 = sst [smem:[#allocation25 + $0x6]] %s11129_s28 }
  0x56   :  { %235 = sst [smem:[#allocation25 + $0x7]] %s11134_s20 }
  0x57   :  { %237 = sst [smem:[#allocation25 + $0x8]] %s11133_s17 }
  0x58   :  { %239 = dma.general %s12375_s10, 4096, %s218_s22, %s11150_s8, %s11151_s24, [#allocation25], %s11271_s23, 0  }
  0x59   :  { %256 = sst [smem:[#allocation27]] %s11132_s16  ;;  %s11153_s10 = smov [#allocation11 + $0x5]  }
  0x5a   :  { %258 = sst [smem:[#allocation27 + $0x1]] %s11132_s16 }
  0x5b   :  { %260 = sst [smem:[#allocation27 + $0x2]] %s11133_s17 }
  0x5c   :  { %262 = sst [smem:[#allocation27 + $0x3]] %s11134_s20 }
  0x5d   :  { %264 = sst [smem:[#allocation27 + $0x4]] %s11135_s21 }
  0x5e   :  { %266 = sst [smem:[#allocation27 + $0x5]] %s11136_s2 }
  0x5f   :  { %268 = sst [smem:[#allocation27 + $0x6]] %s11129_s28 }
  0x60   :  { %270 = sst [smem:[#allocation27 + $0x7]] %s11134_s20 }
  0x61   :  { %272 = sst [smem:[#allocation27 + $0x8]] %s11133_s17 }
  0x62   :  { %274 = dma.general %s12376_s11, 4096, %s253_s27, %s11153_s10, %s11154_s1, [#allocation27], %s11271_s23, 0  }
  0x63   :  { %v11347_v0 = vld [vmem:[%s12378_s13] sm:$0xff]  ;;  %v11352_v1 = vld [vmem:[%s12378_s13 + $0x8] sm:$0xff]  ;;  %v11357_v2 = vld [vmem:[%s12378_s13 + $0x10] sm:$0xff] }
  0x64   :  { %12391 = vst [vmem:[#allocation38_spill] sm:$0xff] %v11347_v0  ;;  %12392 = vst [vmem:[#allocation39_spill] sm:$0xff] %v11352_v1  ;;  %v11362_v3 = vld [vmem:[%s12378_s13 + $0x18] sm:$0xff]  ;;  %v11367_v4 = vld [vmem:[%s12378_s13 + $0x20] sm:$0xff] }
  0x65   :  { %12393 = vst [vmem:[#allocation40_spill] sm:$0xff] %v11357_v2  ;;  %12394 = vst [vmem:[#allocation41_spill] sm:$0xff] %v11362_v3  ;;  %v11372_v5 = vld [vmem:[%s12378_s13 + $0x28] sm:$0xff]  ;;  %v11377_v6 = vld [vmem:[%s12378_s13 + $0x30] sm:$0xff] }
  0x66   :  { %12395 = vst [vmem:[#allocation42_spill] sm:$0xff] %v11367_v4  ;;  %12396 = vst [vmem:[#allocation43_spill] sm:$0xff] %v11372_v5  ;;  %v11382_v7 = vld [vmem:[%s12378_s13 + $0x38] sm:$0xff] }
  0x67   :  { %12397 = vst [vmem:[#allocation44_spill] sm:$0xff] %v11377_v6  ;;  %12398 = vst [vmem:[#allocation45_spill] sm:$0xff] %v11382_v7 }
  0x68   :  { %331 = vsyncadd [#allocation11 + $0x6], 1024  ;;  %v10118_v8 = vld [vmem:[#allocation12 + $0x4] ss:$16 sps:$4 sm:$0xff]   ;;  %v10120_v9 = vld [vmem:[#allocation12] ss:$16 sps:$4 sm:$0xff]   ;;  %v374_v45 = vlaneseq }
  0x69   :  { %v12381_v10 = vmov 0   ;;  %v10121_v11 = vld [vmem:[#allocation12 + $0x24] ss:$16 sps:$4 sm:$0xff]   ;;  %578 = vmatprep.subr.bf16.mxu1 %v10118_v8  ;;  %v10123_v12 = vld [vmem:[#allocation12 + $0x20] ss:$16 sps:$4 sm:$0xff]   ;;  %v10149_v31 = vld [vmem:[%s12365_s0 + $0x8] sm:$0xff]  }
  0x6a   :  { %610 = vmatprep.mubr.bf16.mxu1 %v12381_v10  ;;  %579 = vmatpush1.bf16.msra.mxu1 %v10120_v9  ;;  %v10124_v13 = vld [vmem:[#allocation12 + $0x44] ss:$16 sps:$4 sm:$0xff]   ;;  %v10126_v14 = vld [vmem:[#allocation12 + $0x40] ss:$16 sps:$4 sm:$0xff]   ;;  %v10145_v25 = vld [vmem:[#allocation12 + $0xc] ss:$16 sps:$4 sm:$0xff]  }
  0x6b   :  { %580 = vmatprep.subr.bf16.mxu1 %v10121_v11  ;;  %v10127_v15 = vld [vmem:[#allocation12 + $0x64] ss:$16 sps:$4 sm:$0xff]   ;;  %v10129_v16 = vld [vmem:[#allocation12 + $0x60] ss:$16 sps:$4 sm:$0xff]   ;;  %v10143_v27 = vld [vmem:[#allocation12 + $0x8] ss:$16 sps:$4 sm:$0xff]  }
  0x6c   :  { %v10130_v17 = vld [vmem:[#allocation12 + $0x84] ss:$16 sps:$4 sm:$0xff]   ;;  %v10132_v18 = vld [vmem:[#allocation12 + $0x80] ss:$16 sps:$4 sm:$0xff]   ;;  %v10148_v28 = vld [vmem:[#allocation12 + $0x2c] ss:$16 sps:$4 sm:$0xff]  }
  0x6d   :  { %v10133_v19 = vld [vmem:[#allocation12 + $0xa4] ss:$16 sps:$4 sm:$0xff]   ;;  %v10135_v20 = vld [vmem:[#allocation12 + $0xa0] ss:$16 sps:$4 sm:$0xff]   ;;  %v10146_v29 = vld [vmem:[#allocation12 + $0x28] ss:$16 sps:$4 sm:$0xff]  }
  0x6e   :  { %581 = vmatpush1.bf16.msra.mxu1 %v10123_v12  ;;  %v10136_v21 = vld [vmem:[#allocation12 + $0xc4] ss:$16 sps:$4 sm:$0xff]   ;;  %v10138_v22 = vld [vmem:[#allocation12 + $0xc0] ss:$16 sps:$4 sm:$0xff]   ;;  %v10152_v30 = vld [vmem:[#allocation12 + $0x4c] ss:$16 sps:$4 sm:$0xff]  }
  0x6f   :  { %582 = vmatprep.subr.bf16.mxu1 %v10124_v13  ;;  %v10139_v23 = vld [vmem:[#allocation12 + $0xe4] ss:$16 sps:$4 sm:$0xff]   ;;  %v10141_v24 = vld [vmem:[#allocation12 + $0xe0] ss:$16 sps:$4 sm:$0xff]   ;;  %v10150_v32 = vld [vmem:[#allocation12 + $0x48] ss:$16 sps:$4 sm:$0xff]  }
  0x70   :  { %v10142_v26 = vld [vmem:[%s12365_s0] sm:$0xff]   ;;  %v10155_v33 = vld [vmem:[#allocation12 + $0x6c] ss:$16 sps:$4 sm:$0xff]   ;;  %v10153_v34 = vld [vmem:[#allocation12 + $0x68] ss:$16 sps:$4 sm:$0xff]   ;;  %v375_v46 = vshrl.u32 %v374_v45, 7 }
  0x71   :  { %v10159_v35 = vld [vmem:[#allocation12 + $0x8c] ss:$16 sps:$4 sm:$0xff]   ;;  %v10156_v36 = vld [vmem:[%s12365_s0 + $0x10] sm:$0xff]   ;;  %v10157_v37 = vld [vmem:[#allocation12 + $0x88] ss:$16 sps:$4 sm:$0xff]  }
  0x72   :  { %583 = vmatpush1.bf16.msra.mxu1 %v10126_v14  ;;  %v10162_v38 = vld [vmem:[#allocation12 + $0xac] ss:$16 sps:$4 sm:$0xff]   ;;  %v10160_v39 = vld [vmem:[#allocation12 + $0xa8] ss:$16 sps:$4 sm:$0xff]   ;;  %v376_v47 = vsub.s32 0, %v375_v46  ;;  %v380_v48 = vsub.s32 1, %v375_v46 }
  0x73   :  { %584 = vmatprep.subr.bf16.mxu1 %v10127_v15  ;;  %v10166_v40 = vld [vmem:[#allocation12 + $0xcc] ss:$16 sps:$4 sm:$0xff]   ;;  %v10164_v42 = vld [vmem:[#allocation12 + $0xc8] ss:$16 sps:$4 sm:$0xff]   ;;  %v756_v49 = vld [vmem:[%s12371_s6] sm:$0xf] }
  0x74   :  { %v10163_v41 = vld [vmem:[%s12365_s0 + $0x18] sm:$0xff]   ;;  %v778_v50 = vld [vmem:[%s12374_s9] sm:$0xf]  ;;  %v11413_v52 = vrot.slane %v756_v49, %v376_v47  ;;  %v11419_v55 = vrot.slane %v756_v49, %v380_v48  ;;  %v384_v58 = vsub.s32 2, %v375_v46  ;;  %v388_v59 = vsub.s32 3, %v375_v46 }
  0x75   :  { %v10169_v43 = vld [vmem:[#allocation12 + $0xec] ss:$16 sps:$4 sm:$0xff]   ;;  %v10167_v44 = vld [vmem:[#allocation12 + $0xe8] ss:$16 sps:$4 sm:$0xff]   ;;  %v800_v51 = vld [vmem:[%s12377_s12] sm:$0xf]  ;;  %v11415_v53 = vrot.slane %v778_v50, %v376_v47  ;;  %v11421_v56 = vrot.slane %v778_v50, %v380_v48 }
  0x76   :  { %585 = vmatpush1.bf16.msra.mxu1 %v10129_v16  ;;  %v11417_v54 = vrot.slane %v800_v51, %v376_v47  ;;  %v11423_v57 = vrot.slane %v800_v51, %v380_v48  ;;  %v11425_v60 = vrot.slane %v756_v49, %v384_v58  ;;  %v11427_v61 = vrot.slane %v778_v50, %v384_v58  ;;  %v372_v11 = vld [vmem:[%s12368_s3] sm:$0xf] }
  0x77   :  { %586 = vmatprep.subr.bf16.mxu1 %v10130_v17  ;;  %v11429_v62 = vrot.slane %v800_v51, %v384_v58  ;;  %v11431_v63 = vrot.slane %v756_v49, %v388_v59  ;;  %v11433_v8 = vrot.slane %v778_v50, %v388_v59  ;;  %v11435_v9 = vrot.slane %v800_v51, %v388_v59 }
  0x78   :  { %v377_v12 = vrot.slane %v372_v11, %v376_v47  ;;  %v381_v13 = vrot.slane %v372_v11, %v380_v48  ;;  %v385_v46 = vrot.slane %v372_v11, %v384_v58  ;;  %v389_v47 = vrot.slane %v372_v11, %v388_v59 }
  0x7a   :  { %587 = vmatpush1.bf16.msra.mxu1 %v10132_v18 }
  0x7b   :  { %588 = vmatprep.subr.bf16.mxu1 %v10133_v19 }
  0x7e   :  { %589 = vmatpush1.bf16.msra.mxu1 %v10135_v20 }
  0x7f   :  { %590 = vmatprep.subr.bf16.mxu1 %v10136_v21 }
  0x82   :  { %591 = vmatpush1.bf16.msra.mxu1 %v10138_v22 }
  0x83   :  { %592 = vmatprep.subr.bf16.mxu1 %v10139_v23 }
  0x86   :  { %593 = vmatpush1.bf16.msra.mxu1 %v10141_v24 }
  0x87   :  { %651 = vmatprep.subr.bf16.mxu1 %v10145_v25 }
  0x89   :  { %611 = vmatmul.mubr.bf16.vlgmr.msra.gmra.mrb[0].mxu1 %v10142_v26 }
  0x8a   :  { %652 = vmatpush1.bf16.msra.mxu1 %v10143_v27  ;;  %620 = vmatprep.mubr.bf16.mxu1 %v12381_v10 }
  0x8b   :  { %653 = vmatprep.subr.bf16.mxu1 %v10148_v28 }
  0x8e   :  { %654 = vmatpush1.bf16.msra.mxu1 %v10146_v29 }
  0x8f   :  { %655 = vmatprep.subr.bf16.mxu1 %v10152_v30 }
  0x91   :  { %621 = vmatmul.mubr.bf16.gmra.mrb[4].mxu1 %v10149_v31 }
  0x92   :  { %656 = vmatpush1.bf16.msra.mxu1 %v10150_v32  ;;  %630 = vmatprep.mubr.bf16.mxu1 %v12381_v10 }
  0x93   :  { %657 = vmatprep.subr.bf16.mxu1 %v10155_v33 }
  0x96   :  { %658 = vmatpush1.bf16.msra.mxu1 %v10153_v34 }
  0x97   :  { %659 = vmatprep.subr.bf16.mxu1 %v10159_v35 }
  0x99   :  { %631 = vmatmul.mubr.bf16.gmra.mrb[8].mxu1 %v10156_v36 }
  0x9a   :  { %660 = vmatpush1.bf16.msra.mxu1 %v10157_v37  ;;  %640 = vmatprep.mubr.bf16.mxu1 %v12381_v10 }
  0x9b   :  { %661 = vmatprep.subr.bf16.mxu1 %v10162_v38 }
  0x9e   :  { %662 = vmatpush1.bf16.msra.mxu1 %v10160_v39 }
  0x9f   :  { %663 = vmatprep.subr.bf16.mxu1 %v10166_v40 }
  0xa1   :  { %641 = vmatmul.mubr.bf16.gmra.mrb[12].mxu1 %v10163_v41 }
  0xa2   :  { %664 = vmatpush1.bf16.msra.mxu1 %v10164_v42  ;;  %683 = vmatprep.mubr.bf16.mxu1 %v12381_v10 }
  0xa3   :  { %665 = vmatprep.subr.bf16.mxu1 %v10169_v43 }
  0xa6   :  { %666 = vmatpush1.bf16.msra.mxu1 %v10167_v44 }
  0xa9   :  { %684 = vmatmul.mubr.bf16.vlgmr.msra.gmra.mrb[16].mxu1 %v10142_v26 }
  0xaa   :  { %693 = vmatprep.mubr.bf16.mxu1 %v12381_v10 }
  0xb1   :  { %694 = vmatmul.mubr.bf16.gmra.mrb[20].mxu1 %v10149_v31 }
  0xb2   :  { %703 = vmatprep.mubr.bf16.mxu1 %v12381_v10 }
  0xb9   :  { %704 = vmatmul.mubr.bf16.gmra.mrb[24].mxu1 %v10156_v36 }
  0xba   :  { %713 = vmatprep.mubr.bf16.mxu1 %v12381_v10 }
  0xc1   :  { %714 = vmatmul.mubr.bf16.gmra.mrb[28].mxu1 %v10163_v41 }
 0x15c   :  { %v612_v14 = vpop.f32.mrb[0].mxu1 }
 0x15d   :  { %v11440_v15 = vadd.f32 %v612_v14, %v377_v12  ;;  %v614_v16 = vpop.f32.mrb[1].mxu1 }
 0x15e   :  { %v11442_v17 = vadd.f32 %v614_v16, %v381_v13  ;;  %v616_v18 = vpop.f32.mrb[2].mxu1 }
 0x15f   :  { %v11444_v19 = vadd.f32 %v616_v18, %v377_v12  ;;  %v618_v20 = vpop.f32.mrb[3].mxu1 }
 0x160   :  { %v11446_v21 = vadd.f32 %v618_v20, %v381_v13 }
 0x164   :  { %v622_v22 = vpop.f32.mrb[4].mxu1 }
 0x165   :  { %v11448_v23 = vadd.f32 %v622_v22, %v377_v12  ;;  %v624_v24 = vpop.f32.mrb[5].mxu1 }
 0x166   :  { %v11450_v25 = vadd.f32 %v624_v24, %v381_v13  ;;  %v626_v26 = vpop.f32.mrb[6].mxu1 }
 0x167   :  { %v11452_v27 = vadd.f32 %v626_v26, %v377_v12  ;;  %v628_v28 = vpop.f32.mrb[7].mxu1 }
 0x168   :  { %v11454_v29 = vadd.f32 %v628_v28, %v381_v13 }
 0x16c   :  { %v632_v30 = vpop.f32.mrb[8].mxu1 }
 0x16d   :  { %v11456_v31 = vadd.f32 %v632_v30, %v377_v12  ;;  %v634_v32 = vpop.f32.mrb[9].mxu1 }
 0x16e   :  { %v11458_v33 = vadd.f32 %v634_v32, %v381_v13  ;;  %v636_v34 = vpop.f32.mrb[10].mxu1 }
 0x16f   :  { %v11460_v35 = vadd.f32 %v636_v34, %v377_v12  ;;  %v638_v36 = vpop.f32.mrb[11].mxu1 }
 0x170   :  { %v11462_v37 = vadd.f32 %v638_v36, %v381_v13 }
 0x174   :  { %v642_v38 = vpop.f32.mrb[12].mxu1 }
 0x175   :  { %v11464_v39 = vadd.f32 %v642_v38, %v377_v12  ;;  %v644_v40 = vpop.f32.mrb[13].mxu1 }
 0x176   :  { %v11466_v41 = vadd.f32 %v644_v40, %v381_v13  ;;  %v646_v42 = vpop.f32.mrb[14].mxu1 }
 0x177   :  { %v11468_v43 = vadd.f32 %v646_v42, %v377_v12  ;;  %v648_v44 = vpop.f32.mrb[15].mxu1 }
 0x178   :  { %v11470_v45 = vadd.f32 %v648_v44, %v381_v13 }
 0x17c   :  { %v685_v48 = vpop.f32.mrb[16].mxu1 }
 0x17d   :  { %v11472_v49 = vadd.f32 %v685_v48, %v385_v46  ;;  %v687_v50 = vpop.f32.mrb[17].mxu1 }
 0x17e   :  { %v11474_v51 = vadd.f32 %v687_v50, %v389_v47  ;;  %v689_v14 = vpop.f32.mrb[18].mxu1 }
 0x17f   :  { %v11476_v16 = vadd.f32 %v689_v14, %v385_v46  ;;  %v691_v18 = vpop.f32.mrb[19].mxu1 }
 0x180   :  { %v11478_v20 = vadd.f32 %v691_v18, %v389_v47 }
 0x184   :  { %v695_v22 = vpop.f32.mrb[20].mxu1 }
 0x185   :  { %v11480_v12 = vadd.f32 %v695_v22, %v385_v46  ;;  %v697_v24 = vpop.f32.mrb[21].mxu1 }
 0x186   :  { %v11482_v13 = vadd.f32 %v697_v24, %v389_v47  ;;  %v699_v58 = vpop.f32.mrb[22].mxu1 }
 0x187   :  { %v11484_v59 = vadd.f32 %v699_v58, %v385_v46  ;;  %v701_v11 = vpop.f32.mrb[23].mxu1 }
 0x188   :  { %v11486_v26 = vadd.f32 %v701_v11, %v389_v47 }
 0x18c   :  { %v705_v28 = vpop.f32.mrb[24].mxu1 }
 0x18d   :  { %v11488_v30 = vadd.f32 %v705_v28, %v385_v46  ;;  %v707_v32 = vpop.f32.mrb[25].mxu1 }
 0x18e   :  { %v11490_v34 = vadd.f32 %v707_v32, %v389_v47  ;;  %v709_v36 = vpop.f32.mrb[26].mxu1 }
 0x18f   :  { %v11492_v38 = vadd.f32 %v709_v36, %v385_v46  ;;  %v711_v40 = vpop.f32.mrb[27].mxu1 }
 0x190   :  { %v11494_v42 = vadd.f32 %v711_v40, %v389_v47 }
 0x194   :  { %v715_v44 = vpop.f32.mrb[28].mxu1 }
 0x195   :  { %v11496_v48 = vadd.f32 %v715_v44, %v385_v46  ;;  %v717_v50 = vpop.f32.mrb[29].mxu1 }
 0x196   :  { %v11498_v14 = vadd.f32 %v717_v50, %v389_v47  ;;  %v719_v18 = vpop.f32.mrb[30].mxu1 }
 0x197   :  { %v11500_v22 = vadd.f32 %v719_v18, %v385_v46  ;;  %v721_v24 = vpop.f32.mrb[31].mxu1 }
 0x198   :  { %v11502_v58 = vadd.f32 %v721_v24, %v389_v47 }
 0x199   :  { %12399 = vst [vmem:[#allocation46_spill] sm:$0xff] %v11500_v22 }
 0x19a   :  { %11114 = dma.done.wait [#allocation11], 4096 }
 0x19b   :  { %11115 = vsyncadd [#allocation11], 4294963200 }
 0x19c   :  { %11116 = dma.done.wait [#allocation11 + $0x1], 4096 }
 0x19d   :  { %11117 = vsyncadd [#allocation11 + $0x1], 4294963200 }
 0x19e   :  { %11118 = dma.done.wait [#allocation11 + $0x2], 4096 }
 0x19f   :  { %11119 = vsyncadd [#allocation11 + $0x2], 4294963200 }
 0x1a0   :  { %11120 = dma.done.wait [#allocation11 + $0x3], 4096 }
 0x1a1   :  { %11121 = vsyncadd [#allocation11 + $0x3], 4294963200 }
 0x1a2   :  { %11122 = dma.done.wait [#allocation11 + $0x4], 4096 }
 0x1a3   :  { %11123 = vsyncadd [#allocation11 + $0x4], 4294963200 }
 0x1a4   :  { %11124 = dma.done.wait [#allocation11 + $0x5], 4096 }
 0x1a5   :  { %11125 = vsyncadd [#allocation11 + $0x5], 4294963200  ;;  %1064 = vmatprep.mubr.bf16.mxu0 %v12381_v10  ;;  %1105 = vmatprep.mubr.bf16.mxu1 %v12381_v10  ;;  %v10170_v46 = vld [vmem:[#allocation14 + $0x4] ss:$16 sps:$4 sm:$0xff]   ;;  %v10172_v11 = vld [vmem:[#allocation14] ss:$16 sps:$4 sm:$0xff]  }
 0x1a6   :  { %1032 = vmatprep.subr.bf16.mxu0 %v10170_v46  ;;  %v10173_v47 = vld [vmem:[#allocation14 + $0x24] ss:$16 sps:$4 sm:$0xff]   ;;  %v10175_v28 = vld [vmem:[#allocation14 + $0x20] ss:$16 sps:$4 sm:$0xff]   ;;  %v10181_v36 = vld [vmem:[#allocation14 + $0xc] ss:$16 sps:$4 sm:$0xff]  }
 0x1a7   :  { %1033 = vmatpush1.bf16.msra.mxu0 %v10172_v11  ;;  %v10176_v32 = vld [vmem:[#allocation14 + $0x44] ss:$16 sps:$4 sm:$0xff]   ;;  %v10184_v40 = vld [vmem:[#allocation14 + $0x8] ss:$16 sps:$4 sm:$0xff]   ;;  %v10178_v44 = vld [vmem:[#allocation14 + $0x40] ss:$16 sps:$4 sm:$0xff]   ;;  %1073 = vmatprep.subr.bf16.mxu1 %v10181_v36 }
 0x1a8   :  { %1034 = vmatprep.subr.bf16.mxu0 %v10173_v47  ;;  %v10179_v50 = vld [vmem:[#allocation14 + $0x64] ss:$16 sps:$4 sm:$0xff]   ;;  %1074 = vmatpush1.bf16.msra.mxu1 %v10184_v40  ;;  %v10187_v18 = vld [vmem:[#allocation14 + $0x2c] ss:$16 sps:$4 sm:$0xff]   ;;  %v10190_v24 = vld [vmem:[#allocation14 + $0x28] ss:$16 sps:$4 sm:$0xff]  }
 0x1a9   :  { %1075 = vmatprep.subr.bf16.mxu1 %v10187_v18  ;;  %v10183_v10 = vld [vmem:[#allocation14 + $0x60] ss:$16 sps:$4 sm:$0xff]   ;;  %v10185_v7 = vld [vmem:[#allocation14 + $0x84] ss:$16 sps:$4 sm:$0xff]   ;;  %v10193_v46 = vld [vmem:[#allocation14 + $0x4c] ss:$16 sps:$4 sm:$0xff]  }
 0x1aa   :  { %v10196_v11 = vld [vmem:[#allocation14 + $0x48] ss:$16 sps:$4 sm:$0xff]   ;;  %v10199_v47 = vld [vmem:[#allocation14 + $0x6c] ss:$16 sps:$4 sm:$0xff]   ;;  %v10189_v6 = vld [vmem:[#allocation14 + $0x80] ss:$16 sps:$4 sm:$0xff]  }
 0x1ab   :  { %1035 = vmatpush1.bf16.msra.mxu0 %v10175_v28  ;;  %v10191_v28 = vld [vmem:[#allocation14 + $0xa4] ss:$16 sps:$4 sm:$0xff]   ;;  %v10205_v36 = vld [vmem:[#allocation14 + $0x8c] ss:$16 sps:$4 sm:$0xff]   ;;  %v10195_v40 = vld [vmem:[#allocation14 + $0xa0] ss:$16 sps:$4 sm:$0xff]  }
 0x1ac   :  { %1036 = vmatprep.subr.bf16.mxu0 %v10176_v32  ;;  %1076 = vmatpush1.bf16.msra.mxu1 %v10190_v24  ;;  %v10202_v32 = vld [vmem:[#allocation14 + $0x68] ss:$16 sps:$4 sm:$0xff]   ;;  %v10197_v18 = vld [vmem:[#allocation14 + $0xc4] ss:$16 sps:$4 sm:$0xff]   ;;  %v10201_v24 = vld [vmem:[#allocation14 + $0xc0] ss:$16 sps:$4 sm:$0xff]  }
 0x1ad   :  { %1077 = vmatprep.subr.bf16.mxu1 %v10193_v46  ;;  %v10203_v46 = vld [vmem:[#allocation14 + $0xe4] ss:$16 sps:$4 sm:$0xff]   ;;  %v10214_v5 = vld [vmem:[#allocation14 + $0xc8] ss:$16 sps:$4 sm:$0xff]  }
 0x1ae   :  { %v1184_v4 = vld [vmem:[#allocation5 + $0x48] sm:$0xff] }
 0x1af   :  { %1037 = vmatpush1.bf16.msra.mxu0 %v10178_v44  ;;  %v10208_v44 = vld [vmem:[#allocation14 + $0x88] ss:$16 sps:$4 sm:$0xff]  }
 0x1b0   :  { %1038 = vmatprep.subr.bf16.mxu0 %v10179_v50  ;;  %1078 = vmatpush1.bf16.msra.mxu1 %v10196_v11  ;;  %v10209_v50 = vld [vmem:[#allocation14 + $0xac] ss:$16 sps:$4 sm:$0xff]   ;;  %v10207_v11 = vld [vmem:[#allocation14 + $0xe0] ss:$16 sps:$4 sm:$0xff]  }
 0x1b1   :  { %1079 = vmatprep.subr.bf16.mxu1 %v10199_v47  ;;  %v10215_v47 = vld [vmem:[#allocation14 + $0xec] ss:$16 sps:$4 sm:$0xff]  }
 0x1b3   :  { %1039 = vmatpush1.bf16.msra.mxu0 %v10183_v10  ;;  %v10211_v10 = vld [vmem:[#allocation14 + $0xa8] ss:$16 sps:$4 sm:$0xff]  }
 0x1b4   :  { %1040 = vmatprep.subr.bf16.mxu0 %v10185_v7  ;;  %1080 = vmatpush1.bf16.msra.mxu1 %v10202_v32  ;;  %v10212_v7 = vld [vmem:[#allocation14 + $0xcc] ss:$16 sps:$4 sm:$0xff]   ;;  %v1175_v32 = vld [vmem:[#allocation5] sm:$0xff] }
 0x1b5   :  { %1081 = vmatprep.subr.bf16.mxu1 %v10205_v36  ;;  %v1180_v36 = vld [vmem:[#allocation5 + $0x28] sm:$0xff] }
 0x1b7   :  { %1041 = vmatpush1.bf16.msra.mxu0 %v10189_v6  ;;  %v1176_v6 = vld [vmem:[#allocation5 + $0x8] sm:$0xff] }
 0x1b8   :  { %1042 = vmatprep.subr.bf16.mxu0 %v10191_v28  ;;  %1082 = vmatpush1.bf16.msra.mxu1 %v10208_v44  ;;  %v10217_v28 = vld [vmem:[#allocation14 + $0xe8] ss:$16 sps:$4 sm:$0xff]   ;;  %v1179_v44 = vld [vmem:[#allocation5 + $0x20] sm:$0xff] }
 0x1b9   :  { %1083 = vmatprep.subr.bf16.mxu1 %v10209_v50  ;;  %v1177_v50 = vld [vmem:[#allocation5 + $0x10] sm:$0xff] }
 0x1bb   :  { %1043 = vmatpush1.bf16.msra.mxu0 %v10195_v40  ;;  %v1178_v40 = vld [vmem:[#allocation5 + $0x18] sm:$0xff] }
 0x1bc   :  { %1044 = vmatprep.subr.bf16.mxu0 %v10197_v18  ;;  %1084 = vmatpush1.bf16.msra.mxu1 %v10211_v10  ;;  %v12400_v18 = vmov 0   ;;  %v1188_v10 = vld [vmem:[#allocation5 + $0x68] sm:$0xff] }
 0x1bd   :  { %1085 = vmatprep.subr.bf16.mxu1 %v10212_v7  ;;  %v1186_v7 = vld [vmem:[#allocation5 + $0x58] sm:$0xff] }
 0x1bf   :  { %1045 = vmatpush1.bf16.msra.mxu0 %v10201_v24  ;;  %v1182_v24 = vld [vmem:[#allocation5 + $0x38] sm:$0xff] }
 0x1c0   :  { %1046 = vmatprep.subr.bf16.mxu0 %v10203_v46  ;;  %1086 = vmatpush1.bf16.msra.mxu1 %v10214_v5  ;;  %v1183_v46 = vld [vmem:[#allocation5 + $0x40] sm:$0xff]  ;;  %v1181_v5 = vld [vmem:[#allocation5 + $0x30] sm:$0xff] }
 0x1c1   :  { %1087 = vmatprep.subr.bf16.mxu1 %v10215_v47  ;;  %v1185_v47 = vld [vmem:[#allocation5 + $0x50] sm:$0xff] }
 0x1c3   :  { %1047 = vmatpush1.bf16.msra.mxu0 %v10207_v11  ;;  %v1187_v11 = vld [vmem:[#allocation5 + $0x60] sm:$0xff] }
 0x1c4   :  { %1207 = vmatprep.subr.bf16.mxu0 %v1176_v6  ;;  %1088 = vmatpush1.bf16.msra.mxu1 %v10217_v28  ;;  %v1192_v6 = vld [vmem:[#allocation5 + $0x88] sm:$0xff]  ;;  %v1190_v28 = vld [vmem:[#allocation5 + $0x78] sm:$0xff] }
 0x1c5   :  { %1248 = vmatprep.subr.bf16.mxu1 %v1178_v40  ;;  %v1193_v40 = vld [vmem:[#allocation5 + $0x90] sm:$0xff] }
 0x1c6   :  { %1065 = vmatmul.mubr.bf16.vlgmr.msra.gmra.mrb[0].mxu0 %v12400_v18 }
 0x1c7   :  { %1208 = vmatpush1.bf16.msra.mxu0 %v1175_v32  ;;  %1239 = vmatprep.mubr.bf16.mxu0 %v12400_v18  ;;  %v1189_v32 = vld [vmem:[#allocation5 + $0x70] sm:$0xff] }
 0x1c8   :  { %1209 = vmatprep.subr.bf16.mxu0 %v1180_v36  ;;  %1106 = vmatmul.mubr.bf16.vlgmr.msra.gmra.mrb[32].mxu1 %v12400_v18  ;;  %v1191_v36 = vld [vmem:[#allocation5 + $0x80] sm:$0xff] }
 0x1c9   :  { %1249 = vmatpush1.bf16.msra.mxu1 %v1177_v50  ;;  %1280 = vmatprep.mubr.bf16.mxu1 %v12400_v18  ;;  %v1195_v50 = vld [vmem:[#allocation5 + $0xa0] sm:$0xff] }
 0x1ca   :  { %1250 = vmatprep.subr.bf16.mxu1 %v1182_v24  ;;  %v1198_v24 = vld [vmem:[#allocation5 + $0xb8] sm:$0xff] }
 0x1cb   :  { %1210 = vmatpush1.bf16.msra.mxu0 %v1179_v44  ;;  %v1196_v44 = vld [vmem:[#allocation5 + $0xa8] sm:$0xff] }
 0x1cc   :  { %1211 = vmatprep.subr.bf16.mxu0 %v1184_v4  ;;  %v1194_v4 = vld [vmem:[#allocation5 + $0x98] sm:$0xff] }
 0x1cd   :  { %1251 = vmatpush1.bf16.msra.mxu1 %v1181_v5  ;;  %v1200_v5 = vld [vmem:[#allocation5 + $0xc8] sm:$0xff] }
 0x1ce   :  { %1252 = vmatprep.subr.bf16.mxu1 %v1186_v7  ;;  %v1202_v7 = vld [vmem:[#allocation5 + $0xd8] sm:$0xff] }
 0x1cf   :  { %1212 = vmatpush1.bf16.msra.mxu0 %v1183_v46  ;;  %v1197_v46 = vld [vmem:[#allocation5 + $0xb0] sm:$0xff] }
 0x1d0   :  { %1213 = vmatprep.subr.bf16.mxu0 %v1188_v10  ;;  %v1199_v10 = vld [vmem:[#allocation5 + $0xc0] sm:$0xff] }
 0x1d1   :  { %1253 = vmatpush1.bf16.msra.mxu1 %v1185_v47  ;;  %v1204_v47 = vld [vmem:[#allocation5 + $0xe8] sm:$0xff] }
 0x1d2   :  { %1254 = vmatprep.subr.bf16.mxu1 %v1190_v28  ;;  %v1206_v28 = vld [vmem:[#allocation5 + $0xf8] sm:$0xff] }
 0x1d3   :  { %1214 = vmatpush1.bf16.msra.mxu0 %v1187_v11  ;;  %v1201_v11 = vld [vmem:[#allocation5 + $0xd0] sm:$0xff] }
 0x1d4   :  { %1215 = vmatprep.subr.bf16.mxu0 %v1192_v6  ;;  %v1203_v6 = vld [vmem:[#allocation5 + $0xe0] sm:$0xff] }
 0x1d5   :  { %1255 = vmatpush1.bf16.msra.mxu1 %v1189_v32  ;;  %v1205_v32 = vld [vmem:[#allocation5 + $0xf0] sm:$0xff] }
 0x1d6   :  { %1256 = vmatprep.subr.bf16.mxu1 %v1194_v4  ;;  %v1146_v4 = vld [vmem:[#allocation4 + $0x18] sm:$0xff] }
 0x1d7   :  { %1216 = vmatpush1.bf16.msra.mxu0 %v1191_v36  ;;  %v1144_v36 = vld [vmem:[#allocation4 + $0x8] sm:$0xff] }
 0x1d8   :  { %1217 = vmatprep.subr.bf16.mxu0 %v1196_v44  ;;  %v1145_v44 = vld [vmem:[#allocation4 + $0x10] sm:$0xff] }
 0x1d9   :  { %1257 = vmatpush1.bf16.msra.mxu1 %v1193_v40  ;;  %v1143_v40 = vld [vmem:[#allocation4] sm:$0xff] }
 0x1da   :  { %1258 = vmatprep.subr.bf16.mxu1 %v1198_v24  ;;  %v1150_v24 = vld [vmem:[#allocation4 + $0x38] sm:$0xff] }
 0x1db   :  { %1218 = vmatpush1.bf16.msra.mxu0 %v1195_v50  ;;  %v1148_v50 = vld [vmem:[#allocation4 + $0x28] sm:$0xff] }
 0x1dc   :  { %1219 = vmatprep.subr.bf16.mxu0 %v1200_v5  ;;  %v1149_v5 = vld [vmem:[#allocation4 + $0x30] sm:$0xff] }
 0x1dd   :  { %1259 = vmatpush1.bf16.msra.mxu1 %v1197_v46  ;;  %v1147_v46 = vld [vmem:[#allocation4 + $0x20] sm:$0xff] }
 0x1de   :  { %1260 = vmatprep.subr.bf16.mxu1 %v1202_v7  ;;  %v1154_v7 = vld [vmem:[#allocation4 + $0x58] sm:$0xff] }
 0x1df   :  { %1220 = vmatpush1.bf16.msra.mxu0 %v1199_v10  ;;  %v1152_v10 = vld [vmem:[#allocation4 + $0x48] sm:$0xff] }
 0x1e0   :  { %1221 = vmatprep.subr.bf16.mxu0 %v1204_v47  ;;  %v1153_v47 = vld [vmem:[#allocation4 + $0x50] sm:$0xff] }
 0x1e1   :  { %1261 = vmatpush1.bf16.msra.mxu1 %v1201_v11  ;;  %v1151_v11 = vld [vmem:[#allocation4 + $0x40] sm:$0xff] }
 0x1e2   :  { %1262 = vmatprep.subr.bf16.mxu1 %v1206_v28  ;;  %v1158_v28 = vld [vmem:[#allocation4 + $0x78] sm:$0xff] }
 0x1e3   :  { %1222 = vmatpush1.bf16.msra.mxu0 %v1203_v6  ;;  %v1156_v6 = vld [vmem:[#allocation4 + $0x68] sm:$0xff] }
 0x1e4   :  { %1289 = vmatprep.subr.bf16.mxu0 %v1144_v36  ;;  %v1157_v36 = vld [vmem:[#allocation4 + $0x70] sm:$0xff] }
 0x1e5   :  { %1263 = vmatpush1.bf16.msra.mxu1 %v1205_v32  ;;  %v1155_v32 = vld [vmem:[#allocation4 + $0x60] sm:$0xff] }
 0x1e6   :  { %1240 = vmatmul.mubr.bf16.vlgmr.msra.gmra.mrb[4].mxu0 %v12400_v18  ;;  %1330 = vmatprep.subr.bf16.mxu1 %v1146_v4  ;;  %v1160_v4 = vld [vmem:[#allocation4 + $0x88] sm:$0xff] }
 0x1e7   :  { %1321 = vmatprep.mubr.bf16.mxu0 %v12400_v18  ;;  %1290 = vmatpush1.bf16.msra.mxu0 %v1143_v40  ;;  %v1162_v40 = vld [vmem:[#allocation4 + $0x98] sm:$0xff] }
 0x1e8   :  { %1281 = vmatmul.mubr.bf16.vlgmr.msra.gmra.mrb[36].mxu1 %v12400_v18  ;;  %1291 = vmatprep.subr.bf16.mxu0 %v1148_v50  ;;  %v1161_v50 = vld [vmem:[#allocation4 + $0x90] sm:$0xff] }
 0x1e9   :  { %1331 = vmatpush1.bf16.msra.mxu1 %v1145_v44  ;;  %1362 = vmatprep.mubr.bf16.mxu1 %v12400_v18  ;;  %v1159_v44 = vld [vmem:[#allocation4 + $0x80] sm:$0xff] }
 0x1ea   :  { %1332 = vmatprep.subr.bf16.mxu1 %v1150_v24  ;;  %v1164_v24 = vld [vmem:[#allocation4 + $0xa8] sm:$0xff] }
 0x1eb   :  { %1292 = vmatpush1.bf16.msra.mxu0 %v1147_v46  ;;  %v1166_v46 = vld [vmem:[#allocation4 + $0xb8] sm:$0xff] }
 0x1ec   :  { %1293 = vmatprep.subr.bf16.mxu0 %v1152_v10  ;;  %v1165_v10 = vld [vmem:[#allocation4 + $0xb0] sm:$0xff] }
 0x1ed   :  { %1333 = vmatpush1.bf16.msra.mxu1 %v1149_v5  ;;  %v1163_v5 = vld [vmem:[#allocation4 + $0xa0] sm:$0xff] }
 0x1ee   :  { %1334 = vmatprep.subr.bf16.mxu1 %v1154_v7  ;;  %v1168_v7 = vld [vmem:[#allocation4 + $0xc8] sm:$0xff] }
 0x1ef   :  { %1294 = vmatpush1.bf16.msra.mxu0 %v1151_v11  ;;  %v1170_v11 = vld [vmem:[#allocation4 + $0xd8] sm:$0xff] }
 0x1f0   :  { %1295 = vmatprep.subr.bf16.mxu0 %v1156_v6  ;;  %v1169_v6 = vld [vmem:[#allocation4 + $0xd0] sm:$0xff] }
 0x1f1   :  { %1335 = vmatpush1.bf16.msra.mxu1 %v1153_v47  ;;  %v1167_v47 = vld [vmem:[#allocation4 + $0xc0] sm:$0xff] }
 0x1f2   :  { %1336 = vmatprep.subr.bf16.mxu1 %v1158_v28  ;;  %v1172_v28 = vld [vmem:[#allocation4 + $0xe8] sm:$0xff] }
 0x1f3   :  { %1296 = vmatpush1.bf16.msra.mxu0 %v1155_v32  ;;  %v1174_v32 = vld [vmem:[#allocation4 + $0xf8] sm:$0xff] }
 0x1f4   :  { %1297 = vmatprep.subr.bf16.mxu0 %v1160_v4  ;;  %v1173_v4 = vld [vmem:[#allocation4 + $0xf0] sm:$0xff] }
 0x1f5   :  { %1337 = vmatpush1.bf16.msra.mxu1 %v1157_v36  ;;  %v1171_v36 = vld [vmem:[#allocation4 + $0xe0] sm:$0xff] }
 0x1f6   :  { %1338 = vmatprep.subr.bf16.mxu1 %v1162_v40  ;;  %v1433_v40 = vld [vmem:[#allocation7 + $0x8] sm:$0xff] }
 0x1f7   :  { %1298 = vmatpush1.bf16.msra.mxu0 %v1159_v44  ;;  %v1435_v44 = vld [vmem:[#allocation7 + $0x18] sm:$0xff] }
 0x1f8   :  { %1299 = vmatprep.subr.bf16.mxu0 %v1164_v24 }
 0x1f9   :  { %1339 = vmatpush1.bf16.msra.mxu1 %v1161_v50 }
 0x1fa   :  { %1340 = vmatprep.subr.bf16.mxu1 %v1166_v46 }
 0x1fb   :  { %1300 = vmatpush1.bf16.msra.mxu0 %v1163_v5 }
 0x1fc   :  { %1301 = vmatprep.subr.bf16.mxu0 %v1168_v7 }
 0x1fd   :  { %1341 = vmatpush1.bf16.msra.mxu1 %v1165_v10 }
 0x1fe   :  { %1342 = vmatprep.subr.bf16.mxu1 %v1170_v11 }
 0x1ff   :  { %1302 = vmatpush1.bf16.msra.mxu0 %v1167_v47 }
 0x200   :  { %1303 = vmatprep.subr.bf16.mxu0 %v1172_v28 }
 0x201   :  { %1343 = vmatpush1.bf16.msra.mxu1 %v1169_v6 }
 0x202   :  { %1344 = vmatprep.subr.bf16.mxu1 %v1174_v32 }
 0x203   :  { %1304 = vmatpush1.bf16.msra.mxu0 %v1171_v36 }
 0x204   :  { %1464 = vmatprep.subr.bf16.mxu0 %v1433_v40 }
 0x205   :  { %1345 = vmatpush1.bf16.msra.mxu1 %v1173_v4 }
 0x206   :  { %1505 = vmatprep.subr.bf16.mxu1 %v1435_v44 }
 0x299   :  { %v1066_v50 = vpop.f32.mrb[0].mxu0 }
 0x29a   :  { %v1114_v24 = vadd.f32 %v1066_v50, %v11440_v15  ;;  %v1068_v46 = vpop.f32.mrb[1].mxu0 }
 0x29b   :  { %v1115_v5 = vadd.f32 %v1068_v46, %v11442_v17  ;;  %v1070_v10 = vpop.f32.mrb[2].mxu0  ;;  %v1107_v6 = vpop.f32.mrb[32].mxu1 }
 0x29c   :  { %v9726_v7 = vmul.f32 -1.442695, %v1114_v24  ;;  %v1071_v11 = vpop.f32.mrb[3].mxu0  ;;  %v1109_v28 = vpop.f32.mrb[33].mxu1  ;;  %v1116_v44 = vadd.f32 %v1107_v6, %v11472_v49 }
 0x29d   :  { %v9727_v47 = vmul.f32 -1.442695, %v1115_v5  ;;  %v1117_v32 = vadd.f32 %v1109_v28, %v11474_v51  ;;  %v1111_v36 = vpop.f32.mrb[34].mxu1 }
 0x29e   :  { %10554 = vpow2.f32 %v9726_v7  ;;  %v1112_v4 = vpop.f32.mrb[35].mxu1  ;;  %v1434_v36 = vld [vmem:[#allocation7 + $0x10] sm:$0xff] }
 0x29f   :  { %10556 = vpow2.f32 %v9727_v47  ;;  %v9728_v40 = vmul.f32 -1.442695, %v1117_v32  ;;  %v1432_v32 = vld [vmem:[#allocation7] sm:$0xff]  ;;  %v1437_v4 = vld [vmem:[#allocation7 + $0x28] sm:$0xff] }
 0x2a1   :  { %10558 = vpow2.f32 %v9728_v40  ;;  %v1439_v40 = vld [vmem:[#allocation7 + $0x38] sm:$0xff] }
 0x2a2   :  { %10560 = vtanh.f32 %v1116_v44  ;;  %v1436_v44 = vld [vmem:[#allocation7 + $0x20] sm:$0xff] }
 0x2a8   :  { %v10555_v3 = vpop.eup %10554 }
 0x2a9   :  { %v10557_v15 = vpop.eup %10556  ;;  %v1121_v50 = vadd.f32 1.0, %v10555_v3 }
 0x2aa   :  { %v1127_v17 = vadd.f32 1.0, %v10557_v15  ;;  %v1438_v15 = vld [vmem:[#allocation7 + $0x30] sm:$0xff] }
 0x2ab   :  { %10562 = vrcp.f32 %v1121_v50  ;;  %v10559_v24 = vpop.eup %10558  ;;  %v1441_v50 = vld [vmem:[#allocation7 + $0x48] sm:$0xff] }
 0x2ac   :  { %10564 = vrcp.f32 %v1127_v17  ;;  %v10561_v46 = vpop.eup %10560  ;;  %v1134_v10 = vadd.f32 1.0, %v10559_v24  ;;  %v1443_v17 = vld [vmem:[#allocation7 + $0x58] sm:$0xff]  ;;  %v1440_v24 = vld [vmem:[#allocation7 + $0x40] sm:$0xff] }
 0x2ae   :  { %10566 = vrcp.f32 %v1134_v10  ;;  %v1447_v10 = vld [vmem:[#allocation7 + $0x78] sm:$0xff] }
 0x2b5   :  { %v10563_v5 = vpop.eup %10562 }
 0x2b6   :  { %v10565_v7 = vpop.eup %10564  ;;  %v1138_v11 = vmul.f32 %v10563_v5, %v10561_v46  ;;  %v1442_v46 = vld [vmem:[#allocation7 + $0x50] sm:$0xff]  ;;  %v1445_v5 = vld [vmem:[#allocation7 + $0x68] sm:$0xff] }
 0x2b7   :  { %v1137_v51 = vmul.f32 0.0, %v10565_v7  ;;  %v1444_v7 = vld [vmem:[#allocation7 + $0x60] sm:$0xff] }
 0x2b8   :  { %v10567_v49 = vpop.eup %10566 }
 0x2b9   :  { %v11518_v47 = vadd.f32 %v1138_v11, %v1137_v51  ;;  %v11527_v11 = vpop.f32.mrb[4].mxu0 }
 0x2ba   :  { %v11529_v51 = vpop.f32.mrb[5].mxu0 }
 0x2bb   :  { %10568 = vtanh.f32 %v11518_v47 }
 0x2c5   :  { %v10569_v6 = vpop.eup %10568 }
 0x2c6   :  { %v1141_v28 = vmul.f32 %v10569_v6, %v10567_v49  ;;  %v1245_v49 = vpop.f32.mrb[6].mxu0 }
 0x2c7   :  { %v1246_v6 = vpop.f32.mrb[7].mxu0  ;;  %v1456_v49 = vld [vmem:[#allocation7 + $0xc0] sm:$0xff] }
 0x2c8   :  { %v11521_v3 = vpack.c.bf16 %v1141_v28, %v1141_v28  ;;  %v11531_v28 = vpop.f32.mrb[36].mxu1  ;;  %v1459_v6 = vld [vmem:[#allocation7 + $0xd8] sm:$0xff] }
 0x2ca   :  { %1322 = vmatmul.mubr.bf16.vlgmr.msra.gmra.mrb[8].mxu0 %v11521_v3  ;;  %1363 = vmatmul.mubr.bf16.vlgmr.msra.gmra.mrb[40].mxu1 %v11521_v3 }
 0x2cb   :  { %1465 = vmatpush1.bf16.msra.mxu0 %v1432_v32  ;;  %1506 = vmatpush1.bf16.msra.mxu1 %v1434_v36  ;;  %v11533_v32 = vpop.f32.mrb[37].mxu1 }
 0x2cc   :  { %1466 = vmatprep.subr.bf16.mxu0 %v1437_v4  ;;  %1507 = vmatprep.subr.bf16.mxu1 %v1439_v40  ;;  %v1286_v36 = vpop.f32.mrb[38].mxu1  ;;  %v1446_v40 = vld [vmem:[#allocation7 + $0x70] sm:$0xff] }
 0x2cd   :  { %1496 = vmatprep.mubr.bf16.mxu0 %v12400_v18  ;;  %1537 = vmatprep.mubr.bf16.mxu1 %v12400_v18  ;;  %v1287_v4 = vpop.f32.mrb[39].mxu1  ;;  %v1458_v36 = vld [vmem:[#allocation7 + $0xd0] sm:$0xff] }
 0x2ce   :  { %v1461_v4 = vld [vmem:[#allocation7 + $0xe8] sm:$0xff] }
 0x2cf   :  { %1467 = vmatpush1.bf16.msra.mxu0 %v1436_v44  ;;  %1508 = vmatpush1.bf16.msra.mxu1 %v1438_v15  ;;  %v1449_v44 = vld [vmem:[#allocation7 + $0x88] sm:$0xff]  ;;  %v1448_v15 = vld [vmem:[#allocation7 + $0x80] sm:$0xff] }
 0x2d0   :  { %1468 = vmatprep.subr.bf16.mxu0 %v1441_v50  ;;  %1509 = vmatprep.subr.bf16.mxu1 %v1443_v17  ;;  %v1451_v50 = vld [vmem:[#allocation7 + $0x98] sm:$0xff]  ;;  %v1450_v17 = vld [vmem:[#allocation7 + $0x90] sm:$0xff] }
 0x2d3   :  { %1469 = vmatpush1.bf16.msra.mxu0 %v1440_v24  ;;  %1510 = vmatpush1.bf16.msra.mxu1 %v1442_v46  ;;  %v1453_v24 = vld [vmem:[#allocation7 + $0xa8] sm:$0xff]  ;;  %v1452_v46 = vld [vmem:[#allocation7 + $0xa0] sm:$0xff] }
 0x2d4   :  { %1470 = vmatprep.subr.bf16.mxu0 %v1445_v5  ;;  %1511 = vmatprep.subr.bf16.mxu1 %v1447_v10  ;;  %v1455_v5 = vld [vmem:[#allocation7 + $0xb8] sm:$0xff]  ;;  %v1454_v10 = vld [vmem:[#allocation7 + $0xb0] sm:$0xff] }
 0x2d7   :  { %1471 = vmatpush1.bf16.msra.mxu0 %v1444_v7  ;;  %1512 = vmatpush1.bf16.msra.mxu1 %v1446_v40  ;;  %v1457_v7 = vld [vmem:[#allocation7 + $0xc8] sm:$0xff]  ;;  %v1460_v40 = vld [vmem:[#allocation7 + $0xe0] sm:$0xff] }
 0x2d8   :  { %1472 = vmatprep.subr.bf16.mxu0 %v1449_v44  ;;  %1513 = vmatprep.subr.bf16.mxu1 %v1451_v50  ;;  %v1463_v44 = vld [vmem:[#allocation7 + $0xf8] sm:$0xff]  ;;  %v1401_v50 = vld [vmem:[#allocation6 + $0x8] sm:$0xff] }
 0x2db   :  { %1473 = vmatpush1.bf16.msra.mxu0 %v1448_v15  ;;  %1514 = vmatpush1.bf16.msra.mxu1 %v1450_v17  ;;  %v1462_v15 = vld [vmem:[#allocation7 + $0xf0] sm:$0xff]  ;;  %v1403_v17 = vld [vmem:[#allocation6 + $0x18] sm:$0xff] }
 0x2dc   :  { %1474 = vmatprep.subr.bf16.mxu0 %v1453_v24  ;;  %1515 = vmatprep.subr.bf16.mxu1 %v1455_v5  ;;  %v1400_v24 = vld [vmem:[#allocation6] sm:$0xff]  ;;  %v1405_v5 = vld [vmem:[#allocation6 + $0x28] sm:$0xff] }
 0x2df   :  { %1475 = vmatpush1.bf16.msra.mxu0 %v1452_v46  ;;  %1516 = vmatpush1.bf16.msra.mxu1 %v1454_v10  ;;  %v1402_v46 = vld [vmem:[#allocation6 + $0x10] sm:$0xff]  ;;  %v1407_v10 = vld [vmem:[#allocation6 + $0x38] sm:$0xff] }
 0x2e0   :  { %1476 = vmatprep.subr.bf16.mxu0 %v1457_v7  ;;  %1517 = vmatprep.subr.bf16.mxu1 %v1459_v6  ;;  %v1404_v7 = vld [vmem:[#allocation6 + $0x20] sm:$0xff]  ;;  %v1409_v6 = vld [vmem:[#allocation6 + $0x48] sm:$0xff] }
 0x2e3   :  { %1477 = vmatpush1.bf16.msra.mxu0 %v1456_v49  ;;  %1518 = vmatpush1.bf16.msra.mxu1 %v1458_v36  ;;  %v1406_v49 = vld [vmem:[#allocation6 + $0x30] sm:$0xff]  ;;  %v1411_v36 = vld [vmem:[#allocation6 + $0x58] sm:$0xff] }
 0x2e4   :  { %1478 = vmatprep.subr.bf16.mxu0 %v1461_v4  ;;  %1519 = vmatprep.subr.bf16.mxu1 %v1463_v44  ;;  %v1408_v4 = vld [vmem:[#allocation6 + $0x40] sm:$0xff]  ;;  %v1413_v44 = vld [vmem:[#allocation6 + $0x68] sm:$0xff] }
 0x2e7   :  { %1479 = vmatpush1.bf16.msra.mxu0 %v1460_v40  ;;  %1520 = vmatpush1.bf16.msra.mxu1 %v1462_v15  ;;  %v1410_v40 = vld [vmem:[#allocation6 + $0x50] sm:$0xff]  ;;  %v1415_v15 = vld [vmem:[#allocation6 + $0x78] sm:$0xff] }
 0x2e8   :  { %1546 = vmatprep.subr.bf16.mxu0 %v1401_v50  ;;  %1587 = vmatprep.subr.bf16.mxu1 %v1403_v17  ;;  %v1412_v50 = vld [vmem:[#allocation6 + $0x60] sm:$0xff]  ;;  %v1414_v17 = vld [vmem:[#allocation6 + $0x70] sm:$0xff] }
 0x2ea   :  { %1497 = vmatmul.mubr.bf16.vlgmr.msra.gmra.mrb[12].mxu0 %v12400_v18  ;;  %1538 = vmatmul.mubr.bf16.vlgmr.msra.gmra.mrb[44].mxu1 %v12400_v18 }
 0x2eb   :  { %1578 = vmatprep.mubr.bf16.mxu0 %v12400_v18  ;;  %1547 = vmatpush1.bf16.msra.mxu0 %v1400_v24  ;;  %v1417_v24 = vld [vmem:[#allocation6 + $0x88] sm:$0xff] }
 0x2ec   :  { %1588 = vmatpush1.bf16.msra.mxu1 %v1402_v46  ;;  %1619 = vmatprep.mubr.bf16.mxu1 %v12400_v18  ;;  %v1419_v46 = vld [vmem:[#allocation6 + $0x98] sm:$0xff] }
 0x2ed   :  { %1548 = vmatprep.subr.bf16.mxu0 %v1405_v5  ;;  %1589 = vmatprep.subr.bf16.mxu1 %v1407_v10  ;;  %v1416_v5 = vld [vmem:[#allocation6 + $0x80] sm:$0xff]  ;;  %v1418_v10 = vld [vmem:[#allocation6 + $0x90] sm:$0xff] }
 0x2ef   :  { %1549 = vmatpush1.bf16.msra.mxu0 %v1404_v7  ;;  %v1421_v7 = vld [vmem:[#allocation6 + $0xa8] sm:$0xff] }
 0x2f0   :  { %1590 = vmatpush1.bf16.msra.mxu1 %v1406_v49  ;;  %1550 = vmatprep.subr.bf16.mxu0 %v1409_v6  ;;  %v1423_v49 = vld [vmem:[#allocation6 + $0xb8] sm:$0xff]  ;;  %v1420_v6 = vld [vmem:[#allocation6 + $0xa0] sm:$0xff] }
 0x2f1   :  { %1591 = vmatprep.subr.bf16.mxu1 %v1411_v36  ;;  %v1422_v36 = vld [vmem:[#allocation6 + $0xb0] sm:$0xff] }
 0x2f3   :  { %1551 = vmatpush1.bf16.msra.mxu0 %v1408_v4  ;;  %v1425_v4 = vld [vmem:[#allocation6 + $0xc8] sm:$0xff] }
 0x2f4   :  { %1592 = vmatpush1.bf16.msra.mxu1 %v1410_v40  ;;  %1552 = vmatprep.subr.bf16.mxu0 %v1413_v44  ;;  %v1427_v40 = vld [vmem:[#allocation6 + $0xd8] sm:$0xff]  ;;  %v1424_v44 = vld [vmem:[#allocation6 + $0xc0] sm:$0xff] }
 0x2f5   :  { %1593 = vmatprep.subr.bf16.mxu1 %v1415_v15  ;;  %v1426_v15 = vld [vmem:[#allocation6 + $0xd0] sm:$0xff] }
 0x2f7   :  { %1553 = vmatpush1.bf16.msra.mxu0 %v1412_v50  ;;  %v1429_v50 = vld [vmem:[#allocation6 + $0xe8] sm:$0xff] }
 0x2f8   :  { %1594 = vmatpush1.bf16.msra.mxu1 %v1414_v17  ;;  %1554 = vmatprep.subr.bf16.mxu0 %v1417_v24  ;;  %v1431_v17 = vld [vmem:[#allocation6 + $0xf8] sm:$0xff]  ;;  %v1428_v24 = vld [vmem:[#allocation6 + $0xe0] sm:$0xff] }
 0x2f9   :  { %1595 = vmatprep.subr.bf16.mxu1 %v1419_v46  ;;  %v1430_v46 = vld [vmem:[#allocation6 + $0xf0] sm:$0xff] }
 0x2fb   :  { %1555 = vmatpush1.bf16.msra.mxu0 %v1416_v5  ;;  %v1690_v5 = vld [vmem:[#allocation9 + $0x8] sm:$0xff] }
 0x2fc   :  { %1596 = vmatpush1.bf16.msra.mxu1 %v1418_v10  ;;  %1556 = vmatprep.subr.bf16.mxu0 %v1421_v7  ;;  %v1692_v10 = vld [vmem:[#allocation9 + $0x18] sm:$0xff] }
 0x2fd   :  { %1597 = vmatprep.subr.bf16.mxu1 %v1423_v49 }
 0x2ff   :  { %1557 = vmatpush1.bf16.msra.mxu0 %v1420_v6 }
 0x300   :  { %1598 = vmatpush1.bf16.msra.mxu1 %v1422_v36  ;;  %1558 = vmatprep.subr.bf16.mxu0 %v1425_v4 }
 0x301   :  { %1599 = vmatprep.subr.bf16.mxu1 %v1427_v40 }
 0x303   :  { %1559 = vmatpush1.bf16.msra.mxu0 %v1424_v44 }
 0x304   :  { %1600 = vmatpush1.bf16.msra.mxu1 %v1426_v15  ;;  %1560 = vmatprep.subr.bf16.mxu0 %v1429_v50 }
 0x305   :  { %1601 = vmatprep.subr.bf16.mxu1 %v1431_v17 }
 0x307   :  { %1561 = vmatpush1.bf16.msra.mxu0 %v1428_v24 }
 0x308   :  { %1602 = vmatpush1.bf16.msra.mxu1 %v1430_v46  ;;  %1721 = vmatprep.subr.bf16.mxu0 %v1690_v5 }
 0x309   :  { %1762 = vmatprep.subr.bf16.mxu1 %v1692_v10 }
 0x39d   :  { %v1323_v7 = vpop.f32.mrb[8].mxu0  ;;  %v1364_v49 = vpop.f32.mrb[40].mxu1 }
 0x39e   :  { %v1324_v6 = vadd.f32 %v1323_v7, %v11527_v11  ;;  %v1365_v36 = vadd.f32 %v1364_v49, %v11531_v28  ;;  %v1325_v4 = vpop.f32.mrb[9].mxu0  ;;  %v1366_v40 = vpop.f32.mrb[41].mxu1 }
 0x39f   :  { %v1326_v44 = vadd.f32 %v1325_v4, %v11529_v51  ;;  %v1367_v15 = vadd.f32 %v1366_v40, %v11533_v32  ;;  %v1327_v50 = vpop.f32.mrb[10].mxu0  ;;  %v1368_v17 = vpop.f32.mrb[42].mxu1 }
 0x3a0   :  { %v1371_v24 = vadd.f32 %v1324_v6, %v11413_v52  ;;  %v1328_v46 = vpop.f32.mrb[11].mxu0  ;;  %v1369_v2 = vpop.f32.mrb[43].mxu1  ;;  %v1373_v7 = vadd.f32 %v1365_v36, %v11425_v60 }
 0x3a1   :  { %v1372_v5 = vadd.f32 %v1326_v44, %v11419_v55  ;;  %v1374_v11 = vadd.f32 %v1367_v15, %v11431_v63 }
 0x3a2   :  { %v9729_v10 = vmul.f32 -1.442695, %v1371_v24 }
 0x3a3   :  { %v9730_v1 = vmul.f32 -1.442695, %v1372_v5  ;;  %v9731_v28 = vmul.f32 -1.442695, %v1374_v11  ;;  %v1691_v11 = vld [vmem:[#allocation9 + $0x10] sm:$0xff] }
 0x3a4   :  { %10570 = vpow2.f32 %v9729_v10  ;;  %v1689_v10 = vld [vmem:[#allocation9] sm:$0xff] }
 0x3a5   :  { %10572 = vpow2.f32 %v9730_v1 }
 0x3a6   :  { %10574 = vpow2.f32 %v9731_v28  ;;  %v1694_v28 = vld [vmem:[#allocation9 + $0x28] sm:$0xff] }
 0x3a7   :  { %10576 = vtanh.f32 %v1373_v7  ;;  %v1696_v7 = vld [vmem:[#allocation9 + $0x38] sm:$0xff] }
 0x3ae   :  { %v10571_v51 = vpop.eup %10570 }
 0x3af   :  { %v10573_v49 = vpop.eup %10572  ;;  %v1378_v32 = vadd.f32 1.0, %v10571_v51  ;;  %v1693_v51 = vld [vmem:[#allocation9 + $0x20] sm:$0xff] }
 0x3b0   :  { %v1384_v4 = vadd.f32 1.0, %v10573_v49  ;;  %v10575_v2 = vpop.eup %10574  ;;  %v1695_v49 = vld [vmem:[#allocation9 + $0x30] sm:$0xff] }
 0x3b1   :  { %10578 = vrcp.f32 %v1378_v32  ;;  %v10577_v6 = vpop.eup %10576  ;;  %v1391_v17 = vadd.f32 1.0, %v10575_v2  ;;  %v1698_v32 = vld [vmem:[#allocation9 + $0x48] sm:$0xff]  ;;  %v1697_v2 = vld [vmem:[#allocation9 + $0x40] sm:$0xff] }
 0x3b2   :  { %10580 = vrcp.f32 %v1384_v4  ;;  %v1700_v4 = vld [vmem:[#allocation9 + $0x58] sm:$0xff] }
 0x3b3   :  { %10582 = vrcp.f32 %v1391_v17  ;;  %v1703_v17 = vld [vmem:[#allocation9 + $0x70] sm:$0xff] }
 0x3bb   :  { %v10579_v40 = vpop.eup %10578 }
 0x3bc   :  { %v10581_v44 = vpop.eup %10580  ;;  %v1395_v50 = vmul.f32 %v10579_v40, %v10577_v6  ;;  %v1699_v6 = vld [vmem:[#allocation9 + $0x50] sm:$0xff]  ;;  %v1702_v40 = vld [vmem:[#allocation9 + $0x68] sm:$0xff] }
 0x3bd   :  { %v1394_v1 = vmul.f32 0.0, %v10581_v44  ;;  %v10583_v36 = vpop.eup %10582  ;;  %v1704_v44 = vld [vmem:[#allocation9 + $0x78] sm:$0xff] }
 0x3bf   :  { %v11547_v24 = vadd.f32 %v1395_v50, %v1394_v1  ;;  %v1701_v50 = vld [vmem:[#allocation9 + $0x60] sm:$0xff]  ;;  %v11556_v1 = vpop.f32.mrb[12].mxu0 }
 0x3c1   :  { %10584 = vtanh.f32 %v11547_v24 }
 0x3cb   :  { %v10585_v15 = vpop.eup %10584 }
 0x3cc   :  { %v1398_v46 = vmul.f32 %v10585_v15, %v10583_v36  ;;  %v11558_v36 = vpop.f32.mrb[13].mxu0 }
 0x3cd   :  { %v1502_v15 = vpop.f32.mrb[14].mxu0 }
 0x3ce   :  { %v11550_v5 = vpack.c.bf16 %v1398_v46, %v1398_v46  ;;  %v1503_v46 = vpop.f32.mrb[15].mxu0  ;;  %v1716_v15 = vld [vmem:[#allocation9 + $0xd8] sm:$0xff] }
 0x3cf   :  { %v1715_v46 = vld [vmem:[#allocation9 + $0xd0] sm:$0xff] }
 0x3d0   :  { %1579 = vmatmul.mubr.bf16.vlgmr.msra.gmra.mrb[16].mxu0 %v11550_v5  ;;  %1620 = vmatmul.mubr.bf16.vlgmr.msra.gmra.mrb[48].mxu1 %v11550_v5 }
 0x3d1   :  { %1722 = vmatpush1.bf16.msra.mxu0 %v1689_v10  ;;  %1763 = vmatpush1.bf16.msra.mxu1 %v1691_v11  ;;  %v11560_v10 = vpop.f32.mrb[44].mxu1 }
 0x3d2   :  { %1723 = vmatprep.subr.bf16.mxu0 %v1694_v28  ;;  %1764 = vmatprep.subr.bf16.mxu1 %v1696_v7  ;;  %v11562_v11 = vpop.f32.mrb[45].mxu1 }
 0x3d3   :  { %1753 = vmatprep.mubr.bf16.mxu0 %v12400_v18  ;;  %1794 = vmatprep.mubr.bf16.mxu1 %v12400_v18  ;;  %v1543_v28 = vpop.f32.mrb[46].mxu1 }
 0x3d4   :  { %v1544_v7 = vpop.f32.mrb[47].mxu1  ;;  %v1718_v28 = vld [vmem:[#allocation9 + $0xe8] sm:$0xff] }
 0x3d5   :  { %1724 = vmatpush1.bf16.msra.mxu0 %v1693_v51  ;;  %1765 = vmatpush1.bf16.msra.mxu1 %v1695_v49  ;;  %v1706_v51 = vld [vmem:[#allocation9 + $0x88] sm:$0xff]  ;;  %v1705_v49 = vld [vmem:[#allocation9 + $0x80] sm:$0xff] }
 0x3d6   :  { %1725 = vmatprep.subr.bf16.mxu0 %v1698_v32  ;;  %1766 = vmatprep.subr.bf16.mxu1 %v1700_v4  ;;  %v1708_v32 = vld [vmem:[#allocation9 + $0x98] sm:$0xff]  ;;  %v1707_v4 = vld [vmem:[#allocation9 + $0x90] sm:$0xff]  ;;  %v1717_v7 = vld [vmem:[#allocation9 + $0xe0] sm:$0xff] }
 0x3d9   :  { %1726 = vmatpush1.bf16.msra.mxu0 %v1697_v2  ;;  %1767 = vmatpush1.bf16.msra.mxu1 %v1699_v6  ;;  %v1710_v2 = vld [vmem:[#allocation9 + $0xa8] sm:$0xff]  ;;  %v1709_v6 = vld [vmem:[#allocation9 + $0xa0] sm:$0xff] }
 0x3da   :  { %1727 = vmatprep.subr.bf16.mxu0 %v1702_v40  ;;  %1768 = vmatprep.subr.bf16.mxu1 %v1704_v44  ;;  %v1712_v40 = vld [vmem:[#allocation9 + $0xb8] sm:$0xff]  ;;  %v1711_v44 = vld [vmem:[#allocation9 + $0xb0] sm:$0xff] }
 0x3dd   :  { %1728 = vmatpush1.bf16.msra.mxu0 %v1701_v50  ;;  %1769 = vmatpush1.bf16.msra.mxu1 %v1703_v17  ;;  %v1714_v50 = vld [vmem:[#allocation9 + $0xc8] sm:$0xff]  ;;  %v1713_v17 = vld [vmem:[#allocation9 + $0xc0] sm:$0xff] }
 0x3de   :  { %1729 = vmatprep.subr.bf16.mxu0 %v1706_v51  ;;  %1770 = vmatprep.subr.bf16.mxu1 %v1708_v32  ;;  %v1720_v51 = vld [vmem:[#allocation9 + $0xf8] sm:$0xff]  ;;  %v1658_v32 = vld [vmem:[#allocation8 + $0x8] sm:$0xff] }
 0x3e1   :  { %1730 = vmatpush1.bf16.msra.mxu0 %v1705_v49  ;;  %1771 = vmatpush1.bf16.msra.mxu1 %v1707_v4  ;;  %v1719_v49 = vld [vmem:[#allocation9 + $0xf0] sm:$0xff]  ;;  %v1660_v4 = vld [vmem:[#allocation8 + $0x18] sm:$0xff] }
 0x3e2   :  { %1731 = vmatprep.subr.bf16.mxu0 %v1710_v2  ;;  %1772 = vmatprep.subr.bf16.mxu1 %v1712_v40  ;;  %v1657_v2 = vld [vmem:[#allocation8] sm:$0xff]  ;;  %v1662_v40 = vld [vmem:[#allocation8 + $0x28] sm:$0xff] }
 0x3e5   :  { %1732 = vmatpush1.bf16.msra.mxu0 %v1709_v6  ;;  %1773 = vmatpush1.bf16.msra.mxu1 %v1711_v44  ;;  %v1659_v6 = vld [vmem:[#allocation8 + $0x10] sm:$0xff]  ;;  %v1664_v44 = vld [vmem:[#allocation8 + $0x38] sm:$0xff] }
 0x3e6   :  { %1733 = vmatprep.subr.bf16.mxu0 %v1714_v50  ;;  %1774 = vmatprep.subr.bf16.mxu1 %v1716_v15  ;;  %v1661_v50 = vld [vmem:[#allocation8 + $0x20] sm:$0xff]  ;;  %v1666_v15 = vld [vmem:[#allocation8 + $0x48] sm:$0xff] }
 0x3e9   :  { %1734 = vmatpush1.bf16.msra.mxu0 %v1713_v17  ;;  %1775 = vmatpush1.bf16.msra.mxu1 %v1715_v46  ;;  %v1663_v17 = vld [vmem:[#allocation8 + $0x30] sm:$0xff]  ;;  %v1668_v46 = vld [vmem:[#allocation8 + $0x58] sm:$0xff] }
 0x3ea   :  { %1735 = vmatprep.subr.bf16.mxu0 %v1718_v28  ;;  %1776 = vmatprep.subr.bf16.mxu1 %v1720_v51  ;;  %v1665_v28 = vld [vmem:[#allocation8 + $0x40] sm:$0xff]  ;;  %v1670_v51 = vld [vmem:[#allocation8 + $0x68] sm:$0xff] }
 0x3ed   :  { %1736 = vmatpush1.bf16.msra.mxu0 %v1717_v7  ;;  %1777 = vmatpush1.bf16.msra.mxu1 %v1719_v49  ;;  %v1667_v7 = vld [vmem:[#allocation8 + $0x50] sm:$0xff]  ;;  %v1672_v49 = vld [vmem:[#allocation8 + $0x78] sm:$0xff] }
 0x3ee   :  { %1803 = vmatprep.subr.bf16.mxu0 %v1658_v32  ;;  %1844 = vmatprep.subr.bf16.mxu1 %v1660_v4  ;;  %v1669_v32 = vld [vmem:[#allocation8 + $0x60] sm:$0xff]  ;;  %v1671_v4 = vld [vmem:[#allocation8 + $0x70] sm:$0xff] }
 0x3f0   :  { %1754 = vmatmul.mubr.bf16.vlgmr.msra.gmra.mrb[20].mxu0 %v12400_v18  ;;  %1795 = vmatmul.mubr.bf16.vlgmr.msra.gmra.mrb[52].mxu1 %v12400_v18 }
 0x3f1   :  { %1835 = vmatprep.mubr.bf16.mxu0 %v12400_v18  ;;  %1804 = vmatpush1.bf16.msra.mxu0 %v1657_v2  ;;  %v1674_v2 = vld [vmem:[#allocation8 + $0x88] sm:$0xff] }
 0x3f2   :  { %1845 = vmatpush1.bf16.msra.mxu1 %v1659_v6  ;;  %1876 = vmatprep.mubr.bf16.mxu1 %v12400_v18  ;;  %v1676_v6 = vld [vmem:[#allocation8 + $0x98] sm:$0xff] }
 0x3f3   :  { %1805 = vmatprep.subr.bf16.mxu0 %v1662_v40  ;;  %1846 = vmatprep.subr.bf16.mxu1 %v1664_v44  ;;  %v1673_v40 = vld [vmem:[#allocation8 + $0x80] sm:$0xff]  ;;  %v1675_v44 = vld [vmem:[#allocation8 + $0x90] sm:$0xff] }
 0x3f5   :  { %1806 = vmatpush1.bf16.msra.mxu0 %v1661_v50  ;;  %v1678_v50 = vld [vmem:[#allocation8 + $0xa8] sm:$0xff] }
 0x3f6   :  { %1847 = vmatpush1.bf16.msra.mxu1 %v1663_v17  ;;  %1807 = vmatprep.subr.bf16.mxu0 %v1666_v15  ;;  %v1680_v17 = vld [vmem:[#allocation8 + $0xb8] sm:$0xff]  ;;  %v1677_v15 = vld [vmem:[#allocation8 + $0xa0] sm:$0xff] }
 0x3f7   :  { %1848 = vmatprep.subr.bf16.mxu1 %v1668_v46  ;;  %v1679_v46 = vld [vmem:[#allocation8 + $0xb0] sm:$0xff] }
 0x3f9   :  { %1808 = vmatpush1.bf16.msra.mxu0 %v1665_v28  ;;  %v1682_v28 = vld [vmem:[#allocation8 + $0xc8] sm:$0xff] }
 0x3fa   :  { %1849 = vmatpush1.bf16.msra.mxu1 %v1667_v7  ;;  %1809 = vmatprep.subr.bf16.mxu0 %v1670_v51  ;;  %v1684_v7 = vld [vmem:[#allocation8 + $0xd8] sm:$0xff]  ;;  %v1681_v51 = vld [vmem:[#allocation8 + $0xc0] sm:$0xff] }
 0x3fb   :  { %1850 = vmatprep.subr.bf16.mxu1 %v1672_v49  ;;  %v1683_v49 = vld [vmem:[#allocation8 + $0xd0] sm:$0xff] }
 0x3fd   :  { %1810 = vmatpush1.bf16.msra.mxu0 %v1669_v32  ;;  %v1686_v32 = vld [vmem:[#allocation8 + $0xe8] sm:$0xff] }
 0x3fe   :  { %1851 = vmatpush1.bf16.msra.mxu1 %v1671_v4  ;;  %1811 = vmatprep.subr.bf16.mxu0 %v1674_v2  ;;  %v1688_v4 = vld [vmem:[#allocation8 + $0xf8] sm:$0xff]  ;;  %v1685_v2 = vld [vmem:[#allocation8 + $0xe0] sm:$0xff] }
 0x3ff   :  { %1852 = vmatprep.subr.bf16.mxu1 %v1676_v6  ;;  %v10220_v6 = vld [vmem:[#allocation14 + $0x4] ss:$16 sps:$4 sm:$0xff]  }
 0x401   :  { %1812 = vmatpush1.bf16.msra.mxu0 %v1673_v40  ;;  %v1687_v40 = vld [vmem:[#allocation8 + $0xf0] sm:$0xff] }
 0x402   :  { %1853 = vmatpush1.bf16.msra.mxu1 %v1675_v44  ;;  %1813 = vmatprep.subr.bf16.mxu0 %v1678_v50  ;;  %v10223_v44 = vld [vmem:[#allocation14 + $0xc] ss:$16 sps:$4 sm:$0xff]  }
 0x403   :  { %1854 = vmatprep.subr.bf16.mxu1 %v1680_v17 }
 0x405   :  { %1814 = vmatpush1.bf16.msra.mxu0 %v1677_v15 }
 0x406   :  { %1855 = vmatpush1.bf16.msra.mxu1 %v1679_v46  ;;  %1815 = vmatprep.subr.bf16.mxu0 %v1682_v28 }
 0x407   :  { %1856 = vmatprep.subr.bf16.mxu1 %v1684_v7 }
 0x409   :  { %1816 = vmatpush1.bf16.msra.mxu0 %v1681_v51 }
 0x40a   :  { %1857 = vmatpush1.bf16.msra.mxu1 %v1683_v49  ;;  %1817 = vmatprep.subr.bf16.mxu0 %v1686_v32 }
 0x40b   :  { %1858 = vmatprep.subr.bf16.mxu1 %v1688_v4 }
 0x40d   :  { %1818 = vmatpush1.bf16.msra.mxu0 %v1685_v2 }
 0x40e   :  { %1859 = vmatpush1.bf16.msra.mxu1 %v1687_v40  ;;  %2111 = vmatprep.subr.bf16.mxu0 %v10220_v6 }
 0x40f   :  { %2152 = vmatprep.subr.bf16.mxu1 %v10223_v44 }
 0x4a3   :  { %v1580_v50 = vpop.f32.mrb[16].mxu0  ;;  %v1621_v17 = vpop.f32.mrb[48].mxu1 }
 0x4a4   :  { %v1581_v15 = vadd.f32 %v1580_v50, %v11556_v1  ;;  %v1622_v46 = vadd.f32 %v1621_v17, %v11560_v10  ;;  %v1582_v28 = vpop.f32.mrb[17].mxu0  ;;  %v1623_v7 = vpop.f32.mrb[49].mxu1 }
 0x4a5   :  { %v1583_v51 = vadd.f32 %v1582_v28, %v11558_v36  ;;  %v1624_v49 = vadd.f32 %v1623_v7, %v11562_v11  ;;  %v1584_v32 = vpop.f32.mrb[18].mxu0  ;;  %v1625_v4 = vpop.f32.mrb[50].mxu1 }
 0x4a6   :  { %v1628_v0 = vadd.f32 %v1581_v15, %v11415_v53  ;;  %v1585_v2 = vpop.f32.mrb[19].mxu0  ;;  %v1626_v40 = vpop.f32.mrb[51].mxu1  ;;  %v1630_v50 = vadd.f32 %v1622_v46, %v11427_v61 }
 0x4a7   :  { %v1629_v6 = vadd.f32 %v1583_v51, %v11421_v56  ;;  %v1631_v1 = vadd.f32 %v1624_v49, %v11433_v8 }
 0x4a8   :  { %v9732_v44 = vmul.f32 -1.442695, %v1628_v0 }
 0x4a9   :  { %v9733_v22 = vmul.f32 -1.442695, %v1629_v6  ;;  %v9734_v10 = vmul.f32 -1.442695, %v1631_v1  ;;  %v10218_v6 = vld [vmem:[#allocation14] ss:$16 sps:$4 sm:$0xff]  }
 0x4aa   :  { %10586 = vpow2.f32 %v9732_v44  ;;  %v10221_v44 = vld [vmem:[#allocation14 + $0x8] ss:$16 sps:$4 sm:$0xff]  }
 0x4ab   :  { %10588 = vpow2.f32 %v9733_v22 }
 0x4ac   :  { %10590 = vpow2.f32 %v9734_v10  ;;  %v10226_v10 = vld [vmem:[#allocation14 + $0x24] ss:$16 sps:$4 sm:$0xff]  }
 0x4ad   :  { %10592 = vtanh.f32 %v1630_v50  ;;  %v10229_v50 = vld [vmem:[#allocation14 + $0x2c] ss:$16 sps:$4 sm:$0xff]  }
 0x4b4   :  { %v10587_v36 = vpop.eup %10586 }
 0x4b5   :  { %v10589_v17 = vpop.eup %10588  ;;  %v1635_v11 = vadd.f32 1.0, %v10587_v36  ;;  %v10224_v36 = vld [vmem:[#allocation14 + $0x20] ss:$16 sps:$4 sm:$0xff]  }
 0x4b6   :  { %v1641_v28 = vadd.f32 1.0, %v10589_v17  ;;  %v10591_v15 = vpop.eup %10590  ;;  %v10227_v17 = vld [vmem:[#allocation14 + $0x28] ss:$16 sps:$4 sm:$0xff]  }
 0x4b7   :  { %10594 = vrcp.f32 %v1635_v11  ;;  %v10593_v7 = vpop.eup %10592  ;;  %v1648_v4 = vadd.f32 1.0, %v10591_v15  ;;  %v10232_v11 = vld [vmem:[#allocation14 + $0x44] ss:$16 sps:$4 sm:$0xff]   ;;  %v10230_v15 = vld [vmem:[#allocation14 + $0x40] ss:$16 sps:$4 sm:$0xff]  }
 0x4b8   :  { %10596 = vrcp.f32 %v1641_v28  ;;  %v10235_v28 = vld [vmem:[#allocation14 + $0x4c] ss:$16 sps:$4 sm:$0xff]  }
 0x4b9   :  { %10598 = vrcp.f32 %v1648_v4  ;;  %v10239_v4 = vld [vmem:[#allocation14 + $0x68] ss:$16 sps:$4 sm:$0xff]  }
 0x4c1   :  { %v10595_v51 = vpop.eup %10594 }
 0x4c2   :  { %v10597_v0 = vpop.eup %10596  ;;  %v1652_v32 = vmul.f32 %v10595_v51, %v10593_v7  ;;  %v10233_v7 = vld [vmem:[#allocation14 + $0x48] ss:$16 sps:$4 sm:$0xff]   ;;  %v10238_v51 = vld [vmem:[#allocation14 + $0x64] ss:$16 sps:$4 sm:$0xff]  }
 0x4c3   :  { %v1651_v22 = vmul.f32 0.0, %v10597_v0  ;;  %v10599_v46 = vpop.eup %10598  ;;  %v10241_v0 = vld [vmem:[#allocation14 + $0x6c] ss:$16 sps:$4 sm:$0xff]  }
 0x4c5   :  { %v11576_v2 = vadd.f32 %v1652_v32, %v1651_v22  ;;  %v10236_v32 = vld [vmem:[#allocation14 + $0x60] ss:$16 sps:$4 sm:$0xff]   ;;  %v10244_v22 = vld [vmem:[#allocation14 + $0x84] ss:$16 sps:$4 sm:$0xff]  }
 0x4c7   :  { %10600 = vtanh.f32 %v11576_v2 }
 0x4d1   :  { %v10601_v49 = vpop.eup %10600 }
 0x4d2   :  { %v1655_v40 = vmul.f32 %v10601_v49, %v10599_v46  ;;  %v10247_v46 = vld [vmem:[#allocation14 + $0x8c] ss:$16 sps:$4 sm:$0xff]   ;;  %v10242_v49 = vld [vmem:[#allocation14 + $0x80] ss:$16 sps:$4 sm:$0xff]  }
 0x4d4   :  { %v11579_v1 = vpack.c.bf16 %v1655_v40, %v1655_v40  ;;  %v10245_v40 = vld [vmem:[#allocation14 + $0x88] ss:$16 sps:$4 sm:$0xff]  }
 0x4d6   :  { %1836 = vmatmul.mubr.bf16.vlgmr.msra.gmra.mrb[24].mxu0 %v11579_v1  ;;  %1877 = vmatmul.mubr.bf16.vlgmr.msra.gmra.mrb[56].mxu1 %v11579_v1 }
 0x4d7   :  { %2112 = vmatpush1.bf16.msra.mxu0 %v10218_v6  ;;  %2153 = vmatpush1.bf16.msra.mxu1 %v10221_v44  ;;  %v10250_v6 = vld [vmem:[#allocation14 + $0xa4] ss:$16 sps:$4 sm:$0xff]   ;;  %v10253_v44 = vld [vmem:[#allocation14 + $0xac] ss:$16 sps:$4 sm:$0xff]  }
 0x4d8   :  { %2113 = vmatprep.subr.bf16.mxu0 %v10226_v10  ;;  %2154 = vmatprep.subr.bf16.mxu1 %v10229_v50  ;;  %v10248_v10 = vld [vmem:[#allocation14 + $0xa0] ss:$16 sps:$4 sm:$0xff]   ;;  %v10251_v50 = vld [vmem:[#allocation14 + $0xa8] ss:$16 sps:$4 sm:$0xff]  }
 0x4d9   :  { %2143 = vmatprep.mubr.bf16.mxu0 %v12400_v18  ;;  %2184 = vmatprep.mubr.bf16.mxu1 %v12400_v18 }
 0x4db   :  { %2114 = vmatpush1.bf16.msra.mxu0 %v10224_v36  ;;  %2155 = vmatpush1.bf16.msra.mxu1 %v10227_v17  ;;  %v10256_v36 = vld [vmem:[#allocation14 + $0xc4] ss:$16 sps:$4 sm:$0xff]   ;;  %v10259_v17 = vld [vmem:[#allocation14 + $0xcc] ss:$16 sps:$4 sm:$0xff]  }
 0x4dc   :  { %2115 = vmatprep.subr.bf16.mxu0 %v10232_v11  ;;  %2156 = vmatprep.subr.bf16.mxu1 %v10235_v28  ;;  %v10254_v11 = vld [vmem:[#allocation14 + $0xc0] ss:$16 sps:$4 sm:$0xff]   ;;  %v10257_v28 = vld [vmem:[#allocation14 + $0xc8] ss:$16 sps:$4 sm:$0xff]  }
 0x4df   :  { %2116 = vmatpush1.bf16.msra.mxu0 %v10230_v15  ;;  %2157 = vmatpush1.bf16.msra.mxu1 %v10233_v7  ;;  %v10262_v15 = vld [vmem:[#allocation14 + $0xe4] ss:$16 sps:$4 sm:$0xff]   ;;  %v10265_v7 = vld [vmem:[#allocation14 + $0xec] ss:$16 sps:$4 sm:$0xff]  }
 0x4e0   :  { %2117 = vmatprep.subr.bf16.mxu0 %v10238_v51  ;;  %2158 = vmatprep.subr.bf16.mxu1 %v10241_v0  ;;  %v10260_v51 = vld [vmem:[#allocation14 + $0xe0] ss:$16 sps:$4 sm:$0xff]   ;;  %v10263_v0 = vld [vmem:[#allocation14 + $0xe8] ss:$16 sps:$4 sm:$0xff]  }
 0x4e3   :  { %2118 = vmatpush1.bf16.msra.mxu0 %v10236_v32  ;;  %2159 = vmatpush1.bf16.msra.mxu1 %v10239_v4  ;;  %v2255_v32 = vld [vmem:[#allocation5 + $0x8] sm:$0xff]  ;;  %v2257_v4 = vld [vmem:[#allocation5 + $0x18] sm:$0xff] }
 0x4e4   :  { %2119 = vmatprep.subr.bf16.mxu0 %v10244_v22  ;;  %2160 = vmatprep.subr.bf16.mxu1 %v10247_v46  ;;  %v2254_v22 = vld [vmem:[#allocation5] sm:$0xff]  ;;  %v2256_v46 = vld [vmem:[#allocation5 + $0x10] sm:$0xff] }
 0x4e7   :  { %2120 = vmatpush1.bf16.msra.mxu0 %v10242_v49  ;;  %2161 = vmatpush1.bf16.msra.mxu1 %v10245_v40  ;;  %v2259_v49 = vld [vmem:[#allocation5 + $0x28] sm:$0xff]  ;;  %v2261_v40 = vld [vmem:[#allocation5 + $0x38] sm:$0xff] }
 0x4e8   :  { %2121 = vmatprep.subr.bf16.mxu0 %v10250_v6  ;;  %2162 = vmatprep.subr.bf16.mxu1 %v10253_v44  ;;  %v2258_v6 = vld [vmem:[#allocation5 + $0x20] sm:$0xff]  ;;  %v2260_v44 = vld [vmem:[#allocation5 + $0x30] sm:$0xff] }
 0x4eb   :  { %2122 = vmatpush1.bf16.msra.mxu0 %v10248_v10  ;;  %2163 = vmatpush1.bf16.msra.mxu1 %v10251_v50  ;;  %v2263_v10 = vld [vmem:[#allocation5 + $0x48] sm:$0xff]  ;;  %v2265_v50 = vld [vmem:[#allocation5 + $0x58] sm:$0xff] }
 0x4ec   :  { %2123 = vmatprep.subr.bf16.mxu0 %v10256_v36  ;;  %2164 = vmatprep.subr.bf16.mxu1 %v10259_v17  ;;  %v2262_v36 = vld [vmem:[#allocation5 + $0x40] sm:$0xff]  ;;  %v2264_v17 = vld [vmem:[#allocation5 + $0x50] sm:$0xff] }
 0x4ef   :  { %2124 = vmatpush1.bf16.msra.mxu0 %v10254_v11  ;;  %2165 = vmatpush1.bf16.msra.mxu1 %v10257_v28  ;;  %v2267_v11 = vld [vmem:[#allocation5 + $0x68] sm:$0xff]  ;;  %v2266_v28 = vld [vmem:[#allocation5 + $0x60] sm:$0xff] }
 0x4f0   :  { %2125 = vmatprep.subr.bf16.mxu0 %v10262_v15  ;;  %2166 = vmatprep.subr.bf16.mxu1 %v10265_v7  ;;  %v2268_v15 = vld [vmem:[#allocation5 + $0x70] sm:$0xff]  ;;  %v2271_v7 = vld [vmem:[#allocation5 + $0x88] sm:$0xff] }
 0x4f3   :  { %2126 = vmatpush1.bf16.msra.mxu0 %v10260_v51  ;;  %2167 = vmatpush1.bf16.msra.mxu1 %v10263_v0  ;;  %v2273_v51 = vld [vmem:[#allocation5 + $0x98] sm:$0xff]  ;;  %v2270_v0 = vld [vmem:[#allocation5 + $0x80] sm:$0xff] }
 0x4f4   :  { %2286 = vmatprep.subr.bf16.mxu0 %v2255_v32  ;;  %2327 = vmatprep.subr.bf16.mxu1 %v2257_v4  ;;  %v2272_v32 = vld [vmem:[#allocation5 + $0x90] sm:$0xff]  ;;  %v2275_v4 = vld [vmem:[#allocation5 + $0xa8] sm:$0xff] }
 0x4f6   :  { %2144 = vmatmul.mubr.bf16.vlgmr.msra.gmra.mrb[28].mxu0 %v11521_v3  ;;  %2185 = vmatmul.mubr.bf16.vlgmr.msra.gmra.mrb[60].mxu1 %v11521_v3  ;;  %v2269_v3 = vld [vmem:[#allocation5 + $0x78] sm:$0xff] }
 0x4f7   :  { %2287 = vmatpush1.bf16.msra.mxu0 %v2254_v22  ;;  %2328 = vmatpush1.bf16.msra.mxu1 %v2256_v46  ;;  %v2277_v22 = vld [vmem:[#allocation5 + $0xb8] sm:$0xff]  ;;  %v11589_v46 = vpop.f32.mrb[20].mxu0 }
 0x4f8   :  { %2288 = vmatprep.subr.bf16.mxu0 %v2259_v49  ;;  %2329 = vmatprep.subr.bf16.mxu1 %v2261_v40  ;;  %v2274_v49 = vld [vmem:[#allocation5 + $0xa0] sm:$0xff]  ;;  %v2276_v40 = vld [vmem:[#allocation5 + $0xb0] sm:$0xff] }
 0x4f9   :  { %2318 = vmatprep.mubr.bf16.mxu0 %v12400_v18  ;;  %2359 = vmatprep.mubr.bf16.mxu1 %v12400_v18 }
 0x4fb   :  { %2289 = vmatpush1.bf16.msra.mxu0 %v2258_v6  ;;  %2330 = vmatpush1.bf16.msra.mxu1 %v2260_v44  ;;  %v11591_v6 = vpop.f32.mrb[21].mxu0  ;;  %v2279_v44 = vld [vmem:[#allocation5 + $0xc8] sm:$0xff] }
 0x4fc   :  { %2290 = vmatprep.subr.bf16.mxu0 %v2263_v10  ;;  %2331 = vmatprep.subr.bf16.mxu1 %v2265_v50  ;;  %v2281_v10 = vld [vmem:[#allocation5 + $0xd8] sm:$0xff]  ;;  %v1759_v50 = vpop.f32.mrb[22].mxu0 }
 0x4fd   :  { %v2229_v50 = vld [vmem:[#allocation4 + $0x38] sm:$0xff] }
 0x4ff   :  { %2291 = vmatpush1.bf16.msra.mxu0 %v2262_v36  ;;  %2332 = vmatpush1.bf16.msra.mxu1 %v2264_v17  ;;  %v1760_v36 = vpop.f32.mrb[23].mxu0  ;;  %v11593_v17 = vpop.f32.mrb[52].mxu1 }
 0x500   :  { %2292 = vmatprep.subr.bf16.mxu0 %v2267_v11  ;;  %2333 = vmatprep.subr.bf16.mxu1 %v2269_v3  ;;  %v11595_v11 = vpop.f32.mrb[53].mxu1  ;;  %v2278_v3 = vld [vmem:[#allocation5 + $0xc0] sm:$0xff] }
 0x501   :  { %v2226_v36 = vld [vmem:[#allocation4 + $0x20] sm:$0xff] }
 0x503   :  { %2293 = vmatpush1.bf16.msra.mxu0 %v2266_v28  ;;  %2334 = vmatpush1.bf16.msra.mxu1 %v2268_v15  ;;  %v2280_v28 = vld [vmem:[#allocation5 + $0xd0] sm:$0xff]  ;;  %v1800_v15 = vpop.f32.mrb[54].mxu1 }
 0x504   :  { %2294 = vmatprep.subr.bf16.mxu0 %v2271_v7  ;;  %2335 = vmatprep.subr.bf16.mxu1 %v2273_v51  ;;  %v2283_v7 = vld [vmem:[#allocation5 + $0xe8] sm:$0xff]  ;;  %v2285_v51 = vld [vmem:[#allocation5 + $0xf8] sm:$0xff]  ;;  %v2230_v15 = vld [vmem:[#allocation4 + $0x40] sm:$0xff] }
 0x507   :  { %2295 = vmatpush1.bf16.msra.mxu0 %v2270_v0  ;;  %2336 = vmatpush1.bf16.msra.mxu1 %v2272_v32  ;;  %v1801_v0 = vpop.f32.mrb[55].mxu1  ;;  %v2282_v32 = vld [vmem:[#allocation5 + $0xe0] sm:$0xff] }
 0x508   :  { %2296 = vmatprep.subr.bf16.mxu0 %v2275_v4  ;;  %2337 = vmatprep.subr.bf16.mxu1 %v2277_v22  ;;  %v2284_v4 = vld [vmem:[#allocation5 + $0xf0] sm:$0xff]  ;;  %v2223_v22 = vld [vmem:[#allocation4 + $0x8] sm:$0xff]  ;;  %v2237_v0 = vld [vmem:[#allocation4 + $0x78] sm:$0xff] }
 0x50b   :  { %2297 = vmatpush1.bf16.msra.mxu0 %v2274_v49  ;;  %2338 = vmatpush1.bf16.msra.mxu1 %v2276_v40  ;;  %v2225_v49 = vld [vmem:[#allocation4 + $0x18] sm:$0xff]  ;;  %v2222_v40 = vld [vmem:[#allocation4] sm:$0xff] }
 0x50c   :  { %2298 = vmatprep.subr.bf16.mxu0 %v2279_v44  ;;  %2339 = vmatprep.subr.bf16.mxu1 %v2281_v10  ;;  %v2224_v44 = vld [vmem:[#allocation4 + $0x10] sm:$0xff]  ;;  %v2227_v10 = vld [vmem:[#allocation4 + $0x28] sm:$0xff] }
 0x50f   :  { %2299 = vmatpush1.bf16.msra.mxu0 %v2278_v3  ;;  %2340 = vmatpush1.bf16.msra.mxu1 %v2280_v28  ;;  %v2228_v3 = vld [vmem:[#allocation4 + $0x30] sm:$0xff]  ;;  %v2233_v28 = vld [vmem:[#allocation4 + $0x58] sm:$0xff] }
 0x510   :  { %2300 = vmatprep.subr.bf16.mxu0 %v2283_v7  ;;  %2341 = vmatprep.subr.bf16.mxu1 %v2285_v51  ;;  %v2232_v7 = vld [vmem:[#allocation4 + $0x50] sm:$0xff]  ;;  %v2235_v51 = vld [vmem:[#allocation4 + $0x68] sm:$0xff] }
 0x513   :  { %2301 = vmatpush1.bf16.msra.mxu0 %v2282_v32  ;;  %2342 = vmatpush1.bf16.msra.mxu1 %v2284_v4  ;;  %v2234_v32 = vld [vmem:[#allocation4 + $0x60] sm:$0xff]  ;;  %v2236_v4 = vld [vmem:[#allocation4 + $0x70] sm:$0xff] }
 0x514   :  { %2368 = vmatprep.subr.bf16.mxu0 %v2223_v22  ;;  %2409 = vmatprep.subr.bf16.mxu1 %v2225_v49  ;;  %v2239_v22 = vld [vmem:[#allocation4 + $0x88] sm:$0xff]  ;;  %v2241_v49 = vld [vmem:[#allocation4 + $0x98] sm:$0xff] }
 0x516   :  { %2319 = vmatmul.mubr.bf16.vlgmr.msra.gmra.mrb[32].mxu0 %v11550_v5  ;;  %2360 = vmatmul.mubr.bf16.vlgmr.msra.gmra.mrb[64].mxu1 %v11550_v5  ;;  %v2231_v5 = vld [vmem:[#allocation4 + $0x48] sm:$0xff] }
 0x517   :  { %2400 = vmatprep.mubr.bf16.mxu0 %v12400_v18  ;;  %2441 = vmatprep.mubr.bf16.mxu1 %v12400_v18 }
 0x518   :  { %2369 = vmatpush1.bf16.msra.mxu0 %v2222_v40  ;;  %2410 = vmatpush1.bf16.msra.mxu1 %v2224_v44  ;;  %v2238_v40 = vld [vmem:[#allocation4 + $0x80] sm:$0xff]  ;;  %v2240_v44 = vld [vmem:[#allocation4 + $0x90] sm:$0xff] }
 0x519   :  { %2370 = vmatprep.subr.bf16.mxu0 %v2227_v10  ;;  %2411 = vmatprep.subr.bf16.mxu1 %v2229_v50  ;;  %v2243_v10 = vld [vmem:[#allocation4 + $0xa8] sm:$0xff]  ;;  %v2245_v50 = vld [vmem:[#allocation4 + $0xb8] sm:$0xff] }
 0x51c   :  { %2371 = vmatpush1.bf16.msra.mxu0 %v2226_v36  ;;  %2412 = vmatpush1.bf16.msra.mxu1 %v2228_v3  ;;  %v2242_v36 = vld [vmem:[#allocation4 + $0xa0] sm:$0xff]  ;;  %v2244_v3 = vld [vmem:[#allocation4 + $0xb0] sm:$0xff] }
 0x51d   :  { %2372 = vmatprep.subr.bf16.mxu0 %v2231_v5  ;;  %2413 = vmatprep.subr.bf16.mxu1 %v2233_v28  ;;  %v2247_v5 = vld [vmem:[#allocation4 + $0xc8] sm:$0xff]  ;;  %v2249_v28 = vld [vmem:[#allocation4 + $0xd8] sm:$0xff] }
 0x520   :  { %2373 = vmatpush1.bf16.msra.mxu0 %v2230_v15  ;;  %2414 = vmatpush1.bf16.msra.mxu1 %v2232_v7  ;;  %v2246_v15 = vld [vmem:[#allocation4 + $0xc0] sm:$0xff]  ;;  %v2248_v7 = vld [vmem:[#allocation4 + $0xd0] sm:$0xff] }
 0x521   :  { %2374 = vmatprep.subr.bf16.mxu0 %v2235_v51  ;;  %2415 = vmatprep.subr.bf16.mxu1 %v2237_v0  ;;  %v2251_v51 = vld [vmem:[#allocation4 + $0xe8] sm:$0xff]  ;;  %v2253_v0 = vld [vmem:[#allocation4 + $0xf8] sm:$0xff] }
 0x524   :  { %2375 = vmatpush1.bf16.msra.mxu0 %v2234_v32  ;;  %2416 = vmatpush1.bf16.msra.mxu1 %v2236_v4  ;;  %v2250_v32 = vld [vmem:[#allocation4 + $0xe0] sm:$0xff]  ;;  %v2252_v4 = vld [vmem:[#allocation4 + $0xf0] sm:$0xff] }
 0x525   :  { %2376 = vmatprep.subr.bf16.mxu0 %v2239_v22  ;;  %2417 = vmatprep.subr.bf16.mxu1 %v2241_v49  ;;  %v2512_v22 = vld [vmem:[#allocation7 + $0x8] sm:$0xff]  ;;  %v2514_v49 = vld [vmem:[#allocation7 + $0x18] sm:$0xff] }
 0x528   :  { %2377 = vmatpush1.bf16.msra.mxu0 %v2238_v40  ;;  %2418 = vmatpush1.bf16.msra.mxu1 %v2240_v44 }
 0x529   :  { %2378 = vmatprep.subr.bf16.mxu0 %v2243_v10  ;;  %2419 = vmatprep.subr.bf16.mxu1 %v2245_v50 }
 0x52c   :  { %2379 = vmatpush1.bf16.msra.mxu0 %v2242_v36  ;;  %2420 = vmatpush1.bf16.msra.mxu1 %v2244_v3 }
 0x52d   :  { %2380 = vmatprep.subr.bf16.mxu0 %v2247_v5  ;;  %2421 = vmatprep.subr.bf16.mxu1 %v2249_v28 }
 0x530   :  { %2381 = vmatpush1.bf16.msra.mxu0 %v2246_v15  ;;  %2422 = vmatpush1.bf16.msra.mxu1 %v2248_v7 }
 0x531   :  { %2382 = vmatprep.subr.bf16.mxu0 %v2251_v51  ;;  %2423 = vmatprep.subr.bf16.mxu1 %v2253_v0 }
 0x534   :  { %2383 = vmatpush1.bf16.msra.mxu0 %v2250_v32  ;;  %2424 = vmatpush1.bf16.msra.mxu1 %v2252_v4 }
 0x535   :  { %2543 = vmatprep.subr.bf16.mxu0 %v2512_v22  ;;  %2584 = vmatprep.subr.bf16.mxu1 %v2514_v49 }
 0x5a9   :  { %v1837_v40 = vpop.f32.mrb[24].mxu0  ;;  %v1878_v44 = vpop.f32.mrb[56].mxu1 }
 0x5aa   :  { %v1838_v10 = vadd.f32 %v1837_v40, %v11589_v46  ;;  %v1879_v50 = vadd.f32 %v1878_v44, %v11593_v17  ;;  %v1839_v36 = vpop.f32.mrb[25].mxu0  ;;  %v1880_v3 = vpop.f32.mrb[57].mxu1 }
 0x5ab   :  { %v1840_v5 = vadd.f32 %v1839_v36, %v11591_v6  ;;  %v11605_v28 = vadd.f32 %v1880_v3, %v11595_v11  ;;  %v1841_v15 = vpop.f32.mrb[26].mxu0  ;;  %v1882_v7 = vpop.f32.mrb[58].mxu1 }
 0x5ac   :  { %v1885_v51 = vadd.f32 %v1838_v10, %v11417_v54  ;;  %v1842_v0 = vpop.f32.mrb[27].mxu0  ;;  %v1883_v32 = vpop.f32.mrb[59].mxu1  ;;  %v1887_v46 = vadd.f32 %v1879_v50, %v11429_v62 }
 0x5ad   :  { %v1886_v4 = vadd.f32 %v1840_v5, %v11423_v57 }
 0x5ae   :  { %v9735_v22 = vmul.f32 -1.442695, %v1885_v51 }
 0x5af   :  { %v9736_v49 = vmul.f32 -1.442695, %v1886_v4 }
 0x5b0   :  { %10602 = vpow2.f32 %v9735_v22 }
 0x5b1   :  { %10604 = vpow2.f32 %v9736_v49 }
 0x5b2   :  { %10606 = vtanh.f32 %v1887_v46 }
 0x5ba   :  { %v10603_v17 = vpop.eup %10602 }
 0x5bb   :  { %v10605_v40 = vpop.eup %10604  ;;  %v1892_v6 = vadd.f32 1.0, %v10603_v17 }
 0x5bc   :  { %v1898_v11 = vadd.f32 1.0, %v10605_v40  ;;  %v10607_v44 = vpop.eup %10606 }
 0x5bd   :  { %10608 = vrcp.f32 %v1892_v6 }
 0x5be   :  { %10610 = vrcp.f32 %v1898_v11 }
 0x5c7   :  { %v10609_v36 = vpop.eup %10608 }
 0x5c8   :  { %v10611_v10 = vpop.eup %10610  ;;  %v1909_v3 = vmul.f32 %v10609_v36, %v10607_v44 }
 0x5c9   :  { %v1908_v15 = vmul.f32 0.0, %v10611_v10  ;;  %v2145_v7 = vpop.f32.mrb[28].mxu0  ;;  %v2186_v5 = vpop.f32.mrb[60].mxu1 }
 0x5ca   :  { %v2193_v51 = vadd.f32 %v2145_v7, %v11444_v19  ;;  %v2147_v0 = vpop.f32.mrb[29].mxu0  ;;  %v2188_v32 = vpop.f32.mrb[61].mxu1  ;;  %v2195_v36 = vadd.f32 %v2186_v5, %v11476_v16 }
 0x5cb   :  { %v11611_v4 = vadd.f32 %v1909_v3, %v1908_v15  ;;  %v2194_v50 = vadd.f32 %v2147_v0, %v11446_v21  ;;  %v2149_v22 = vpop.f32.mrb[30].mxu0  ;;  %v2190_v49 = vpop.f32.mrb[62].mxu1  ;;  %v2196_v11 = vadd.f32 %v2188_v32, %v11478_v20 }
 0x5cc   :  { %v9770_v46 = vmul.f32 -1.442695, %v2193_v51  ;;  %v2150_v17 = vpop.f32.mrb[31].mxu0  ;;  %v2191_v40 = vpop.f32.mrb[63].mxu1 }
 0x5cd   :  { %v9771_v6 = vmul.f32 -1.442695, %v2194_v50  ;;  %v9772_v44 = vmul.f32 -1.442695, %v2196_v11 }
 0x5ce   :  { %10612 = vpow2.f32 %v9770_v46 }
 0x5cf   :  { %10614 = vpow2.f32 %v9771_v6 }
 0x5d0   :  { %10616 = vpow2.f32 %v9772_v44 }
 0x5d1   :  { %10618 = vtanh.f32 %v2195_v36 }
 0x5d8   :  { %v10613_v19 = vpop.eup %10612 }
 0x5d9   :  { %v10615_v10 = vpop.eup %10614  ;;  %v2200_v7 = vadd.f32 1.0, %v10613_v19 }
 0x5da   :  { %v2206_v3 = vadd.f32 1.0, %v10615_v10  ;;  %v10617_v21 = vpop.eup %10616  ;;  %v2511_v10 = vld [vmem:[#allocation7] sm:$0xff] }
 0x5db   :  { %10620 = vrcp.f32 %v2200_v7  ;;  %v10619_v15 = vpop.eup %10618  ;;  %v2213_v22 = vadd.f32 1.0, %v10617_v21  ;;  %v2513_v7 = vld [vmem:[#allocation7 + $0x10] sm:$0xff]  ;;  %v2518_v21 = vld [vmem:[#allocation7 + $0x38] sm:$0xff] }
 0x5dc   :  { %10622 = vrcp.f32 %v2206_v3  ;;  %v2516_v3 = vld [vmem:[#allocation7 + $0x28] sm:$0xff] }
 0x5dd   :  { %10624 = vrcp.f32 %v2213_v22  ;;  %v2519_v22 = vld [vmem:[#allocation7 + $0x40] sm:$0xff] }
 0x5e5   :  { %v10621_v51 = vpop.eup %10620 }
 0x5e6   :  { %v10623_v0 = vpop.eup %10622  ;;  %v2217_v50 = vmul.f32 %v10621_v51, %v10619_v15  ;;  %v2515_v15 = vld [vmem:[#allocation7 + $0x20] sm:$0xff]  ;;  %v2517_v51 = vld [vmem:[#allocation7 + $0x30] sm:$0xff] }
 0x5e7   :  { %v2216_v49 = vmul.f32 %v10623_v0, %v11518_v47  ;;  %v10625_v44 = vpop.eup %10624  ;;  %v2520_v0 = vld [vmem:[#allocation7 + $0x48] sm:$0xff] }
 0x5e9   :  { %v11617_v20 = vadd.f32 %v2217_v50, %v2216_v49  ;;  %v11619_v32 = vpop.f32.mrb[32].mxu0  ;;  %v11621_v16 = vpop.f32.mrb[64].mxu1  ;;  %v2522_v50 = vld [vmem:[#allocation7 + $0x58] sm:$0xff]  ;;  %v2521_v49 = vld [vmem:[#allocation7 + $0x50] sm:$0xff] }
 0x5ea   :  { %v11623_v5 = vpop.f32.mrb[33].mxu0  ;;  %v11625_v46 = vpop.f32.mrb[65].mxu1 }
 0x5eb   :  { %v2324_v17 = vpop.f32.mrb[34].mxu0  ;;  %v2365_v40 = vpop.f32.mrb[66].mxu1  ;;  %10626 = vtanh.f32 %v11617_v20 }
 0x5ec   :  { %v2325_v6 = vpop.f32.mrb[35].mxu0  ;;  %v2366_v11 = vpop.f32.mrb[67].mxu1  ;;  %v2524_v17 = vld [vmem:[#allocation7 + $0x68] sm:$0xff]  ;;  %v2526_v40 = vld [vmem:[#allocation7 + $0x78] sm:$0xff] }
 0x5ed   :  { %v2523_v6 = vld [vmem:[#allocation7 + $0x60] sm:$0xff]  ;;  %v2525_v11 = vld [vmem:[#allocation7 + $0x70] sm:$0xff] }
 0x5f5   :  { %v10627_v36 = vpop.eup %10626 }
 0x5f6   :  { %v2220_v47 = vmul.f32 %v10627_v36, %v10625_v44  ;;  %v2528_v44 = vld [vmem:[#allocation7 + $0x88] sm:$0xff]  ;;  %v2530_v36 = vld [vmem:[#allocation7 + $0x98] sm:$0xff] }
 0x5f8   :  { %v11628_v19 = vpack.c.bf16 %v2220_v47, %v2220_v47  ;;  %v2527_v47 = vld [vmem:[#allocation7 + $0x80] sm:$0xff] }
 0x5fa   :  { %2401 = vmatmul.mubr.bf16.vlgmr.msra.gmra.mrb[36].mxu0 %v11628_v19  ;;  %2442 = vmatmul.mubr.bf16.vlgmr.msra.gmra.mrb[68].mxu1 %v11628_v19 }
 0x5fb   :  { %2544 = vmatpush1.bf16.msra.mxu0 %v2511_v10  ;;  %2585 = vmatpush1.bf16.msra.mxu1 %v2513_v7  ;;  %v2529_v10 = vld [vmem:[#allocation7 + $0x90] sm:$0xff]  ;;  %v2532_v7 = vld [vmem:[#allocation7 + $0xa8] sm:$0xff] }
 0x5fc   :  { %2545 = vmatprep.subr.bf16.mxu0 %v2516_v3  ;;  %2586 = vmatprep.subr.bf16.mxu1 %v2518_v21  ;;  %v2534_v3 = vld [vmem:[#allocation7 + $0xb8] sm:$0xff]  ;;  %v2531_v21 = vld [vmem:[#allocation7 + $0xa0] sm:$0xff] }
 0x5fd   :  { %2575 = vmatprep.mubr.bf16.mxu0 %v12400_v18  ;;  %2616 = vmatprep.mubr.bf16.mxu1 %v12400_v18 }
 0x5ff   :  { %2546 = vmatpush1.bf16.msra.mxu0 %v2515_v15  ;;  %2587 = vmatpush1.bf16.msra.mxu1 %v2517_v51  ;;  %v2533_v15 = vld [vmem:[#allocation7 + $0xb0] sm:$0xff]  ;;  %v2536_v51 = vld [vmem:[#allocation7 + $0xc8] sm:$0xff] }
 0x600   :  { %2547 = vmatprep.subr.bf16.mxu0 %v2520_v0  ;;  %2588 = vmatprep.subr.bf16.mxu1 %v2522_v50  ;;  %v2538_v0 = vld [vmem:[#allocation7 + $0xd8] sm:$0xff]  ;;  %v2535_v50 = vld [vmem:[#allocation7 + $0xc0] sm:$0xff] }
 0x603   :  { %2548 = vmatpush1.bf16.msra.mxu0 %v2519_v22  ;;  %2589 = vmatpush1.bf16.msra.mxu1 %v2521_v49  ;;  %v2537_v22 = vld [vmem:[#allocation7 + $0xd0] sm:$0xff]  ;;  %v2540_v49 = vld [vmem:[#allocation7 + $0xe8] sm:$0xff] }
 0x604   :  { %2549 = vmatprep.subr.bf16.mxu0 %v2524_v17  ;;  %2590 = vmatprep.subr.bf16.mxu1 %v2526_v40  ;;  %v2542_v17 = vld [vmem:[#allocation7 + $0xf8] sm:$0xff]  ;;  %v2539_v40 = vld [vmem:[#allocation7 + $0xe0] sm:$0xff] }
 0x607   :  { %2550 = vmatpush1.bf16.msra.mxu0 %v2523_v6  ;;  %2591 = vmatpush1.bf16.msra.mxu1 %v2525_v11  ;;  %v2541_v6 = vld [vmem:[#allocation7 + $0xf0] sm:$0xff]  ;;  %v2480_v11 = vld [vmem:[#allocation6 + $0x8] sm:$0xff] }
 0x608   :  { %2551 = vmatprep.subr.bf16.mxu0 %v2528_v44  ;;  %2592 = vmatprep.subr.bf16.mxu1 %v2530_v36  ;;  %v2482_v44 = vld [vmem:[#allocation6 + $0x18] sm:$0xff]  ;;  %v2479_v36 = vld [vmem:[#allocation6] sm:$0xff] }
 0x60b   :  { %2552 = vmatpush1.bf16.msra.mxu0 %v2527_v47  ;;  %2593 = vmatpush1.bf16.msra.mxu1 %v2529_v10  ;;  %v2481_v47 = vld [vmem:[#allocation6 + $0x10] sm:$0xff]  ;;  %v2484_v10 = vld [vmem:[#allocation6 + $0x28] sm:$0xff] }
 0x60c   :  { %2553 = vmatprep.subr.bf16.mxu0 %v2532_v7  ;;  %2594 = vmatprep.subr.bf16.mxu1 %v2534_v3  ;;  %v2486_v7 = vld [vmem:[#allocation6 + $0x38] sm:$0xff]  ;;  %v2483_v3 = vld [vmem:[#allocation6 + $0x20] sm:$0xff] }
 0x60f   :  { %2554 = vmatpush1.bf16.msra.mxu0 %v2531_v21  ;;  %2595 = vmatpush1.bf16.msra.mxu1 %v2533_v15  ;;  %v2485_v21 = vld [vmem:[#allocation6 + $0x30] sm:$0xff]  ;;  %v2490_v15 = vld [vmem:[#allocation6 + $0x58] sm:$0xff] }
 0x610   :  { %2555 = vmatprep.subr.bf16.mxu0 %v2536_v51  ;;  %2596 = vmatprep.subr.bf16.mxu1 %v2538_v0  ;;  %v2487_v51 = vld [vmem:[#allocation6 + $0x40] sm:$0xff]  ;;  %v2489_v0 = vld [vmem:[#allocation6 + $0x50] sm:$0xff] }
 0x613   :  { %2556 = vmatpush1.bf16.msra.mxu0 %v2535_v50  ;;  %2597 = vmatpush1.bf16.msra.mxu1 %v2537_v22  ;;  %v2492_v50 = vld [vmem:[#allocation6 + $0x68] sm:$0xff]  ;;  %v2494_v22 = vld [vmem:[#allocation6 + $0x78] sm:$0xff] }
 0x614   :  { %2557 = vmatprep.subr.bf16.mxu0 %v2540_v49  ;;  %2598 = vmatprep.subr.bf16.mxu1 %v2542_v17  ;;  %v2491_v49 = vld [vmem:[#allocation6 + $0x60] sm:$0xff]  ;;  %v2493_v17 = vld [vmem:[#allocation6 + $0x70] sm:$0xff] }
 0x617   :  { %2558 = vmatpush1.bf16.msra.mxu0 %v2539_v40  ;;  %2599 = vmatpush1.bf16.msra.mxu1 %v2541_v6  ;;  %v2496_v40 = vld [vmem:[#allocation6 + $0x88] sm:$0xff]  ;;  %v2498_v6 = vld [vmem:[#allocation6 + $0x98] sm:$0xff] }
 0x618   :  { %2625 = vmatprep.subr.bf16.mxu0 %v2480_v11  ;;  %2666 = vmatprep.subr.bf16.mxu1 %v2482_v44  ;;  %v2495_v11 = vld [vmem:[#allocation6 + $0x80] sm:$0xff]  ;;  %v2497_v44 = vld [vmem:[#allocation6 + $0x90] sm:$0xff] }
 0x61a   :  { %2576 = vmatmul.mubr.bf16.vlgmr.msra.gmra.mrb[40].mxu0 %v11579_v1  ;;  %2617 = vmatmul.mubr.bf16.vlgmr.msra.gmra.mrb[72].mxu1 %v11579_v1  ;;  %v2488_v1 = vld [vmem:[#allocation6 + $0x48] sm:$0xff] }
 0x61b   :  { %2657 = vmatprep.mubr.bf16.mxu0 %v12400_v18  ;;  %2698 = vmatprep.mubr.bf16.mxu1 %v12400_v18 }
 0x61c   :  { %2626 = vmatpush1.bf16.msra.mxu0 %v2479_v36  ;;  %2667 = vmatpush1.bf16.msra.mxu1 %v2481_v47  ;;  %v2500_v36 = vld [vmem:[#allocation6 + $0xa8] sm:$0xff]  ;;  %v2502_v47 = vld [vmem:[#allocation6 + $0xb8] sm:$0xff] }
 0x61d   :  { %2627 = vmatprep.subr.bf16.mxu0 %v2484_v10  ;;  %2668 = vmatprep.subr.bf16.mxu1 %v2486_v7  ;;  %v2499_v10 = vld [vmem:[#allocation6 + $0xa0] sm:$0xff]  ;;  %v2501_v7 = vld [vmem:[#allocation6 + $0xb0] sm:$0xff] }
 0x620   :  { %2628 = vmatpush1.bf16.msra.mxu0 %v2483_v3  ;;  %2669 = vmatpush1.bf16.msra.mxu1 %v2485_v21  ;;  %v2504_v3 = vld [vmem:[#allocation6 + $0xc8] sm:$0xff]  ;;  %v2506_v21 = vld [vmem:[#allocation6 + $0xd8] sm:$0xff] }
 0x621   :  { %2629 = vmatprep.subr.bf16.mxu0 %v2488_v1  ;;  %2670 = vmatprep.subr.bf16.mxu1 %v2490_v15  ;;  %v2503_v1 = vld [vmem:[#allocation6 + $0xc0] sm:$0xff]  ;;  %v2505_v15 = vld [vmem:[#allocation6 + $0xd0] sm:$0xff] }
 0x624   :  { %2630 = vmatpush1.bf16.msra.mxu0 %v2487_v51  ;;  %2671 = vmatpush1.bf16.msra.mxu1 %v2489_v0  ;;  %v2508_v51 = vld [vmem:[#allocation6 + $0xe8] sm:$0xff]  ;;  %v2510_v0 = vld [vmem:[#allocation6 + $0xf8] sm:$0xff] }
 0x625   :  { %2631 = vmatprep.subr.bf16.mxu0 %v2492_v50  ;;  %2672 = vmatprep.subr.bf16.mxu1 %v2494_v22  ;;  %v2507_v50 = vld [vmem:[#allocation6 + $0xe0] sm:$0xff]  ;;  %v2509_v22 = vld [vmem:[#allocation6 + $0xf0] sm:$0xff] }
 0x628   :  { %2632 = vmatpush1.bf16.msra.mxu0 %v2491_v49  ;;  %2673 = vmatpush1.bf16.msra.mxu1 %v2493_v17  ;;  %v2770_v49 = vld [vmem:[#allocation9 + $0x8] sm:$0xff]  ;;  %v2772_v17 = vld [vmem:[#allocation9 + $0x18] sm:$0xff] }
 0x629   :  { %2633 = vmatprep.subr.bf16.mxu0 %v2496_v40  ;;  %2674 = vmatprep.subr.bf16.mxu1 %v2498_v6 }
 0x62c   :  { %2634 = vmatpush1.bf16.msra.mxu0 %v2495_v11  ;;  %2675 = vmatpush1.bf16.msra.mxu1 %v2497_v44 }
 0x62d   :  { %2635 = vmatprep.subr.bf16.mxu0 %v2500_v36  ;;  %2676 = vmatprep.subr.bf16.mxu1 %v2502_v47 }
 0x630   :  { %2636 = vmatpush1.bf16.msra.mxu0 %v2499_v10  ;;  %2677 = vmatpush1.bf16.msra.mxu1 %v2501_v7 }
 0x631   :  { %2637 = vmatprep.subr.bf16.mxu0 %v2504_v3  ;;  %2678 = vmatprep.subr.bf16.mxu1 %v2506_v21 }
 0x634   :  { %2638 = vmatpush1.bf16.msra.mxu0 %v2503_v1  ;;  %2679 = vmatpush1.bf16.msra.mxu1 %v2505_v15 }
 0x635   :  { %2639 = vmatprep.subr.bf16.mxu0 %v2508_v51  ;;  %2680 = vmatprep.subr.bf16.mxu1 %v2510_v0 }
 0x638   :  { %2640 = vmatpush1.bf16.msra.mxu0 %v2507_v50  ;;  %2681 = vmatpush1.bf16.msra.mxu1 %v2509_v22 }
 0x639   :  { %2801 = vmatprep.subr.bf16.mxu0 %v2770_v49  ;;  %2842 = vmatprep.subr.bf16.mxu1 %v2772_v17 }
 0x6cd   :  { %v2402_v40 = vpop.f32.mrb[36].mxu0  ;;  %v2443_v6 = vpop.f32.mrb[68].mxu1 }
 0x6ce   :  { %v2403_v11 = vadd.f32 %v2402_v40, %v11619_v32  ;;  %v2444_v44 = vadd.f32 %v2443_v6, %v11621_v16  ;;  %v2404_v36 = vpop.f32.mrb[37].mxu0  ;;  %v2445_v47 = vpop.f32.mrb[69].mxu1 }
 0x6cf   :  { %v2405_v10 = vadd.f32 %v2404_v36, %v11623_v5  ;;  %v2446_v7 = vadd.f32 %v2445_v47, %v11625_v46  ;;  %v2406_v3 = vpop.f32.mrb[38].mxu0  ;;  %v2447_v21 = vpop.f32.mrb[70].mxu1 }
 0x6d0   :  { %v2450_v1 = vadd.f32 %v2403_v11, %v11413_v52  ;;  %v2407_v15 = vpop.f32.mrb[39].mxu0  ;;  %v2448_v51 = vpop.f32.mrb[71].mxu1  ;;  %v2452_v49 = vadd.f32 %v2444_v44, %v11425_v60 }
 0x6d1   :  { %v2451_v0 = vadd.f32 %v2405_v10, %v11419_v55  ;;  %v2453_v32 = vadd.f32 %v2446_v7, %v11431_v63 }
 0x6d2   :  { %v9773_v50 = vmul.f32 -1.442695, %v2450_v1 }
 0x6d3   :  { %v9774_v22 = vmul.f32 -1.442695, %v2451_v0  ;;  %v9775_v16 = vmul.f32 -1.442695, %v2453_v32 }
 0x6d4   :  { %10628 = vpow2.f32 %v9773_v50 }
 0x6d5   :  { %10630 = vpow2.f32 %v9774_v22 }
 0x6d6   :  { %10632 = vpow2.f32 %v9775_v16 }
 0x6d7   :  { %10634 = vtanh.f32 %v2452_v49 }
 0x6de   :  { %v10629_v5 = vpop.eup %10628 }
 0x6df   :  { %v10631_v17 = vpop.eup %10630  ;;  %v2457_v46 = vadd.f32 1.0, %v10629_v5 }
 0x6e0   :  { %v2463_v40 = vadd.f32 1.0, %v10631_v17  ;;  %v10633_v6 = vpop.eup %10632 }
 0x6e1   :  { %10636 = vrcp.f32 %v2457_v46  ;;  %v10635_v11 = vpop.eup %10634  ;;  %v2470_v3 = vadd.f32 1.0, %v10633_v6  ;;  %v2771_v6 = vld [vmem:[#allocation9 + $0x10] sm:$0xff] }
 0x6e2   :  { %10638 = vrcp.f32 %v2463_v40  ;;  %v2769_v40 = vld [vmem:[#allocation9] sm:$0xff] }
 0x6e3   :  { %10640 = vrcp.f32 %v2470_v3  ;;  %v2780_v3 = vld [vmem:[#allocation9 + $0x58] sm:$0xff] }
 0x6eb   :  { %v10637_v36 = vpop.eup %10636 }
 0x6ec   :  { %v10639_v47 = vpop.eup %10638  ;;  %v2474_v10 = vmul.f32 %v10637_v36, %v10635_v11  ;;  %v2774_v11 = vld [vmem:[#allocation9 + $0x28] sm:$0xff]  ;;  %v2776_v36 = vld [vmem:[#allocation9 + $0x38] sm:$0xff] }
 0x6ed   :  { %v2473_v21 = vmul.f32 %v10639_v47, %v11547_v24  ;;  %v11647_v7 = vpop.f32.mrb[40].mxu0  ;;  %v11649_v1 = vpop.f32.mrb[72].mxu1  ;;  %v1888_v24 = vadd.f32 %v11605_v28, %v11435_v9  ;;  %v2773_v28 = vld [vmem:[#allocation9 + $0x20] sm:$0xff]  ;;  %v2775_v47 = vld [vmem:[#allocation9 + $0x30] sm:$0xff] }
 0x6ee   :  { %v11651_v44 = vpop.f32.mrb[41].mxu0  ;;  %v11653_v15 = vpop.f32.mrb[73].mxu1 }
 0x6ef   :  { %v11655_v51 = vadd.f32 %v2474_v10, %v2473_v21  ;;  %v2581_v0 = vpop.f32.mrb[42].mxu0  ;;  %v2622_v50 = vpop.f32.mrb[74].mxu1  ;;  %v9737_v49 = vmul.f32 -1.442695, %v1888_v24  ;;  %v2778_v10 = vld [vmem:[#allocation9 + $0x48] sm:$0xff]  ;;  %v2777_v21 = vld [vmem:[#allocation9 + $0x40] sm:$0xff] }
 0x6f0   :  { %v2582_v22 = vpop.f32.mrb[43].mxu0  ;;  %v2623_v32 = vpop.f32.mrb[75].mxu1  ;;  %v2779_v0 = vld [vmem:[#allocation9 + $0x50] sm:$0xff]  ;;  %v2782_v50 = vld [vmem:[#allocation9 + $0x68] sm:$0xff]  ;;  %v2781_v24 = vld [vmem:[#allocation9 + $0x60] sm:$0xff] }
 0x6f1   :  { %10642 = vtanh.f32 %v11655_v51  ;;  %v10641_v16 = vpop.eup %10640  ;;  %v2784_v22 = vld [vmem:[#allocation9 + $0x78] sm:$0xff] }
 0x6f2   :  { %10644 = vpow2.f32 %v9737_v49 }
 0x6f3   :  { %10646 = vtanh.f32 %v11611_v4 }
 0x6fb   :  { %v10643_v5 = vpop.eup %10642 }
 0x6fc   :  { %v2477_v17 = vmul.f32 %v10643_v5, %v10641_v16  ;;  %v10645_v32 = vpop.eup %10644  ;;  %v2783_v16 = vld [vmem:[#allocation9 + $0x70] sm:$0xff]  ;;  %v2786_v5 = vld [vmem:[#allocation9 + $0x88] sm:$0xff] }
 0x6fd   :  { %v1905_v49 = vadd.f32 1.0, %v10645_v32  ;;  %v2800_v32 = vld [vmem:[#allocation9 + $0xf8] sm:$0xff] }
 0x6fe   :  { %v11660_v46 = vpack.c.bf16 %v2477_v17, %v2477_v17  ;;  %v2788_v17 = vld [vmem:[#allocation9 + $0x98] sm:$0xff] }
 0x6ff   :  { %10648 = vrcp.f32 %v1905_v49  ;;  %v2799_v49 = vld [vmem:[#allocation9 + $0xf0] sm:$0xff] }
 0x700   :  { %2658 = vmatmul.mubr.bf16.vlgmr.msra.gmra.mrb[44].mxu0 %v11660_v46  ;;  %2699 = vmatmul.mubr.bf16.vlgmr.msra.gmra.mrb[76].mxu1 %v11660_v46 }
 0x701   :  { %2802 = vmatpush1.bf16.msra.mxu0 %v2769_v40  ;;  %2843 = vmatpush1.bf16.msra.mxu1 %v2771_v6  ;;  %v2785_v40 = vld [vmem:[#allocation9 + $0x80] sm:$0xff]  ;;  %v2787_v6 = vld [vmem:[#allocation9 + $0x90] sm:$0xff] }
 0x702   :  { %2803 = vmatprep.subr.bf16.mxu0 %v2774_v11  ;;  %2844 = vmatprep.subr.bf16.mxu1 %v2776_v36  ;;  %v2790_v11 = vld [vmem:[#allocation9 + $0xa8] sm:$0xff]  ;;  %v2792_v36 = vld [vmem:[#allocation9 + $0xb8] sm:$0xff] }
 0x703   :  { %2833 = vmatprep.mubr.bf16.mxu0 %v12400_v18  ;;  %2874 = vmatprep.mubr.bf16.mxu1 %v12400_v18 }
 0x705   :  { %2804 = vmatpush1.bf16.msra.mxu0 %v2773_v28  ;;  %2845 = vmatpush1.bf16.msra.mxu1 %v2775_v47  ;;  %v2789_v28 = vld [vmem:[#allocation9 + $0xa0] sm:$0xff]  ;;  %v2791_v47 = vld [vmem:[#allocation9 + $0xb0] sm:$0xff] }
 0x706   :  { %2805 = vmatprep.subr.bf16.mxu0 %v2778_v10  ;;  %2846 = vmatprep.subr.bf16.mxu1 %v2780_v3  ;;  %v2794_v10 = vld [vmem:[#allocation9 + $0xc8] sm:$0xff]  ;;  %v2796_v3 = vld [vmem:[#allocation9 + $0xd8] sm:$0xff] }
 0x709   :  { %2806 = vmatpush1.bf16.msra.mxu0 %v2777_v21  ;;  %2847 = vmatpush1.bf16.msra.mxu1 %v2779_v0  ;;  %v2793_v21 = vld [vmem:[#allocation9 + $0xc0] sm:$0xff]  ;;  %v2795_v0 = vld [vmem:[#allocation9 + $0xd0] sm:$0xff] }
 0x70a   :  { %2807 = vmatprep.subr.bf16.mxu0 %v2782_v50  ;;  %2848 = vmatprep.subr.bf16.mxu1 %v2784_v22  ;;  %v10647_v50 = vpop.eup %10646  ;;  %v2798_v22 = vld [vmem:[#allocation9 + $0xe8] sm:$0xff] }
 0x70d   :  { %2808 = vmatpush1.bf16.msra.mxu0 %v2781_v24  ;;  %2849 = vmatpush1.bf16.msra.mxu1 %v2783_v16  ;;  %v10649_v24 = vpop.eup %10648  ;;  %v2797_v16 = vld [vmem:[#allocation9 + $0xe0] sm:$0xff] }
 0x70e   :  { %2809 = vmatprep.subr.bf16.mxu0 %v2786_v5  ;;  %2850 = vmatprep.subr.bf16.mxu1 %v2788_v17  ;;  %v11667_v5 = vmul.f32 %v10649_v24, %v10647_v50  ;;  %v2744_v50 = vld [vmem:[#allocation8 + $0x40] sm:$0xff]  ;;  %v2751_v24 = vld [vmem:[#allocation8 + $0x78] sm:$0xff] }
 0x710   :  { %v2768_v17 = vpack.c.bf16 %v11667_v5, %v11667_v5 }
 0x711   :  { %2810 = vmatpush1.bf16.msra.mxu0 %v2785_v40  ;;  %2851 = vmatpush1.bf16.msra.mxu1 %v2787_v6  ;;  %v2737_v40 = vld [vmem:[#allocation8 + $0x8] sm:$0xff]  ;;  %v2739_v6 = vld [vmem:[#allocation8 + $0x18] sm:$0xff] }
 0x712   :  { %2811 = vmatprep.subr.bf16.mxu0 %v2790_v11  ;;  %2852 = vmatprep.subr.bf16.mxu1 %v2792_v36  ;;  %v2736_v11 = vld [vmem:[#allocation8] sm:$0xff]  ;;  %v2738_v36 = vld [vmem:[#allocation8 + $0x10] sm:$0xff] }
 0x715   :  { %2812 = vmatpush1.bf16.msra.mxu0 %v2789_v28  ;;  %2853 = vmatpush1.bf16.msra.mxu1 %v2791_v47  ;;  %v2741_v28 = vld [vmem:[#allocation8 + $0x28] sm:$0xff]  ;;  %v2743_v47 = vld [vmem:[#allocation8 + $0x38] sm:$0xff] }
 0x716   :  { %2813 = vmatprep.subr.bf16.mxu0 %v2794_v10  ;;  %2854 = vmatprep.subr.bf16.mxu1 %v2796_v3  ;;  %v2740_v10 = vld [vmem:[#allocation8 + $0x20] sm:$0xff]  ;;  %v2742_v3 = vld [vmem:[#allocation8 + $0x30] sm:$0xff] }
 0x719   :  { %2814 = vmatpush1.bf16.msra.mxu0 %v2793_v21  ;;  %2855 = vmatpush1.bf16.msra.mxu1 %v2795_v0  ;;  %v2745_v21 = vld [vmem:[#allocation8 + $0x48] sm:$0xff]  ;;  %v2747_v0 = vld [vmem:[#allocation8 + $0x58] sm:$0xff] }
 0x71a   :  { %2815 = vmatprep.subr.bf16.mxu0 %v2798_v22  ;;  %2856 = vmatprep.subr.bf16.mxu1 %v2800_v32  ;;  %v2746_v22 = vld [vmem:[#allocation8 + $0x50] sm:$0xff]  ;;  %v2749_v32 = vld [vmem:[#allocation8 + $0x68] sm:$0xff] }
 0x71d   :  { %2816 = vmatpush1.bf16.msra.mxu0 %v2797_v16  ;;  %2857 = vmatpush1.bf16.msra.mxu1 %v2799_v49  ;;  %v2748_v16 = vld [vmem:[#allocation8 + $0x60] sm:$0xff]  ;;  %v2750_v49 = vld [vmem:[#allocation8 + $0x70] sm:$0xff] }
 0x71e   :  { %2883 = vmatprep.subr.bf16.mxu0 %v2737_v40  ;;  %2924 = vmatprep.subr.bf16.mxu1 %v2739_v6  ;;  %v2755_v40 = vld [vmem:[#allocation8 + $0x98] sm:$0xff]  ;;  %v2752_v6 = vld [vmem:[#allocation8 + $0x80] sm:$0xff] }
 0x720   :  { %2834 = vmatmul.mubr.bf16.vlgmr.msra.gmra.mrb[48].mxu0 %v2768_v17  ;;  %2875 = vmatmul.mubr.bf16.vlgmr.msra.gmra.mrb[80].mxu1 %v2768_v17  ;;  %v2753_v17 = vld [vmem:[#allocation8 + $0x88] sm:$0xff] }
 0x721   :  { %2915 = vmatprep.mubr.bf16.mxu0 %v12400_v18  ;;  %2956 = vmatprep.mubr.bf16.mxu1 %v12400_v18 }
 0x722   :  { %2884 = vmatpush1.bf16.msra.mxu0 %v2736_v11  ;;  %2925 = vmatpush1.bf16.msra.mxu1 %v2738_v36  ;;  %v2754_v11 = vld [vmem:[#allocation8 + $0x90] sm:$0xff]  ;;  %v2757_v36 = vld [vmem:[#allocation8 + $0xa8] sm:$0xff] }
 0x723   :  { %2885 = vmatprep.subr.bf16.mxu0 %v2741_v28  ;;  %2926 = vmatprep.subr.bf16.mxu1 %v2743_v47  ;;  %v2759_v28 = vld [vmem:[#allocation8 + $0xb8] sm:$0xff]  ;;  %v2756_v47 = vld [vmem:[#allocation8 + $0xa0] sm:$0xff] }
 0x726   :  { %2886 = vmatpush1.bf16.msra.mxu0 %v2740_v10  ;;  %2927 = vmatpush1.bf16.msra.mxu1 %v2742_v3  ;;  %v2758_v10 = vld [vmem:[#allocation8 + $0xb0] sm:$0xff]  ;;  %v2761_v3 = vld [vmem:[#allocation8 + $0xc8] sm:$0xff] }
 0x727   :  { %2887 = vmatprep.subr.bf16.mxu0 %v2745_v21  ;;  %2928 = vmatprep.subr.bf16.mxu1 %v2747_v0  ;;  %v2763_v21 = vld [vmem:[#allocation8 + $0xd8] sm:$0xff]  ;;  %v2760_v0 = vld [vmem:[#allocation8 + $0xc0] sm:$0xff] }
 0x72a   :  { %2888 = vmatpush1.bf16.msra.mxu0 %v2744_v50  ;;  %2929 = vmatpush1.bf16.msra.mxu1 %v2746_v22  ;;  %v2762_v50 = vld [vmem:[#allocation8 + $0xd0] sm:$0xff]  ;;  %v2765_v22 = vld [vmem:[#allocation8 + $0xe8] sm:$0xff] }
 0x72b   :  { %2889 = vmatprep.subr.bf16.mxu0 %v2749_v32  ;;  %2930 = vmatprep.subr.bf16.mxu1 %v2751_v24  ;;  %v2767_v32 = vld [vmem:[#allocation8 + $0xf8] sm:$0xff]  ;;  %v2764_v24 = vld [vmem:[#allocation8 + $0xe0] sm:$0xff] }
 0x72e   :  { %2890 = vmatpush1.bf16.msra.mxu0 %v2748_v16  ;;  %2931 = vmatpush1.bf16.msra.mxu1 %v2750_v49  ;;  %v2766_v16 = vld [vmem:[#allocation8 + $0xf0] sm:$0xff] }
 0x72f   :  { %2891 = vmatprep.subr.bf16.mxu0 %v2753_v17  ;;  %2932 = vmatprep.subr.bf16.mxu1 %v2755_v40  ;;  %v10268_v49 = vld [vmem:[#allocation14 + $0x4] ss:$16 sps:$4 sm:$0xff]   ;;  %v10271_v17 = vld [vmem:[#allocation14 + $0xc] ss:$16 sps:$4 sm:$0xff]  }
 0x732   :  { %2892 = vmatpush1.bf16.msra.mxu0 %v2752_v6  ;;  %2933 = vmatpush1.bf16.msra.mxu1 %v2754_v11 }
 0x733   :  { %2893 = vmatprep.subr.bf16.mxu0 %v2757_v36  ;;  %2934 = vmatprep.subr.bf16.mxu1 %v2759_v28 }
 0x736   :  { %2894 = vmatpush1.bf16.msra.mxu0 %v2756_v47  ;;  %2935 = vmatpush1.bf16.msra.mxu1 %v2758_v10 }
 0x737   :  { %2895 = vmatprep.subr.bf16.mxu0 %v2761_v3  ;;  %2936 = vmatprep.subr.bf16.mxu1 %v2763_v21 }
 0x73a   :  { %2896 = vmatpush1.bf16.msra.mxu0 %v2760_v0  ;;  %2937 = vmatpush1.bf16.msra.mxu1 %v2762_v50 }
 0x73b   :  { %2897 = vmatprep.subr.bf16.mxu0 %v2765_v22  ;;  %2938 = vmatprep.subr.bf16.mxu1 %v2767_v32 }
 0x73e   :  { %2898 = vmatpush1.bf16.msra.mxu0 %v2764_v24  ;;  %2939 = vmatpush1.bf16.msra.mxu1 %v2766_v16 }
 0x73f   :  { %3192 = vmatprep.subr.bf16.mxu0 %v10268_v49  ;;  %3233 = vmatprep.subr.bf16.mxu1 %v10271_v17 }
 0x7d3   :  { %v2659_v40 = vpop.f32.mrb[44].mxu0  ;;  %v2700_v6 = vpop.f32.mrb[76].mxu1 }
 0x7d4   :  { %v2660_v11 = vadd.f32 %v2659_v40, %v11647_v7  ;;  %v2701_v36 = vadd.f32 %v2700_v6, %v11649_v1  ;;  %v2661_v28 = vpop.f32.mrb[45].mxu0  ;;  %v2702_v47 = vpop.f32.mrb[77].mxu1 }
 0x7d5   :  { %v2662_v10 = vadd.f32 %v2661_v28, %v11651_v44  ;;  %v2703_v3 = vadd.f32 %v2702_v47, %v11653_v15  ;;  %v2663_v21 = vpop.f32.mrb[46].mxu0  ;;  %v2704_v0 = vpop.f32.mrb[78].mxu1 }
 0x7d6   :  { %v2707_v50 = vadd.f32 %v2660_v11, %v11415_v53  ;;  %v2664_v22 = vpop.f32.mrb[47].mxu0  ;;  %v2705_v32 = vpop.f32.mrb[79].mxu1  ;;  %v2709_v17 = vadd.f32 %v2701_v36, %v11427_v61 }
 0x7d7   :  { %v2708_v24 = vadd.f32 %v2662_v10, %v11421_v56  ;;  %v2710_v7 = vadd.f32 %v2703_v3, %v11433_v8 }
 0x7d8   :  { %v9776_v16 = vmul.f32 -1.442695, %v2707_v50 }
 0x7d9   :  { %v9777_v49 = vmul.f32 -1.442695, %v2708_v24  ;;  %v9778_v1 = vmul.f32 -1.442695, %v2710_v7 }
 0x7da   :  { %10650 = vpow2.f32 %v9776_v16 }
 0x7db   :  { %10652 = vpow2.f32 %v9777_v49 }
 0x7dc   :  { %10654 = vpow2.f32 %v9778_v1 }
 0x7dd   :  { %10656 = vtanh.f32 %v2709_v17 }
 0x7e4   :  { %v10651_v44 = vpop.eup %10650 }
 0x7e5   :  { %v10653_v40 = vpop.eup %10652  ;;  %v2714_v15 = vadd.f32 1.0, %v10651_v44 }
 0x7e6   :  { %v2720_v6 = vadd.f32 1.0, %v10653_v40  ;;  %v10655_v11 = vpop.eup %10654  ;;  %v10266_v40 = vld [vmem:[#allocation14] ss:$16 sps:$4 sm:$0xff]  }
 0x7e7   :  { %10658 = vrcp.f32 %v2714_v15  ;;  %v10657_v28 = vpop.eup %10656  ;;  %v2727_v0 = vadd.f32 1.0, %v10655_v11  ;;  %v10269_v15 = vld [vmem:[#allocation14 + $0x8] ss:$16 sps:$4 sm:$0xff]   ;;  %v10274_v11 = vld [vmem:[#allocation14 + $0x24] ss:$16 sps:$4 sm:$0xff]  }
 0x7e8   :  { %10660 = vrcp.f32 %v2720_v6 }
 0x7e9   :  { %10662 = vrcp.f32 %v2727_v0  ;;  %v10283_v0 = vld [vmem:[#allocation14 + $0x4c] ss:$16 sps:$4 sm:$0xff]  }
 0x7f1   :  { %v10659_v47 = vpop.eup %10658 }
 0x7f2   :  { %v10661_v10 = vpop.eup %10660  ;;  %v2731_v21 = vmul.f32 %v10659_v47, %v10657_v28  ;;  %v10277_v28 = vld [vmem:[#allocation14 + $0x2c] ss:$16 sps:$4 sm:$0xff]   ;;  %v10272_v47 = vld [vmem:[#allocation14 + $0x20] ss:$16 sps:$4 sm:$0xff]  }
 0x7f3   :  { %v2730_v50 = vmul.f32 %v10661_v10, %v11576_v2  ;;  %v11682_v3 = vpop.f32.mrb[48].mxu0  ;;  %v11684_v22 = vpop.f32.mrb[80].mxu1  ;;  %v10275_v10 = vld [vmem:[#allocation14 + $0x28] ss:$16 sps:$4 sm:$0xff]  }
 0x7f4   :  { %v11686_v36 = vpop.f32.mrb[49].mxu0  ;;  %v11688_v32 = vpop.f32.mrb[81].mxu1 }
 0x7f5   :  { %v11690_v24 = vadd.f32 %v2731_v21, %v2730_v50  ;;  %v2839_v16 = vpop.f32.mrb[50].mxu0  ;;  %v2880_v49 = vpop.f32.mrb[82].mxu1  ;;  %v10280_v21 = vld [vmem:[#allocation14 + $0x44] ss:$16 sps:$4 sm:$0xff]   ;;  %v10278_v50 = vld [vmem:[#allocation14 + $0x40] ss:$16 sps:$4 sm:$0xff]  }
 0x7f6   :  { %v2840_v7 = vpop.f32.mrb[51].mxu0  ;;  %v2881_v1 = vpop.f32.mrb[83].mxu1  ;;  %v10281_v16 = vld [vmem:[#allocation14 + $0x48] ss:$16 sps:$4 sm:$0xff]   ;;  %v10286_v49 = vld [vmem:[#allocation14 + $0x64] ss:$16 sps:$4 sm:$0xff]  }
 0x7f7   :  { %10664 = vtanh.f32 %v11690_v24  ;;  %v10663_v17 = vpop.eup %10662  ;;  %v10289_v7 = vld [vmem:[#allocation14 + $0x6c] ss:$16 sps:$4 sm:$0xff]   ;;  %v10284_v1 = vld [vmem:[#allocation14 + $0x60] ss:$16 sps:$4 sm:$0xff]  }
 0x801   :  { %v10665_v44 = vpop.eup %10664 }
 0x802   :  { %v2734_v2 = vmul.f32 %v10665_v44, %v10663_v17  ;;  %v10287_v17 = vld [vmem:[#allocation14 + $0x68] ss:$16 sps:$4 sm:$0xff]   ;;  %v10292_v44 = vld [vmem:[#allocation14 + $0x84] ss:$16 sps:$4 sm:$0xff]  }
 0x804   :  { %v11693_v6 = vpack.c.bf16 %v2734_v2, %v2734_v2  ;;  %v10295_v2 = vld [vmem:[#allocation14 + $0x8c] ss:$16 sps:$4 sm:$0xff]  }
 0x806   :  { %2916 = vmatmul.mubr.bf16.vlgmr.msra.gmra.mrb[52].mxu0 %v11693_v6  ;;  %2957 = vmatmul.mubr.bf16.vlgmr.msra.gmra.mrb[84].mxu1 %v11693_v6 }
 0x807   :  { %3193 = vmatpush1.bf16.msra.mxu0 %v10266_v40  ;;  %3234 = vmatpush1.bf16.msra.mxu1 %v10269_v15  ;;  %v10290_v40 = vld [vmem:[#allocation14 + $0x80] ss:$16 sps:$4 sm:$0xff]   ;;  %v10293_v15 = vld [vmem:[#allocation14 + $0x88] ss:$16 sps:$4 sm:$0xff]  }
 0x808   :  { %3194 = vmatprep.subr.bf16.mxu0 %v10274_v11  ;;  %3235 = vmatprep.subr.bf16.mxu1 %v10277_v28  ;;  %v10298_v11 = vld [vmem:[#allocation14 + $0xa4] ss:$16 sps:$4 sm:$0xff]   ;;  %v10301_v28 = vld [vmem:[#allocation14 + $0xac] ss:$16 sps:$4 sm:$0xff]  }
 0x809   :  { %3224 = vmatprep.mubr.bf16.mxu0 %v12400_v18  ;;  %3265 = vmatprep.mubr.bf16.mxu1 %v12400_v18 }
 0x80b   :  { %3195 = vmatpush1.bf16.msra.mxu0 %v10272_v47  ;;  %3236 = vmatpush1.bf16.msra.mxu1 %v10275_v10  ;;  %v10296_v47 = vld [vmem:[#allocation14 + $0xa0] ss:$16 sps:$4 sm:$0xff]   ;;  %v10299_v10 = vld [vmem:[#allocation14 + $0xa8] ss:$16 sps:$4 sm:$0xff]  }
 0x80c   :  { %3196 = vmatprep.subr.bf16.mxu0 %v10280_v21  ;;  %3237 = vmatprep.subr.bf16.mxu1 %v10283_v0  ;;  %v10304_v21 = vld [vmem:[#allocation14 + $0xc4] ss:$16 sps:$4 sm:$0xff]   ;;  %v10307_v0 = vld [vmem:[#allocation14 + $0xcc] ss:$16 sps:$4 sm:$0xff]  }
 0x80f   :  { %3197 = vmatpush1.bf16.msra.mxu0 %v10278_v50  ;;  %3238 = vmatpush1.bf16.msra.mxu1 %v10281_v16  ;;  %v10302_v50 = vld [vmem:[#allocation14 + $0xc0] ss:$16 sps:$4 sm:$0xff]   ;;  %v10305_v16 = vld [vmem:[#allocation14 + $0xc8] ss:$16 sps:$4 sm:$0xff]  }
 0x810   :  { %3198 = vmatprep.subr.bf16.mxu0 %v10286_v49  ;;  %3239 = vmatprep.subr.bf16.mxu1 %v10289_v7  ;;  %v10310_v49 = vld [vmem:[#allocation14 + $0xe4] ss:$16 sps:$4 sm:$0xff]   ;;  %v10313_v7 = vld [vmem:[#allocation14 + $0xec] ss:$16 sps:$4 sm:$0xff]  }
 0x813   :  { %3199 = vmatpush1.bf16.msra.mxu0 %v10284_v1  ;;  %3240 = vmatpush1.bf16.msra.mxu1 %v10287_v17  ;;  %v10308_v1 = vld [vmem:[#allocation14 + $0xe0] ss:$16 sps:$4 sm:$0xff]   ;;  %v10311_v17 = vld [vmem:[#allocation14 + $0xe8] ss:$16 sps:$4 sm:$0xff]  }
 0x814   :  { %3200 = vmatprep.subr.bf16.mxu0 %v10292_v44  ;;  %3241 = vmatprep.subr.bf16.mxu1 %v10295_v2  ;;  %v3336_v44 = vld [vmem:[#allocation5 + $0x8] sm:$0xff]  ;;  %v3338_v2 = vld [vmem:[#allocation5 + $0x18] sm:$0xff] }
 0x817   :  { %3201 = vmatpush1.bf16.msra.mxu0 %v10290_v40  ;;  %3242 = vmatpush1.bf16.msra.mxu1 %v10293_v15  ;;  %v3335_v40 = vld [vmem:[#allocation5] sm:$0xff]  ;;  %v3337_v15 = vld [vmem:[#allocation5 + $0x10] sm:$0xff] }
 0x818   :  { %3202 = vmatprep.subr.bf16.mxu0 %v10298_v11  ;;  %3243 = vmatprep.subr.bf16.mxu1 %v10301_v28  ;;  %v3340_v11 = vld [vmem:[#allocation5 + $0x28] sm:$0xff]  ;;  %v3342_v28 = vld [vmem:[#allocation5 + $0x38] sm:$0xff] }
 0x81b   :  { %3203 = vmatpush1.bf16.msra.mxu0 %v10296_v47  ;;  %3244 = vmatpush1.bf16.msra.mxu1 %v10299_v10  ;;  %v3339_v47 = vld [vmem:[#allocation5 + $0x20] sm:$0xff]  ;;  %v3341_v10 = vld [vmem:[#allocation5 + $0x30] sm:$0xff] }
 0x81c   :  { %3204 = vmatprep.subr.bf16.mxu0 %v10304_v21  ;;  %3245 = vmatprep.subr.bf16.mxu1 %v10307_v0  ;;  %v3344_v21 = vld [vmem:[#allocation5 + $0x48] sm:$0xff]  ;;  %v3346_v0 = vld [vmem:[#allocation5 + $0x58] sm:$0xff] }
 0x81f   :  { %3205 = vmatpush1.bf16.msra.mxu0 %v10302_v50  ;;  %3246 = vmatpush1.bf16.msra.mxu1 %v10305_v16  ;;  %v3343_v50 = vld [vmem:[#allocation5 + $0x40] sm:$0xff]  ;;  %v3345_v16 = vld [vmem:[#allocation5 + $0x50] sm:$0xff] }
 0x820   :  { %3206 = vmatprep.subr.bf16.mxu0 %v10310_v49  ;;  %3247 = vmatprep.subr.bf16.mxu1 %v10313_v7  ;;  %v3348_v49 = vld [vmem:[#allocation5 + $0x68] sm:$0xff]  ;;  %v3347_v7 = vld [vmem:[#allocation5 + $0x60] sm:$0xff] }
 0x823   :  { %3207 = vmatpush1.bf16.msra.mxu0 %v10308_v1  ;;  %3248 = vmatpush1.bf16.msra.mxu1 %v10311_v17  ;;  %v3349_v1 = vld [vmem:[#allocation5 + $0x70] sm:$0xff]  ;;  %v3352_v17 = vld [vmem:[#allocation5 + $0x88] sm:$0xff] }
 0x824   :  { %3367 = vmatprep.subr.bf16.mxu0 %v3336_v44  ;;  %3408 = vmatprep.subr.bf16.mxu1 %v3338_v2  ;;  %v3354_v44 = vld [vmem:[#allocation5 + $0x98] sm:$0xff]  ;;  %v3351_v2 = vld [vmem:[#allocation5 + $0x80] sm:$0xff] }
 0x826   :  { %3225 = vmatmul.mubr.bf16.vlgmr.msra.gmra.mrb[56].mxu0 %v11628_v19  ;;  %3266 = vmatmul.mubr.bf16.vlgmr.msra.gmra.mrb[88].mxu1 %v11628_v19  ;;  %v3350_v19 = vld [vmem:[#allocation5 + $0x78] sm:$0xff] }
 0x827   :  { %3368 = vmatpush1.bf16.msra.mxu0 %v3335_v40  ;;  %3409 = vmatpush1.bf16.msra.mxu1 %v3337_v15  ;;  %v3353_v40 = vld [vmem:[#allocation5 + $0x90] sm:$0xff]  ;;  %v3356_v15 = vld [vmem:[#allocation5 + $0xa8] sm:$0xff] }
 0x828   :  { %3369 = vmatprep.subr.bf16.mxu0 %v3340_v11  ;;  %3410 = vmatprep.subr.bf16.mxu1 %v3342_v28  ;;  %v3358_v11 = vld [vmem:[#allocation5 + $0xb8] sm:$0xff]  ;;  %v3355_v28 = vld [vmem:[#allocation5 + $0xa0] sm:$0xff] }
 0x829   :  { %3399 = vmatprep.mubr.bf16.mxu0 %v12400_v18  ;;  %3440 = vmatprep.mubr.bf16.mxu1 %v12400_v18 }
 0x82b   :  { %3370 = vmatpush1.bf16.msra.mxu0 %v3339_v47  ;;  %3411 = vmatpush1.bf16.msra.mxu1 %v3341_v10  ;;  %v3357_v47 = vld [vmem:[#allocation5 + $0xb0] sm:$0xff]  ;;  %v3360_v10 = vld [vmem:[#allocation5 + $0xc8] sm:$0xff] }
 0x82c   :  { %3371 = vmatprep.subr.bf16.mxu0 %v3344_v21  ;;  %3412 = vmatprep.subr.bf16.mxu1 %v3346_v0  ;;  %v3362_v21 = vld [vmem:[#allocation5 + $0xd8] sm:$0xff]  ;;  %v3359_v0 = vld [vmem:[#allocation5 + $0xc0] sm:$0xff] }
 0x82f   :  { %3372 = vmatpush1.bf16.msra.mxu0 %v3343_v50  ;;  %3413 = vmatpush1.bf16.msra.mxu1 %v3345_v16  ;;  %v3361_v50 = vld [vmem:[#allocation5 + $0xd0] sm:$0xff]  ;;  %v3364_v16 = vld [vmem:[#allocation5 + $0xe8] sm:$0xff] }
 0x830   :  { %3373 = vmatprep.subr.bf16.mxu0 %v3348_v49  ;;  %3414 = vmatprep.subr.bf16.mxu1 %v3350_v19  ;;  %v3366_v49 = vld [vmem:[#allocation5 + $0xf8] sm:$0xff]  ;;  %v3363_v19 = vld [vmem:[#allocation5 + $0xe0] sm:$0xff] }
 0x833   :  { %3374 = vmatpush1.bf16.msra.mxu0 %v3347_v7  ;;  %3415 = vmatpush1.bf16.msra.mxu1 %v3349_v1  ;;  %v3365_v7 = vld [vmem:[#allocation5 + $0xf0] sm:$0xff]  ;;  %v3304_v1 = vld [vmem:[#allocation4 + $0x8] sm:$0xff] }
 0x834   :  { %3375 = vmatprep.subr.bf16.mxu0 %v3352_v17  ;;  %3416 = vmatprep.subr.bf16.mxu1 %v3354_v44  ;;  %v3306_v17 = vld [vmem:[#allocation4 + $0x18] sm:$0xff]  ;;  %v3303_v44 = vld [vmem:[#allocation4] sm:$0xff] }
 0x837   :  { %3376 = vmatpush1.bf16.msra.mxu0 %v3351_v2  ;;  %3417 = vmatpush1.bf16.msra.mxu1 %v3353_v40  ;;  %v3305_v2 = vld [vmem:[#allocation4 + $0x10] sm:$0xff]  ;;  %v3308_v40 = vld [vmem:[#allocation4 + $0x28] sm:$0xff] }
 0x838   :  { %3377 = vmatprep.subr.bf16.mxu0 %v3356_v15  ;;  %3418 = vmatprep.subr.bf16.mxu1 %v3358_v11  ;;  %v3310_v15 = vld [vmem:[#allocation4 + $0x38] sm:$0xff]  ;;  %v3307_v11 = vld [vmem:[#allocation4 + $0x20] sm:$0xff] }
 0x83b   :  { %3378 = vmatpush1.bf16.msra.mxu0 %v3355_v28  ;;  %3419 = vmatpush1.bf16.msra.mxu1 %v3357_v47  ;;  %v3309_v28 = vld [vmem:[#allocation4 + $0x30] sm:$0xff]  ;;  %v3314_v47 = vld [vmem:[#allocation4 + $0x58] sm:$0xff] }
 0x83c   :  { %3379 = vmatprep.subr.bf16.mxu0 %v3360_v10  ;;  %3420 = vmatprep.subr.bf16.mxu1 %v3362_v21  ;;  %v3311_v10 = vld [vmem:[#allocation4 + $0x40] sm:$0xff]  ;;  %v3313_v21 = vld [vmem:[#allocation4 + $0x50] sm:$0xff] }
 0x83f   :  { %3380 = vmatpush1.bf16.msra.mxu0 %v3359_v0  ;;  %3421 = vmatpush1.bf16.msra.mxu1 %v3361_v50  ;;  %v3316_v0 = vld [vmem:[#allocation4 + $0x68] sm:$0xff]  ;;  %v3318_v50 = vld [vmem:[#allocation4 + $0x78] sm:$0xff] }
 0x840   :  { %3381 = vmatprep.subr.bf16.mxu0 %v3364_v16  ;;  %3422 = vmatprep.subr.bf16.mxu1 %v3366_v49  ;;  %v3315_v16 = vld [vmem:[#allocation4 + $0x60] sm:$0xff]  ;;  %v3317_v49 = vld [vmem:[#allocation4 + $0x70] sm:$0xff] }
 0x843   :  { %3382 = vmatpush1.bf16.msra.mxu0 %v3363_v19  ;;  %3423 = vmatpush1.bf16.msra.mxu1 %v3365_v7  ;;  %v3320_v19 = vld [vmem:[#allocation4 + $0x88] sm:$0xff]  ;;  %v3322_v7 = vld [vmem:[#allocation4 + $0x98] sm:$0xff] }
 0x844   :  { %3449 = vmatprep.subr.bf16.mxu0 %v3304_v1  ;;  %3490 = vmatprep.subr.bf16.mxu1 %v3306_v17  ;;  %v3319_v1 = vld [vmem:[#allocation4 + $0x80] sm:$0xff]  ;;  %v3321_v17 = vld [vmem:[#allocation4 + $0x90] sm:$0xff] }
 0x846   :  { %3400 = vmatmul.mubr.bf16.vlgmr.msra.gmra.mrb[60].mxu0 %v11660_v46  ;;  %3441 = vmatmul.mubr.bf16.vlgmr.msra.gmra.mrb[92].mxu1 %v11660_v46  ;;  %v3312_v46 = vld [vmem:[#allocation4 + $0x48] sm:$0xff] }
 0x847   :  { %3481 = vmatprep.mubr.bf16.mxu0 %v12400_v18  ;;  %3522 = vmatprep.mubr.bf16.mxu1 %v12400_v18 }
 0x848   :  { %3450 = vmatpush1.bf16.msra.mxu0 %v3303_v44  ;;  %3491 = vmatpush1.bf16.msra.mxu1 %v3305_v2  ;;  %v3324_v44 = vld [vmem:[#allocation4 + $0xa8] sm:$0xff]  ;;  %v3326_v2 = vld [vmem:[#allocation4 + $0xb8] sm:$0xff] }
 0x849   :  { %3451 = vmatprep.subr.bf16.mxu0 %v3308_v40  ;;  %3492 = vmatprep.subr.bf16.mxu1 %v3310_v15  ;;  %v3323_v40 = vld [vmem:[#allocation4 + $0xa0] sm:$0xff]  ;;  %v3325_v15 = vld [vmem:[#allocation4 + $0xb0] sm:$0xff] }
 0x84c   :  { %3452 = vmatpush1.bf16.msra.mxu0 %v3307_v11  ;;  %3493 = vmatpush1.bf16.msra.mxu1 %v3309_v28  ;;  %v3328_v11 = vld [vmem:[#allocation4 + $0xc8] sm:$0xff]  ;;  %v3330_v28 = vld [vmem:[#allocation4 + $0xd8] sm:$0xff] }
 0x84d   :  { %3453 = vmatprep.subr.bf16.mxu0 %v3312_v46  ;;  %3494 = vmatprep.subr.bf16.mxu1 %v3314_v47  ;;  %v3327_v46 = vld [vmem:[#allocation4 + $0xc0] sm:$0xff]  ;;  %v3329_v47 = vld [vmem:[#allocation4 + $0xd0] sm:$0xff] }
 0x850   :  { %3454 = vmatpush1.bf16.msra.mxu0 %v3311_v10  ;;  %3495 = vmatpush1.bf16.msra.mxu1 %v3313_v21  ;;  %v3332_v10 = vld [vmem:[#allocation4 + $0xe8] sm:$0xff]  ;;  %v3334_v21 = vld [vmem:[#allocation4 + $0xf8] sm:$0xff] }
 0x851   :  { %3455 = vmatprep.subr.bf16.mxu0 %v3316_v0  ;;  %3496 = vmatprep.subr.bf16.mxu1 %v3318_v50  ;;  %v3331_v0 = vld [vmem:[#allocation4 + $0xe0] sm:$0xff]  ;;  %v3333_v50 = vld [vmem:[#allocation4 + $0xf0] sm:$0xff] }
 0x854   :  { %3456 = vmatpush1.bf16.msra.mxu0 %v3315_v16  ;;  %3497 = vmatpush1.bf16.msra.mxu1 %v3317_v49  ;;  %v3593_v16 = vld [vmem:[#allocation7 + $0x8] sm:$0xff]  ;;  %v3595_v49 = vld [vmem:[#allocation7 + $0x18] sm:$0xff] }
 0x855   :  { %3457 = vmatprep.subr.bf16.mxu0 %v3320_v19  ;;  %3498 = vmatprep.subr.bf16.mxu1 %v3322_v7 }
 0x858   :  { %3458 = vmatpush1.bf16.msra.mxu0 %v3319_v1  ;;  %3499 = vmatpush1.bf16.msra.mxu1 %v3321_v17 }
 0x859   :  { %3459 = vmatprep.subr.bf16.mxu0 %v3324_v44  ;;  %3500 = vmatprep.subr.bf16.mxu1 %v3326_v2 }
 0x85c   :  { %3460 = vmatpush1.bf16.msra.mxu0 %v3323_v40  ;;  %3501 = vmatpush1.bf16.msra.mxu1 %v3325_v15 }
 0x85d   :  { %3461 = vmatprep.subr.bf16.mxu0 %v3328_v11  ;;  %3502 = vmatprep.subr.bf16.mxu1 %v3330_v28 }
 0x860   :  { %3462 = vmatpush1.bf16.msra.mxu0 %v3327_v46  ;;  %3503 = vmatpush1.bf16.msra.mxu1 %v3329_v47 }
 0x861   :  { %3463 = vmatprep.subr.bf16.mxu0 %v3332_v10  ;;  %3504 = vmatprep.subr.bf16.mxu1 %v3334_v21 }
 0x864   :  { %3464 = vmatpush1.bf16.msra.mxu0 %v3331_v0  ;;  %3505 = vmatpush1.bf16.msra.mxu1 %v3333_v50 }
 0x865   :  { %3624 = vmatprep.subr.bf16.mxu0 %v3593_v16  ;;  %3665 = vmatprep.subr.bf16.mxu1 %v3595_v49 }
 0x8d9   :  { %v2917_v19 = vpop.f32.mrb[52].mxu0  ;;  %v2958_v7 = vpop.f32.mrb[84].mxu1 }
 0x8da   :  { %v2918_v1 = vadd.f32 %v2917_v19, %v11682_v3  ;;  %v2959_v17 = vadd.f32 %v2958_v7, %v11684_v22  ;;  %v2919_v44 = vpop.f32.mrb[53].mxu0  ;;  %v2960_v2 = vpop.f32.mrb[85].mxu1 }
 0x8db   :  { %v2920_v40 = vadd.f32 %v2919_v44, %v11686_v36  ;;  %v11711_v15 = vadd.f32 %v2960_v2, %v11688_v32  ;;  %v2921_v11 = vpop.f32.mrb[54].mxu0  ;;  %v2962_v28 = vpop.f32.mrb[86].mxu1 }
 0x8dc   :  { %v2965_v46 = vadd.f32 %v2918_v1, %v11417_v54  ;;  %v2922_v47 = vpop.f32.mrb[55].mxu0  ;;  %v2963_v10 = vpop.f32.mrb[87].mxu1  ;;  %v2967_v3 = vadd.f32 %v2959_v17, %v11429_v62 }
 0x8dd   :  { %v2966_v21 = vadd.f32 %v2920_v40, %v11423_v57 }
 0x8de   :  { %v9779_v0 = vmul.f32 -1.442695, %v2965_v46 }
 0x8df   :  { %v9780_v50 = vmul.f32 -1.442695, %v2966_v21 }
 0x8e0   :  { %10666 = vpow2.f32 %v9779_v0 }
 0x8e1   :  { %10668 = vpow2.f32 %v9780_v50 }
 0x8e2   :  { %10670 = vtanh.f32 %v2967_v3 }
 0x8ea   :  { %v10667_v22 = vpop.eup %10666 }
 0x8eb   :  { %v10669_v16 = vpop.eup %10668  ;;  %v2972_v36 = vadd.f32 1.0, %v10667_v22 }
 0x8ec   :  { %v2978_v32 = vadd.f32 1.0, %v10669_v16  ;;  %v10671_v49 = vpop.eup %10670 }
 0x8ed   :  { %10672 = vrcp.f32 %v2972_v36 }
 0x8ee   :  { %10674 = vrcp.f32 %v2978_v32 }
 0x8f7   :  { %v10673_v19 = vpop.eup %10672 }
 0x8f8   :  { %v10675_v7 = vpop.eup %10674  ;;  %v2989_v1 = vmul.f32 %v10673_v19, %v10671_v49 }
 0x8f9   :  { %v2988_v44 = vmul.f32 %v10675_v7, %v11611_v4  ;;  %v3226_v2 = vpop.f32.mrb[56].mxu0  ;;  %v3267_v40 = vpop.f32.mrb[88].mxu1 }
 0x8fa   :  { %v3274_v11 = vadd.f32 %v3226_v2, %v11448_v23  ;;  %v3228_v28 = vpop.f32.mrb[57].mxu0  ;;  %v3269_v46 = vpop.f32.mrb[89].mxu1  ;;  %v3276_v36 = vadd.f32 %v3267_v40, %v11480_v12 }
 0x8fb   :  { %v11718_v17 = vadd.f32 %v2989_v1, %v2988_v44  ;;  %v3275_v47 = vadd.f32 %v3228_v28, %v11450_v25  ;;  %v3230_v10 = vpop.f32.mrb[58].mxu0  ;;  %v3271_v21 = vpop.f32.mrb[90].mxu1  ;;  %v3277_v4 = vadd.f32 %v3269_v46, %v11482_v13 }
 0x8fc   :  { %v9814_v0 = vmul.f32 -1.442695, %v3274_v11  ;;  %v3231_v50 = vpop.f32.mrb[59].mxu0  ;;  %v3272_v3 = vpop.f32.mrb[91].mxu1 }
 0x8fd   :  { %v9815_v22 = vmul.f32 -1.442695, %v3275_v47  ;;  %v9816_v16 = vmul.f32 -1.442695, %v3277_v4 }
 0x8fe   :  { %10676 = vpow2.f32 %v9814_v0 }
 0x8ff   :  { %10678 = vpow2.f32 %v9815_v22 }
 0x900   :  { %10680 = vpow2.f32 %v9816_v16  ;;  %v3592_v16 = vld [vmem:[#allocation7] sm:$0xff] }
 0x901   :  { %10682 = vtanh.f32 %v3276_v36  ;;  %v3594_v36 = vld [vmem:[#allocation7 + $0x10] sm:$0xff] }
 0x908   :  { %v10677_v23 = vpop.eup %10676 }
 0x909   :  { %v10679_v32 = vpop.eup %10678  ;;  %v3281_v49 = vadd.f32 1.0, %v10677_v23  ;;  %v3597_v23 = vld [vmem:[#allocation7 + $0x28] sm:$0xff] }
 0x90a   :  { %v3287_v19 = vadd.f32 1.0, %v10679_v32  ;;  %v10681_v25 = vpop.eup %10680  ;;  %v3599_v32 = vld [vmem:[#allocation7 + $0x38] sm:$0xff] }
 0x90b   :  { %10684 = vrcp.f32 %v3281_v49  ;;  %v10683_v7 = vpop.eup %10682  ;;  %v3294_v11 = vadd.f32 1.0, %v10681_v25  ;;  %v3596_v49 = vld [vmem:[#allocation7 + $0x20] sm:$0xff]  ;;  %v3601_v25 = vld [vmem:[#allocation7 + $0x48] sm:$0xff] }
 0x90c   :  { %10686 = vrcp.f32 %v3287_v19  ;;  %v3598_v19 = vld [vmem:[#allocation7 + $0x30] sm:$0xff] }
 0x90d   :  { %10688 = vrcp.f32 %v3294_v11  ;;  %v3607_v11 = vld [vmem:[#allocation7 + $0x78] sm:$0xff] }
 0x915   :  { %v10685_v1 = vpop.eup %10684 }
 0x916   :  { %v10687_v44 = vpop.eup %10686  ;;  %v3298_v2 = vmul.f32 %v10685_v1, %v10683_v7  ;;  %v3603_v7 = vld [vmem:[#allocation7 + $0x58] sm:$0xff]  ;;  %v3600_v1 = vld [vmem:[#allocation7 + $0x40] sm:$0xff] }
 0x917   :  { %v3297_v28 = vmul.f32 %v10687_v44, %v11617_v20  ;;  %v10689_v3 = vpop.eup %10688  ;;  %v3602_v44 = vld [vmem:[#allocation7 + $0x50] sm:$0xff] }
 0x919   :  { %v11724_v13 = vadd.f32 %v3298_v2, %v3297_v28  ;;  %v11726_v46 = vpop.f32.mrb[60].mxu0  ;;  %v11728_v12 = vpop.f32.mrb[92].mxu1  ;;  %v3605_v2 = vld [vmem:[#allocation7 + $0x68] sm:$0xff]  ;;  %v3604_v28 = vld [vmem:[#allocation7 + $0x60] sm:$0xff] }
 0x91a   :  { %v11730_v40 = vpop.f32.mrb[61].mxu0  ;;  %v11732_v47 = vpop.f32.mrb[93].mxu1 }
 0x91b   :  { %v3405_v10 = vpop.f32.mrb[62].mxu0  ;;  %v3446_v21 = vpop.f32.mrb[94].mxu1  ;;  %10690 = vtanh.f32 %v11724_v13 }
 0x91c   :  { %v3406_v0 = vpop.f32.mrb[63].mxu0  ;;  %v3447_v50 = vpop.f32.mrb[95].mxu1  ;;  %v3606_v10 = vld [vmem:[#allocation7 + $0x70] sm:$0xff]  ;;  %v3609_v21 = vld [vmem:[#allocation7 + $0x88] sm:$0xff] }
 0x91d   :  { %v3611_v0 = vld [vmem:[#allocation7 + $0x98] sm:$0xff]  ;;  %v3608_v50 = vld [vmem:[#allocation7 + $0x80] sm:$0xff] }
 0x925   :  { %v10691_v22 = vpop.eup %10690 }
 0x926   :  { %v3301_v20 = vmul.f32 %v10691_v22, %v10689_v3  ;;  %v3610_v3 = vld [vmem:[#allocation7 + $0x90] sm:$0xff]  ;;  %v3613_v22 = vld [vmem:[#allocation7 + $0xa8] sm:$0xff] }
 0x928   :  { %v11735_v4 = vpack.c.bf16 %v3301_v20, %v3301_v20  ;;  %v3615_v20 = vld [vmem:[#allocation7 + $0xb8] sm:$0xff] }
 0x92a   :  { %3482 = vmatmul.mubr.bf16.vlgmr.msra.gmra.mrb[64].mxu0 %v11735_v4  ;;  %3523 = vmatmul.mubr.bf16.vlgmr.msra.gmra.mrb[96].mxu1 %v11735_v4 }
 0x92b   :  { %3625 = vmatpush1.bf16.msra.mxu0 %v3592_v16  ;;  %3666 = vmatpush1.bf16.msra.mxu1 %v3594_v36  ;;  %v3612_v16 = vld [vmem:[#allocation7 + $0xa0] sm:$0xff]  ;;  %v3614_v36 = vld [vmem:[#allocation7 + $0xb0] sm:$0xff] }
 0x92c   :  { %3626 = vmatprep.subr.bf16.mxu0 %v3597_v23  ;;  %3667 = vmatprep.subr.bf16.mxu1 %v3599_v32  ;;  %v3617_v23 = vld [vmem:[#allocation7 + $0xc8] sm:$0xff]  ;;  %v3619_v32 = vld [vmem:[#allocation7 + $0xd8] sm:$0xff] }
 0x92d   :  { %3656 = vmatprep.mubr.bf16.mxu0 %v12400_v18  ;;  %3697 = vmatprep.mubr.bf16.mxu1 %v12400_v18 }
 0x92f   :  { %3627 = vmatpush1.bf16.msra.mxu0 %v3596_v49  ;;  %3668 = vmatpush1.bf16.msra.mxu1 %v3598_v19  ;;  %v3616_v49 = vld [vmem:[#allocation7 + $0xc0] sm:$0xff]  ;;  %v3618_v19 = vld [vmem:[#allocation7 + $0xd0] sm:$0xff] }
 0x930   :  { %3628 = vmatprep.subr.bf16.mxu0 %v3601_v25  ;;  %3669 = vmatprep.subr.bf16.mxu1 %v3603_v7  ;;  %v3621_v25 = vld [vmem:[#allocation7 + $0xe8] sm:$0xff]  ;;  %v3623_v7 = vld [vmem:[#allocation7 + $0xf8] sm:$0xff] }
 0x933   :  { %3629 = vmatpush1.bf16.msra.mxu0 %v3600_v1  ;;  %3670 = vmatpush1.bf16.msra.mxu1 %v3602_v44  ;;  %v3620_v1 = vld [vmem:[#allocation7 + $0xe0] sm:$0xff]  ;;  %v3622_v44 = vld [vmem:[#allocation7 + $0xf0] sm:$0xff] }
 0x934   :  { %3630 = vmatprep.subr.bf16.mxu0 %v3605_v2  ;;  %3671 = vmatprep.subr.bf16.mxu1 %v3607_v11  ;;  %v3561_v2 = vld [vmem:[#allocation6 + $0x8] sm:$0xff]  ;;  %v3563_v11 = vld [vmem:[#allocation6 + $0x18] sm:$0xff] }
 0x937   :  { %3631 = vmatpush1.bf16.msra.mxu0 %v3604_v28  ;;  %3672 = vmatpush1.bf16.msra.mxu1 %v3606_v10  ;;  %v3560_v28 = vld [vmem:[#allocation6] sm:$0xff]  ;;  %v3562_v10 = vld [vmem:[#allocation6 + $0x10] sm:$0xff] }
 0x938   :  { %3632 = vmatprep.subr.bf16.mxu0 %v3609_v21  ;;  %3673 = vmatprep.subr.bf16.mxu1 %v3611_v0  ;;  %v3565_v21 = vld [vmem:[#allocation6 + $0x28] sm:$0xff]  ;;  %v3567_v0 = vld [vmem:[#allocation6 + $0x38] sm:$0xff] }
 0x93b   :  { %3633 = vmatpush1.bf16.msra.mxu0 %v3608_v50  ;;  %3674 = vmatpush1.bf16.msra.mxu1 %v3610_v3  ;;  %v3564_v50 = vld [vmem:[#allocation6 + $0x20] sm:$0xff]  ;;  %v3566_v3 = vld [vmem:[#allocation6 + $0x30] sm:$0xff] }
 0x93c   :  { %3634 = vmatprep.subr.bf16.mxu0 %v3613_v22  ;;  %3675 = vmatprep.subr.bf16.mxu1 %v3615_v20  ;;  %v3571_v22 = vld [vmem:[#allocation6 + $0x58] sm:$0xff]  ;;  %v3568_v20 = vld [vmem:[#allocation6 + $0x40] sm:$0xff] }
 0x93f   :  { %3635 = vmatpush1.bf16.msra.mxu0 %v3612_v16  ;;  %3676 = vmatpush1.bf16.msra.mxu1 %v3614_v36  ;;  %v3570_v16 = vld [vmem:[#allocation6 + $0x50] sm:$0xff]  ;;  %v3573_v36 = vld [vmem:[#allocation6 + $0x68] sm:$0xff] }
 0x940   :  { %3636 = vmatprep.subr.bf16.mxu0 %v3617_v23  ;;  %3677 = vmatprep.subr.bf16.mxu1 %v3619_v32  ;;  %v3575_v23 = vld [vmem:[#allocation6 + $0x78] sm:$0xff]  ;;  %v3572_v32 = vld [vmem:[#allocation6 + $0x60] sm:$0xff] }
 0x943   :  { %3637 = vmatpush1.bf16.msra.mxu0 %v3616_v49  ;;  %3678 = vmatpush1.bf16.msra.mxu1 %v3618_v19  ;;  %v3574_v49 = vld [vmem:[#allocation6 + $0x70] sm:$0xff]  ;;  %v3577_v19 = vld [vmem:[#allocation6 + $0x88] sm:$0xff] }
 0x944   :  { %3638 = vmatprep.subr.bf16.mxu0 %v3621_v25  ;;  %3679 = vmatprep.subr.bf16.mxu1 %v3623_v7  ;;  %v3579_v25 = vld [vmem:[#allocation6 + $0x98] sm:$0xff]  ;;  %v3576_v7 = vld [vmem:[#allocation6 + $0x80] sm:$0xff] }
 0x947   :  { %3639 = vmatpush1.bf16.msra.mxu0 %v3620_v1  ;;  %3680 = vmatpush1.bf16.msra.mxu1 %v3622_v44  ;;  %v3578_v1 = vld [vmem:[#allocation6 + $0x90] sm:$0xff]  ;;  %v3581_v44 = vld [vmem:[#allocation6 + $0xa8] sm:$0xff] }
 0x948   :  { %3706 = vmatprep.subr.bf16.mxu0 %v3561_v2  ;;  %3747 = vmatprep.subr.bf16.mxu1 %v3563_v11  ;;  %v3583_v2 = vld [vmem:[#allocation6 + $0xb8] sm:$0xff]  ;;  %v3580_v11 = vld [vmem:[#allocation6 + $0xa0] sm:$0xff] }
 0x94a   :  { %3657 = vmatmul.mubr.bf16.vlgmr.msra.gmra.mrb[68].mxu0 %v11693_v6  ;;  %3698 = vmatmul.mubr.bf16.vlgmr.msra.gmra.mrb[100].mxu1 %v11693_v6  ;;  %v3569_v6 = vld [vmem:[#allocation6 + $0x48] sm:$0xff] }
 0x94b   :  { %3738 = vmatprep.mubr.bf16.mxu0 %v12400_v18  ;;  %3779 = vmatprep.mubr.bf16.mxu1 %v12400_v18 }
 0x94c   :  { %3707 = vmatpush1.bf16.msra.mxu0 %v3560_v28  ;;  %3748 = vmatpush1.bf16.msra.mxu1 %v3562_v10  ;;  %v3582_v28 = vld [vmem:[#allocation6 + $0xb0] sm:$0xff]  ;;  %v3585_v10 = vld [vmem:[#allocation6 + $0xc8] sm:$0xff] }
 0x94d   :  { %3708 = vmatprep.subr.bf16.mxu0 %v3565_v21  ;;  %3749 = vmatprep.subr.bf16.mxu1 %v3567_v0  ;;  %v3587_v21 = vld [vmem:[#allocation6 + $0xd8] sm:$0xff]  ;;  %v3584_v0 = vld [vmem:[#allocation6 + $0xc0] sm:$0xff] }
 0x950   :  { %3709 = vmatpush1.bf16.msra.mxu0 %v3564_v50  ;;  %3750 = vmatpush1.bf16.msra.mxu1 %v3566_v3  ;;  %v3586_v50 = vld [vmem:[#allocation6 + $0xd0] sm:$0xff]  ;;  %v3589_v3 = vld [vmem:[#allocation6 + $0xe8] sm:$0xff] }
 0x951   :  { %3710 = vmatprep.subr.bf16.mxu0 %v3569_v6  ;;  %3751 = vmatprep.subr.bf16.mxu1 %v3571_v22  ;;  %v3591_v6 = vld [vmem:[#allocation6 + $0xf8] sm:$0xff]  ;;  %v3588_v22 = vld [vmem:[#allocation6 + $0xe0] sm:$0xff] }
 0x954   :  { %3711 = vmatpush1.bf16.msra.mxu0 %v3568_v20  ;;  %3752 = vmatpush1.bf16.msra.mxu1 %v3570_v16  ;;  %v3590_v20 = vld [vmem:[#allocation6 + $0xf0] sm:$0xff]  ;;  %v3851_v16 = vld [vmem:[#allocation9 + $0x8] sm:$0xff] }
 0x955   :  { %3712 = vmatprep.subr.bf16.mxu0 %v3573_v36  ;;  %3753 = vmatprep.subr.bf16.mxu1 %v3575_v23  ;;  %v3853_v36 = vld [vmem:[#allocation9 + $0x18] sm:$0xff] }
 0x958   :  { %3713 = vmatpush1.bf16.msra.mxu0 %v3572_v32  ;;  %3754 = vmatpush1.bf16.msra.mxu1 %v3574_v49 }
 0x959   :  { %3714 = vmatprep.subr.bf16.mxu0 %v3577_v19  ;;  %3755 = vmatprep.subr.bf16.mxu1 %v3579_v25 }
 0x95c   :  { %3715 = vmatpush1.bf16.msra.mxu0 %v3576_v7  ;;  %3756 = vmatpush1.bf16.msra.mxu1 %v3578_v1 }
 0x95d   :  { %3716 = vmatprep.subr.bf16.mxu0 %v3581_v44  ;;  %3757 = vmatprep.subr.bf16.mxu1 %v3583_v2 }
 0x960   :  { %3717 = vmatpush1.bf16.msra.mxu0 %v3580_v11  ;;  %3758 = vmatpush1.bf16.msra.mxu1 %v3582_v28 }
 0x961   :  { %3718 = vmatprep.subr.bf16.mxu0 %v3585_v10  ;;  %3759 = vmatprep.subr.bf16.mxu1 %v3587_v21 }
 0x964   :  { %3719 = vmatpush1.bf16.msra.mxu0 %v3584_v0  ;;  %3760 = vmatpush1.bf16.msra.mxu1 %v3586_v50 }
 0x965   :  { %3720 = vmatprep.subr.bf16.mxu0 %v3589_v3  ;;  %3761 = vmatprep.subr.bf16.mxu1 %v3591_v6 }
 0x968   :  { %3721 = vmatpush1.bf16.msra.mxu0 %v3588_v22  ;;  %3762 = vmatpush1.bf16.msra.mxu1 %v3590_v20 }
 0x969   :  { %3882 = vmatprep.subr.bf16.mxu0 %v3851_v16  ;;  %3923 = vmatprep.subr.bf16.mxu1 %v3853_v36 }
 0x9fd   :  { %v3483_v23 = vpop.f32.mrb[64].mxu0  ;;  %v3524_v32 = vpop.f32.mrb[96].mxu1 }
 0x9fe   :  { %v3484_v49 = vadd.f32 %v3483_v23, %v11726_v46  ;;  %v3525_v19 = vadd.f32 %v3524_v32, %v11728_v12  ;;  %v3485_v25 = vpop.f32.mrb[65].mxu0  ;;  %v3526_v7 = vpop.f32.mrb[97].mxu1 }
 0x9ff   :  { %v3486_v1 = vadd.f32 %v3485_v25, %v11730_v40  ;;  %v3527_v44 = vadd.f32 %v3526_v7, %v11732_v47  ;;  %v3487_v2 = vpop.f32.mrb[66].mxu0  ;;  %v3528_v11 = vpop.f32.mrb[98].mxu1 }
 0xa00   :  { %v3531_v28 = vadd.f32 %v3484_v49, %v11413_v52  ;;  %v3488_v10 = vpop.f32.mrb[67].mxu0  ;;  %v3529_v21 = vpop.f32.mrb[99].mxu1  ;;  %v3533_v6 = vadd.f32 %v3525_v19, %v11425_v60 }
 0xa01   :  { %v3532_v0 = vadd.f32 %v3486_v1, %v11419_v55  ;;  %v3534_v46 = vadd.f32 %v3527_v44, %v11431_v63 }
 0xa02   :  { %v9817_v50 = vmul.f32 -1.442695, %v3531_v28 }
 0xa03   :  { %v9818_v3 = vmul.f32 -1.442695, %v3532_v0  ;;  %v9819_v12 = vmul.f32 -1.442695, %v3534_v46 }
 0xa04   :  { %10692 = vpow2.f32 %v9817_v50 }
 0xa05   :  { %10694 = vpow2.f32 %v9818_v3 }
 0xa06   :  { %10696 = vpow2.f32 %v9819_v12 }
 0xa07   :  { %10698 = vtanh.f32 %v3533_v6 }
 0xa0e   :  { %v10693_v40 = vpop.eup %10692 }
 0xa0f   :  { %v10695_v22 = vpop.eup %10694  ;;  %v3538_v47 = vadd.f32 1.0, %v10693_v40  ;;  %v3850_v40 = vld [vmem:[#allocation9] sm:$0xff] }
 0xa10   :  { %v3544_v20 = vadd.f32 1.0, %v10695_v22  ;;  %v10697_v16 = vpop.eup %10696  ;;  %v3852_v22 = vld [vmem:[#allocation9 + $0x10] sm:$0xff] }
 0xa11   :  { %10700 = vrcp.f32 %v3538_v47  ;;  %v10699_v36 = vpop.eup %10698  ;;  %v3551_v25 = vadd.f32 1.0, %v10697_v16  ;;  %v3855_v47 = vld [vmem:[#allocation9 + $0x28] sm:$0xff]  ;;  %v3856_v16 = vld [vmem:[#allocation9 + $0x30] sm:$0xff] }
 0xa12   :  { %10702 = vrcp.f32 %v3544_v20  ;;  %v3857_v20 = vld [vmem:[#allocation9 + $0x38] sm:$0xff] }
 0xa13   :  { %10704 = vrcp.f32 %v3551_v25  ;;  %v3863_v25 = vld [vmem:[#allocation9 + $0x68] sm:$0xff] }
 0xa1b   :  { %v10701_v23 = vpop.eup %10700 }
 0xa1c   :  { %v10703_v32 = vpop.eup %10702  ;;  %v3555_v49 = vmul.f32 %v10701_v23, %v10699_v36  ;;  %v3859_v36 = vld [vmem:[#allocation9 + $0x48] sm:$0xff]  ;;  %v3861_v23 = vld [vmem:[#allocation9 + $0x58] sm:$0xff] }
 0xa1d   :  { %v3554_v7 = vmul.f32 %v10703_v32, %v11655_v51  ;;  %v11754_v1 = vpop.f32.mrb[68].mxu0  ;;  %v11756_v44 = vpop.f32.mrb[100].mxu1  ;;  %v2968_v51 = vadd.f32 %v11711_v15, %v11435_v9  ;;  %v3854_v15 = vld [vmem:[#allocation9 + $0x20] sm:$0xff] }
 0xa1e   :  { %v11758_v19 = vpop.f32.mrb[69].mxu0  ;;  %v11760_v2 = vpop.f32.mrb[101].mxu1  ;;  %v3858_v32 = vld [vmem:[#allocation9 + $0x40] sm:$0xff] }
 0xa1f   :  { %v11762_v11 = vadd.f32 %v3555_v49, %v3554_v7  ;;  %v3662_v28 = vpop.f32.mrb[70].mxu0  ;;  %v3703_v10 = vpop.f32.mrb[102].mxu1  ;;  %v9781_v3 = vmul.f32 -1.442695, %v2968_v51  ;;  %v3860_v49 = vld [vmem:[#allocation9 + $0x50] sm:$0xff]  ;;  %v3865_v7 = vld [vmem:[#allocation9 + $0x78] sm:$0xff] }
 0xa20   :  { %v3663_v21 = vpop.f32.mrb[71].mxu0  ;;  %v3704_v0 = vpop.f32.mrb[103].mxu1  ;;  %v3862_v10 = vld [vmem:[#allocation9 + $0x60] sm:$0xff]  ;;  %v3867_v51 = vld [vmem:[#allocation9 + $0x88] sm:$0xff] }
 0xa21   :  { %10706 = vtanh.f32 %v11762_v11  ;;  %v10705_v50 = vpop.eup %10704  ;;  %v3864_v21 = vld [vmem:[#allocation9 + $0x70] sm:$0xff] }
 0xa22   :  { %10708 = vpow2.f32 %v9781_v3  ;;  %v3866_v3 = vld [vmem:[#allocation9 + $0x80] sm:$0xff] }
 0xa23   :  { %10710 = vtanh.f32 %v11718_v17 }
 0xa2b   :  { %v10707_v46 = vpop.eup %10706 }
 0xa2c   :  { %v3558_v12 = vmul.f32 %v10707_v46, %v10705_v50  ;;  %v10709_v28 = vpop.eup %10708  ;;  %v3869_v50 = vld [vmem:[#allocation9 + $0x98] sm:$0xff]  ;;  %v3868_v46 = vld [vmem:[#allocation9 + $0x90] sm:$0xff] }
 0xa2d   :  { %v2985_v0 = vadd.f32 1.0, %v10709_v28  ;;  %v3880_v28 = vld [vmem:[#allocation9 + $0xf0] sm:$0xff] }
 0xa2e   :  { %v11767_v6 = vpack.c.bf16 %v3558_v12, %v3558_v12  ;;  %v3871_v12 = vld [vmem:[#allocation9 + $0xa8] sm:$0xff] }
 0xa2f   :  { %10712 = vrcp.f32 %v2985_v0  ;;  %v3818_v0 = vld [vmem:[#allocation8 + $0x8] sm:$0xff] }
 0xa30   :  { %3739 = vmatmul.mubr.bf16.vlgmr.msra.gmra.mrb[72].mxu0 %v11767_v6  ;;  %3780 = vmatmul.mubr.bf16.vlgmr.msra.gmra.mrb[104].mxu1 %v11767_v6 }
 0xa31   :  { %3883 = vmatpush1.bf16.msra.mxu0 %v3850_v40  ;;  %3924 = vmatpush1.bf16.msra.mxu1 %v3852_v22  ;;  %v3873_v40 = vld [vmem:[#allocation9 + $0xb8] sm:$0xff]  ;;  %v3870_v22 = vld [vmem:[#allocation9 + $0xa0] sm:$0xff] }
 0xa32   :  { %3884 = vmatprep.subr.bf16.mxu0 %v3855_v47  ;;  %3925 = vmatprep.subr.bf16.mxu1 %v3857_v20  ;;  %v3872_v47 = vld [vmem:[#allocation9 + $0xb0] sm:$0xff]  ;;  %v3875_v20 = vld [vmem:[#allocation9 + $0xc8] sm:$0xff] }
 0xa33   :  { %3914 = vmatprep.mubr.bf16.mxu0 %v12400_v18  ;;  %3955 = vmatprep.mubr.bf16.mxu1 %v12400_v18 }
 0xa35   :  { %3885 = vmatpush1.bf16.msra.mxu0 %v3854_v15  ;;  %3926 = vmatpush1.bf16.msra.mxu1 %v3856_v16  ;;  %v3877_v15 = vld [vmem:[#allocation9 + $0xd8] sm:$0xff]  ;;  %v3874_v16 = vld [vmem:[#allocation9 + $0xc0] sm:$0xff] }
 0xa36   :  { %3886 = vmatprep.subr.bf16.mxu0 %v3859_v36  ;;  %3927 = vmatprep.subr.bf16.mxu1 %v3861_v23  ;;  %v3876_v36 = vld [vmem:[#allocation9 + $0xd0] sm:$0xff]  ;;  %v10711_v23 = vpop.eup %10710 }
 0xa39   :  { %3887 = vmatpush1.bf16.msra.mxu0 %v3858_v32  ;;  %3928 = vmatpush1.bf16.msra.mxu1 %v3860_v49  ;;  %v3879_v32 = vld [vmem:[#allocation9 + $0xe8] sm:$0xff]  ;;  %v3881_v49 = vld [vmem:[#allocation9 + $0xf8] sm:$0xff] }
 0xa3a   :  { %3888 = vmatprep.subr.bf16.mxu0 %v3863_v25  ;;  %3929 = vmatprep.subr.bf16.mxu1 %v3865_v7  ;;  %v10713_v25 = vpop.eup %10712  ;;  %v3878_v7 = vld [vmem:[#allocation9 + $0xe0] sm:$0xff] }
 0xa3d   :  { %3889 = vmatpush1.bf16.msra.mxu0 %v3862_v10  ;;  %3930 = vmatpush1.bf16.msra.mxu1 %v3864_v21  ;;  %v11774_v10 = vmul.f32 %v10713_v25, %v10711_v23  ;;  %v3832_v23 = vld [vmem:[#allocation8 + $0x78] sm:$0xff]  ;;  %v3834_v25 = vld [vmem:[#allocation8 + $0x88] sm:$0xff] }
 0xa3e   :  { %3890 = vmatprep.subr.bf16.mxu0 %v3867_v51  ;;  %3931 = vmatprep.subr.bf16.mxu1 %v3869_v50  ;;  %v3820_v51 = vld [vmem:[#allocation8 + $0x18] sm:$0xff]  ;;  %v3817_v50 = vld [vmem:[#allocation8] sm:$0xff] }
 0xa3f   :  { %v3849_v21 = vpack.c.bf16 %v11774_v10, %v11774_v10 }
 0xa41   :  { %3891 = vmatpush1.bf16.msra.mxu0 %v3866_v3  ;;  %3932 = vmatpush1.bf16.msra.mxu1 %v3868_v46  ;;  %v3819_v3 = vld [vmem:[#allocation8 + $0x10] sm:$0xff]  ;;  %v3822_v46 = vld [vmem:[#allocation8 + $0x28] sm:$0xff] }
 0xa42   :  { %3892 = vmatprep.subr.bf16.mxu0 %v3871_v12  ;;  %3933 = vmatprep.subr.bf16.mxu1 %v3873_v40  ;;  %v3824_v12 = vld [vmem:[#allocation8 + $0x38] sm:$0xff]  ;;  %v3821_v40 = vld [vmem:[#allocation8 + $0x20] sm:$0xff] }
 0xa45   :  { %3893 = vmatpush1.bf16.msra.mxu0 %v3870_v22  ;;  %3934 = vmatpush1.bf16.msra.mxu1 %v3872_v47  ;;  %v3823_v22 = vld [vmem:[#allocation8 + $0x30] sm:$0xff]  ;;  %v3826_v47 = vld [vmem:[#allocation8 + $0x48] sm:$0xff] }
 0xa46   :  { %3894 = vmatprep.subr.bf16.mxu0 %v3875_v20  ;;  %3935 = vmatprep.subr.bf16.mxu1 %v3877_v15  ;;  %v3828_v20 = vld [vmem:[#allocation8 + $0x58] sm:$0xff]  ;;  %v3825_v15 = vld [vmem:[#allocation8 + $0x40] sm:$0xff] }
 0xa49   :  { %3895 = vmatpush1.bf16.msra.mxu0 %v3874_v16  ;;  %3936 = vmatpush1.bf16.msra.mxu1 %v3876_v36  ;;  %v3827_v16 = vld [vmem:[#allocation8 + $0x50] sm:$0xff]  ;;  %v3830_v36 = vld [vmem:[#allocation8 + $0x68] sm:$0xff] }
 0xa4a   :  { %3896 = vmatprep.subr.bf16.mxu0 %v3879_v32  ;;  %3937 = vmatprep.subr.bf16.mxu1 %v3881_v49  ;;  %v3829_v32 = vld [vmem:[#allocation8 + $0x60] sm:$0xff]  ;;  %v3831_v49 = vld [vmem:[#allocation8 + $0x70] sm:$0xff] }
 0xa4d   :  { %3897 = vmatpush1.bf16.msra.mxu0 %v3878_v7  ;;  %3938 = vmatpush1.bf16.msra.mxu1 %v3880_v28  ;;  %v3836_v7 = vld [vmem:[#allocation8 + $0x98] sm:$0xff]  ;;  %v3833_v28 = vld [vmem:[#allocation8 + $0x80] sm:$0xff] }
 0xa4e   :  { %3964 = vmatprep.subr.bf16.mxu0 %v3818_v0  ;;  %4005 = vmatprep.subr.bf16.mxu1 %v3820_v51  ;;  %v3838_v0 = vld [vmem:[#allocation8 + $0xa8] sm:$0xff]  ;;  %v3840_v51 = vld [vmem:[#allocation8 + $0xb8] sm:$0xff] }
 0xa50   :  { %3915 = vmatmul.mubr.bf16.vlgmr.msra.gmra.mrb[76].mxu0 %v3849_v21  ;;  %3956 = vmatmul.mubr.bf16.vlgmr.msra.gmra.mrb[108].mxu1 %v3849_v21  ;;  %v3835_v21 = vld [vmem:[#allocation8 + $0x90] sm:$0xff] }
 0xa51   :  { %3996 = vmatprep.mubr.bf16.mxu0 %v12400_v18  ;;  %4037 = vmatprep.mubr.bf16.mxu1 %v12400_v18 }
 0xa52   :  { %3965 = vmatpush1.bf16.msra.mxu0 %v3817_v50  ;;  %4006 = vmatpush1.bf16.msra.mxu1 %v3819_v3  ;;  %v3837_v50 = vld [vmem:[#allocation8 + $0xa0] sm:$0xff]  ;;  %v3839_v3 = vld [vmem:[#allocation8 + $0xb0] sm:$0xff] }
 0xa53   :  { %3966 = vmatprep.subr.bf16.mxu0 %v3822_v46  ;;  %4007 = vmatprep.subr.bf16.mxu1 %v3824_v12  ;;  %v3842_v46 = vld [vmem:[#allocation8 + $0xc8] sm:$0xff]  ;;  %v3844_v12 = vld [vmem:[#allocation8 + $0xd8] sm:$0xff] }
 0xa56   :  { %3967 = vmatpush1.bf16.msra.mxu0 %v3821_v40  ;;  %4008 = vmatpush1.bf16.msra.mxu1 %v3823_v22  ;;  %v3841_v40 = vld [vmem:[#allocation8 + $0xc0] sm:$0xff]  ;;  %v3843_v22 = vld [vmem:[#allocation8 + $0xd0] sm:$0xff] }
 0xa57   :  { %3968 = vmatprep.subr.bf16.mxu0 %v3826_v47  ;;  %4009 = vmatprep.subr.bf16.mxu1 %v3828_v20  ;;  %v3846_v47 = vld [vmem:[#allocation8 + $0xe8] sm:$0xff]  ;;  %v3848_v20 = vld [vmem:[#allocation8 + $0xf8] sm:$0xff] }
 0xa5a   :  { %3969 = vmatpush1.bf16.msra.mxu0 %v3825_v15  ;;  %4010 = vmatpush1.bf16.msra.mxu1 %v3827_v16  ;;  %v3845_v15 = vld [vmem:[#allocation8 + $0xe0] sm:$0xff]  ;;  %v3847_v16 = vld [vmem:[#allocation8 + $0xf0] sm:$0xff] }
 0xa5b   :  { %3970 = vmatprep.subr.bf16.mxu0 %v3830_v36  ;;  %4011 = vmatprep.subr.bf16.mxu1 %v3832_v23  ;;  %v10316_v36 = vld [vmem:[#allocation14 + $0x4] ss:$16 sps:$4 sm:$0xff]   ;;  %v10319_v23 = vld [vmem:[#allocation14 + $0xc] ss:$16 sps:$4 sm:$0xff]  }
 0xa5e   :  { %3971 = vmatpush1.bf16.msra.mxu0 %v3829_v32  ;;  %4012 = vmatpush1.bf16.msra.mxu1 %v3831_v49 }
 0xa5f   :  { %3972 = vmatprep.subr.bf16.mxu0 %v3834_v25  ;;  %4013 = vmatprep.subr.bf16.mxu1 %v3836_v7 }
 0xa62   :  { %3973 = vmatpush1.bf16.msra.mxu0 %v3833_v28  ;;  %4014 = vmatpush1.bf16.msra.mxu1 %v3835_v21 }
 0xa63   :  { %3974 = vmatprep.subr.bf16.mxu0 %v3838_v0  ;;  %4015 = vmatprep.subr.bf16.mxu1 %v3840_v51 }
 0xa66   :  { %3975 = vmatpush1.bf16.msra.mxu0 %v3837_v50  ;;  %4016 = vmatpush1.bf16.msra.mxu1 %v3839_v3 }
 0xa67   :  { %3976 = vmatprep.subr.bf16.mxu0 %v3842_v46  ;;  %4017 = vmatprep.subr.bf16.mxu1 %v3844_v12 }
 0xa6a   :  { %3977 = vmatpush1.bf16.msra.mxu0 %v3841_v40  ;;  %4018 = vmatpush1.bf16.msra.mxu1 %v3843_v22 }
 0xa6b   :  { %3978 = vmatprep.subr.bf16.mxu0 %v3846_v47  ;;  %4019 = vmatprep.subr.bf16.mxu1 %v3848_v20 }
 0xa6e   :  { %3979 = vmatpush1.bf16.msra.mxu0 %v3845_v15  ;;  %4020 = vmatpush1.bf16.msra.mxu1 %v3847_v16 }
 0xa6f   :  { %4273 = vmatprep.subr.bf16.mxu0 %v10316_v36  ;;  %4314 = vmatprep.subr.bf16.mxu1 %v10319_v23 }
 0xb03   :  { %v3740_v32 = vpop.f32.mrb[72].mxu0  ;;  %v3781_v49 = vpop.f32.mrb[104].mxu1 }
 0xb04   :  { %v3741_v25 = vadd.f32 %v3740_v32, %v11754_v1  ;;  %v3782_v7 = vadd.f32 %v3781_v49, %v11756_v44  ;;  %v3742_v28 = vpop.f32.mrb[73].mxu0  ;;  %v3783_v21 = vpop.f32.mrb[105].mxu1 }
 0xb05   :  { %v3743_v0 = vadd.f32 %v3742_v28, %v11758_v19  ;;  %v3784_v51 = vadd.f32 %v3783_v21, %v11760_v2  ;;  %v3744_v50 = vpop.f32.mrb[74].mxu0  ;;  %v3785_v3 = vpop.f32.mrb[106].mxu1 }
 0xb06   :  { %v3788_v46 = vadd.f32 %v3741_v25, %v11415_v53  ;;  %v3745_v12 = vpop.f32.mrb[75].mxu0  ;;  %v3786_v40 = vpop.f32.mrb[107].mxu1  ;;  %v3790_v15 = vadd.f32 %v3782_v7, %v11427_v61 }
 0xb07   :  { %v3789_v22 = vadd.f32 %v3743_v0, %v11421_v56  ;;  %v3791_v1 = vadd.f32 %v3784_v51, %v11433_v8 }
 0xb08   :  { %v9820_v47 = vmul.f32 -1.442695, %v3788_v46 }
 0xb09   :  { %v9821_v20 = vmul.f32 -1.442695, %v3789_v22  ;;  %v9822_v44 = vmul.f32 -1.442695, %v3791_v1 }
 0xb0a   :  { %10714 = vpow2.f32 %v9820_v47 }
 0xb0b   :  { %10716 = vpow2.f32 %v9821_v20 }
 0xb0c   :  { %10718 = vpow2.f32 %v9822_v44  ;;  %v10314_v44 = vld [vmem:[#allocation14] ss:$16 sps:$4 sm:$0xff]  }
 0xb0d   :  { %10720 = vtanh.f32 %v3790_v15  ;;  %v10317_v15 = vld [vmem:[#allocation14 + $0x8] ss:$16 sps:$4 sm:$0xff]  }
 0xb14   :  { %v10715_v19 = vpop.eup %10714 }
 0xb15   :  { %v10717_v16 = vpop.eup %10716  ;;  %v3795_v2 = vadd.f32 1.0, %v10715_v19 }
 0xb16   :  { %v3801_v36 = vadd.f32 1.0, %v10717_v16  ;;  %v10719_v23 = vpop.eup %10718  ;;  %v10322_v16 = vld [vmem:[#allocation14 + $0x24] ss:$16 sps:$4 sm:$0xff]  }
 0xb17   :  { %10722 = vrcp.f32 %v3795_v2  ;;  %v10721_v32 = vpop.eup %10720  ;;  %v3808_v21 = vadd.f32 1.0, %v10719_v23  ;;  %v10325_v2 = vld [vmem:[#allocation14 + $0x2c] ss:$16 sps:$4 sm:$0xff]   ;;  %v10323_v23 = vld [vmem:[#allocation14 + $0x28] ss:$16 sps:$4 sm:$0xff]  }
 0xb18   :  { %10724 = vrcp.f32 %v3801_v36  ;;  %v10320_v36 = vld [vmem:[#allocation14 + $0x20] ss:$16 sps:$4 sm:$0xff]  }
 0xb19   :  { %10726 = vrcp.f32 %v3808_v21  ;;  %v10334_v21 = vld [vmem:[#allocation14 + $0x64] ss:$16 sps:$4 sm:$0xff]  }
 0xb21   :  { %v10723_v49 = vpop.eup %10722 }
 0xb22   :  { %v10725_v25 = vpop.eup %10724  ;;  %v3812_v28 = vmul.f32 %v10723_v49, %v10721_v32  ;;  %v10328_v32 = vld [vmem:[#allocation14 + $0x44] ss:$16 sps:$4 sm:$0xff]   ;;  %v10331_v49 = vld [vmem:[#allocation14 + $0x4c] ss:$16 sps:$4 sm:$0xff]  }
 0xb23   :  { %v3811_v0 = vmul.f32 %v10725_v25, %v11690_v24  ;;  %v11789_v51 = vpop.f32.mrb[76].mxu0  ;;  %v11791_v50 = vpop.f32.mrb[108].mxu1  ;;  %v10326_v25 = vld [vmem:[#allocation14 + $0x40] ss:$16 sps:$4 sm:$0xff]  }
 0xb24   :  { %v11793_v7 = vpop.f32.mrb[77].mxu0  ;;  %v11795_v3 = vpop.f32.mrb[109].mxu1 }
 0xb25   :  { %v11797_v46 = vadd.f32 %v3812_v28, %v3811_v0  ;;  %v3920_v12 = vpop.f32.mrb[78].mxu0  ;;  %v3961_v40 = vpop.f32.mrb[110].mxu1  ;;  %v10329_v28 = vld [vmem:[#allocation14 + $0x48] ss:$16 sps:$4 sm:$0xff]   ;;  %v10337_v0 = vld [vmem:[#allocation14 + $0x6c] ss:$16 sps:$4 sm:$0xff]  }
 0xb26   :  { %v3921_v22 = vpop.f32.mrb[79].mxu0  ;;  %v3962_v47 = vpop.f32.mrb[111].mxu1  ;;  %v10332_v12 = vld [vmem:[#allocation14 + $0x60] ss:$16 sps:$4 sm:$0xff]   ;;  %v10335_v40 = vld [vmem:[#allocation14 + $0x68] ss:$16 sps:$4 sm:$0xff]  }
 0xb27   :  { %10728 = vtanh.f32 %v11797_v46  ;;  %v10727_v20 = vpop.eup %10726  ;;  %v10340_v22 = vld [vmem:[#allocation14 + $0x84] ss:$16 sps:$4 sm:$0xff]   ;;  %v10343_v47 = vld [vmem:[#allocation14 + $0x8c] ss:$16 sps:$4 sm:$0xff]  }
 0xb31   :  { %v10729_v1 = vpop.eup %10728 }
 0xb32   :  { %v3815_v24 = vmul.f32 %v10729_v1, %v10727_v20  ;;  %v10338_v20 = vld [vmem:[#allocation14 + $0x80] ss:$16 sps:$4 sm:$0xff]   ;;  %v10341_v1 = vld [vmem:[#allocation14 + $0x88] ss:$16 sps:$4 sm:$0xff]  }
 0xb34   :  { %v11800_v19 = vpack.c.bf16 %v3815_v24, %v3815_v24  ;;  %v10346_v24 = vld [vmem:[#allocation14 + $0xa4] ss:$16 sps:$4 sm:$0xff]  }
 0xb36   :  { %3997 = vmatmul.mubr.bf16.vlgmr.msra.gmra.mrb[80].mxu0 %v11800_v19  ;;  %4038 = vmatmul.mubr.bf16.vlgmr.msra.gmra.mrb[112].mxu1 %v11800_v19 }
 0xb37   :  { %4274 = vmatpush1.bf16.msra.mxu0 %v10314_v44  ;;  %4315 = vmatpush1.bf16.msra.mxu1 %v10317_v15  ;;  %v10349_v44 = vld [vmem:[#allocation14 + $0xac] ss:$16 sps:$4 sm:$0xff]   ;;  %v10344_v15 = vld [vmem:[#allocation14 + $0xa0] ss:$16 sps:$4 sm:$0xff]  }
 0xb38   :  { %4275 = vmatprep.subr.bf16.mxu0 %v10322_v16  ;;  %4316 = vmatprep.subr.bf16.mxu1 %v10325_v2  ;;  %v10347_v16 = vld [vmem:[#allocation14 + $0xa8] ss:$16 sps:$4 sm:$0xff]   ;;  %v10352_v2 = vld [vmem:[#allocation14 + $0xc4] ss:$16 sps:$4 sm:$0xff]  }
 0xb39   :  { %4305 = vmatprep.mubr.bf16.mxu0 %v12400_v18  ;;  %4346 = vmatprep.mubr.bf16.mxu1 %v12400_v18 }
 0xb3b   :  { %4276 = vmatpush1.bf16.msra.mxu0 %v10320_v36  ;;  %4317 = vmatpush1.bf16.msra.mxu1 %v10323_v23  ;;  %v10355_v36 = vld [vmem:[#allocation14 + $0xcc] ss:$16 sps:$4 sm:$0xff]   ;;  %v10350_v23 = vld [vmem:[#allocation14 + $0xc0] ss:$16 sps:$4 sm:$0xff]  }
 0xb3c   :  { %4277 = vmatprep.subr.bf16.mxu0 %v10328_v32  ;;  %4318 = vmatprep.subr.bf16.mxu1 %v10331_v49  ;;  %v10353_v32 = vld [vmem:[#allocation14 + $0xc8] ss:$16 sps:$4 sm:$0xff]   ;;  %v10358_v49 = vld [vmem:[#allocation14 + $0xe4] ss:$16 sps:$4 sm:$0xff]  }
 0xb3f   :  { %4278 = vmatpush1.bf16.msra.mxu0 %v10326_v25  ;;  %4319 = vmatpush1.bf16.msra.mxu1 %v10329_v28  ;;  %v10361_v25 = vld [vmem:[#allocation14 + $0xec] ss:$16 sps:$4 sm:$0xff]   ;;  %v10356_v28 = vld [vmem:[#allocation14 + $0xe0] ss:$16 sps:$4 sm:$0xff]  }
 0xb40   :  { %4279 = vmatprep.subr.bf16.mxu0 %v10334_v21  ;;  %4320 = vmatprep.subr.bf16.mxu1 %v10337_v0  ;;  %v10359_v21 = vld [vmem:[#allocation14 + $0xe8] ss:$16 sps:$4 sm:$0xff]  }
 0xb41   :  { %v4417_v0 = vld [vmem:[#allocation5 + $0x8] sm:$0xff] }
 0xb43   :  { %4280 = vmatpush1.bf16.msra.mxu0 %v10332_v12  ;;  %4321 = vmatpush1.bf16.msra.mxu1 %v10335_v40  ;;  %v4419_v12 = vld [vmem:[#allocation5 + $0x18] sm:$0xff]  ;;  %v4416_v40 = vld [vmem:[#allocation5] sm:$0xff] }
 0xb44   :  { %4281 = vmatprep.subr.bf16.mxu0 %v10340_v22  ;;  %4322 = vmatprep.subr.bf16.mxu1 %v10343_v47  ;;  %v4418_v22 = vld [vmem:[#allocation5 + $0x10] sm:$0xff]  ;;  %v4421_v47 = vld [vmem:[#allocation5 + $0x28] sm:$0xff] }
 0xb47   :  { %4282 = vmatpush1.bf16.msra.mxu0 %v10338_v20  ;;  %4323 = vmatpush1.bf16.msra.mxu1 %v10341_v1  ;;  %v4423_v20 = vld [vmem:[#allocation5 + $0x38] sm:$0xff]  ;;  %v4420_v1 = vld [vmem:[#allocation5 + $0x20] sm:$0xff] }
 0xb48   :  { %4283 = vmatprep.subr.bf16.mxu0 %v10346_v24  ;;  %4324 = vmatprep.subr.bf16.mxu1 %v10349_v44  ;;  %v4422_v24 = vld [vmem:[#allocation5 + $0x30] sm:$0xff]  ;;  %v4425_v44 = vld [vmem:[#allocation5 + $0x48] sm:$0xff] }
 0xb4b   :  { %4284 = vmatpush1.bf16.msra.mxu0 %v10344_v15  ;;  %4325 = vmatpush1.bf16.msra.mxu1 %v10347_v16  ;;  %v4427_v15 = vld [vmem:[#allocation5 + $0x58] sm:$0xff]  ;;  %v4424_v16 = vld [vmem:[#allocation5 + $0x40] sm:$0xff] }
 0xb4c   :  { %4285 = vmatprep.subr.bf16.mxu0 %v10352_v2  ;;  %4326 = vmatprep.subr.bf16.mxu1 %v10355_v36  ;;  %v4426_v2 = vld [vmem:[#allocation5 + $0x50] sm:$0xff]  ;;  %v4429_v36 = vld [vmem:[#allocation5 + $0x68] sm:$0xff] }
 0xb4f   :  { %4286 = vmatpush1.bf16.msra.mxu0 %v10350_v23  ;;  %4327 = vmatpush1.bf16.msra.mxu1 %v10353_v32  ;;  %v4428_v23 = vld [vmem:[#allocation5 + $0x60] sm:$0xff]  ;;  %v4430_v32 = vld [vmem:[#allocation5 + $0x70] sm:$0xff] }
 0xb50   :  { %4287 = vmatprep.subr.bf16.mxu0 %v10358_v49  ;;  %4328 = vmatprep.subr.bf16.mxu1 %v10361_v25  ;;  %v4433_v49 = vld [vmem:[#allocation5 + $0x88] sm:$0xff]  ;;  %v4435_v25 = vld [vmem:[#allocation5 + $0x98] sm:$0xff] }
 0xb53   :  { %4288 = vmatpush1.bf16.msra.mxu0 %v10356_v28  ;;  %4329 = vmatpush1.bf16.msra.mxu1 %v10359_v21  ;;  %v4432_v28 = vld [vmem:[#allocation5 + $0x80] sm:$0xff]  ;;  %v4434_v21 = vld [vmem:[#allocation5 + $0x90] sm:$0xff] }
 0xb54   :  { %4448 = vmatprep.subr.bf16.mxu0 %v4417_v0  ;;  %4489 = vmatprep.subr.bf16.mxu1 %v4419_v12  ;;  %v4437_v0 = vld [vmem:[#allocation5 + $0xa8] sm:$0xff]  ;;  %v4439_v12 = vld [vmem:[#allocation5 + $0xb8] sm:$0xff] }
 0xb56   :  { %4306 = vmatmul.mubr.bf16.vlgmr.msra.gmra.mrb[84].mxu0 %v11735_v4  ;;  %4347 = vmatmul.mubr.bf16.vlgmr.msra.gmra.mrb[116].mxu1 %v11735_v4  ;;  %v4431_v4 = vld [vmem:[#allocation5 + $0x78] sm:$0xff] }
 0xb57   :  { %4449 = vmatpush1.bf16.msra.mxu0 %v4416_v40  ;;  %4490 = vmatpush1.bf16.msra.mxu1 %v4418_v22  ;;  %v4436_v40 = vld [vmem:[#allocation5 + $0xa0] sm:$0xff]  ;;  %v4438_v22 = vld [vmem:[#allocation5 + $0xb0] sm:$0xff] }
 0xb58   :  { %4450 = vmatprep.subr.bf16.mxu0 %v4421_v47  ;;  %4491 = vmatprep.subr.bf16.mxu1 %v4423_v20  ;;  %v4441_v47 = vld [vmem:[#allocation5 + $0xc8] sm:$0xff]  ;;  %v4443_v20 = vld [vmem:[#allocation5 + $0xd8] sm:$0xff] }
 0xb59   :  { %4480 = vmatprep.mubr.bf16.mxu0 %v12400_v18  ;;  %4521 = vmatprep.mubr.bf16.mxu1 %v12400_v18 }
 0xb5b   :  { %4451 = vmatpush1.bf16.msra.mxu0 %v4420_v1  ;;  %4492 = vmatpush1.bf16.msra.mxu1 %v4422_v24  ;;  %v4440_v1 = vld [vmem:[#allocation5 + $0xc0] sm:$0xff]  ;;  %v4442_v24 = vld [vmem:[#allocation5 + $0xd0] sm:$0xff] }
 0xb5c   :  { %4452 = vmatprep.subr.bf16.mxu0 %v4425_v44  ;;  %4493 = vmatprep.subr.bf16.mxu1 %v4427_v15  ;;  %v4445_v44 = vld [vmem:[#allocation5 + $0xe8] sm:$0xff]  ;;  %v4447_v15 = vld [vmem:[#allocation5 + $0xf8] sm:$0xff] }
 0xb5f   :  { %4453 = vmatpush1.bf16.msra.mxu0 %v4424_v16  ;;  %4494 = vmatpush1.bf16.msra.mxu1 %v4426_v2  ;;  %v4444_v16 = vld [vmem:[#allocation5 + $0xe0] sm:$0xff]  ;;  %v4446_v2 = vld [vmem:[#allocation5 + $0xf0] sm:$0xff] }
 0xb60   :  { %4454 = vmatprep.subr.bf16.mxu0 %v4429_v36  ;;  %4495 = vmatprep.subr.bf16.mxu1 %v4431_v4  ;;  %v4385_v36 = vld [vmem:[#allocation4 + $0x8] sm:$0xff]  ;;  %v4387_v4 = vld [vmem:[#allocation4 + $0x18] sm:$0xff] }
 0xb63   :  { %4455 = vmatpush1.bf16.msra.mxu0 %v4428_v23  ;;  %4496 = vmatpush1.bf16.msra.mxu1 %v4430_v32  ;;  %v4384_v23 = vld [vmem:[#allocation4] sm:$0xff]  ;;  %v4386_v32 = vld [vmem:[#allocation4 + $0x10] sm:$0xff] }
 0xb64   :  { %4456 = vmatprep.subr.bf16.mxu0 %v4433_v49  ;;  %4497 = vmatprep.subr.bf16.mxu1 %v4435_v25  ;;  %v4389_v49 = vld [vmem:[#allocation4 + $0x28] sm:$0xff]  ;;  %v4391_v25 = vld [vmem:[#allocation4 + $0x38] sm:$0xff] }
 0xb67   :  { %4457 = vmatpush1.bf16.msra.mxu0 %v4432_v28  ;;  %4498 = vmatpush1.bf16.msra.mxu1 %v4434_v21  ;;  %v4388_v28 = vld [vmem:[#allocation4 + $0x20] sm:$0xff]  ;;  %v4390_v21 = vld [vmem:[#allocation4 + $0x30] sm:$0xff] }
 0xb68   :  { %4458 = vmatprep.subr.bf16.mxu0 %v4437_v0  ;;  %4499 = vmatprep.subr.bf16.mxu1 %v4439_v12  ;;  %v4395_v0 = vld [vmem:[#allocation4 + $0x58] sm:$0xff]  ;;  %v4392_v12 = vld [vmem:[#allocation4 + $0x40] sm:$0xff] }
 0xb6b   :  { %4459 = vmatpush1.bf16.msra.mxu0 %v4436_v40  ;;  %4500 = vmatpush1.bf16.msra.mxu1 %v4438_v22  ;;  %v4394_v40 = vld [vmem:[#allocation4 + $0x50] sm:$0xff]  ;;  %v4397_v22 = vld [vmem:[#allocation4 + $0x68] sm:$0xff] }
 0xb6c   :  { %4460 = vmatprep.subr.bf16.mxu0 %v4441_v47  ;;  %4501 = vmatprep.subr.bf16.mxu1 %v4443_v20  ;;  %v4399_v47 = vld [vmem:[#allocation4 + $0x78] sm:$0xff]  ;;  %v4396_v20 = vld [vmem:[#allocation4 + $0x60] sm:$0xff] }
 0xb6f   :  { %4461 = vmatpush1.bf16.msra.mxu0 %v4440_v1  ;;  %4502 = vmatpush1.bf16.msra.mxu1 %v4442_v24  ;;  %v4398_v1 = vld [vmem:[#allocation4 + $0x70] sm:$0xff]  ;;  %v4401_v24 = vld [vmem:[#allocation4 + $0x88] sm:$0xff] }
 0xb70   :  { %4462 = vmatprep.subr.bf16.mxu0 %v4445_v44  ;;  %4503 = vmatprep.subr.bf16.mxu1 %v4447_v15  ;;  %v4403_v44 = vld [vmem:[#allocation4 + $0x98] sm:$0xff]  ;;  %v4400_v15 = vld [vmem:[#allocation4 + $0x80] sm:$0xff] }
 0xb73   :  { %4463 = vmatpush1.bf16.msra.mxu0 %v4444_v16  ;;  %4504 = vmatpush1.bf16.msra.mxu1 %v4446_v2  ;;  %v4402_v16 = vld [vmem:[#allocation4 + $0x90] sm:$0xff]  ;;  %v4405_v2 = vld [vmem:[#allocation4 + $0xa8] sm:$0xff] }
 0xb74   :  { %4530 = vmatprep.subr.bf16.mxu0 %v4385_v36  ;;  %4571 = vmatprep.subr.bf16.mxu1 %v4387_v4  ;;  %v4407_v36 = vld [vmem:[#allocation4 + $0xb8] sm:$0xff]  ;;  %v4404_v4 = vld [vmem:[#allocation4 + $0xa0] sm:$0xff] }
 0xb76   :  { %4481 = vmatmul.mubr.bf16.vlgmr.msra.gmra.mrb[88].mxu0 %v11767_v6  ;;  %4522 = vmatmul.mubr.bf16.vlgmr.msra.gmra.mrb[120].mxu1 %v11767_v6  ;;  %v4393_v6 = vld [vmem:[#allocation4 + $0x48] sm:$0xff] }
 0xb77   :  { %4562 = vmatprep.mubr.bf16.mxu0 %v12400_v18  ;;  %4603 = vmatprep.mubr.bf16.mxu1 %v12400_v18 }
 0xb78   :  { %4531 = vmatpush1.bf16.msra.mxu0 %v4384_v23  ;;  %4572 = vmatpush1.bf16.msra.mxu1 %v4386_v32  ;;  %v4406_v23 = vld [vmem:[#allocation4 + $0xb0] sm:$0xff]  ;;  %v4409_v32 = vld [vmem:[#allocation4 + $0xc8] sm:$0xff] }
 0xb79   :  { %4532 = vmatprep.subr.bf16.mxu0 %v4389_v49  ;;  %4573 = vmatprep.subr.bf16.mxu1 %v4391_v25  ;;  %v4411_v49 = vld [vmem:[#allocation4 + $0xd8] sm:$0xff]  ;;  %v4408_v25 = vld [vmem:[#allocation4 + $0xc0] sm:$0xff] }
 0xb7c   :  { %4533 = vmatpush1.bf16.msra.mxu0 %v4388_v28  ;;  %4574 = vmatpush1.bf16.msra.mxu1 %v4390_v21  ;;  %v4410_v28 = vld [vmem:[#allocation4 + $0xd0] sm:$0xff]  ;;  %v4413_v21 = vld [vmem:[#allocation4 + $0xe8] sm:$0xff] }
 0xb7d   :  { %4534 = vmatprep.subr.bf16.mxu0 %v4393_v6  ;;  %4575 = vmatprep.subr.bf16.mxu1 %v4395_v0  ;;  %v4415_v6 = vld [vmem:[#allocation4 + $0xf8] sm:$0xff]  ;;  %v4412_v0 = vld [vmem:[#allocation4 + $0xe0] sm:$0xff] }
 0xb80   :  { %4535 = vmatpush1.bf16.msra.mxu0 %v4392_v12  ;;  %4576 = vmatpush1.bf16.msra.mxu1 %v4394_v40  ;;  %v4414_v12 = vld [vmem:[#allocation4 + $0xf0] sm:$0xff]  ;;  %v4674_v40 = vld [vmem:[#allocation7 + $0x8] sm:$0xff] }
 0xb81   :  { %4536 = vmatprep.subr.bf16.mxu0 %v4397_v22  ;;  %4577 = vmatprep.subr.bf16.mxu1 %v4399_v47  ;;  %v4676_v22 = vld [vmem:[#allocation7 + $0x18] sm:$0xff] }
 0xb84   :  { %4537 = vmatpush1.bf16.msra.mxu0 %v4396_v20  ;;  %4578 = vmatpush1.bf16.msra.mxu1 %v4398_v1 }
 0xb85   :  { %4538 = vmatprep.subr.bf16.mxu0 %v4401_v24  ;;  %4579 = vmatprep.subr.bf16.mxu1 %v4403_v44 }
 0xb88   :  { %4539 = vmatpush1.bf16.msra.mxu0 %v4400_v15  ;;  %4580 = vmatpush1.bf16.msra.mxu1 %v4402_v16 }
 0xb89   :  { %4540 = vmatprep.subr.bf16.mxu0 %v4405_v2  ;;  %4581 = vmatprep.subr.bf16.mxu1 %v4407_v36 }
 0xb8c   :  { %4541 = vmatpush1.bf16.msra.mxu0 %v4404_v4  ;;  %4582 = vmatpush1.bf16.msra.mxu1 %v4406_v23 }
 0xb8d   :  { %4542 = vmatprep.subr.bf16.mxu0 %v4409_v32  ;;  %4583 = vmatprep.subr.bf16.mxu1 %v4411_v49 }
 0xb90   :  { %4543 = vmatpush1.bf16.msra.mxu0 %v4408_v25  ;;  %4584 = vmatpush1.bf16.msra.mxu1 %v4410_v28 }
 0xb91   :  { %4544 = vmatprep.subr.bf16.mxu0 %v4413_v21  ;;  %4585 = vmatprep.subr.bf16.mxu1 %v4415_v6 }
 0xb94   :  { %4545 = vmatpush1.bf16.msra.mxu0 %v4412_v0  ;;  %4586 = vmatpush1.bf16.msra.mxu1 %v4414_v12 }
 0xb95   :  { %4705 = vmatprep.subr.bf16.mxu0 %v4674_v40  ;;  %4746 = vmatprep.subr.bf16.mxu1 %v4676_v22 }
 0xc09   :  { %v3998_v47 = vpop.f32.mrb[80].mxu0  ;;  %v4039_v20 = vpop.f32.mrb[112].mxu1 }
 0xc0a   :  { %v3999_v1 = vadd.f32 %v3998_v47, %v11789_v51  ;;  %v4040_v24 = vadd.f32 %v4039_v20, %v11791_v50  ;;  %v4000_v44 = vpop.f32.mrb[81].mxu0  ;;  %v4041_v15 = vpop.f32.mrb[113].mxu1 }
 0xc0b   :  { %v4001_v16 = vadd.f32 %v4000_v44, %v11793_v7  ;;  %v11818_v2 = vadd.f32 %v4041_v15, %v11795_v3  ;;  %v4002_v36 = vpop.f32.mrb[82].mxu0  ;;  %v4043_v4 = vpop.f32.mrb[114].mxu1 }
 0xc0c   :  { %v4046_v23 = vadd.f32 %v3999_v1, %v11417_v54  ;;  %v4003_v32 = vpop.f32.mrb[83].mxu0  ;;  %v4044_v49 = vpop.f32.mrb[115].mxu1  ;;  %v4048_v51 = vadd.f32 %v4040_v24, %v11429_v62 }
 0xc0d   :  { %v4047_v25 = vadd.f32 %v4001_v16, %v11423_v57 }
 0xc0e   :  { %v9823_v28 = vmul.f32 -1.442695, %v4046_v23 }
 0xc0f   :  { %v9824_v21 = vmul.f32 -1.442695, %v4047_v25 }
 0xc10   :  { %10730 = vpow2.f32 %v9823_v28 }
 0xc11   :  { %10732 = vpow2.f32 %v9824_v21 }
 0xc12   :  { %10734 = vtanh.f32 %v4048_v51 }
 0xc1a   :  { %v10731_v50 = vpop.eup %10730 }
 0xc1b   :  { %v10733_v6 = vpop.eup %10732  ;;  %v4053_v7 = vadd.f32 1.0, %v10731_v50 }
 0xc1c   :  { %v4059_v3 = vadd.f32 1.0, %v10733_v6  ;;  %v10735_v0 = vpop.eup %10734 }
 0xc1d   :  { %10736 = vrcp.f32 %v4053_v7 }
 0xc1e   :  { %10738 = vrcp.f32 %v4059_v3 }
 0xc27   :  { %v10737_v12 = vpop.eup %10736 }
 0xc28   :  { %v10739_v40 = vpop.eup %10738  ;;  %v4070_v22 = vmul.f32 %v10737_v12, %v10735_v0 }
 0xc29   :  { %v4069_v47 = vmul.f32 %v10739_v40, %v11718_v17  ;;  %v4307_v20 = vpop.f32.mrb[84].mxu0  ;;  %v4348_v1 = vpop.f32.mrb[116].mxu1 }
 0xc2a   :  { %v4355_v44 = vadd.f32 %v4307_v20, %v11452_v27  ;;  %v4309_v15 = vpop.f32.mrb[85].mxu0  ;;  %v4350_v16 = vpop.f32.mrb[117].mxu1  ;;  %v4357_v51 = vadd.f32 %v4348_v1, %v11484_v59 }
 0xc2b   :  { %v11825_v24 = vadd.f32 %v4070_v22, %v4069_v47  ;;  %v4356_v36 = vadd.f32 %v4309_v15, %v11454_v29  ;;  %v4311_v4 = vpop.f32.mrb[86].mxu0  ;;  %v4352_v23 = vpop.f32.mrb[118].mxu1  ;;  %v4358_v17 = vadd.f32 %v4350_v16, %v11486_v26 }
 0xc2c   :  { %v9858_v32 = vmul.f32 -1.442695, %v4355_v44  ;;  %v4312_v49 = vpop.f32.mrb[87].mxu0  ;;  %v4353_v25 = vpop.f32.mrb[119].mxu1 }
 0xc2d   :  { %v9859_v28 = vmul.f32 -1.442695, %v4356_v36  ;;  %v9860_v21 = vmul.f32 -1.442695, %v4358_v17  ;;  %v4673_v25 = vld [vmem:[#allocation7] sm:$0xff]  ;;  %v4678_v17 = vld [vmem:[#allocation7 + $0x28] sm:$0xff] }
 0xc2e   :  { %10740 = vpow2.f32 %v9858_v32 }
 0xc2f   :  { %10742 = vpow2.f32 %v9859_v28  ;;  %v4675_v28 = vld [vmem:[#allocation7 + $0x10] sm:$0xff] }
 0xc30   :  { %10744 = vpow2.f32 %v9860_v21  ;;  %v4680_v21 = vld [vmem:[#allocation7 + $0x38] sm:$0xff] }
 0xc31   :  { %10746 = vtanh.f32 %v4357_v51  ;;  %v4677_v51 = vld [vmem:[#allocation7 + $0x20] sm:$0xff] }
 0xc38   :  { %v10741_v27 = vpop.eup %10740 }
 0xc39   :  { %v10743_v50 = vpop.eup %10742  ;;  %v4362_v6 = vadd.f32 1.0, %v10741_v27  ;;  %v4679_v27 = vld [vmem:[#allocation7 + $0x30] sm:$0xff] }
 0xc3a   :  { %v4368_v7 = vadd.f32 1.0, %v10743_v50  ;;  %v10745_v29 = vpop.eup %10744  ;;  %v4682_v50 = vld [vmem:[#allocation7 + $0x48] sm:$0xff] }
 0xc3b   :  { %10748 = vrcp.f32 %v4362_v6  ;;  %v10747_v3 = vpop.eup %10746  ;;  %v4375_v22 = vadd.f32 1.0, %v10745_v29  ;;  %v4684_v6 = vld [vmem:[#allocation7 + $0x58] sm:$0xff]  ;;  %v4683_v29 = vld [vmem:[#allocation7 + $0x50] sm:$0xff] }
 0xc3c   :  { %10750 = vrcp.f32 %v4368_v7  ;;  %v4681_v7 = vld [vmem:[#allocation7 + $0x40] sm:$0xff] }
 0xc3d   :  { %10752 = vrcp.f32 %v4375_v22  ;;  %v4690_v22 = vld [vmem:[#allocation7 + $0x88] sm:$0xff] }
 0xc45   :  { %v10749_v0 = vpop.eup %10748 }
 0xc46   :  { %v10751_v12 = vpop.eup %10750  ;;  %v4379_v40 = vmul.f32 %v10749_v0, %v10747_v3  ;;  %v4686_v3 = vld [vmem:[#allocation7 + $0x68] sm:$0xff]  ;;  %v4688_v0 = vld [vmem:[#allocation7 + $0x78] sm:$0xff] }
 0xc47   :  { %v4378_v47 = vmul.f32 %v10751_v12, %v11724_v13  ;;  %v10753_v23 = vpop.eup %10752  ;;  %v4685_v12 = vld [vmem:[#allocation7 + $0x60] sm:$0xff] }
 0xc49   :  { %v11831_v26 = vadd.f32 %v4379_v40, %v4378_v47  ;;  %v11833_v20 = vpop.f32.mrb[88].mxu0  ;;  %v11835_v59 = vpop.f32.mrb[120].mxu1  ;;  %v4687_v40 = vld [vmem:[#allocation7 + $0x70] sm:$0xff]  ;;  %v4692_v47 = vld [vmem:[#allocation7 + $0x98] sm:$0xff] }
 0xc4a   :  { %v11837_v1 = vpop.f32.mrb[89].mxu0  ;;  %v11839_v44 = vpop.f32.mrb[121].mxu1 }
 0xc4b   :  { %v4486_v15 = vpop.f32.mrb[90].mxu0  ;;  %v4527_v16 = vpop.f32.mrb[122].mxu1  ;;  %10754 = vtanh.f32 %v11831_v26 }
 0xc4c   :  { %v4487_v36 = vpop.f32.mrb[91].mxu0  ;;  %v4528_v4 = vpop.f32.mrb[123].mxu1  ;;  %v4689_v15 = vld [vmem:[#allocation7 + $0x80] sm:$0xff]  ;;  %v4691_v16 = vld [vmem:[#allocation7 + $0x90] sm:$0xff] }
 0xc4d   :  { %v4694_v36 = vld [vmem:[#allocation7 + $0xa8] sm:$0xff]  ;;  %v4696_v4 = vld [vmem:[#allocation7 + $0xb8] sm:$0xff] }
 0xc55   :  { %v10755_v32 = vpop.eup %10754 }
 0xc56   :  { %v4382_v13 = vmul.f32 %v10755_v32, %v10753_v23  ;;  %v4693_v23 = vld [vmem:[#allocation7 + $0xa0] sm:$0xff]  ;;  %v4695_v32 = vld [vmem:[#allocation7 + $0xb0] sm:$0xff] }
 0xc58   :  { %v11842_v49 = vpack.c.bf16 %v4382_v13, %v4382_v13  ;;  %v4698_v13 = vld [vmem:[#allocation7 + $0xc8] sm:$0xff] }
 0xc5a   :  { %4563 = vmatmul.mubr.bf16.vlgmr.msra.gmra.mrb[92].mxu0 %v11842_v49  ;;  %4604 = vmatmul.mubr.bf16.vlgmr.msra.gmra.mrb[124].mxu1 %v11842_v49 }
 0xc5b   :  { %4706 = vmatpush1.bf16.msra.mxu0 %v4673_v25  ;;  %4747 = vmatpush1.bf16.msra.mxu1 %v4675_v28  ;;  %v4700_v25 = vld [vmem:[#allocation7 + $0xd8] sm:$0xff]  ;;  %v4697_v28 = vld [vmem:[#allocation7 + $0xc0] sm:$0xff] }
 0xc5c   :  { %4707 = vmatprep.subr.bf16.mxu0 %v4678_v17  ;;  %4748 = vmatprep.subr.bf16.mxu1 %v4680_v21  ;;  %v4699_v17 = vld [vmem:[#allocation7 + $0xd0] sm:$0xff]  ;;  %v4702_v21 = vld [vmem:[#allocation7 + $0xe8] sm:$0xff] }
 0xc5d   :  { %4737 = vmatprep.mubr.bf16.mxu0 %v12400_v18  ;;  %4778 = vmatprep.mubr.bf16.mxu1 %v12400_v18 }
 0xc5f   :  { %4708 = vmatpush1.bf16.msra.mxu0 %v4677_v51  ;;  %4749 = vmatpush1.bf16.msra.mxu1 %v4679_v27  ;;  %v4704_v51 = vld [vmem:[#allocation7 + $0xf8] sm:$0xff]  ;;  %v4701_v27 = vld [vmem:[#allocation7 + $0xe0] sm:$0xff] }
 0xc60   :  { %4709 = vmatprep.subr.bf16.mxu0 %v4682_v50  ;;  %4750 = vmatprep.subr.bf16.mxu1 %v4684_v6  ;;  %v4703_v50 = vld [vmem:[#allocation7 + $0xf0] sm:$0xff]  ;;  %v4642_v6 = vld [vmem:[#allocation6 + $0x8] sm:$0xff] }
 0xc63   :  { %4710 = vmatpush1.bf16.msra.mxu0 %v4681_v7  ;;  %4751 = vmatpush1.bf16.msra.mxu1 %v4683_v29  ;;  %v4644_v7 = vld [vmem:[#allocation6 + $0x18] sm:$0xff]  ;;  %v4641_v29 = vld [vmem:[#allocation6] sm:$0xff] }
 0xc64   :  { %4711 = vmatprep.subr.bf16.mxu0 %v4686_v3  ;;  %4752 = vmatprep.subr.bf16.mxu1 %v4688_v0  ;;  %v4643_v3 = vld [vmem:[#allocation6 + $0x10] sm:$0xff]  ;;  %v4646_v0 = vld [vmem:[#allocation6 + $0x28] sm:$0xff] }
 0xc67   :  { %4712 = vmatpush1.bf16.msra.mxu0 %v4685_v12  ;;  %4753 = vmatpush1.bf16.msra.mxu1 %v4687_v40  ;;  %v4648_v12 = vld [vmem:[#allocation6 + $0x38] sm:$0xff]  ;;  %v4645_v40 = vld [vmem:[#allocation6 + $0x20] sm:$0xff] }
 0xc68   :  { %4713 = vmatprep.subr.bf16.mxu0 %v4690_v22  ;;  %4754 = vmatprep.subr.bf16.mxu1 %v4692_v47  ;;  %v4647_v22 = vld [vmem:[#allocation6 + $0x30] sm:$0xff]  ;;  %v4652_v47 = vld [vmem:[#allocation6 + $0x58] sm:$0xff] }
 0xc6b   :  { %4714 = vmatpush1.bf16.msra.mxu0 %v4689_v15  ;;  %4755 = vmatpush1.bf16.msra.mxu1 %v4691_v16  ;;  %v4649_v15 = vld [vmem:[#allocation6 + $0x40] sm:$0xff]  ;;  %v4651_v16 = vld [vmem:[#allocation6 + $0x50] sm:$0xff] }
 0xc6c   :  { %4715 = vmatprep.subr.bf16.mxu0 %v4694_v36  ;;  %4756 = vmatprep.subr.bf16.mxu1 %v4696_v4  ;;  %v4654_v36 = vld [vmem:[#allocation6 + $0x68] sm:$0xff]  ;;  %v4656_v4 = vld [vmem:[#allocation6 + $0x78] sm:$0xff] }
 0xc6f   :  { %4716 = vmatpush1.bf16.msra.mxu0 %v4693_v23  ;;  %4757 = vmatpush1.bf16.msra.mxu1 %v4695_v32  ;;  %v4653_v23 = vld [vmem:[#allocation6 + $0x60] sm:$0xff]  ;;  %v4655_v32 = vld [vmem:[#allocation6 + $0x70] sm:$0xff] }
 0xc70   :  { %4717 = vmatprep.subr.bf16.mxu0 %v4698_v13  ;;  %4758 = vmatprep.subr.bf16.mxu1 %v4700_v25  ;;  %v4658_v13 = vld [vmem:[#allocation6 + $0x88] sm:$0xff]  ;;  %v4660_v25 = vld [vmem:[#allocation6 + $0x98] sm:$0xff] }
 0xc73   :  { %4718 = vmatpush1.bf16.msra.mxu0 %v4697_v28  ;;  %4759 = vmatpush1.bf16.msra.mxu1 %v4699_v17  ;;  %v4657_v28 = vld [vmem:[#allocation6 + $0x80] sm:$0xff]  ;;  %v4659_v17 = vld [vmem:[#allocation6 + $0x90] sm:$0xff] }
 0xc74   :  { %4719 = vmatprep.subr.bf16.mxu0 %v4702_v21  ;;  %4760 = vmatprep.subr.bf16.mxu1 %v4704_v51  ;;  %v4662_v21 = vld [vmem:[#allocation6 + $0xa8] sm:$0xff]  ;;  %v4664_v51 = vld [vmem:[#allocation6 + $0xb8] sm:$0xff] }
 0xc77   :  { %4720 = vmatpush1.bf16.msra.mxu0 %v4701_v27  ;;  %4761 = vmatpush1.bf16.msra.mxu1 %v4703_v50  ;;  %v4661_v27 = vld [vmem:[#allocation6 + $0xa0] sm:$0xff]  ;;  %v4663_v50 = vld [vmem:[#allocation6 + $0xb0] sm:$0xff] }
 0xc78   :  { %4787 = vmatprep.subr.bf16.mxu0 %v4642_v6  ;;  %4828 = vmatprep.subr.bf16.mxu1 %v4644_v7  ;;  %v4666_v6 = vld [vmem:[#allocation6 + $0xc8] sm:$0xff]  ;;  %v4668_v7 = vld [vmem:[#allocation6 + $0xd8] sm:$0xff] }
 0xc7a   :  { %4738 = vmatmul.mubr.bf16.vlgmr.msra.gmra.mrb[96].mxu0 %v11800_v19  ;;  %4779 = vmatmul.mubr.bf16.vlgmr.msra.gmra.mrb[128].mxu1 %v11800_v19  ;;  %v4650_v19 = vld [vmem:[#allocation6 + $0x48] sm:$0xff] }
 0xc7b   :  { %4819 = vmatprep.mubr.bf16.mxu0 %v12400_v18  ;;  %4860 = vmatprep.mubr.bf16.mxu1 %v12400_v18 }
 0xc7c   :  { %4788 = vmatpush1.bf16.msra.mxu0 %v4641_v29  ;;  %4829 = vmatpush1.bf16.msra.mxu1 %v4643_v3  ;;  %v4665_v29 = vld [vmem:[#allocation6 + $0xc0] sm:$0xff]  ;;  %v4667_v3 = vld [vmem:[#allocation6 + $0xd0] sm:$0xff] }
 0xc7d   :  { %4789 = vmatprep.subr.bf16.mxu0 %v4646_v0  ;;  %4830 = vmatprep.subr.bf16.mxu1 %v4648_v12  ;;  %v4670_v0 = vld [vmem:[#allocation6 + $0xe8] sm:$0xff]  ;;  %v4672_v12 = vld [vmem:[#allocation6 + $0xf8] sm:$0xff] }
 0xc80   :  { %4790 = vmatpush1.bf16.msra.mxu0 %v4645_v40  ;;  %4831 = vmatpush1.bf16.msra.mxu1 %v4647_v22  ;;  %v4669_v40 = vld [vmem:[#allocation6 + $0xe0] sm:$0xff]  ;;  %v4671_v22 = vld [vmem:[#allocation6 + $0xf0] sm:$0xff] }
 0xc81   :  { %4791 = vmatprep.subr.bf16.mxu0 %v4650_v19  ;;  %4832 = vmatprep.subr.bf16.mxu1 %v4652_v47  ;;  %v4932_v19 = vld [vmem:[#allocation9 + $0x8] sm:$0xff]  ;;  %v4934_v47 = vld [vmem:[#allocation9 + $0x18] sm:$0xff] }
 0xc84   :  { %4792 = vmatpush1.bf16.msra.mxu0 %v4649_v15  ;;  %4833 = vmatpush1.bf16.msra.mxu1 %v4651_v16 }
 0xc85   :  { %4793 = vmatprep.subr.bf16.mxu0 %v4654_v36  ;;  %4834 = vmatprep.subr.bf16.mxu1 %v4656_v4 }
 0xc88   :  { %4794 = vmatpush1.bf16.msra.mxu0 %v4653_v23  ;;  %4835 = vmatpush1.bf16.msra.mxu1 %v4655_v32 }
 0xc89   :  { %4795 = vmatprep.subr.bf16.mxu0 %v4658_v13  ;;  %4836 = vmatprep.subr.bf16.mxu1 %v4660_v25 }
 0xc8c   :  { %4796 = vmatpush1.bf16.msra.mxu0 %v4657_v28  ;;  %4837 = vmatpush1.bf16.msra.mxu1 %v4659_v17 }
 0xc8d   :  { %4797 = vmatprep.subr.bf16.mxu0 %v4662_v21  ;;  %4838 = vmatprep.subr.bf16.mxu1 %v4664_v51 }
 0xc90   :  { %4798 = vmatpush1.bf16.msra.mxu0 %v4661_v27  ;;  %4839 = vmatpush1.bf16.msra.mxu1 %v4663_v50 }
 0xc91   :  { %4799 = vmatprep.subr.bf16.mxu0 %v4666_v6  ;;  %4840 = vmatprep.subr.bf16.mxu1 %v4668_v7 }
 0xc94   :  { %4800 = vmatpush1.bf16.msra.mxu0 %v4665_v29  ;;  %4841 = vmatpush1.bf16.msra.mxu1 %v4667_v3 }
 0xc95   :  { %4801 = vmatprep.subr.bf16.mxu0 %v4670_v0  ;;  %4842 = vmatprep.subr.bf16.mxu1 %v4672_v12 }
 0xc98   :  { %4802 = vmatpush1.bf16.msra.mxu0 %v4669_v40  ;;  %4843 = vmatpush1.bf16.msra.mxu1 %v4671_v22 }
 0xc99   :  { %4963 = vmatprep.subr.bf16.mxu0 %v4932_v19  ;;  %5004 = vmatprep.subr.bf16.mxu1 %v4934_v47 }
 0xd2d   :  { %v4564_v15 = vpop.f32.mrb[92].mxu0  ;;  %v4605_v16 = vpop.f32.mrb[124].mxu1 }
 0xd2e   :  { %v4565_v36 = vadd.f32 %v4564_v15, %v11833_v20  ;;  %v4606_v4 = vadd.f32 %v4605_v16, %v11835_v59  ;;  %v4566_v23 = vpop.f32.mrb[93].mxu0  ;;  %v4607_v32 = vpop.f32.mrb[125].mxu1 }
 0xd2f   :  { %v4567_v13 = vadd.f32 %v4566_v23, %v11837_v1  ;;  %v4608_v25 = vadd.f32 %v4607_v32, %v11839_v44  ;;  %v4568_v28 = vpop.f32.mrb[94].mxu0  ;;  %v4609_v17 = vpop.f32.mrb[126].mxu1 }
 0xd30   :  { %v4612_v21 = vadd.f32 %v4565_v36, %v11413_v52  ;;  %v4569_v51 = vpop.f32.mrb[95].mxu0  ;;  %v4610_v27 = vpop.f32.mrb[127].mxu1  ;;  %v4614_v29 = vadd.f32 %v4606_v4, %v11425_v60 }
 0xd31   :  { %v4613_v50 = vadd.f32 %v4567_v13, %v11419_v55  ;;  %v4615_v20 = vadd.f32 %v4608_v25, %v11431_v63 }
 0xd32   :  { %v9861_v6 = vmul.f32 -1.442695, %v4612_v21 }
 0xd33   :  { %v9862_v7 = vmul.f32 -1.442695, %v4613_v50  ;;  %v9863_v59 = vmul.f32 -1.442695, %v4615_v20  ;;  %v4931_v20 = vld [vmem:[#allocation9] sm:$0xff] }
 0xd34   :  { %10756 = vpow2.f32 %v9861_v6 }
 0xd35   :  { %10758 = vpow2.f32 %v9862_v7 }
 0xd36   :  { %10760 = vpow2.f32 %v9863_v59  ;;  %v4933_v59 = vld [vmem:[#allocation9 + $0x10] sm:$0xff] }
 0xd37   :  { %10762 = vtanh.f32 %v4614_v29  ;;  %v4936_v29 = vld [vmem:[#allocation9 + $0x28] sm:$0xff] }
 0xd3e   :  { %v10757_v1 = vpop.eup %10756 }
 0xd3f   :  { %v10759_v3 = vpop.eup %10758  ;;  %v4619_v44 = vadd.f32 1.0, %v10757_v1  ;;  %v4938_v1 = vld [vmem:[#allocation9 + $0x38] sm:$0xff] }
 0xd40   :  { %v4625_v0 = vadd.f32 1.0, %v10759_v3  ;;  %v10761_v12 = vpop.eup %10760  ;;  %v4937_v3 = vld [vmem:[#allocation9 + $0x30] sm:$0xff] }
 0xd41   :  { %10764 = vrcp.f32 %v4619_v44  ;;  %v10763_v40 = vpop.eup %10762  ;;  %v4632_v15 = vadd.f32 1.0, %v10761_v12  ;;  %v4940_v44 = vld [vmem:[#allocation9 + $0x48] sm:$0xff]  ;;  %v4939_v12 = vld [vmem:[#allocation9 + $0x40] sm:$0xff] }
 0xd42   :  { %10766 = vrcp.f32 %v4625_v0  ;;  %v4942_v0 = vld [vmem:[#allocation9 + $0x58] sm:$0xff] }
 0xd43   :  { %10768 = vrcp.f32 %v4632_v15  ;;  %v4943_v15 = vld [vmem:[#allocation9 + $0x60] sm:$0xff] }
 0xd4b   :  { %v10765_v22 = vpop.eup %10764 }
 0xd4c   :  { %v10767_v19 = vpop.eup %10766  ;;  %v4636_v47 = vmul.f32 %v10765_v22, %v10763_v40  ;;  %v4941_v40 = vld [vmem:[#allocation9 + $0x50] sm:$0xff]  ;;  %v4944_v22 = vld [vmem:[#allocation9 + $0x68] sm:$0xff] }
 0xd4d   :  { %v4635_v16 = vmul.f32 %v10767_v19, %v11762_v11  ;;  %v11861_v36 = vpop.f32.mrb[96].mxu0  ;;  %v11863_v23 = vpop.f32.mrb[128].mxu1  ;;  %v4049_v11 = vadd.f32 %v11818_v2, %v11435_v9  ;;  %v4935_v2 = vld [vmem:[#allocation9 + $0x20] sm:$0xff]  ;;  %v4946_v19 = vld [vmem:[#allocation9 + $0x78] sm:$0xff] }
 0xd4e   :  { %v11865_v4 = vpop.f32.mrb[97].mxu0  ;;  %v11867_v32 = vpop.f32.mrb[129].mxu1 }
 0xd4f   :  { %v11869_v13 = vadd.f32 %v4636_v47, %v4635_v16  ;;  %v4743_v25 = vpop.f32.mrb[98].mxu0  ;;  %v4784_v28 = vpop.f32.mrb[130].mxu1  ;;  %v9825_v27 = vmul.f32 -1.442695, %v4049_v11  ;;  %v4945_v16 = vld [vmem:[#allocation9 + $0x70] sm:$0xff] }
 0xd50   :  { %v4744_v17 = vpop.f32.mrb[99].mxu0  ;;  %v4785_v21 = vpop.f32.mrb[131].mxu1  ;;  %v4948_v28 = vld [vmem:[#allocation9 + $0x88] sm:$0xff]  ;;  %v4949_v11 = vld [vmem:[#allocation9 + $0x90] sm:$0xff] }
 0xd51   :  { %10770 = vtanh.f32 %v11869_v13  ;;  %v10769_v51 = vpop.eup %10768  ;;  %v4950_v17 = vld [vmem:[#allocation9 + $0x98] sm:$0xff]  ;;  %v4947_v21 = vld [vmem:[#allocation9 + $0x80] sm:$0xff] }
 0xd52   :  { %10772 = vpow2.f32 %v9825_v27  ;;  %v4954_v27 = vld [vmem:[#allocation9 + $0xb8] sm:$0xff] }
 0xd53   :  { %10774 = vtanh.f32 %v11825_v24 }
 0xd5b   :  { %v10771_v50 = vpop.eup %10770 }
 0xd5c   :  { %v4639_v6 = vmul.f32 %v10771_v50, %v10769_v51  ;;  %v10773_v47 = vpop.eup %10772  ;;  %v4952_v51 = vld [vmem:[#allocation9 + $0xa8] sm:$0xff]  ;;  %v4951_v50 = vld [vmem:[#allocation9 + $0xa0] sm:$0xff] }
 0xd5d   :  { %v4066_v25 = vadd.f32 1.0, %v10773_v47  ;;  %v4899_v47 = vld [vmem:[#allocation8 + $0x8] sm:$0xff] }
 0xd5e   :  { %v11874_v7 = vpack.c.bf16 %v4639_v6, %v4639_v6  ;;  %v4953_v6 = vld [vmem:[#allocation9 + $0xb0] sm:$0xff] }
 0xd5f   :  { %10776 = vrcp.f32 %v4066_v25  ;;  %v4900_v25 = vld [vmem:[#allocation8 + $0x10] sm:$0xff] }
 0xd60   :  { %4820 = vmatmul.mubr.bf16.vlgmr.msra.gmra.mrb[100].mxu0 %v11874_v7  ;;  %4861 = vmatmul.mubr.bf16.vlgmr.msra.gmra.mrb[132].mxu1 %v11874_v7 }
 0xd61   :  { %4964 = vmatpush1.bf16.msra.mxu0 %v4931_v20  ;;  %5005 = vmatpush1.bf16.msra.mxu1 %v4933_v59  ;;  %v4956_v20 = vld [vmem:[#allocation9 + $0xc8] sm:$0xff]  ;;  %v4958_v59 = vld [vmem:[#allocation9 + $0xd8] sm:$0xff] }
 0xd62   :  { %4965 = vmatprep.subr.bf16.mxu0 %v4936_v29  ;;  %5006 = vmatprep.subr.bf16.mxu1 %v4938_v1  ;;  %v4955_v29 = vld [vmem:[#allocation9 + $0xc0] sm:$0xff]  ;;  %v4957_v1 = vld [vmem:[#allocation9 + $0xd0] sm:$0xff] }
 0xd63   :  { %4995 = vmatprep.mubr.bf16.mxu0 %v12400_v18  ;;  %5036 = vmatprep.mubr.bf16.mxu1 %v12400_v18 }
 0xd65   :  { %4966 = vmatpush1.bf16.msra.mxu0 %v4935_v2  ;;  %5007 = vmatpush1.bf16.msra.mxu1 %v4937_v3  ;;  %v10775_v2 = vpop.eup %10774  ;;  %v4960_v3 = vld [vmem:[#allocation9 + $0xe8] sm:$0xff] }
 0xd66   :  { %4967 = vmatprep.subr.bf16.mxu0 %v4940_v44  ;;  %5008 = vmatprep.subr.bf16.mxu1 %v4942_v0  ;;  %v4962_v44 = vld [vmem:[#allocation9 + $0xf8] sm:$0xff] }
 0xd69   :  { %4968 = vmatpush1.bf16.msra.mxu0 %v4939_v12  ;;  %5009 = vmatpush1.bf16.msra.mxu1 %v4941_v40  ;;  %v10777_v0 = vpop.eup %10776  ;;  %v4959_v12 = vld [vmem:[#allocation9 + $0xe0] sm:$0xff]  ;;  %v4961_v40 = vld [vmem:[#allocation9 + $0xf0] sm:$0xff] }
 0xd6a   :  { %4969 = vmatprep.subr.bf16.mxu0 %v4944_v22  ;;  %5010 = vmatprep.subr.bf16.mxu1 %v4946_v19  ;;  %v11881_v22 = vmul.f32 %v10777_v0, %v10775_v2  ;;  %v4915_v2 = vld [vmem:[#allocation8 + $0x88] sm:$0xff]  ;;  %v4916_v0 = vld [vmem:[#allocation8 + $0x90] sm:$0xff] }
 0xd6c   :  { %v4930_v19 = vpack.c.bf16 %v11881_v22, %v11881_v22 }
 0xd6d   :  { %4970 = vmatpush1.bf16.msra.mxu0 %v4943_v15  ;;  %5011 = vmatpush1.bf16.msra.mxu1 %v4945_v16  ;;  %v4901_v15 = vld [vmem:[#allocation8 + $0x18] sm:$0xff]  ;;  %v4898_v16 = vld [vmem:[#allocation8] sm:$0xff] }
 0xd6e   :  { %4971 = vmatprep.subr.bf16.mxu0 %v4948_v28  ;;  %5012 = vmatprep.subr.bf16.mxu1 %v4950_v17  ;;  %v4903_v28 = vld [vmem:[#allocation8 + $0x28] sm:$0xff]  ;;  %v4905_v17 = vld [vmem:[#allocation8 + $0x38] sm:$0xff] }
 0xd71   :  { %4972 = vmatpush1.bf16.msra.mxu0 %v4947_v21  ;;  %5013 = vmatpush1.bf16.msra.mxu1 %v4949_v11  ;;  %v4902_v21 = vld [vmem:[#allocation8 + $0x20] sm:$0xff]  ;;  %v4904_v11 = vld [vmem:[#allocation8 + $0x30] sm:$0xff] }
 0xd72   :  { %4973 = vmatprep.subr.bf16.mxu0 %v4952_v51  ;;  %5014 = vmatprep.subr.bf16.mxu1 %v4954_v27  ;;  %v4907_v51 = vld [vmem:[#allocation8 + $0x48] sm:$0xff]  ;;  %v4909_v27 = vld [vmem:[#allocation8 + $0x58] sm:$0xff] }
 0xd75   :  { %4974 = vmatpush1.bf16.msra.mxu0 %v4951_v50  ;;  %5015 = vmatpush1.bf16.msra.mxu1 %v4953_v6  ;;  %v4906_v50 = vld [vmem:[#allocation8 + $0x40] sm:$0xff]  ;;  %v4908_v6 = vld [vmem:[#allocation8 + $0x50] sm:$0xff] }
 0xd76   :  { %4975 = vmatprep.subr.bf16.mxu0 %v4956_v20  ;;  %5016 = vmatprep.subr.bf16.mxu1 %v4958_v59  ;;  %v4911_v20 = vld [vmem:[#allocation8 + $0x68] sm:$0xff]  ;;  %v4913_v59 = vld [vmem:[#allocation8 + $0x78] sm:$0xff] }
 0xd79   :  { %4976 = vmatpush1.bf16.msra.mxu0 %v4955_v29  ;;  %5017 = vmatpush1.bf16.msra.mxu1 %v4957_v1  ;;  %v4910_v29 = vld [vmem:[#allocation8 + $0x60] sm:$0xff]  ;;  %v4912_v1 = vld [vmem:[#allocation8 + $0x70] sm:$0xff] }
 0xd7a   :  { %4977 = vmatprep.subr.bf16.mxu0 %v4960_v3  ;;  %5018 = vmatprep.subr.bf16.mxu1 %v4962_v44  ;;  %v4917_v3 = vld [vmem:[#allocation8 + $0x98] sm:$0xff]  ;;  %v4914_v44 = vld [vmem:[#allocation8 + $0x80] sm:$0xff] }
 0xd7d   :  { %4978 = vmatpush1.bf16.msra.mxu0 %v4959_v12  ;;  %5019 = vmatpush1.bf16.msra.mxu1 %v4961_v40  ;;  %v4919_v12 = vld [vmem:[#allocation8 + $0xa8] sm:$0xff]  ;;  %v4921_v40 = vld [vmem:[#allocation8 + $0xb8] sm:$0xff] }
 0xd7e   :  { %5045 = vmatprep.subr.bf16.mxu0 %v4899_v47  ;;  %5086 = vmatprep.subr.bf16.mxu1 %v4901_v15  ;;  %v4920_v47 = vld [vmem:[#allocation8 + $0xb0] sm:$0xff]  ;;  %v4923_v15 = vld [vmem:[#allocation8 + $0xc8] sm:$0xff] }
 0xd80   :  { %4996 = vmatmul.mubr.bf16.vlgmr.msra.gmra.mrb[104].mxu0 %v4930_v19  ;;  %5037 = vmatmul.mubr.bf16.vlgmr.msra.gmra.mrb[136].mxu1 %v4930_v19  ;;  %v4918_v19 = vld [vmem:[#allocation8 + $0xa0] sm:$0xff] }
 0xd81   :  { %5077 = vmatprep.mubr.bf16.mxu0 %v12400_v18  ;;  %5118 = vmatprep.mubr.bf16.mxu1 %v12400_v18 }
 0xd82   :  { %5046 = vmatpush1.bf16.msra.mxu0 %v4898_v16  ;;  %5087 = vmatpush1.bf16.msra.mxu1 %v4900_v25  ;;  %v4925_v16 = vld [vmem:[#allocation8 + $0xd8] sm:$0xff]  ;;  %v4922_v25 = vld [vmem:[#allocation8 + $0xc0] sm:$0xff] }
 0xd83   :  { %5047 = vmatprep.subr.bf16.mxu0 %v4903_v28  ;;  %5088 = vmatprep.subr.bf16.mxu1 %v4905_v17  ;;  %v4924_v28 = vld [vmem:[#allocation8 + $0xd0] sm:$0xff]  ;;  %v4927_v17 = vld [vmem:[#allocation8 + $0xe8] sm:$0xff] }
 0xd86   :  { %5048 = vmatpush1.bf16.msra.mxu0 %v4902_v21  ;;  %5089 = vmatpush1.bf16.msra.mxu1 %v4904_v11  ;;  %v4929_v21 = vld [vmem:[#allocation8 + $0xf8] sm:$0xff]  ;;  %v4926_v11 = vld [vmem:[#allocation8 + $0xe0] sm:$0xff] }
 0xd87   :  { %5049 = vmatprep.subr.bf16.mxu0 %v4907_v51  ;;  %5090 = vmatprep.subr.bf16.mxu1 %v4909_v27  ;;  %v4928_v51 = vld [vmem:[#allocation8 + $0xf0] sm:$0xff] }
 0xd88   :  { %v10364_v27 = vld [vmem:[#allocation14 + $0x4] ss:$16 sps:$4 sm:$0xff]  }
 0xd8a   :  { %5050 = vmatpush1.bf16.msra.mxu0 %v4906_v50  ;;  %5091 = vmatpush1.bf16.msra.mxu1 %v4908_v6  ;;  %v10367_v50 = vld [vmem:[#allocation14 + $0xc] ss:$16 sps:$4 sm:$0xff]  }
 0xd8b   :  { %5051 = vmatprep.subr.bf16.mxu0 %v4911_v20  ;;  %5092 = vmatprep.subr.bf16.mxu1 %v4913_v59 }
 0xd8e   :  { %5052 = vmatpush1.bf16.msra.mxu0 %v4910_v29  ;;  %5093 = vmatpush1.bf16.msra.mxu1 %v4912_v1 }
 0xd8f   :  { %5053 = vmatprep.subr.bf16.mxu0 %v4915_v2  ;;  %5094 = vmatprep.subr.bf16.mxu1 %v4917_v3 }
 0xd92   :  { %5054 = vmatpush1.bf16.msra.mxu0 %v4914_v44  ;;  %5095 = vmatpush1.bf16.msra.mxu1 %v4916_v0 }
 0xd93   :  { %5055 = vmatprep.subr.bf16.mxu0 %v4919_v12  ;;  %5096 = vmatprep.subr.bf16.mxu1 %v4921_v40 }
 0xd96   :  { %5056 = vmatpush1.bf16.msra.mxu0 %v4918_v19  ;;  %5097 = vmatpush1.bf16.msra.mxu1 %v4920_v47 }
 0xd97   :  { %5057 = vmatprep.subr.bf16.mxu0 %v4923_v15  ;;  %5098 = vmatprep.subr.bf16.mxu1 %v4925_v16 }
 0xd9a   :  { %5058 = vmatpush1.bf16.msra.mxu0 %v4922_v25  ;;  %5099 = vmatpush1.bf16.msra.mxu1 %v4924_v28 }
 0xd9b   :  { %5059 = vmatprep.subr.bf16.mxu0 %v4927_v17  ;;  %5100 = vmatprep.subr.bf16.mxu1 %v4929_v21 }
 0xd9e   :  { %5060 = vmatpush1.bf16.msra.mxu0 %v4926_v11  ;;  %5101 = vmatpush1.bf16.msra.mxu1 %v4928_v51 }
 0xd9f   :  { %5354 = vmatprep.subr.bf16.mxu0 %v10364_v27  ;;  %5395 = vmatprep.subr.bf16.mxu1 %v10367_v50 }
 0xe33   :  { %v4821_v6 = vpop.f32.mrb[100].mxu0  ;;  %v4862_v20 = vpop.f32.mrb[132].mxu1 }
 0xe34   :  { %v4822_v59 = vadd.f32 %v4821_v6, %v11861_v36  ;;  %v4863_v29 = vadd.f32 %v4862_v20, %v11863_v23  ;;  %v4823_v1 = vpop.f32.mrb[101].mxu0  ;;  %v4864_v2 = vpop.f32.mrb[133].mxu1 }
 0xe35   :  { %v4824_v3 = vadd.f32 %v4823_v1, %v11865_v4  ;;  %v4865_v44 = vadd.f32 %v4864_v2, %v11867_v32  ;;  %v4825_v0 = vpop.f32.mrb[102].mxu0  ;;  %v4866_v12 = vpop.f32.mrb[134].mxu1 }
 0xe36   :  { %v4869_v40 = vadd.f32 %v4822_v59, %v11415_v53  ;;  %v4826_v19 = vpop.f32.mrb[103].mxu0  ;;  %v4867_v47 = vpop.f32.mrb[135].mxu1  ;;  %v4871_v28 = vadd.f32 %v4863_v29, %v11427_v61 }
 0xe37   :  { %v4870_v15 = vadd.f32 %v4824_v3, %v11421_v56  ;;  %v4872_v36 = vadd.f32 %v4865_v44, %v11433_v8 }
 0xe38   :  { %v9864_v16 = vmul.f32 -1.442695, %v4869_v40 }
 0xe39   :  { %v9865_v25 = vmul.f32 -1.442695, %v4870_v15  ;;  %v9866_v23 = vmul.f32 -1.442695, %v4872_v36 }
 0xe3a   :  { %10778 = vpow2.f32 %v9864_v16  ;;  %v10362_v16 = vld [vmem:[#allocation14] ss:$16 sps:$4 sm:$0xff]  }
 0xe3b   :  { %10780 = vpow2.f32 %v9865_v25  ;;  %v10365_v25 = vld [vmem:[#allocation14 + $0x8] ss:$16 sps:$4 sm:$0xff]  }
 0xe3c   :  { %10782 = vpow2.f32 %v9866_v23  ;;  %v10370_v23 = vld [vmem:[#allocation14 + $0x24] ss:$16 sps:$4 sm:$0xff]  }
 0xe3d   :  { %10784 = vtanh.f32 %v4871_v28  ;;  %v10373_v28 = vld [vmem:[#allocation14 + $0x2c] ss:$16 sps:$4 sm:$0xff]  }
 0xe44   :  { %v10779_v4 = vpop.eup %10778 }
 0xe45   :  { %v10781_v17 = vpop.eup %10780  ;;  %v4876_v32 = vadd.f32 1.0, %v10779_v4  ;;  %v10368_v4 = vld [vmem:[#allocation14 + $0x20] ss:$16 sps:$4 sm:$0xff]  }
 0xe46   :  { %v4882_v21 = vadd.f32 1.0, %v10781_v17  ;;  %v10783_v11 = vpop.eup %10782  ;;  %v10371_v17 = vld [vmem:[#allocation14 + $0x28] ss:$16 sps:$4 sm:$0xff]  }
 0xe47   :  { %10786 = vrcp.f32 %v4876_v32  ;;  %v10785_v51 = vpop.eup %10784  ;;  %v4889_v20 = vadd.f32 1.0, %v10783_v11  ;;  %v10376_v32 = vld [vmem:[#allocation14 + $0x44] ss:$16 sps:$4 sm:$0xff]   ;;  %v10374_v11 = vld [vmem:[#allocation14 + $0x40] ss:$16 sps:$4 sm:$0xff]  }
 0xe48   :  { %10788 = vrcp.f32 %v4882_v21  ;;  %v10379_v21 = vld [vmem:[#allocation14 + $0x4c] ss:$16 sps:$4 sm:$0xff]  }
 0xe49   :  { %10790 = vrcp.f32 %v4889_v20  ;;  %v10383_v20 = vld [vmem:[#allocation14 + $0x68] ss:$16 sps:$4 sm:$0xff]  }
 0xe51   :  { %v10787_v27 = vpop.eup %10786 }
 0xe52   :  { %v10789_v50 = vpop.eup %10788  ;;  %v4893_v6 = vmul.f32 %v10787_v27, %v10785_v51  ;;  %v10377_v51 = vld [vmem:[#allocation14 + $0x48] ss:$16 sps:$4 sm:$0xff]   ;;  %v10382_v27 = vld [vmem:[#allocation14 + $0x64] ss:$16 sps:$4 sm:$0xff]  }
 0xe53   :  { %v4892_v59 = vmul.f32 %v10789_v50, %v11797_v46  ;;  %v11896_v1 = vpop.f32.mrb[104].mxu0  ;;  %v11898_v2 = vpop.f32.mrb[136].mxu1  ;;  %v10385_v50 = vld [vmem:[#allocation14 + $0x6c] ss:$16 sps:$4 sm:$0xff]  }
 0xe54   :  { %v11900_v29 = vpop.f32.mrb[105].mxu0  ;;  %v11902_v3 = vpop.f32.mrb[137].mxu1 }
 0xe55   :  { %v11904_v44 = vadd.f32 %v4893_v6, %v4892_v59  ;;  %v5001_v0 = vpop.f32.mrb[106].mxu0  ;;  %v5042_v12 = vpop.f32.mrb[138].mxu1  ;;  %v10380_v6 = vld [vmem:[#allocation14 + $0x60] ss:$16 sps:$4 sm:$0xff]   ;;  %v10388_v59 = vld [vmem:[#allocation14 + $0x84] ss:$16 sps:$4 sm:$0xff]  }
 0xe56   :  { %v5002_v40 = vpop.f32.mrb[107].mxu0  ;;  %v5043_v19 = vpop.f32.mrb[139].mxu1  ;;  %v10391_v0 = vld [vmem:[#allocation14 + $0x8c] ss:$16 sps:$4 sm:$0xff]   ;;  %v10386_v12 = vld [vmem:[#allocation14 + $0x80] ss:$16 sps:$4 sm:$0xff]  }
 0xe57   :  { %10792 = vtanh.f32 %v11904_v44  ;;  %v10791_v47 = vpop.eup %10790  ;;  %v10389_v40 = vld [vmem:[#allocation14 + $0x88] ss:$16 sps:$4 sm:$0xff]   ;;  %v10394_v19 = vld [vmem:[#allocation14 + $0xa4] ss:$16 sps:$4 sm:$0xff]  }
 0xe61   :  { %v10793_v15 = vpop.eup %10792 }
 0xe62   :  { %v4896_v46 = vmul.f32 %v10793_v15, %v10791_v47  ;;  %v10397_v47 = vld [vmem:[#allocation14 + $0xac] ss:$16 sps:$4 sm:$0xff]   ;;  %v10392_v15 = vld [vmem:[#allocation14 + $0xa0] ss:$16 sps:$4 sm:$0xff]  }
 0xe64   :  { %v11907_v36 = vpack.c.bf16 %v4896_v46, %v4896_v46  ;;  %v10395_v46 = vld [vmem:[#allocation14 + $0xa8] ss:$16 sps:$4 sm:$0xff]  }
 0xe66   :  { %5078 = vmatmul.mubr.bf16.vlgmr.msra.gmra.mrb[108].mxu0 %v11907_v36  ;;  %5119 = vmatmul.mubr.bf16.vlgmr.msra.gmra.mrb[140].mxu1 %v11907_v36 }
 0xe67   :  { %5355 = vmatpush1.bf16.msra.mxu0 %v10362_v16  ;;  %5396 = vmatpush1.bf16.msra.mxu1 %v10365_v25  ;;  %v10400_v16 = vld [vmem:[#allocation14 + $0xc4] ss:$16 sps:$4 sm:$0xff]   ;;  %v10403_v25 = vld [vmem:[#allocation14 + $0xcc] ss:$16 sps:$4 sm:$0xff]  }
 0xe68   :  { %5356 = vmatprep.subr.bf16.mxu0 %v10370_v23  ;;  %5397 = vmatprep.subr.bf16.mxu1 %v10373_v28  ;;  %v10398_v23 = vld [vmem:[#allocation14 + $0xc0] ss:$16 sps:$4 sm:$0xff]   ;;  %v10401_v28 = vld [vmem:[#allocation14 + $0xc8] ss:$16 sps:$4 sm:$0xff]  }
 0xe69   :  { %5386 = vmatprep.mubr.bf16.mxu0 %v12400_v18  ;;  %5427 = vmatprep.mubr.bf16.mxu1 %v12400_v18 }
 0xe6b   :  { %5357 = vmatpush1.bf16.msra.mxu0 %v10368_v4  ;;  %5398 = vmatpush1.bf16.msra.mxu1 %v10371_v17  ;;  %v10406_v4 = vld [vmem:[#allocation14 + $0xe4] ss:$16 sps:$4 sm:$0xff]   ;;  %v10409_v17 = vld [vmem:[#allocation14 + $0xec] ss:$16 sps:$4 sm:$0xff]  }
 0xe6c   :  { %5358 = vmatprep.subr.bf16.mxu0 %v10376_v32  ;;  %5399 = vmatprep.subr.bf16.mxu1 %v10379_v21  ;;  %v10404_v32 = vld [vmem:[#allocation14 + $0xe0] ss:$16 sps:$4 sm:$0xff]   ;;  %v10407_v21 = vld [vmem:[#allocation14 + $0xe8] ss:$16 sps:$4 sm:$0xff]  }
 0xe6f   :  { %5359 = vmatpush1.bf16.msra.mxu0 %v10374_v11  ;;  %5400 = vmatpush1.bf16.msra.mxu1 %v10377_v51  ;;  %v5498_v11 = vld [vmem:[#allocation5 + $0x8] sm:$0xff]  ;;  %v5500_v51 = vld [vmem:[#allocation5 + $0x18] sm:$0xff] }
 0xe70   :  { %5360 = vmatprep.subr.bf16.mxu0 %v10382_v27  ;;  %5401 = vmatprep.subr.bf16.mxu1 %v10385_v50  ;;  %v5497_v27 = vld [vmem:[#allocation5] sm:$0xff]  ;;  %v5499_v50 = vld [vmem:[#allocation5 + $0x10] sm:$0xff] }
 0xe73   :  { %5361 = vmatpush1.bf16.msra.mxu0 %v10380_v6  ;;  %5402 = vmatpush1.bf16.msra.mxu1 %v10383_v20  ;;  %v5502_v6 = vld [vmem:[#allocation5 + $0x28] sm:$0xff]  ;;  %v5504_v20 = vld [vmem:[#allocation5 + $0x38] sm:$0xff] }
 0xe74   :  { %5362 = vmatprep.subr.bf16.mxu0 %v10388_v59  ;;  %5403 = vmatprep.subr.bf16.mxu1 %v10391_v0  ;;  %v5501_v59 = vld [vmem:[#allocation5 + $0x20] sm:$0xff]  ;;  %v5503_v0 = vld [vmem:[#allocation5 + $0x30] sm:$0xff] }
 0xe77   :  { %5363 = vmatpush1.bf16.msra.mxu0 %v10386_v12  ;;  %5404 = vmatpush1.bf16.msra.mxu1 %v10389_v40  ;;  %v5506_v12 = vld [vmem:[#allocation5 + $0x48] sm:$0xff]  ;;  %v5508_v40 = vld [vmem:[#allocation5 + $0x58] sm:$0xff] }
 0xe78   :  { %5364 = vmatprep.subr.bf16.mxu0 %v10394_v19  ;;  %5405 = vmatprep.subr.bf16.mxu1 %v10397_v47  ;;  %v5505_v19 = vld [vmem:[#allocation5 + $0x40] sm:$0xff]  ;;  %v5507_v47 = vld [vmem:[#allocation5 + $0x50] sm:$0xff] }
 0xe7b   :  { %5365 = vmatpush1.bf16.msra.mxu0 %v10392_v15  ;;  %5406 = vmatpush1.bf16.msra.mxu1 %v10395_v46  ;;  %v5510_v15 = vld [vmem:[#allocation5 + $0x68] sm:$0xff]  ;;  %v5509_v46 = vld [vmem:[#allocation5 + $0x60] sm:$0xff] }
 0xe7c   :  { %5366 = vmatprep.subr.bf16.mxu0 %v10400_v16  ;;  %5407 = vmatprep.subr.bf16.mxu1 %v10403_v25  ;;  %v5511_v16 = vld [vmem:[#allocation5 + $0x70] sm:$0xff]  ;;  %v5514_v25 = vld [vmem:[#allocation5 + $0x88] sm:$0xff] }
 0xe7f   :  { %5367 = vmatpush1.bf16.msra.mxu0 %v10398_v23  ;;  %5408 = vmatpush1.bf16.msra.mxu1 %v10401_v28  ;;  %v5516_v23 = vld [vmem:[#allocation5 + $0x98] sm:$0xff]  ;;  %v5513_v28 = vld [vmem:[#allocation5 + $0x80] sm:$0xff] }
 0xe80   :  { %5368 = vmatprep.subr.bf16.mxu0 %v10406_v4  ;;  %5409 = vmatprep.subr.bf16.mxu1 %v10409_v17  ;;  %v5515_v4 = vld [vmem:[#allocation5 + $0x90] sm:$0xff]  ;;  %v5518_v17 = vld [vmem:[#allocation5 + $0xa8] sm:$0xff] }
 0xe83   :  { %5369 = vmatpush1.bf16.msra.mxu0 %v10404_v32  ;;  %5410 = vmatpush1.bf16.msra.mxu1 %v10407_v21  ;;  %v5520_v32 = vld [vmem:[#allocation5 + $0xb8] sm:$0xff]  ;;  %v5517_v21 = vld [vmem:[#allocation5 + $0xa0] sm:$0xff] }
 0xe84   :  { %5529 = vmatprep.subr.bf16.mxu0 %v5498_v11  ;;  %5570 = vmatprep.subr.bf16.mxu1 %v5500_v51  ;;  %v5519_v11 = vld [vmem:[#allocation5 + $0xb0] sm:$0xff]  ;;  %v5522_v51 = vld [vmem:[#allocation5 + $0xc8] sm:$0xff] }
 0xe86   :  { %5387 = vmatmul.mubr.bf16.vlgmr.msra.gmra.mrb[112].mxu0 %v11842_v49  ;;  %5428 = vmatmul.mubr.bf16.vlgmr.msra.gmra.mrb[144].mxu1 %v11842_v49  ;;  %v5512_v49 = vld [vmem:[#allocation5 + $0x78] sm:$0xff] }
 0xe87   :  { %5530 = vmatpush1.bf16.msra.mxu0 %v5497_v27  ;;  %5571 = vmatpush1.bf16.msra.mxu1 %v5499_v50  ;;  %v5524_v27 = vld [vmem:[#allocation5 + $0xd8] sm:$0xff]  ;;  %v5521_v50 = vld [vmem:[#allocation5 + $0xc0] sm:$0xff] }
 0xe88   :  { %5531 = vmatprep.subr.bf16.mxu0 %v5502_v6  ;;  %5572 = vmatprep.subr.bf16.mxu1 %v5504_v20  ;;  %v5523_v6 = vld [vmem:[#allocation5 + $0xd0] sm:$0xff]  ;;  %v5526_v20 = vld [vmem:[#allocation5 + $0xe8] sm:$0xff] }
 0xe89   :  { %5561 = vmatprep.mubr.bf16.mxu0 %v12400_v18  ;;  %5602 = vmatprep.mubr.bf16.mxu1 %v12400_v18 }
 0xe8b   :  { %5532 = vmatpush1.bf16.msra.mxu0 %v5501_v59  ;;  %5573 = vmatpush1.bf16.msra.mxu1 %v5503_v0  ;;  %v5528_v59 = vld [vmem:[#allocation5 + $0xf8] sm:$0xff]  ;;  %v5525_v0 = vld [vmem:[#allocation5 + $0xe0] sm:$0xff] }
 0xe8c   :  { %5533 = vmatprep.subr.bf16.mxu0 %v5506_v12  ;;  %5574 = vmatprep.subr.bf16.mxu1 %v5508_v40  ;;  %v5527_v12 = vld [vmem:[#allocation5 + $0xf0] sm:$0xff]  ;;  %v5466_v40 = vld [vmem:[#allocation4 + $0x8] sm:$0xff] }
 0xe8f   :  { %5534 = vmatpush1.bf16.msra.mxu0 %v5505_v19  ;;  %5575 = vmatpush1.bf16.msra.mxu1 %v5507_v47  ;;  %v5468_v19 = vld [vmem:[#allocation4 + $0x18] sm:$0xff]  ;;  %v5465_v47 = vld [vmem:[#allocation4] sm:$0xff] }
 0xe90   :  { %5535 = vmatprep.subr.bf16.mxu0 %v5510_v15  ;;  %5576 = vmatprep.subr.bf16.mxu1 %v5512_v49  ;;  %v5467_v15 = vld [vmem:[#allocation4 + $0x10] sm:$0xff]  ;;  %v5470_v49 = vld [vmem:[#allocation4 + $0x28] sm:$0xff] }
 0xe93   :  { %5536 = vmatpush1.bf16.msra.mxu0 %v5509_v46  ;;  %5577 = vmatpush1.bf16.msra.mxu1 %v5511_v16  ;;  %v5472_v46 = vld [vmem:[#allocation4 + $0x38] sm:$0xff]  ;;  %v5469_v16 = vld [vmem:[#allocation4 + $0x20] sm:$0xff] }
 0xe94   :  { %5537 = vmatprep.subr.bf16.mxu0 %v5514_v25  ;;  %5578 = vmatprep.subr.bf16.mxu1 %v5516_v23  ;;  %v5471_v25 = vld [vmem:[#allocation4 + $0x30] sm:$0xff]  ;;  %v5476_v23 = vld [vmem:[#allocation4 + $0x58] sm:$0xff] }
 0xe97   :  { %5538 = vmatpush1.bf16.msra.mxu0 %v5513_v28  ;;  %5579 = vmatpush1.bf16.msra.mxu1 %v5515_v4  ;;  %v5473_v28 = vld [vmem:[#allocation4 + $0x40] sm:$0xff]  ;;  %v5475_v4 = vld [vmem:[#allocation4 + $0x50] sm:$0xff] }
 0xe98   :  { %5539 = vmatprep.subr.bf16.mxu0 %v5518_v17  ;;  %5580 = vmatprep.subr.bf16.mxu1 %v5520_v32  ;;  %v5478_v17 = vld [vmem:[#allocation4 + $0x68] sm:$0xff]  ;;  %v5480_v32 = vld [vmem:[#allocation4 + $0x78] sm:$0xff] }
 0xe9b   :  { %5540 = vmatpush1.bf16.msra.mxu0 %v5517_v21  ;;  %5581 = vmatpush1.bf16.msra.mxu1 %v5519_v11  ;;  %v5477_v21 = vld [vmem:[#allocation4 + $0x60] sm:$0xff]  ;;  %v5479_v11 = vld [vmem:[#allocation4 + $0x70] sm:$0xff] }
 0xe9c   :  { %5541 = vmatprep.subr.bf16.mxu0 %v5522_v51  ;;  %5582 = vmatprep.subr.bf16.mxu1 %v5524_v27  ;;  %v5482_v51 = vld [vmem:[#allocation4 + $0x88] sm:$0xff]  ;;  %v5484_v27 = vld [vmem:[#allocation4 + $0x98] sm:$0xff] }
 0xe9f   :  { %5542 = vmatpush1.bf16.msra.mxu0 %v5521_v50  ;;  %5583 = vmatpush1.bf16.msra.mxu1 %v5523_v6  ;;  %v5481_v50 = vld [vmem:[#allocation4 + $0x80] sm:$0xff]  ;;  %v5483_v6 = vld [vmem:[#allocation4 + $0x90] sm:$0xff] }
 0xea0   :  { %5543 = vmatprep.subr.bf16.mxu0 %v5526_v20  ;;  %5584 = vmatprep.subr.bf16.mxu1 %v5528_v59  ;;  %v5486_v20 = vld [vmem:[#allocation4 + $0xa8] sm:$0xff]  ;;  %v5488_v59 = vld [vmem:[#allocation4 + $0xb8] sm:$0xff] }
 0xea3   :  { %5544 = vmatpush1.bf16.msra.mxu0 %v5525_v0  ;;  %5585 = vmatpush1.bf16.msra.mxu1 %v5527_v12  ;;  %v5485_v0 = vld [vmem:[#allocation4 + $0xa0] sm:$0xff]  ;;  %v5487_v12 = vld [vmem:[#allocation4 + $0xb0] sm:$0xff] }
 0xea4   :  { %5611 = vmatprep.subr.bf16.mxu0 %v5466_v40  ;;  %5652 = vmatprep.subr.bf16.mxu1 %v5468_v19  ;;  %v5490_v40 = vld [vmem:[#allocation4 + $0xc8] sm:$0xff]  ;;  %v5492_v19 = vld [vmem:[#allocation4 + $0xd8] sm:$0xff] }
 0xea6   :  { %5562 = vmatmul.mubr.bf16.vlgmr.msra.gmra.mrb[116].mxu0 %v11874_v7  ;;  %5603 = vmatmul.mubr.bf16.vlgmr.msra.gmra.mrb[148].mxu1 %v11874_v7  ;;  %v5474_v7 = vld [vmem:[#allocation4 + $0x48] sm:$0xff] }
 0xea7   :  { %5643 = vmatprep.mubr.bf16.mxu0 %v12400_v18  ;;  %5684 = vmatprep.mubr.bf16.mxu1 %v12400_v18 }
 0xea8   :  { %5612 = vmatpush1.bf16.msra.mxu0 %v5465_v47  ;;  %5653 = vmatpush1.bf16.msra.mxu1 %v5467_v15  ;;  %v5489_v47 = vld [vmem:[#allocation4 + $0xc0] sm:$0xff]  ;;  %v5491_v15 = vld [vmem:[#allocation4 + $0xd0] sm:$0xff] }
 0xea9   :  { %5613 = vmatprep.subr.bf16.mxu0 %v5470_v49  ;;  %5654 = vmatprep.subr.bf16.mxu1 %v5472_v46  ;;  %v5494_v49 = vld [vmem:[#allocation4 + $0xe8] sm:$0xff]  ;;  %v5496_v46 = vld [vmem:[#allocation4 + $0xf8] sm:$0xff] }
 0xeac   :  { %5614 = vmatpush1.bf16.msra.mxu0 %v5469_v16  ;;  %5655 = vmatpush1.bf16.msra.mxu1 %v5471_v25  ;;  %v5493_v16 = vld [vmem:[#allocation4 + $0xe0] sm:$0xff]  ;;  %v5495_v25 = vld [vmem:[#allocation4 + $0xf0] sm:$0xff] }
 0xead   :  { %5615 = vmatprep.subr.bf16.mxu0 %v5474_v7  ;;  %5656 = vmatprep.subr.bf16.mxu1 %v5476_v23  ;;  %v5755_v7 = vld [vmem:[#allocation7 + $0x8] sm:$0xff]  ;;  %v5757_v23 = vld [vmem:[#allocation7 + $0x18] sm:$0xff] }
 0xeb0   :  { %5616 = vmatpush1.bf16.msra.mxu0 %v5473_v28  ;;  %5657 = vmatpush1.bf16.msra.mxu1 %v5475_v4 }
 0xeb1   :  { %5617 = vmatprep.subr.bf16.mxu0 %v5478_v17  ;;  %5658 = vmatprep.subr.bf16.mxu1 %v5480_v32 }
 0xeb4   :  { %5618 = vmatpush1.bf16.msra.mxu0 %v5477_v21  ;;  %5659 = vmatpush1.bf16.msra.mxu1 %v5479_v11 }
 0xeb5   :  { %5619 = vmatprep.subr.bf16.mxu0 %v5482_v51  ;;  %5660 = vmatprep.subr.bf16.mxu1 %v5484_v27 }
 0xeb8   :  { %5620 = vmatpush1.bf16.msra.mxu0 %v5481_v50  ;;  %5661 = vmatpush1.bf16.msra.mxu1 %v5483_v6 }
 0xeb9   :  { %5621 = vmatprep.subr.bf16.mxu0 %v5486_v20  ;;  %5662 = vmatprep.subr.bf16.mxu1 %v5488_v59 }
 0xebc   :  { %5622 = vmatpush1.bf16.msra.mxu0 %v5485_v0  ;;  %5663 = vmatpush1.bf16.msra.mxu1 %v5487_v12 }
 0xebd   :  { %5623 = vmatprep.subr.bf16.mxu0 %v5490_v40  ;;  %5664 = vmatprep.subr.bf16.mxu1 %v5492_v19 }
 0xec0   :  { %5624 = vmatpush1.bf16.msra.mxu0 %v5489_v47  ;;  %5665 = vmatpush1.bf16.msra.mxu1 %v5491_v15 }
 0xec1   :  { %5625 = vmatprep.subr.bf16.mxu0 %v5494_v49  ;;  %5666 = vmatprep.subr.bf16.mxu1 %v5496_v46 }
 0xec4   :  { %5626 = vmatpush1.bf16.msra.mxu0 %v5493_v16  ;;  %5667 = vmatpush1.bf16.msra.mxu1 %v5495_v25 }
 0xec5   :  { %5786 = vmatprep.subr.bf16.mxu0 %v5755_v7  ;;  %5827 = vmatprep.subr.bf16.mxu1 %v5757_v23 }
 0xf39   :  { %v5079_v28 = vpop.f32.mrb[108].mxu0  ;;  %v5120_v4 = vpop.f32.mrb[140].mxu1 }
 0xf3a   :  { %v5080_v17 = vadd.f32 %v5079_v28, %v11896_v1  ;;  %v5121_v32 = vadd.f32 %v5120_v4, %v11898_v2  ;;  %v5081_v21 = vpop.f32.mrb[109].mxu0  ;;  %v5122_v11 = vpop.f32.mrb[141].mxu1 }
 0xf3b   :  { %v5082_v51 = vadd.f32 %v5081_v21, %v11900_v29  ;;  %v11925_v27 = vadd.f32 %v5122_v11, %v11902_v3  ;;  %v5083_v50 = vpop.f32.mrb[110].mxu0  ;;  %v5124_v6 = vpop.f32.mrb[142].mxu1 }
 0xf3c   :  { %v5127_v20 = vadd.f32 %v5080_v17, %v11417_v54  ;;  %v5084_v59 = vpop.f32.mrb[111].mxu0  ;;  %v5125_v0 = vpop.f32.mrb[143].mxu1  ;;  %v5129_v1 = vadd.f32 %v5121_v32, %v11429_v62 }
 0xf3d   :  { %v5128_v12 = vadd.f32 %v5082_v51, %v11423_v57 }
 0xf3e   :  { %v9867_v40 = vmul.f32 -1.442695, %v5127_v20 }
 0xf3f   :  { %v9868_v19 = vmul.f32 -1.442695, %v5128_v12 }
 0xf40   :  { %10794 = vpow2.f32 %v9867_v40 }
 0xf41   :  { %10796 = vpow2.f32 %v9868_v19 }
 0xf42   :  { %10798 = vtanh.f32 %v5129_v1 }
 0xf4a   :  { %v10795_v2 = vpop.eup %10794 }
 0xf4b   :  { %v10797_v47 = vpop.eup %10796  ;;  %v5134_v29 = vadd.f32 1.0, %v10795_v2 }
 0xf4c   :  { %v5140_v3 = vadd.f32 1.0, %v10797_v47  ;;  %v10799_v15 = vpop.eup %10798 }
 0xf4d   :  { %10800 = vrcp.f32 %v5134_v29 }
 0xf4e   :  { %10802 = vrcp.f32 %v5140_v3 }
 0xf57   :  { %v10801_v49 = vpop.eup %10800 }
 0xf58   :  { %v10803_v46 = vpop.eup %10802  ;;  %v5151_v16 = vmul.f32 %v10801_v49, %v10799_v15 }
 0xf59   :  { %v5150_v25 = vmul.f32 %v10803_v46, %v11825_v24  ;;  %v5388_v7 = vpop.f32.mrb[112].mxu0  ;;  %v5429_v23 = vpop.f32.mrb[144].mxu1 }
 0xf5a   :  { %v5436_v28 = vadd.f32 %v5388_v7, %v11456_v31  ;;  %v5390_v4 = vpop.f32.mrb[113].mxu0  ;;  %v5431_v17 = vpop.f32.mrb[145].mxu1  ;;  %v5438_v12 = vadd.f32 %v5429_v23, %v11488_v30 }
 0xf5b   :  { %v11932_v32 = vadd.f32 %v5151_v16, %v5150_v25  ;;  %v5437_v21 = vadd.f32 %v5390_v4, %v11458_v33  ;;  %v5392_v11 = vpop.f32.mrb[114].mxu0  ;;  %v5433_v51 = vpop.f32.mrb[146].mxu1  ;;  %v5439_v24 = vadd.f32 %v5431_v17, %v11490_v34 }
 0xf5c   :  { %v9902_v50 = vmul.f32 -1.442695, %v5436_v28  ;;  %v5393_v6 = vpop.f32.mrb[115].mxu0  ;;  %v5434_v20 = vpop.f32.mrb[147].mxu1  ;;  %v5754_v51 = vld [vmem:[#allocation7] sm:$0xff] }
 0xf5d   :  { %v9903_v59 = vmul.f32 -1.442695, %v5437_v21  ;;  %v9904_v0 = vmul.f32 -1.442695, %v5439_v24  ;;  %v5759_v6 = vld [vmem:[#allocation7 + $0x28] sm:$0xff]  ;;  %v5761_v20 = vld [vmem:[#allocation7 + $0x38] sm:$0xff] }
 0xf5e   :  { %10804 = vpow2.f32 %v9902_v50  ;;  %v5756_v50 = vld [vmem:[#allocation7 + $0x10] sm:$0xff] }
 0xf5f   :  { %10806 = vpow2.f32 %v9903_v59  ;;  %v5758_v59 = vld [vmem:[#allocation7 + $0x20] sm:$0xff]  ;;  %v5760_v24 = vld [vmem:[#allocation7 + $0x30] sm:$0xff] }
 0xf60   :  { %10808 = vpow2.f32 %v9904_v0  ;;  %v5763_v0 = vld [vmem:[#allocation7 + $0x48] sm:$0xff] }
 0xf61   :  { %10810 = vtanh.f32 %v5438_v12  ;;  %v5765_v12 = vld [vmem:[#allocation7 + $0x58] sm:$0xff] }
 0xf68   :  { %v10805_v31 = vpop.eup %10804 }
 0xf69   :  { %v10807_v40 = vpop.eup %10806  ;;  %v5443_v19 = vadd.f32 1.0, %v10805_v31  ;;  %v5762_v31 = vld [vmem:[#allocation7 + $0x40] sm:$0xff] }
 0xf6a   :  { %v5449_v1 = vadd.f32 1.0, %v10807_v40  ;;  %v10809_v33 = vpop.eup %10808  ;;  %v5764_v40 = vld [vmem:[#allocation7 + $0x50] sm:$0xff] }
 0xf6b   :  { %10812 = vrcp.f32 %v5443_v19  ;;  %v10811_v2 = vpop.eup %10810  ;;  %v5456_v15 = vadd.f32 1.0, %v10809_v33  ;;  %v5767_v19 = vld [vmem:[#allocation7 + $0x68] sm:$0xff]  ;;  %v5766_v33 = vld [vmem:[#allocation7 + $0x60] sm:$0xff] }
 0xf6c   :  { %10814 = vrcp.f32 %v5449_v1  ;;  %v5769_v1 = vld [vmem:[#allocation7 + $0x78] sm:$0xff] }
 0xf6d   :  { %10816 = vrcp.f32 %v5456_v15  ;;  %v5772_v15 = vld [vmem:[#allocation7 + $0x90] sm:$0xff] }
 0xf75   :  { %v10813_v47 = vpop.eup %10812 }
 0xf76   :  { %v10815_v29 = vpop.eup %10814  ;;  %v5460_v3 = vmul.f32 %v10813_v47, %v10811_v2  ;;  %v5768_v2 = vld [vmem:[#allocation7 + $0x70] sm:$0xff]  ;;  %v5771_v47 = vld [vmem:[#allocation7 + $0x88] sm:$0xff] }
 0xf77   :  { %v5459_v49 = vmul.f32 %v10815_v29, %v11831_v26  ;;  %v10817_v17 = vpop.eup %10816  ;;  %v5773_v29 = vld [vmem:[#allocation7 + $0x98] sm:$0xff] }
 0xf79   :  { %v11938_v34 = vadd.f32 %v5460_v3, %v5459_v49  ;;  %v11940_v46 = vpop.f32.mrb[116].mxu0  ;;  %v11942_v30 = vpop.f32.mrb[148].mxu1  ;;  %v5770_v3 = vld [vmem:[#allocation7 + $0x80] sm:$0xff]  ;;  %v5775_v49 = vld [vmem:[#allocation7 + $0xa8] sm:$0xff] }
 0xf7a   :  { %v11944_v16 = vpop.f32.mrb[117].mxu0  ;;  %v11946_v25 = vpop.f32.mrb[149].mxu1 }
 0xf7b   :  { %v5567_v7 = vpop.f32.mrb[118].mxu0  ;;  %v5608_v23 = vpop.f32.mrb[150].mxu1  ;;  %10818 = vtanh.f32 %v11938_v34 }
 0xf7c   :  { %v5568_v28 = vpop.f32.mrb[119].mxu0  ;;  %v5609_v4 = vpop.f32.mrb[151].mxu1  ;;  %v5777_v7 = vld [vmem:[#allocation7 + $0xb8] sm:$0xff]  ;;  %v5774_v23 = vld [vmem:[#allocation7 + $0xa0] sm:$0xff] }
 0xf7d   :  { %v5776_v28 = vld [vmem:[#allocation7 + $0xb0] sm:$0xff]  ;;  %v5779_v4 = vld [vmem:[#allocation7 + $0xc8] sm:$0xff] }
 0xf85   :  { %v10819_v21 = vpop.eup %10818 }
 0xf86   :  { %v5463_v26 = vmul.f32 %v10819_v21, %v10817_v17  ;;  %v5781_v17 = vld [vmem:[#allocation7 + $0xd8] sm:$0xff]  ;;  %v5778_v21 = vld [vmem:[#allocation7 + $0xc0] sm:$0xff] }
 0xf88   :  { %v11949_v11 = vpack.c.bf16 %v5463_v26, %v5463_v26  ;;  %v5780_v26 = vld [vmem:[#allocation7 + $0xd0] sm:$0xff] }
 0xf8a   :  { %5644 = vmatmul.mubr.bf16.vlgmr.msra.gmra.mrb[120].mxu0 %v11949_v11  ;;  %5685 = vmatmul.mubr.bf16.vlgmr.msra.gmra.mrb[152].mxu1 %v11949_v11 }
 0xf8b   :  { %5787 = vmatpush1.bf16.msra.mxu0 %v5754_v51  ;;  %5828 = vmatpush1.bf16.msra.mxu1 %v5756_v50  ;;  %v5783_v51 = vld [vmem:[#allocation7 + $0xe8] sm:$0xff]  ;;  %v5785_v50 = vld [vmem:[#allocation7 + $0xf8] sm:$0xff] }
 0xf8c   :  { %5788 = vmatprep.subr.bf16.mxu0 %v5759_v6  ;;  %5829 = vmatprep.subr.bf16.mxu1 %v5761_v20  ;;  %v5782_v6 = vld [vmem:[#allocation7 + $0xe0] sm:$0xff]  ;;  %v5784_v20 = vld [vmem:[#allocation7 + $0xf0] sm:$0xff] }
 0xf8d   :  { %5818 = vmatprep.mubr.bf16.mxu0 %v12400_v18  ;;  %5859 = vmatprep.mubr.bf16.mxu1 %v12400_v18 }
 0xf8f   :  { %5789 = vmatpush1.bf16.msra.mxu0 %v5758_v59  ;;  %5830 = vmatpush1.bf16.msra.mxu1 %v5760_v24  ;;  %v5723_v59 = vld [vmem:[#allocation6 + $0x8] sm:$0xff]  ;;  %v5725_v24 = vld [vmem:[#allocation6 + $0x18] sm:$0xff] }
 0xf90   :  { %5790 = vmatprep.subr.bf16.mxu0 %v5763_v0  ;;  %5831 = vmatprep.subr.bf16.mxu1 %v5765_v12  ;;  %v5722_v0 = vld [vmem:[#allocation6] sm:$0xff]  ;;  %v5724_v12 = vld [vmem:[#allocation6 + $0x10] sm:$0xff] }
 0xf93   :  { %5791 = vmatpush1.bf16.msra.mxu0 %v5762_v31  ;;  %5832 = vmatpush1.bf16.msra.mxu1 %v5764_v40  ;;  %v5727_v31 = vld [vmem:[#allocation6 + $0x28] sm:$0xff]  ;;  %v5729_v40 = vld [vmem:[#allocation6 + $0x38] sm:$0xff] }
 0xf94   :  { %5792 = vmatprep.subr.bf16.mxu0 %v5767_v19  ;;  %5833 = vmatprep.subr.bf16.mxu1 %v5769_v1  ;;  %v5726_v19 = vld [vmem:[#allocation6 + $0x20] sm:$0xff]  ;;  %v5728_v1 = vld [vmem:[#allocation6 + $0x30] sm:$0xff] }
 0xf97   :  { %5793 = vmatpush1.bf16.msra.mxu0 %v5766_v33  ;;  %5834 = vmatpush1.bf16.msra.mxu1 %v5768_v2  ;;  %v5733_v33 = vld [vmem:[#allocation6 + $0x58] sm:$0xff]  ;;  %v5730_v2 = vld [vmem:[#allocation6 + $0x40] sm:$0xff] }
 0xf98   :  { %5794 = vmatprep.subr.bf16.mxu0 %v5771_v47  ;;  %5835 = vmatprep.subr.bf16.mxu1 %v5773_v29  ;;  %v5732_v47 = vld [vmem:[#allocation6 + $0x50] sm:$0xff]  ;;  %v5735_v29 = vld [vmem:[#allocation6 + $0x68] sm:$0xff] }
 0xf9b   :  { %5795 = vmatpush1.bf16.msra.mxu0 %v5770_v3  ;;  %5836 = vmatpush1.bf16.msra.mxu1 %v5772_v15  ;;  %v5737_v3 = vld [vmem:[#allocation6 + $0x78] sm:$0xff]  ;;  %v5734_v15 = vld [vmem:[#allocation6 + $0x60] sm:$0xff] }
 0xf9c   :  { %5796 = vmatprep.subr.bf16.mxu0 %v5775_v49  ;;  %5837 = vmatprep.subr.bf16.mxu1 %v5777_v7  ;;  %v5736_v49 = vld [vmem:[#allocation6 + $0x70] sm:$0xff]  ;;  %v5739_v7 = vld [vmem:[#allocation6 + $0x88] sm:$0xff] }
 0xf9f   :  { %5797 = vmatpush1.bf16.msra.mxu0 %v5774_v23  ;;  %5838 = vmatpush1.bf16.msra.mxu1 %v5776_v28  ;;  %v5741_v23 = vld [vmem:[#allocation6 + $0x98] sm:$0xff]  ;;  %v5738_v28 = vld [vmem:[#allocation6 + $0x80] sm:$0xff] }
 0xfa0   :  { %5798 = vmatprep.subr.bf16.mxu0 %v5779_v4  ;;  %5839 = vmatprep.subr.bf16.mxu1 %v5781_v17  ;;  %v5740_v4 = vld [vmem:[#allocation6 + $0x90] sm:$0xff]  ;;  %v5743_v17 = vld [vmem:[#allocation6 + $0xa8] sm:$0xff] }
 0xfa3   :  { %5799 = vmatpush1.bf16.msra.mxu0 %v5778_v21  ;;  %5840 = vmatpush1.bf16.msra.mxu1 %v5780_v26  ;;  %v5745_v21 = vld [vmem:[#allocation6 + $0xb8] sm:$0xff]  ;;  %v5742_v26 = vld [vmem:[#allocation6 + $0xa0] sm:$0xff] }
 0xfa4   :  { %5800 = vmatprep.subr.bf16.mxu0 %v5783_v51  ;;  %5841 = vmatprep.subr.bf16.mxu1 %v5785_v50  ;;  %v5744_v51 = vld [vmem:[#allocation6 + $0xb0] sm:$0xff]  ;;  %v5747_v50 = vld [vmem:[#allocation6 + $0xc8] sm:$0xff] }
 0xfa7   :  { %5801 = vmatpush1.bf16.msra.mxu0 %v5782_v6  ;;  %5842 = vmatpush1.bf16.msra.mxu1 %v5784_v20  ;;  %v5749_v6 = vld [vmem:[#allocation6 + $0xd8] sm:$0xff]  ;;  %v5746_v20 = vld [vmem:[#allocation6 + $0xc0] sm:$0xff] }
 0xfa8   :  { %5868 = vmatprep.subr.bf16.mxu0 %v5723_v59  ;;  %5909 = vmatprep.subr.bf16.mxu1 %v5725_v24  ;;  %v5748_v59 = vld [vmem:[#allocation6 + $0xd0] sm:$0xff]  ;;  %v5751_v24 = vld [vmem:[#allocation6 + $0xe8] sm:$0xff] }
 0xfaa   :  { %5819 = vmatmul.mubr.bf16.vlgmr.msra.gmra.mrb[124].mxu0 %v11907_v36  ;;  %5860 = vmatmul.mubr.bf16.vlgmr.msra.gmra.mrb[156].mxu1 %v11907_v36  ;;  %v5731_v36 = vld [vmem:[#allocation6 + $0x48] sm:$0xff] }
 0xfab   :  { %5900 = vmatprep.mubr.bf16.mxu0 %v12400_v18  ;;  %5941 = vmatprep.mubr.bf16.mxu1 %v12400_v18 }
 0xfac   :  { %5869 = vmatpush1.bf16.msra.mxu0 %v5722_v0  ;;  %5910 = vmatpush1.bf16.msra.mxu1 %v5724_v12  ;;  %v5753_v0 = vld [vmem:[#allocation6 + $0xf8] sm:$0xff]  ;;  %v5750_v12 = vld [vmem:[#allocation6 + $0xe0] sm:$0xff] }
 0xfad   :  { %5870 = vmatprep.subr.bf16.mxu0 %v5727_v31  ;;  %5911 = vmatprep.subr.bf16.mxu1 %v5729_v40  ;;  %v5752_v31 = vld [vmem:[#allocation6 + $0xf0] sm:$0xff]  ;;  %v6013_v40 = vld [vmem:[#allocation9 + $0x8] sm:$0xff] }
 0xfb0   :  { %5871 = vmatpush1.bf16.msra.mxu0 %v5726_v19  ;;  %5912 = vmatpush1.bf16.msra.mxu1 %v5728_v1  ;;  %v6015_v19 = vld [vmem:[#allocation9 + $0x18] sm:$0xff] }
 0xfb1   :  { %5872 = vmatprep.subr.bf16.mxu0 %v5731_v36  ;;  %5913 = vmatprep.subr.bf16.mxu1 %v5733_v33 }
 0xfb4   :  { %5873 = vmatpush1.bf16.msra.mxu0 %v5730_v2  ;;  %5914 = vmatpush1.bf16.msra.mxu1 %v5732_v47 }
 0xfb5   :  { %5874 = vmatprep.subr.bf16.mxu0 %v5735_v29  ;;  %5915 = vmatprep.subr.bf16.mxu1 %v5737_v3 }
 0xfb8   :  { %5875 = vmatpush1.bf16.msra.mxu0 %v5734_v15  ;;  %5916 = vmatpush1.bf16.msra.mxu1 %v5736_v49 }
 0xfb9   :  { %5876 = vmatprep.subr.bf16.mxu0 %v5739_v7  ;;  %5917 = vmatprep.subr.bf16.mxu1 %v5741_v23 }
 0xfbc   :  { %5877 = vmatpush1.bf16.msra.mxu0 %v5738_v28  ;;  %5918 = vmatpush1.bf16.msra.mxu1 %v5740_v4 }
 0xfbd   :  { %5878 = vmatprep.subr.bf16.mxu0 %v5743_v17  ;;  %5919 = vmatprep.subr.bf16.mxu1 %v5745_v21 }
 0xfc0   :  { %5879 = vmatpush1.bf16.msra.mxu0 %v5742_v26  ;;  %5920 = vmatpush1.bf16.msra.mxu1 %v5744_v51 }
 0xfc1   :  { %5880 = vmatprep.subr.bf16.mxu0 %v5747_v50  ;;  %5921 = vmatprep.subr.bf16.mxu1 %v5749_v6 }
 0xfc4   :  { %5881 = vmatpush1.bf16.msra.mxu0 %v5746_v20  ;;  %5922 = vmatpush1.bf16.msra.mxu1 %v5748_v59 }
 0xfc5   :  { %5882 = vmatprep.subr.bf16.mxu0 %v5751_v24  ;;  %5923 = vmatprep.subr.bf16.mxu1 %v5753_v0 }
 0xfc8   :  { %5883 = vmatpush1.bf16.msra.mxu0 %v5750_v12  ;;  %5924 = vmatpush1.bf16.msra.mxu1 %v5752_v31 }
 0xfc9   :  { %6044 = vmatprep.subr.bf16.mxu0 %v6013_v40  ;;  %6085 = vmatprep.subr.bf16.mxu1 %v6015_v19 }
0x105d   :  { %v5645_v1 = vpop.f32.mrb[120].mxu0  ;;  %v5686_v36 = vpop.f32.mrb[152].mxu1 }
0x105e   :  { %v5646_v33 = vadd.f32 %v5645_v1, %v11940_v46  ;;  %v5687_v2 = vadd.f32 %v5686_v36, %v11942_v30  ;;  %v5647_v47 = vpop.f32.mrb[121].mxu0  ;;  %v5688_v29 = vpop.f32.mrb[153].mxu1 }
0x105f   :  { %v5648_v3 = vadd.f32 %v5647_v47, %v11944_v16  ;;  %v5689_v15 = vadd.f32 %v5688_v29, %v11946_v25  ;;  %v5649_v49 = vpop.f32.mrb[122].mxu0  ;;  %v5690_v7 = vpop.f32.mrb[154].mxu1 }
0x1060   :  { %v5693_v23 = vadd.f32 %v5646_v33, %v11413_v52  ;;  %v5650_v28 = vpop.f32.mrb[123].mxu0  ;;  %v5691_v4 = vpop.f32.mrb[155].mxu1  ;;  %v5695_v51 = vadd.f32 %v5687_v2, %v11425_v60 }
0x1061   :  { %v5694_v17 = vadd.f32 %v5648_v3, %v11419_v55  ;;  %v5696_v46 = vadd.f32 %v5689_v15, %v11431_v63 }
0x1062   :  { %v9905_v21 = vmul.f32 -1.442695, %v5693_v23 }
0x1063   :  { %v9906_v26 = vmul.f32 -1.442695, %v5694_v17  ;;  %v9907_v30 = vmul.f32 -1.442695, %v5696_v46  ;;  %v6012_v17 = vld [vmem:[#allocation9] sm:$0xff]  ;;  %v6019_v46 = vld [vmem:[#allocation9 + $0x38] sm:$0xff] }
0x1064   :  { %10820 = vpow2.f32 %v9905_v21  ;;  %v6014_v21 = vld [vmem:[#allocation9 + $0x10] sm:$0xff] }
0x1065   :  { %10822 = vpow2.f32 %v9906_v26  ;;  %v6017_v26 = vld [vmem:[#allocation9 + $0x28] sm:$0xff] }
0x1066   :  { %10824 = vpow2.f32 %v9907_v30  ;;  %v6018_v30 = vld [vmem:[#allocation9 + $0x30] sm:$0xff] }
0x1067   :  { %10826 = vtanh.f32 %v5695_v51  ;;  %v6021_v51 = vld [vmem:[#allocation9 + $0x48] sm:$0xff] }
0x106e   :  { %v10821_v16 = vpop.eup %10820 }
0x106f   :  { %v10823_v50 = vpop.eup %10822  ;;  %v5700_v25 = vadd.f32 1.0, %v10821_v16  ;;  %v6023_v16 = vld [vmem:[#allocation9 + $0x58] sm:$0xff] }
0x1070   :  { %v5706_v6 = vadd.f32 1.0, %v10823_v50  ;;  %v10825_v20 = vpop.eup %10824  ;;  %v6020_v50 = vld [vmem:[#allocation9 + $0x40] sm:$0xff] }
0x1071   :  { %10828 = vrcp.f32 %v5700_v25  ;;  %v10827_v59 = vpop.eup %10826  ;;  %v5713_v31 = vadd.f32 1.0, %v10825_v20  ;;  %v6022_v25 = vld [vmem:[#allocation9 + $0x50] sm:$0xff]  ;;  %v6027_v20 = vld [vmem:[#allocation9 + $0x78] sm:$0xff] }
0x1072   :  { %10830 = vrcp.f32 %v5706_v6  ;;  %v6025_v6 = vld [vmem:[#allocation9 + $0x68] sm:$0xff] }
0x1073   :  { %10832 = vrcp.f32 %v5713_v31  ;;  %v6029_v31 = vld [vmem:[#allocation9 + $0x88] sm:$0xff] }
0x107b   :  { %v10829_v24 = vpop.eup %10828 }
0x107c   :  { %v10831_v0 = vpop.eup %10830  ;;  %v5717_v12 = vmul.f32 %v10829_v24, %v10827_v59  ;;  %v6024_v24 = vld [vmem:[#allocation9 + $0x60] sm:$0xff] }
0x107d   :  { %v5716_v40 = vmul.f32 %v10831_v0, %v11869_v13  ;;  %v11968_v19 = vpop.f32.mrb[124].mxu0  ;;  %v11970_v1 = vpop.f32.mrb[156].mxu1  ;;  %v5130_v13 = vadd.f32 %v11925_v27, %v11435_v9  ;;  %v6016_v27 = vld [vmem:[#allocation9 + $0x20] sm:$0xff]  ;;  %v6026_v0 = vld [vmem:[#allocation9 + $0x70] sm:$0xff] }
0x107e   :  { %v11972_v36 = vpop.f32.mrb[125].mxu0  ;;  %v11974_v33 = vpop.f32.mrb[157].mxu1 }
0x107f   :  { %v11976_v2 = vadd.f32 %v5717_v12, %v5716_v40  ;;  %v5824_v47 = vpop.f32.mrb[126].mxu0  ;;  %v5865_v29 = vpop.f32.mrb[158].mxu1  ;;  %v9869_v7 = vmul.f32 -1.442695, %v5130_v13  ;;  %v6031_v40 = vld [vmem:[#allocation9 + $0x98] sm:$0xff]  ;;  %v6032_v13 = vld [vmem:[#allocation9 + $0xa0] sm:$0xff] }
0x1080   :  { %v5825_v3 = vpop.f32.mrb[127].mxu0  ;;  %v5866_v15 = vpop.f32.mrb[159].mxu1  ;;  %v6028_v47 = vld [vmem:[#allocation9 + $0x80] sm:$0xff]  ;;  %v6030_v29 = vld [vmem:[#allocation9 + $0x90] sm:$0xff] }
0x1081   :  { %10834 = vtanh.f32 %v11976_v2  ;;  %v10833_v49 = vpop.eup %10832  ;;  %v6033_v3 = vld [vmem:[#allocation9 + $0xa8] sm:$0xff]  ;;  %v6035_v15 = vld [vmem:[#allocation9 + $0xb8] sm:$0xff] }
0x1082   :  { %10836 = vpow2.f32 %v9869_v7  ;;  %v6037_v7 = vld [vmem:[#allocation9 + $0xc8] sm:$0xff] }
0x1083   :  { %10838 = vtanh.f32 %v11932_v32 }
0x108b   :  { %v10835_v23 = vpop.eup %10834 }
0x108c   :  { %v5720_v28 = vmul.f32 %v10835_v23, %v10833_v49  ;;  %v10837_v59 = vpop.eup %10836  ;;  %v6034_v49 = vld [vmem:[#allocation9 + $0xb0] sm:$0xff]  ;;  %v6039_v23 = vld [vmem:[#allocation9 + $0xd8] sm:$0xff] }
0x108d   :  { %v5147_v12 = vadd.f32 1.0, %v10837_v59  ;;  %v5981_v59 = vld [vmem:[#allocation8 + $0x10] sm:$0xff] }
0x108e   :  { %v11981_v4 = vpack.c.bf16 %v5720_v28, %v5720_v28  ;;  %v6036_v28 = vld [vmem:[#allocation9 + $0xc0] sm:$0xff] }
0x108f   :  { %10840 = vrcp.f32 %v5147_v12  ;;  %v5983_v12 = vld [vmem:[#allocation8 + $0x20] sm:$0xff] }
0x1090   :  { %5901 = vmatmul.mubr.bf16.vlgmr.msra.gmra.mrb[128].mxu0 %v11981_v4  ;;  %5942 = vmatmul.mubr.bf16.vlgmr.msra.gmra.mrb[160].mxu1 %v11981_v4 }
0x1091   :  { %6045 = vmatpush1.bf16.msra.mxu0 %v6012_v17  ;;  %6086 = vmatpush1.bf16.msra.mxu1 %v6014_v21  ;;  %v6038_v17 = vld [vmem:[#allocation9 + $0xd0] sm:$0xff]  ;;  %v10839_v21 = vpop.eup %10838 }
0x1092   :  { %6046 = vmatprep.subr.bf16.mxu0 %v6017_v26  ;;  %6087 = vmatprep.subr.bf16.mxu1 %v6019_v46  ;;  %v6041_v26 = vld [vmem:[#allocation9 + $0xe8] sm:$0xff]  ;;  %v6043_v46 = vld [vmem:[#allocation9 + $0xf8] sm:$0xff] }
0x1093   :  { %6076 = vmatprep.mubr.bf16.mxu0 %v12400_v18  ;;  %6117 = vmatprep.mubr.bf16.mxu1 %v12400_v18 }
0x1095   :  { %6047 = vmatpush1.bf16.msra.mxu0 %v6016_v27  ;;  %6088 = vmatpush1.bf16.msra.mxu1 %v6018_v30  ;;  %v6040_v30 = vld [vmem:[#allocation9 + $0xe0] sm:$0xff] }
0x1096   :  { %6048 = vmatprep.subr.bf16.mxu0 %v6021_v51  ;;  %6089 = vmatprep.subr.bf16.mxu1 %v6023_v16  ;;  %v6042_v51 = vld [vmem:[#allocation9 + $0xf0] sm:$0xff] }
0x1099   :  { %6049 = vmatpush1.bf16.msra.mxu0 %v6020_v50  ;;  %6090 = vmatpush1.bf16.msra.mxu1 %v6022_v25  ;;  %v10841_v27 = vpop.eup %10840  ;;  %v5980_v25 = vld [vmem:[#allocation8 + $0x8] sm:$0xff] }
0x109a   :  { %6050 = vmatprep.subr.bf16.mxu0 %v6025_v6  ;;  %6091 = vmatprep.subr.bf16.mxu1 %v6027_v20  ;;  %v11988_v16 = vmul.f32 %v10841_v27, %v10839_v21  ;;  %v5982_v6 = vld [vmem:[#allocation8 + $0x18] sm:$0xff]  ;;  %v5979_v20 = vld [vmem:[#allocation8] sm:$0xff]  ;;  %v5997_v21 = vld [vmem:[#allocation8 + $0x90] sm:$0xff] }
0x109b   :  { %v5999_v27 = vld [vmem:[#allocation8 + $0xa0] sm:$0xff] }
0x109c   :  { %v6011_v50 = vpack.c.bf16 %v11988_v16, %v11988_v16 }
0x109d   :  { %6051 = vmatpush1.bf16.msra.mxu0 %v6024_v24  ;;  %6092 = vmatpush1.bf16.msra.mxu1 %v6026_v0  ;;  %v5984_v24 = vld [vmem:[#allocation8 + $0x28] sm:$0xff]  ;;  %v5986_v0 = vld [vmem:[#allocation8 + $0x38] sm:$0xff] }
0x109e   :  { %6052 = vmatprep.subr.bf16.mxu0 %v6029_v31  ;;  %6093 = vmatprep.subr.bf16.mxu1 %v6031_v40  ;;  %v5985_v31 = vld [vmem:[#allocation8 + $0x30] sm:$0xff]  ;;  %v5988_v40 = vld [vmem:[#allocation8 + $0x48] sm:$0xff] }
0x10a1   :  { %6053 = vmatpush1.bf16.msra.mxu0 %v6028_v47  ;;  %6094 = vmatpush1.bf16.msra.mxu1 %v6030_v29  ;;  %v5990_v47 = vld [vmem:[#allocation8 + $0x58] sm:$0xff]  ;;  %v5987_v29 = vld [vmem:[#allocation8 + $0x40] sm:$0xff] }
0x10a2   :  { %6054 = vmatprep.subr.bf16.mxu0 %v6033_v3  ;;  %6095 = vmatprep.subr.bf16.mxu1 %v6035_v15  ;;  %v5989_v3 = vld [vmem:[#allocation8 + $0x50] sm:$0xff]  ;;  %v5992_v15 = vld [vmem:[#allocation8 + $0x68] sm:$0xff] }
0x10a5   :  { %6055 = vmatpush1.bf16.msra.mxu0 %v6032_v13  ;;  %6096 = vmatpush1.bf16.msra.mxu1 %v6034_v49  ;;  %v5994_v13 = vld [vmem:[#allocation8 + $0x78] sm:$0xff]  ;;  %v5991_v49 = vld [vmem:[#allocation8 + $0x60] sm:$0xff] }
0x10a6   :  { %6056 = vmatprep.subr.bf16.mxu0 %v6037_v7  ;;  %6097 = vmatprep.subr.bf16.mxu1 %v6039_v23  ;;  %v5993_v7 = vld [vmem:[#allocation8 + $0x70] sm:$0xff]  ;;  %v5996_v23 = vld [vmem:[#allocation8 + $0x88] sm:$0xff] }
0x10a9   :  { %6057 = vmatpush1.bf16.msra.mxu0 %v6036_v28  ;;  %6098 = vmatpush1.bf16.msra.mxu1 %v6038_v17  ;;  %v5998_v28 = vld [vmem:[#allocation8 + $0x98] sm:$0xff]  ;;  %v5995_v17 = vld [vmem:[#allocation8 + $0x80] sm:$0xff] }
0x10aa   :  { %6058 = vmatprep.subr.bf16.mxu0 %v6041_v26  ;;  %6099 = vmatprep.subr.bf16.mxu1 %v6043_v46  ;;  %v6000_v26 = vld [vmem:[#allocation8 + $0xa8] sm:$0xff]  ;;  %v6002_v46 = vld [vmem:[#allocation8 + $0xb8] sm:$0xff] }
0x10ad   :  { %6059 = vmatpush1.bf16.msra.mxu0 %v6040_v30  ;;  %6100 = vmatpush1.bf16.msra.mxu1 %v6042_v51  ;;  %v6001_v30 = vld [vmem:[#allocation8 + $0xb0] sm:$0xff]  ;;  %v6004_v51 = vld [vmem:[#allocation8 + $0xc8] sm:$0xff] }
0x10ae   :  { %6126 = vmatprep.subr.bf16.mxu0 %v5980_v25  ;;  %6167 = vmatprep.subr.bf16.mxu1 %v5982_v6  ;;  %v6003_v25 = vld [vmem:[#allocation8 + $0xc0] sm:$0xff]  ;;  %v6005_v6 = vld [vmem:[#allocation8 + $0xd0] sm:$0xff] }
0x10b0   :  { %6077 = vmatmul.mubr.bf16.vlgmr.msra.gmra.mrb[132].mxu0 %v6011_v50  ;;  %6118 = vmatmul.mubr.bf16.vlgmr.msra.gmra.mrb[164].mxu1 %v6011_v50  ;;  %v6006_v50 = vld [vmem:[#allocation8 + $0xd8] sm:$0xff] }
0x10b1   :  { %6158 = vmatprep.mubr.bf16.mxu0 %v12400_v18  ;;  %6199 = vmatprep.mubr.bf16.mxu1 %v12400_v18 }
0x10b2   :  { %6127 = vmatpush1.bf16.msra.mxu0 %v5979_v20  ;;  %6168 = vmatpush1.bf16.msra.mxu1 %v5981_v59  ;;  %v6008_v20 = vld [vmem:[#allocation8 + $0xe8] sm:$0xff]  ;;  %v6010_v59 = vld [vmem:[#allocation8 + $0xf8] sm:$0xff] }
0x10b3   :  { %6128 = vmatprep.subr.bf16.mxu0 %v5984_v24  ;;  %6169 = vmatprep.subr.bf16.mxu1 %v5986_v0  ;;  %v6007_v24 = vld [vmem:[#allocation8 + $0xe0] sm:$0xff]  ;;  %v6009_v0 = vld [vmem:[#allocation8 + $0xf0] sm:$0xff] }
0x10b6   :  { %6129 = vmatpush1.bf16.msra.mxu0 %v5983_v12  ;;  %6170 = vmatpush1.bf16.msra.mxu1 %v5985_v31  ;;  %v10412_v12 = vld [vmem:[#allocation14 + $0x4] ss:$16 sps:$4 sm:$0xff]   ;;  %v10415_v31 = vld [vmem:[#allocation14 + $0xc] ss:$16 sps:$4 sm:$0xff]  }
0x10b7   :  { %6130 = vmatprep.subr.bf16.mxu0 %v5988_v40  ;;  %6171 = vmatprep.subr.bf16.mxu1 %v5990_v47 }
0x10ba   :  { %6131 = vmatpush1.bf16.msra.mxu0 %v5987_v29  ;;  %6172 = vmatpush1.bf16.msra.mxu1 %v5989_v3 }
0x10bb   :  { %6132 = vmatprep.subr.bf16.mxu0 %v5992_v15  ;;  %6173 = vmatprep.subr.bf16.mxu1 %v5994_v13 }
0x10be   :  { %6133 = vmatpush1.bf16.msra.mxu0 %v5991_v49  ;;  %6174 = vmatpush1.bf16.msra.mxu1 %v5993_v7 }
0x10bf   :  { %6134 = vmatprep.subr.bf16.mxu0 %v5996_v23  ;;  %6175 = vmatprep.subr.bf16.mxu1 %v5998_v28 }
0x10c2   :  { %6135 = vmatpush1.bf16.msra.mxu0 %v5995_v17  ;;  %6176 = vmatpush1.bf16.msra.mxu1 %v5997_v21 }
0x10c3   :  { %6136 = vmatprep.subr.bf16.mxu0 %v6000_v26  ;;  %6177 = vmatprep.subr.bf16.mxu1 %v6002_v46 }
0x10c6   :  { %6137 = vmatpush1.bf16.msra.mxu0 %v5999_v27  ;;  %6178 = vmatpush1.bf16.msra.mxu1 %v6001_v30 }
0x10c7   :  { %6138 = vmatprep.subr.bf16.mxu0 %v6004_v51  ;;  %6179 = vmatprep.subr.bf16.mxu1 %v6006_v50 }
0x10ca   :  { %6139 = vmatpush1.bf16.msra.mxu0 %v6003_v25  ;;  %6180 = vmatpush1.bf16.msra.mxu1 %v6005_v6 }
0x10cb   :  { %6140 = vmatprep.subr.bf16.mxu0 %v6008_v20  ;;  %6181 = vmatprep.subr.bf16.mxu1 %v6010_v59 }
0x10ce   :  { %6141 = vmatpush1.bf16.msra.mxu0 %v6007_v24  ;;  %6182 = vmatpush1.bf16.msra.mxu1 %v6009_v0 }
0x10cf   :  { %6435 = vmatprep.subr.bf16.mxu0 %v10412_v12  ;;  %6476 = vmatprep.subr.bf16.mxu1 %v10415_v31 }
0x1163   :  { %v5902_v40 = vpop.f32.mrb[128].mxu0  ;;  %v5943_v47 = vpop.f32.mrb[160].mxu1 }
0x1164   :  { %v5903_v29 = vadd.f32 %v5902_v40, %v11968_v19  ;;  %v5944_v3 = vadd.f32 %v5943_v47, %v11970_v1  ;;  %v5904_v15 = vpop.f32.mrb[129].mxu0  ;;  %v5945_v13 = vpop.f32.mrb[161].mxu1 }
0x1165   :  { %v5905_v49 = vadd.f32 %v5904_v15, %v11972_v36  ;;  %v5946_v7 = vadd.f32 %v5945_v13, %v11974_v33  ;;  %v5906_v23 = vpop.f32.mrb[130].mxu0  ;;  %v5947_v28 = vpop.f32.mrb[162].mxu1 }
0x1166   :  { %v5950_v17 = vadd.f32 %v5903_v29, %v11415_v53  ;;  %v5907_v21 = vpop.f32.mrb[131].mxu0  ;;  %v5948_v26 = vpop.f32.mrb[163].mxu1  ;;  %v5952_v51 = vadd.f32 %v5944_v3, %v11427_v61 }
0x1167   :  { %v5951_v46 = vadd.f32 %v5905_v49, %v11421_v56  ;;  %v5953_v19 = vadd.f32 %v5946_v7, %v11433_v8  ;;  %v10410_v21 = vld [vmem:[#allocation14] ss:$16 sps:$4 sm:$0xff]   ;;  %v10413_v26 = vld [vmem:[#allocation14 + $0x8] ss:$16 sps:$4 sm:$0xff]  }
0x1168   :  { %v9908_v27 = vmul.f32 -1.442695, %v5950_v17 }
0x1169   :  { %v9909_v30 = vmul.f32 -1.442695, %v5951_v46  ;;  %v9910_v1 = vmul.f32 -1.442695, %v5953_v19  ;;  %v10416_v19 = vld [vmem:[#allocation14 + $0x20] ss:$16 sps:$4 sm:$0xff]  }
0x116a   :  { %10842 = vpow2.f32 %v9908_v27  ;;  %v10418_v27 = vld [vmem:[#allocation14 + $0x24] ss:$16 sps:$4 sm:$0xff]  }
0x116b   :  { %10844 = vpow2.f32 %v9909_v30  ;;  %v10421_v30 = vld [vmem:[#allocation14 + $0x2c] ss:$16 sps:$4 sm:$0xff]  }
0x116c   :  { %10846 = vpow2.f32 %v9910_v1  ;;  %v10419_v1 = vld [vmem:[#allocation14 + $0x28] ss:$16 sps:$4 sm:$0xff]  }
0x116d   :  { %10848 = vtanh.f32 %v5952_v51  ;;  %v10424_v51 = vld [vmem:[#allocation14 + $0x44] ss:$16 sps:$4 sm:$0xff]  }
0x1174   :  { %v10843_v36 = vpop.eup %10842 }
0x1175   :  { %v10845_v50 = vpop.eup %10844  ;;  %v5957_v33 = vadd.f32 1.0, %v10843_v36  ;;  %v10427_v36 = vld [vmem:[#allocation14 + $0x4c] ss:$16 sps:$4 sm:$0xff]  }
0x1176   :  { %v5963_v25 = vadd.f32 1.0, %v10845_v50  ;;  %v10847_v6 = vpop.eup %10846  ;;  %v10422_v50 = vld [vmem:[#allocation14 + $0x40] ss:$16 sps:$4 sm:$0xff]  }
0x1177   :  { %10850 = vrcp.f32 %v5957_v33  ;;  %v10849_v20 = vpop.eup %10848  ;;  %v5970_v12 = vadd.f32 1.0, %v10847_v6  ;;  %v10425_v33 = vld [vmem:[#allocation14 + $0x48] ss:$16 sps:$4 sm:$0xff]   ;;  %v10433_v6 = vld [vmem:[#allocation14 + $0x6c] ss:$16 sps:$4 sm:$0xff]  }
0x1178   :  { %10852 = vrcp.f32 %v5963_v25  ;;  %v10430_v25 = vld [vmem:[#allocation14 + $0x64] ss:$16 sps:$4 sm:$0xff]  }
0x1179   :  { %10854 = vrcp.f32 %v5970_v12  ;;  %v10434_v12 = vld [vmem:[#allocation14 + $0x80] ss:$16 sps:$4 sm:$0xff]  }
0x1181   :  { %v10851_v59 = vpop.eup %10850 }
0x1182   :  { %v10853_v24 = vpop.eup %10852  ;;  %v5974_v0 = vmul.f32 %v10851_v59, %v10849_v20  ;;  %v10428_v20 = vld [vmem:[#allocation14 + $0x60] ss:$16 sps:$4 sm:$0xff]   ;;  %v10431_v59 = vld [vmem:[#allocation14 + $0x68] ss:$16 sps:$4 sm:$0xff]  }
0x1183   :  { %v5973_v31 = vmul.f32 %v10853_v24, %v11904_v44  ;;  %v12003_v40 = vpop.f32.mrb[132].mxu0  ;;  %v12005_v47 = vpop.f32.mrb[164].mxu1  ;;  %v10436_v24 = vld [vmem:[#allocation14 + $0x84] ss:$16 sps:$4 sm:$0xff]  }
0x1184   :  { %v12007_v29 = vpop.f32.mrb[133].mxu0  ;;  %v12009_v3 = vpop.f32.mrb[165].mxu1 }
0x1185   :  { %v12011_v15 = vadd.f32 %v5974_v0, %v5973_v31  ;;  %v6082_v13 = vpop.f32.mrb[134].mxu0  ;;  %v6123_v49 = vpop.f32.mrb[166].mxu1  ;;  %v10439_v0 = vld [vmem:[#allocation14 + $0x8c] ss:$16 sps:$4 sm:$0xff]   ;;  %v10437_v31 = vld [vmem:[#allocation14 + $0x88] ss:$16 sps:$4 sm:$0xff]  }
0x1186   :  { %v6083_v7 = vpop.f32.mrb[135].mxu0  ;;  %v6124_v23 = vpop.f32.mrb[167].mxu1  ;;  %v10442_v13 = vld [vmem:[#allocation14 + $0xa4] ss:$16 sps:$4 sm:$0xff]   ;;  %v10445_v49 = vld [vmem:[#allocation14 + $0xac] ss:$16 sps:$4 sm:$0xff]  }
0x1187   :  { %10856 = vtanh.f32 %v12011_v15  ;;  %v10855_v28 = vpop.eup %10854  ;;  %v10440_v7 = vld [vmem:[#allocation14 + $0xa0] ss:$16 sps:$4 sm:$0xff]   ;;  %v10443_v23 = vld [vmem:[#allocation14 + $0xa8] ss:$16 sps:$4 sm:$0xff]  }
0x1191   :  { %v10857_v17 = vpop.eup %10856 }
0x1192   :  { %v5977_v44 = vmul.f32 %v10857_v17, %v10855_v28  ;;  %v10448_v28 = vld [vmem:[#allocation14 + $0xc4] ss:$16 sps:$4 sm:$0xff]   ;;  %v10451_v17 = vld [vmem:[#allocation14 + $0xcc] ss:$16 sps:$4 sm:$0xff]  }
0x1194   :  { %v12014_v46 = vpack.c.bf16 %v5977_v44, %v5977_v44  ;;  %v10446_v44 = vld [vmem:[#allocation14 + $0xc0] ss:$16 sps:$4 sm:$0xff]  }
0x1196   :  { %6159 = vmatmul.mubr.bf16.vlgmr.msra.gmra.mrb[136].mxu0 %v12014_v46  ;;  %6200 = vmatmul.mubr.bf16.vlgmr.msra.gmra.mrb[168].mxu1 %v12014_v46 }
0x1197   :  { %6436 = vmatpush1.bf16.msra.mxu0 %v10410_v21  ;;  %6477 = vmatpush1.bf16.msra.mxu1 %v10413_v26  ;;  %v10449_v21 = vld [vmem:[#allocation14 + $0xc8] ss:$16 sps:$4 sm:$0xff]   ;;  %v10454_v26 = vld [vmem:[#allocation14 + $0xe4] ss:$16 sps:$4 sm:$0xff]  }
0x1198   :  { %6437 = vmatprep.subr.bf16.mxu0 %v10418_v27  ;;  %6478 = vmatprep.subr.bf16.mxu1 %v10421_v30  ;;  %v10457_v27 = vld [vmem:[#allocation14 + $0xec] ss:$16 sps:$4 sm:$0xff]   ;;  %v10452_v30 = vld [vmem:[#allocation14 + $0xe0] ss:$16 sps:$4 sm:$0xff]  }
0x1199   :  { %6467 = vmatprep.mubr.bf16.mxu0 %v12400_v18  ;;  %6508 = vmatprep.mubr.bf16.mxu1 %v12400_v18 }
0x119b   :  { %6438 = vmatpush1.bf16.msra.mxu0 %v10416_v19  ;;  %6479 = vmatpush1.bf16.msra.mxu1 %v10419_v1  ;;  %v10455_v19 = vld [vmem:[#allocation14 + $0xe8] ss:$16 sps:$4 sm:$0xff]  }
0x119c   :  { %6439 = vmatprep.subr.bf16.mxu0 %v10424_v51  ;;  %6480 = vmatprep.subr.bf16.mxu1 %v10427_v36  ;;  %v6579_v1 = vld [vmem:[#allocation5 + $0x8] sm:$0xff]  ;;  %v6581_v51 = vld [vmem:[#allocation5 + $0x18] sm:$0xff]  ;;  %v6578_v36 = vld [vmem:[#allocation5] sm:$0xff] }
0x119f   :  { %6440 = vmatpush1.bf16.msra.mxu0 %v10422_v50  ;;  %6481 = vmatpush1.bf16.msra.mxu1 %v10425_v33  ;;  %v6580_v50 = vld [vmem:[#allocation5 + $0x10] sm:$0xff]  ;;  %v6583_v33 = vld [vmem:[#allocation5 + $0x28] sm:$0xff] }
0x11a0   :  { %6441 = vmatprep.subr.bf16.mxu0 %v10430_v25  ;;  %6482 = vmatprep.subr.bf16.mxu1 %v10433_v6  ;;  %v6585_v25 = vld [vmem:[#allocation5 + $0x38] sm:$0xff]  ;;  %v6582_v6 = vld [vmem:[#allocation5 + $0x20] sm:$0xff] }
0x11a3   :  { %6442 = vmatpush1.bf16.msra.mxu0 %v10428_v20  ;;  %6483 = vmatpush1.bf16.msra.mxu1 %v10431_v59  ;;  %v6584_v20 = vld [vmem:[#allocation5 + $0x30] sm:$0xff]  ;;  %v6587_v59 = vld [vmem:[#allocation5 + $0x48] sm:$0xff] }
0x11a4   :  { %6443 = vmatprep.subr.bf16.mxu0 %v10436_v24  ;;  %6484 = vmatprep.subr.bf16.mxu1 %v10439_v0  ;;  %v6589_v24 = vld [vmem:[#allocation5 + $0x58] sm:$0xff]  ;;  %v6586_v0 = vld [vmem:[#allocation5 + $0x40] sm:$0xff] }
0x11a7   :  { %6444 = vmatpush1.bf16.msra.mxu0 %v10434_v12  ;;  %6485 = vmatpush1.bf16.msra.mxu1 %v10437_v31  ;;  %v6588_v12 = vld [vmem:[#allocation5 + $0x50] sm:$0xff]  ;;  %v6591_v31 = vld [vmem:[#allocation5 + $0x68] sm:$0xff] }
0x11a8   :  { %6445 = vmatprep.subr.bf16.mxu0 %v10442_v13  ;;  %6486 = vmatprep.subr.bf16.mxu1 %v10445_v49  ;;  %v6590_v13 = vld [vmem:[#allocation5 + $0x60] sm:$0xff]  ;;  %v6592_v49 = vld [vmem:[#allocation5 + $0x70] sm:$0xff] }
0x11ab   :  { %6446 = vmatpush1.bf16.msra.mxu0 %v10440_v7  ;;  %6487 = vmatpush1.bf16.msra.mxu1 %v10443_v23  ;;  %v6595_v7 = vld [vmem:[#allocation5 + $0x88] sm:$0xff]  ;;  %v6597_v23 = vld [vmem:[#allocation5 + $0x98] sm:$0xff] }
0x11ac   :  { %6447 = vmatprep.subr.bf16.mxu0 %v10448_v28  ;;  %6488 = vmatprep.subr.bf16.mxu1 %v10451_v17  ;;  %v6594_v28 = vld [vmem:[#allocation5 + $0x80] sm:$0xff]  ;;  %v6596_v17 = vld [vmem:[#allocation5 + $0x90] sm:$0xff] }
0x11af   :  { %6448 = vmatpush1.bf16.msra.mxu0 %v10446_v44  ;;  %6489 = vmatpush1.bf16.msra.mxu1 %v10449_v21  ;;  %v6599_v44 = vld [vmem:[#allocation5 + $0xa8] sm:$0xff]  ;;  %v6601_v21 = vld [vmem:[#allocation5 + $0xb8] sm:$0xff] }
0x11b0   :  { %6449 = vmatprep.subr.bf16.mxu0 %v10454_v26  ;;  %6490 = vmatprep.subr.bf16.mxu1 %v10457_v27  ;;  %v6598_v26 = vld [vmem:[#allocation5 + $0xa0] sm:$0xff]  ;;  %v6600_v27 = vld [vmem:[#allocation5 + $0xb0] sm:$0xff] }
0x11b3   :  { %6450 = vmatpush1.bf16.msra.mxu0 %v10452_v30  ;;  %6491 = vmatpush1.bf16.msra.mxu1 %v10455_v19  ;;  %v6603_v30 = vld [vmem:[#allocation5 + $0xc8] sm:$0xff]  ;;  %v6605_v19 = vld [vmem:[#allocation5 + $0xd8] sm:$0xff] }
0x11b4   :  { %6610 = vmatprep.subr.bf16.mxu0 %v6579_v1  ;;  %6651 = vmatprep.subr.bf16.mxu1 %v6581_v51  ;;  %v6602_v1 = vld [vmem:[#allocation5 + $0xc0] sm:$0xff]  ;;  %v6604_v51 = vld [vmem:[#allocation5 + $0xd0] sm:$0xff] }
0x11b6   :  { %6468 = vmatmul.mubr.bf16.vlgmr.msra.gmra.mrb[140].mxu0 %v11949_v11  ;;  %6509 = vmatmul.mubr.bf16.vlgmr.msra.gmra.mrb[172].mxu1 %v11949_v11  ;;  %v6593_v11 = vld [vmem:[#allocation5 + $0x78] sm:$0xff] }
0x11b7   :  { %6611 = vmatpush1.bf16.msra.mxu0 %v6578_v36  ;;  %6652 = vmatpush1.bf16.msra.mxu1 %v6580_v50  ;;  %v6607_v36 = vld [vmem:[#allocation5 + $0xe8] sm:$0xff]  ;;  %v6609_v50 = vld [vmem:[#allocation5 + $0xf8] sm:$0xff] }
0x11b8   :  { %6612 = vmatprep.subr.bf16.mxu0 %v6583_v33  ;;  %6653 = vmatprep.subr.bf16.mxu1 %v6585_v25  ;;  %v6606_v33 = vld [vmem:[#allocation5 + $0xe0] sm:$0xff]  ;;  %v6608_v25 = vld [vmem:[#allocation5 + $0xf0] sm:$0xff] }
0x11b9   :  { %6642 = vmatprep.mubr.bf16.mxu0 %v12400_v18  ;;  %6683 = vmatprep.mubr.bf16.mxu1 %v12400_v18 }
0x11bb   :  { %6613 = vmatpush1.bf16.msra.mxu0 %v6582_v6  ;;  %6654 = vmatpush1.bf16.msra.mxu1 %v6584_v20  ;;  %v6547_v6 = vld [vmem:[#allocation4 + $0x8] sm:$0xff]  ;;  %v6549_v20 = vld [vmem:[#allocation4 + $0x18] sm:$0xff] }
0x11bc   :  { %6614 = vmatprep.subr.bf16.mxu0 %v6587_v59  ;;  %6655 = vmatprep.subr.bf16.mxu1 %v6589_v24  ;;  %v6546_v59 = vld [vmem:[#allocation4] sm:$0xff]  ;;  %v6548_v24 = vld [vmem:[#allocation4 + $0x10] sm:$0xff] }
0x11bf   :  { %6615 = vmatpush1.bf16.msra.mxu0 %v6586_v0  ;;  %6656 = vmatpush1.bf16.msra.mxu1 %v6588_v12  ;;  %v6551_v0 = vld [vmem:[#allocation4 + $0x28] sm:$0xff]  ;;  %v6553_v12 = vld [vmem:[#allocation4 + $0x38] sm:$0xff] }
0x11c0   :  { %6616 = vmatprep.subr.bf16.mxu0 %v6591_v31  ;;  %6657 = vmatprep.subr.bf16.mxu1 %v6593_v11  ;;  %v6550_v31 = vld [vmem:[#allocation4 + $0x20] sm:$0xff]  ;;  %v6552_v11 = vld [vmem:[#allocation4 + $0x30] sm:$0xff] }
0x11c3   :  { %6617 = vmatpush1.bf16.msra.mxu0 %v6590_v13  ;;  %6658 = vmatpush1.bf16.msra.mxu1 %v6592_v49  ;;  %v6557_v13 = vld [vmem:[#allocation4 + $0x58] sm:$0xff]  ;;  %v6554_v49 = vld [vmem:[#allocation4 + $0x40] sm:$0xff] }
0x11c4   :  { %6618 = vmatprep.subr.bf16.mxu0 %v6595_v7  ;;  %6659 = vmatprep.subr.bf16.mxu1 %v6597_v23  ;;  %v6556_v7 = vld [vmem:[#allocation4 + $0x50] sm:$0xff]  ;;  %v6559_v23 = vld [vmem:[#allocation4 + $0x68] sm:$0xff] }
0x11c7   :  { %6619 = vmatpush1.bf16.msra.mxu0 %v6594_v28  ;;  %6660 = vmatpush1.bf16.msra.mxu1 %v6596_v17  ;;  %v6561_v28 = vld [vmem:[#allocation4 + $0x78] sm:$0xff]  ;;  %v6558_v17 = vld [vmem:[#allocation4 + $0x60] sm:$0xff] }
0x11c8   :  { %6620 = vmatprep.subr.bf16.mxu0 %v6599_v44  ;;  %6661 = vmatprep.subr.bf16.mxu1 %v6601_v21  ;;  %v6560_v44 = vld [vmem:[#allocation4 + $0x70] sm:$0xff]  ;;  %v6563_v21 = vld [vmem:[#allocation4 + $0x88] sm:$0xff] }
0x11cb   :  { %6621 = vmatpush1.bf16.msra.mxu0 %v6598_v26  ;;  %6662 = vmatpush1.bf16.msra.mxu1 %v6600_v27  ;;  %v6565_v26 = vld [vmem:[#allocation4 + $0x98] sm:$0xff]  ;;  %v6562_v27 = vld [vmem:[#allocation4 + $0x80] sm:$0xff] }
0x11cc   :  { %6622 = vmatprep.subr.bf16.mxu0 %v6603_v30  ;;  %6663 = vmatprep.subr.bf16.mxu1 %v6605_v19  ;;  %v6564_v30 = vld [vmem:[#allocation4 + $0x90] sm:$0xff]  ;;  %v6567_v19 = vld [vmem:[#allocation4 + $0xa8] sm:$0xff] }
0x11cf   :  { %6623 = vmatpush1.bf16.msra.mxu0 %v6602_v1  ;;  %6664 = vmatpush1.bf16.msra.mxu1 %v6604_v51  ;;  %v6569_v1 = vld [vmem:[#allocation4 + $0xb8] sm:$0xff]  ;;  %v6566_v51 = vld [vmem:[#allocation4 + $0xa0] sm:$0xff] }
0x11d0   :  { %6624 = vmatprep.subr.bf16.mxu0 %v6607_v36  ;;  %6665 = vmatprep.subr.bf16.mxu1 %v6609_v50  ;;  %v6568_v36 = vld [vmem:[#allocation4 + $0xb0] sm:$0xff]  ;;  %v6571_v50 = vld [vmem:[#allocation4 + $0xc8] sm:$0xff] }
0x11d3   :  { %6625 = vmatpush1.bf16.msra.mxu0 %v6606_v33  ;;  %6666 = vmatpush1.bf16.msra.mxu1 %v6608_v25  ;;  %v6573_v33 = vld [vmem:[#allocation4 + $0xd8] sm:$0xff]  ;;  %v6570_v25 = vld [vmem:[#allocation4 + $0xc0] sm:$0xff] }
0x11d4   :  { %6692 = vmatprep.subr.bf16.mxu0 %v6547_v6  ;;  %6733 = vmatprep.subr.bf16.mxu1 %v6549_v20  ;;  %v6572_v6 = vld [vmem:[#allocation4 + $0xd0] sm:$0xff]  ;;  %v6575_v20 = vld [vmem:[#allocation4 + $0xe8] sm:$0xff] }
0x11d6   :  { %6643 = vmatmul.mubr.bf16.vlgmr.msra.gmra.mrb[144].mxu0 %v11981_v4  ;;  %6684 = vmatmul.mubr.bf16.vlgmr.msra.gmra.mrb[176].mxu1 %v11981_v4  ;;  %v6555_v4 = vld [vmem:[#allocation4 + $0x48] sm:$0xff] }
0x11d7   :  { %6724 = vmatprep.mubr.bf16.mxu0 %v12400_v18  ;;  %6765 = vmatprep.mubr.bf16.mxu1 %v12400_v18 }
0x11d8   :  { %6693 = vmatpush1.bf16.msra.mxu0 %v6546_v59  ;;  %6734 = vmatpush1.bf16.msra.mxu1 %v6548_v24  ;;  %v6577_v59 = vld [vmem:[#allocation4 + $0xf8] sm:$0xff]  ;;  %v6574_v24 = vld [vmem:[#allocation4 + $0xe0] sm:$0xff] }
0x11d9   :  { %6694 = vmatprep.subr.bf16.mxu0 %v6551_v0  ;;  %6735 = vmatprep.subr.bf16.mxu1 %v6553_v12  ;;  %v6576_v0 = vld [vmem:[#allocation4 + $0xf0] sm:$0xff]  ;;  %v6836_v12 = vld [vmem:[#allocation7 + $0x8] sm:$0xff] }
0x11dc   :  { %6695 = vmatpush1.bf16.msra.mxu0 %v6550_v31  ;;  %6736 = vmatpush1.bf16.msra.mxu1 %v6552_v11  ;;  %v6838_v31 = vld [vmem:[#allocation7 + $0x18] sm:$0xff] }
0x11dd   :  { %6696 = vmatprep.subr.bf16.mxu0 %v6555_v4  ;;  %6737 = vmatprep.subr.bf16.mxu1 %v6557_v13 }
0x11e0   :  { %6697 = vmatpush1.bf16.msra.mxu0 %v6554_v49  ;;  %6738 = vmatpush1.bf16.msra.mxu1 %v6556_v7 }
0x11e1   :  { %6698 = vmatprep.subr.bf16.mxu0 %v6559_v23  ;;  %6739 = vmatprep.subr.bf16.mxu1 %v6561_v28 }
0x11e4   :  { %6699 = vmatpush1.bf16.msra.mxu0 %v6558_v17  ;;  %6740 = vmatpush1.bf16.msra.mxu1 %v6560_v44 }
0x11e5   :  { %6700 = vmatprep.subr.bf16.mxu0 %v6563_v21  ;;  %6741 = vmatprep.subr.bf16.mxu1 %v6565_v26 }
0x11e8   :  { %6701 = vmatpush1.bf16.msra.mxu0 %v6562_v27  ;;  %6742 = vmatpush1.bf16.msra.mxu1 %v6564_v30 }
0x11e9   :  { %6702 = vmatprep.subr.bf16.mxu0 %v6567_v19  ;;  %6743 = vmatprep.subr.bf16.mxu1 %v6569_v1 }
0x11ec   :  { %6703 = vmatpush1.bf16.msra.mxu0 %v6566_v51  ;;  %6744 = vmatpush1.bf16.msra.mxu1 %v6568_v36 }
0x11ed   :  { %6704 = vmatprep.subr.bf16.mxu0 %v6571_v50  ;;  %6745 = vmatprep.subr.bf16.mxu1 %v6573_v33 }
0x11f0   :  { %6705 = vmatpush1.bf16.msra.mxu0 %v6570_v25  ;;  %6746 = vmatpush1.bf16.msra.mxu1 %v6572_v6 }
0x11f1   :  { %6706 = vmatprep.subr.bf16.mxu0 %v6575_v20  ;;  %6747 = vmatprep.subr.bf16.mxu1 %v6577_v59 }
0x11f4   :  { %6707 = vmatpush1.bf16.msra.mxu0 %v6574_v24  ;;  %6748 = vmatpush1.bf16.msra.mxu1 %v6576_v0 }
0x11f5   :  { %6867 = vmatprep.subr.bf16.mxu0 %v6836_v12  ;;  %6908 = vmatprep.subr.bf16.mxu1 %v6838_v31 }
0x1269   :  { %v6160_v11 = vpop.f32.mrb[136].mxu0  ;;  %v6201_v4 = vpop.f32.mrb[168].mxu1 }
0x126a   :  { %v6161_v13 = vadd.f32 %v6160_v11, %v12003_v40  ;;  %v6202_v49 = vadd.f32 %v6201_v4, %v12005_v47  ;;  %v6162_v7 = vpop.f32.mrb[137].mxu0  ;;  %v6203_v23 = vpop.f32.mrb[169].mxu1 }
0x126b   :  { %v6163_v28 = vadd.f32 %v6162_v7, %v12007_v29  ;;  %v12032_v17 = vadd.f32 %v6203_v23, %v12009_v3  ;;  %v6164_v44 = vpop.f32.mrb[138].mxu0  ;;  %v6205_v21 = vpop.f32.mrb[170].mxu1 }
0x126c   :  { %v6208_v26 = vadd.f32 %v6161_v13, %v11417_v54  ;;  %v6165_v27 = vpop.f32.mrb[139].mxu0  ;;  %v6206_v30 = vpop.f32.mrb[171].mxu1  ;;  %v6210_v40 = vadd.f32 %v6202_v49, %v11429_v62 }
0x126d   :  { %v6209_v19 = vadd.f32 %v6163_v28, %v11423_v57 }
0x126e   :  { %v9911_v1 = vmul.f32 -1.442695, %v6208_v26 }
0x126f   :  { %v9912_v51 = vmul.f32 -1.442695, %v6209_v19 }
0x1270   :  { %10858 = vpow2.f32 %v9911_v1 }
0x1271   :  { %10860 = vpow2.f32 %v9912_v51 }
0x1272   :  { %10862 = vtanh.f32 %v6210_v40 }
0x127a   :  { %v10859_v47 = vpop.eup %10858 }
0x127b   :  { %v10861_v36 = vpop.eup %10860  ;;  %v6215_v29 = vadd.f32 1.0, %v10859_v47 }
0x127c   :  { %v6221_v3 = vadd.f32 1.0, %v10861_v36  ;;  %v10863_v50 = vpop.eup %10862 }
0x127d   :  { %10864 = vrcp.f32 %v6215_v29 }
0x127e   :  { %10866 = vrcp.f32 %v6221_v3 }
0x1287   :  { %v10865_v33 = vpop.eup %10864 }
0x1288   :  { %v10867_v25 = vpop.eup %10866  ;;  %v6232_v6 = vmul.f32 %v10865_v33, %v10863_v50 }
0x1289   :  { %v6231_v20 = vmul.f32 %v10867_v25, %v11932_v32  ;;  %v6469_v59 = vpop.f32.mrb[140].mxu0  ;;  %v6510_v24 = vpop.f32.mrb[172].mxu1 }
0x128a   :  { %v6517_v0 = vadd.f32 %v6469_v59, %v11460_v35  ;;  %v6471_v12 = vpop.f32.mrb[141].mxu0  ;;  %v6512_v31 = vpop.f32.mrb[173].mxu1  ;;  %v6519_v26 = vadd.f32 %v6510_v24, %v11492_v38 }
0x128b   :  { %v12039_v11 = vadd.f32 %v6232_v6, %v6231_v20  ;;  %v6518_v4 = vadd.f32 %v6471_v12, %v11462_v37  ;;  %v6473_v13 = vpop.f32.mrb[142].mxu0  ;;  %v6514_v49 = vpop.f32.mrb[174].mxu1  ;;  %v6520_v32 = vadd.f32 %v6512_v31, %v11494_v42  ;;  %v6835_v31 = vld [vmem:[#allocation7] sm:$0xff] }
0x128c   :  { %v9946_v7 = vmul.f32 -1.442695, %v6517_v0  ;;  %v6474_v23 = vpop.f32.mrb[143].mxu0  ;;  %v6515_v28 = vpop.f32.mrb[175].mxu1  ;;  %v6840_v13 = vld [vmem:[#allocation7 + $0x28] sm:$0xff]  ;;  %v6842_v49 = vld [vmem:[#allocation7 + $0x38] sm:$0xff] }
0x128d   :  { %v9947_v44 = vmul.f32 -1.442695, %v6518_v4  ;;  %v9948_v21 = vmul.f32 -1.442695, %v6520_v32  ;;  %v6837_v4 = vld [vmem:[#allocation7 + $0x10] sm:$0xff]  ;;  %v6844_v28 = vld [vmem:[#allocation7 + $0x48] sm:$0xff] }
0x128e   :  { %10868 = vpow2.f32 %v9946_v7  ;;  %v6839_v7 = vld [vmem:[#allocation7 + $0x20] sm:$0xff]  ;;  %v6841_v23 = vld [vmem:[#allocation7 + $0x30] sm:$0xff] }
0x128f   :  { %10870 = vpow2.f32 %v9947_v44  ;;  %v6846_v44 = vld [vmem:[#allocation7 + $0x58] sm:$0xff]  ;;  %v6843_v32 = vld [vmem:[#allocation7 + $0x40] sm:$0xff] }
0x1290   :  { %10872 = vpow2.f32 %v9948_v21  ;;  %v6845_v21 = vld [vmem:[#allocation7 + $0x50] sm:$0xff] }
0x1291   :  { %10874 = vtanh.f32 %v6519_v26  ;;  %v6848_v26 = vld [vmem:[#allocation7 + $0x68] sm:$0xff] }
0x1298   :  { %v10869_v35 = vpop.eup %10868 }
0x1299   :  { %v10871_v27 = vpop.eup %10870  ;;  %v6524_v30 = vadd.f32 1.0, %v10869_v35  ;;  %v6850_v35 = vld [vmem:[#allocation7 + $0x78] sm:$0xff] }
0x129a   :  { %v6530_v19 = vadd.f32 1.0, %v10871_v27  ;;  %v10873_v37 = vpop.eup %10872  ;;  %v6847_v27 = vld [vmem:[#allocation7 + $0x60] sm:$0xff] }
0x129b   :  { %10876 = vrcp.f32 %v6524_v30  ;;  %v10875_v1 = vpop.eup %10874  ;;  %v6537_v36 = vadd.f32 1.0, %v10873_v37  ;;  %v6849_v30 = vld [vmem:[#allocation7 + $0x70] sm:$0xff]  ;;  %v6854_v37 = vld [vmem:[#allocation7 + $0x98] sm:$0xff] }
0x129c   :  { %10878 = vrcp.f32 %v6530_v19  ;;  %v6852_v19 = vld [vmem:[#allocation7 + $0x88] sm:$0xff] }
0x129d   :  { %10880 = vrcp.f32 %v6537_v36  ;;  %v6855_v36 = vld [vmem:[#allocation7 + $0xa0] sm:$0xff] }
0x12a5   :  { %v10877_v51 = vpop.eup %10876 }
0x12a6   :  { %v10879_v40 = vpop.eup %10878  ;;  %v6541_v47 = vmul.f32 %v10877_v51, %v10875_v1  ;;  %v6851_v1 = vld [vmem:[#allocation7 + $0x80] sm:$0xff]  ;;  %v6853_v51 = vld [vmem:[#allocation7 + $0x90] sm:$0xff] }
0x12a7   :  { %v6540_v29 = vmul.f32 %v10879_v40, %v11938_v34  ;;  %v10881_v24 = vpop.eup %10880  ;;  %v6856_v40 = vld [vmem:[#allocation7 + $0xa8] sm:$0xff] }
0x12a9   :  { %v12045_v42 = vadd.f32 %v6541_v47, %v6540_v29  ;;  %v12047_v3 = vpop.f32.mrb[144].mxu0  ;;  %v12049_v38 = vpop.f32.mrb[176].mxu1  ;;  %v6858_v47 = vld [vmem:[#allocation7 + $0xb8] sm:$0xff]  ;;  %v6857_v29 = vld [vmem:[#allocation7 + $0xb0] sm:$0xff] }
0x12aa   :  { %v12051_v50 = vpop.f32.mrb[145].mxu0  ;;  %v12053_v33 = vpop.f32.mrb[177].mxu1 }
0x12ab   :  { %v6648_v25 = vpop.f32.mrb[146].mxu0  ;;  %v6689_v6 = vpop.f32.mrb[178].mxu1  ;;  %10882 = vtanh.f32 %v12045_v42 }
0x12ac   :  { %v6649_v20 = vpop.f32.mrb[147].mxu0  ;;  %v6690_v59 = vpop.f32.mrb[179].mxu1  ;;  %v6860_v25 = vld [vmem:[#allocation7 + $0xc8] sm:$0xff]  ;;  %v6862_v6 = vld [vmem:[#allocation7 + $0xd8] sm:$0xff] }
0x12ad   :  { %v6859_v20 = vld [vmem:[#allocation7 + $0xc0] sm:$0xff]  ;;  %v6861_v59 = vld [vmem:[#allocation7 + $0xd0] sm:$0xff] }
0x12b5   :  { %v10883_v0 = vpop.eup %10882 }
0x12b6   :  { %v6544_v34 = vmul.f32 %v10883_v0, %v10881_v24  ;;  %v6864_v24 = vld [vmem:[#allocation7 + $0xe8] sm:$0xff]  ;;  %v6866_v0 = vld [vmem:[#allocation7 + $0xf8] sm:$0xff] }
0x12b8   :  { %v12056_v12 = vpack.c.bf16 %v6544_v34, %v6544_v34  ;;  %v6863_v34 = vld [vmem:[#allocation7 + $0xe0] sm:$0xff] }
0x12ba   :  { %6725 = vmatmul.mubr.bf16.vlgmr.msra.gmra.mrb[148].mxu0 %v12056_v12  ;;  %6766 = vmatmul.mubr.bf16.vlgmr.msra.gmra.mrb[180].mxu1 %v12056_v12 }
0x12bb   :  { %6868 = vmatpush1.bf16.msra.mxu0 %v6835_v31  ;;  %6909 = vmatpush1.bf16.msra.mxu1 %v6837_v4  ;;  %v6865_v31 = vld [vmem:[#allocation7 + $0xf0] sm:$0xff]  ;;  %v6804_v4 = vld [vmem:[#allocation6 + $0x8] sm:$0xff] }
0x12bc   :  { %6869 = vmatprep.subr.bf16.mxu0 %v6840_v13  ;;  %6910 = vmatprep.subr.bf16.mxu1 %v6842_v49  ;;  %v6806_v13 = vld [vmem:[#allocation6 + $0x18] sm:$0xff]  ;;  %v6803_v49 = vld [vmem:[#allocation6] sm:$0xff] }
0x12bd   :  { %6899 = vmatprep.mubr.bf16.mxu0 %v12400_v18  ;;  %6940 = vmatprep.mubr.bf16.mxu1 %v12400_v18 }
0x12bf   :  { %6870 = vmatpush1.bf16.msra.mxu0 %v6839_v7  ;;  %6911 = vmatpush1.bf16.msra.mxu1 %v6841_v23  ;;  %v6805_v7 = vld [vmem:[#allocation6 + $0x10] sm:$0xff]  ;;  %v6808_v23 = vld [vmem:[#allocation6 + $0x28] sm:$0xff] }
0x12c0   :  { %6871 = vmatprep.subr.bf16.mxu0 %v6844_v28  ;;  %6912 = vmatprep.subr.bf16.mxu1 %v6846_v44  ;;  %v6810_v28 = vld [vmem:[#allocation6 + $0x38] sm:$0xff]  ;;  %v6807_v44 = vld [vmem:[#allocation6 + $0x20] sm:$0xff] }
0x12c3   :  { %6872 = vmatpush1.bf16.msra.mxu0 %v6843_v32  ;;  %6913 = vmatpush1.bf16.msra.mxu1 %v6845_v21  ;;  %v6809_v32 = vld [vmem:[#allocation6 + $0x30] sm:$0xff]  ;;  %v6814_v21 = vld [vmem:[#allocation6 + $0x58] sm:$0xff] }
0x12c4   :  { %6873 = vmatprep.subr.bf16.mxu0 %v6848_v26  ;;  %6914 = vmatprep.subr.bf16.mxu1 %v6850_v35  ;;  %v6811_v26 = vld [vmem:[#allocation6 + $0x40] sm:$0xff]  ;;  %v6813_v35 = vld [vmem:[#allocation6 + $0x50] sm:$0xff] }
0x12c7   :  { %6874 = vmatpush1.bf16.msra.mxu0 %v6847_v27  ;;  %6915 = vmatpush1.bf16.msra.mxu1 %v6849_v30  ;;  %v6816_v27 = vld [vmem:[#allocation6 + $0x68] sm:$0xff]  ;;  %v6818_v30 = vld [vmem:[#allocation6 + $0x78] sm:$0xff] }
0x12c8   :  { %6875 = vmatprep.subr.bf16.mxu0 %v6852_v19  ;;  %6916 = vmatprep.subr.bf16.mxu1 %v6854_v37  ;;  %v6815_v19 = vld [vmem:[#allocation6 + $0x60] sm:$0xff]  ;;  %v6817_v37 = vld [vmem:[#allocation6 + $0x70] sm:$0xff] }
0x12cb   :  { %6876 = vmatpush1.bf16.msra.mxu0 %v6851_v1  ;;  %6917 = vmatpush1.bf16.msra.mxu1 %v6853_v51  ;;  %v6820_v1 = vld [vmem:[#allocation6 + $0x88] sm:$0xff]  ;;  %v6822_v51 = vld [vmem:[#allocation6 + $0x98] sm:$0xff] }
0x12cc   :  { %6877 = vmatprep.subr.bf16.mxu0 %v6856_v40  ;;  %6918 = vmatprep.subr.bf16.mxu1 %v6858_v47  ;;  %v6819_v40 = vld [vmem:[#allocation6 + $0x80] sm:$0xff]  ;;  %v6821_v47 = vld [vmem:[#allocation6 + $0x90] sm:$0xff] }
0x12cf   :  { %6878 = vmatpush1.bf16.msra.mxu0 %v6855_v36  ;;  %6919 = vmatpush1.bf16.msra.mxu1 %v6857_v29  ;;  %v6824_v36 = vld [vmem:[#allocation6 + $0xa8] sm:$0xff]  ;;  %v6826_v29 = vld [vmem:[#allocation6 + $0xb8] sm:$0xff] }
0x12d0   :  { %6879 = vmatprep.subr.bf16.mxu0 %v6860_v25  ;;  %6920 = vmatprep.subr.bf16.mxu1 %v6862_v6  ;;  %v6823_v25 = vld [vmem:[#allocation6 + $0xa0] sm:$0xff]  ;;  %v6825_v6 = vld [vmem:[#allocation6 + $0xb0] sm:$0xff] }
0x12d3   :  { %6880 = vmatpush1.bf16.msra.mxu0 %v6859_v20  ;;  %6921 = vmatpush1.bf16.msra.mxu1 %v6861_v59  ;;  %v6828_v20 = vld [vmem:[#allocation6 + $0xc8] sm:$0xff]  ;;  %v6830_v59 = vld [vmem:[#allocation6 + $0xd8] sm:$0xff] }
0x12d4   :  { %6881 = vmatprep.subr.bf16.mxu0 %v6864_v24  ;;  %6922 = vmatprep.subr.bf16.mxu1 %v6866_v0  ;;  %v6827_v24 = vld [vmem:[#allocation6 + $0xc0] sm:$0xff]  ;;  %v6829_v0 = vld [vmem:[#allocation6 + $0xd0] sm:$0xff] }
0x12d7   :  { %6882 = vmatpush1.bf16.msra.mxu0 %v6863_v34  ;;  %6923 = vmatpush1.bf16.msra.mxu1 %v6865_v31  ;;  %v6832_v34 = vld [vmem:[#allocation6 + $0xe8] sm:$0xff]  ;;  %v6834_v31 = vld [vmem:[#allocation6 + $0xf8] sm:$0xff] }
0x12d8   :  { %6949 = vmatprep.subr.bf16.mxu0 %v6804_v4  ;;  %6990 = vmatprep.subr.bf16.mxu1 %v6806_v13  ;;  %v6831_v4 = vld [vmem:[#allocation6 + $0xe0] sm:$0xff]  ;;  %v6833_v13 = vld [vmem:[#allocation6 + $0xf0] sm:$0xff] }
0x12da   :  { %6900 = vmatmul.mubr.bf16.vlgmr.msra.gmra.mrb[152].mxu0 %v12014_v46  ;;  %6941 = vmatmul.mubr.bf16.vlgmr.msra.gmra.mrb[184].mxu1 %v12014_v46  ;;  %v6812_v46 = vld [vmem:[#allocation6 + $0x48] sm:$0xff] }
0x12db   :  { %6981 = vmatprep.mubr.bf16.mxu0 %v12400_v18  ;;  %7022 = vmatprep.mubr.bf16.mxu1 %v12400_v18 }
0x12dc   :  { %6950 = vmatpush1.bf16.msra.mxu0 %v6803_v49  ;;  %6991 = vmatpush1.bf16.msra.mxu1 %v6805_v7  ;;  %v7094_v49 = vld [vmem:[#allocation9 + $0x8] sm:$0xff]  ;;  %v7096_v7 = vld [vmem:[#allocation9 + $0x18] sm:$0xff] }
0x12dd   :  { %6951 = vmatprep.subr.bf16.mxu0 %v6808_v23  ;;  %6992 = vmatprep.subr.bf16.mxu1 %v6810_v28 }
0x12e0   :  { %6952 = vmatpush1.bf16.msra.mxu0 %v6807_v44  ;;  %6993 = vmatpush1.bf16.msra.mxu1 %v6809_v32 }
0x12e1   :  { %6953 = vmatprep.subr.bf16.mxu0 %v6812_v46  ;;  %6994 = vmatprep.subr.bf16.mxu1 %v6814_v21 }
0x12e4   :  { %6954 = vmatpush1.bf16.msra.mxu0 %v6811_v26  ;;  %6995 = vmatpush1.bf16.msra.mxu1 %v6813_v35 }
0x12e5   :  { %6955 = vmatprep.subr.bf16.mxu0 %v6816_v27  ;;  %6996 = vmatprep.subr.bf16.mxu1 %v6818_v30 }
0x12e8   :  { %6956 = vmatpush1.bf16.msra.mxu0 %v6815_v19  ;;  %6997 = vmatpush1.bf16.msra.mxu1 %v6817_v37 }
0x12e9   :  { %6957 = vmatprep.subr.bf16.mxu0 %v6820_v1  ;;  %6998 = vmatprep.subr.bf16.mxu1 %v6822_v51 }
0x12ec   :  { %6958 = vmatpush1.bf16.msra.mxu0 %v6819_v40  ;;  %6999 = vmatpush1.bf16.msra.mxu1 %v6821_v47 }
0x12ed   :  { %6959 = vmatprep.subr.bf16.mxu0 %v6824_v36  ;;  %7000 = vmatprep.subr.bf16.mxu1 %v6826_v29 }
0x12f0   :  { %6960 = vmatpush1.bf16.msra.mxu0 %v6823_v25  ;;  %7001 = vmatpush1.bf16.msra.mxu1 %v6825_v6 }
0x12f1   :  { %6961 = vmatprep.subr.bf16.mxu0 %v6828_v20  ;;  %7002 = vmatprep.subr.bf16.mxu1 %v6830_v59 }
0x12f4   :  { %6962 = vmatpush1.bf16.msra.mxu0 %v6827_v24  ;;  %7003 = vmatpush1.bf16.msra.mxu1 %v6829_v0 }
0x12f5   :  { %6963 = vmatprep.subr.bf16.mxu0 %v6832_v34  ;;  %7004 = vmatprep.subr.bf16.mxu1 %v6834_v31 }
0x12f8   :  { %6964 = vmatpush1.bf16.msra.mxu0 %v6831_v4  ;;  %7005 = vmatpush1.bf16.msra.mxu1 %v6833_v13 }
0x12f9   :  { %7125 = vmatprep.subr.bf16.mxu0 %v7094_v49  ;;  %7166 = vmatprep.subr.bf16.mxu1 %v7096_v7 }
0x138d   :  { %v6726_v23 = vpop.f32.mrb[148].mxu0  ;;  %v6767_v28 = vpop.f32.mrb[180].mxu1 }
0x138e   :  { %v6727_v44 = vadd.f32 %v6726_v23, %v12047_v3  ;;  %v6768_v32 = vadd.f32 %v6767_v28, %v12049_v38  ;;  %v6728_v46 = vpop.f32.mrb[149].mxu0  ;;  %v6769_v21 = vpop.f32.mrb[181].mxu1 }
0x138f   :  { %v6729_v26 = vadd.f32 %v6728_v46, %v12051_v50  ;;  %v6770_v35 = vadd.f32 %v6769_v21, %v12053_v33  ;;  %v6730_v27 = vpop.f32.mrb[150].mxu0  ;;  %v6771_v30 = vpop.f32.mrb[182].mxu1 }
0x1390   :  { %v6774_v19 = vadd.f32 %v6727_v44, %v11413_v52  ;;  %v6731_v37 = vpop.f32.mrb[151].mxu0  ;;  %v6772_v1 = vpop.f32.mrb[183].mxu1  ;;  %v6776_v36 = vadd.f32 %v6768_v32, %v11425_v60 }
0x1391   :  { %v6775_v51 = vadd.f32 %v6729_v26, %v11419_v55  ;;  %v6777_v3 = vadd.f32 %v6770_v35, %v11431_v63  ;;  %v7095_v37 = vld [vmem:[#allocation9 + $0x10] sm:$0xff]  ;;  %v7098_v1 = vld [vmem:[#allocation9 + $0x28] sm:$0xff] }
0x1392   :  { %v9949_v40 = vmul.f32 -1.442695, %v6774_v19  ;;  %v7093_v19 = vld [vmem:[#allocation9] sm:$0xff] }
0x1393   :  { %v9950_v47 = vmul.f32 -1.442695, %v6775_v51  ;;  %v9951_v38 = vmul.f32 -1.442695, %v6777_v3  ;;  %v7100_v51 = vld [vmem:[#allocation9 + $0x38] sm:$0xff] }
0x1394   :  { %10884 = vpow2.f32 %v9949_v40  ;;  %v7099_v40 = vld [vmem:[#allocation9 + $0x30] sm:$0xff]  ;;  %v7104_v3 = vld [vmem:[#allocation9 + $0x58] sm:$0xff] }
0x1395   :  { %10886 = vpow2.f32 %v9950_v47  ;;  %v7102_v47 = vld [vmem:[#allocation9 + $0x48] sm:$0xff] }
0x1396   :  { %10888 = vpow2.f32 %v9951_v38  ;;  %v7101_v38 = vld [vmem:[#allocation9 + $0x40] sm:$0xff] }
0x1397   :  { %10890 = vtanh.f32 %v6776_v36  ;;  %v7103_v36 = vld [vmem:[#allocation9 + $0x50] sm:$0xff] }
0x139e   :  { %v10885_v50 = vpop.eup %10884 }
0x139f   :  { %v10887_v29 = vpop.eup %10886  ;;  %v6781_v33 = vadd.f32 1.0, %v10885_v50  ;;  %v7106_v50 = vld [vmem:[#allocation9 + $0x68] sm:$0xff] }
0x13a0   :  { %v6787_v25 = vadd.f32 1.0, %v10887_v29  ;;  %v10889_v6 = vpop.eup %10888  ;;  %v7108_v29 = vld [vmem:[#allocation9 + $0x78] sm:$0xff] }
0x13a1   :  { %10892 = vrcp.f32 %v6781_v33  ;;  %v10891_v20 = vpop.eup %10890  ;;  %v6794_v34 = vadd.f32 1.0, %v10889_v6  ;;  %v7107_v6 = vld [vmem:[#allocation9 + $0x70] sm:$0xff] }
0x13a2   :  { %10894 = vrcp.f32 %v6787_v25  ;;  %v7105_v25 = vld [vmem:[#allocation9 + $0x60] sm:$0xff] }
0x13a3   :  { %10896 = vrcp.f32 %v6794_v34  ;;  %v7111_v34 = vld [vmem:[#allocation9 + $0x90] sm:$0xff] }
0x13ab   :  { %v10893_v59 = vpop.eup %10892 }
0x13ac   :  { %v10895_v24 = vpop.eup %10894  ;;  %v6798_v0 = vmul.f32 %v10893_v59, %v10891_v20  ;;  %v7110_v59 = vld [vmem:[#allocation9 + $0x88] sm:$0xff] }
0x13ad   :  { %v6797_v31 = vmul.f32 %v10895_v24, %v11976_v2  ;;  %v12075_v4 = vpop.f32.mrb[152].mxu0  ;;  %v12077_v13 = vpop.f32.mrb[184].mxu1  ;;  %v6211_v2 = vadd.f32 %v12032_v17, %v11435_v9  ;;  %v7097_v17 = vld [vmem:[#allocation9 + $0x20] sm:$0xff]  ;;  %v7112_v24 = vld [vmem:[#allocation9 + $0x98] sm:$0xff] }
0x13ae   :  { %v12079_v49 = vpop.f32.mrb[153].mxu0  ;;  %v12081_v7 = vpop.f32.mrb[185].mxu1 }
0x13af   :  { %v12083_v23 = vadd.f32 %v6798_v0, %v6797_v31  ;;  %v6905_v28 = vpop.f32.mrb[154].mxu0  ;;  %v6946_v44 = vpop.f32.mrb[186].mxu1  ;;  %v9913_v26 = vmul.f32 -1.442695, %v6211_v2  ;;  %v7109_v0 = vld [vmem:[#allocation9 + $0x80] sm:$0xff]  ;;  %v7114_v31 = vld [vmem:[#allocation9 + $0xa8] sm:$0xff] }
0x13b0   :  { %v6906_v32 = vpop.f32.mrb[155].mxu0  ;;  %v6947_v46 = vpop.f32.mrb[187].mxu1  ;;  %v7116_v28 = vld [vmem:[#allocation9 + $0xb8] sm:$0xff]  ;;  %v7113_v44 = vld [vmem:[#allocation9 + $0xa0] sm:$0xff] }
0x13b1   :  { %10898 = vtanh.f32 %v12083_v23  ;;  %v10897_v21 = vpop.eup %10896  ;;  %v7115_v32 = vld [vmem:[#allocation9 + $0xb0] sm:$0xff]  ;;  %v7118_v46 = vld [vmem:[#allocation9 + $0xc8] sm:$0xff]  ;;  %v7120_v2 = vld [vmem:[#allocation9 + $0xd8] sm:$0xff] }
0x13b2   :  { %10900 = vpow2.f32 %v9913_v26  ;;  %v7119_v26 = vld [vmem:[#allocation9 + $0xd0] sm:$0xff] }
0x13b3   :  { %10902 = vtanh.f32 %v12039_v11 }
0x13bb   :  { %v10899_v35 = vpop.eup %10898 }
0x13bc   :  { %v6801_v27 = vmul.f32 %v10899_v35, %v10897_v21  ;;  %v10901_v33 = vpop.eup %10900  ;;  %v7117_v21 = vld [vmem:[#allocation9 + $0xc0] sm:$0xff] }
0x13bd   :  { %v6228_v20 = vadd.f32 1.0, %v10901_v33  ;;  %v10903_v35 = vpop.eup %10902  ;;  %v7064_v33 = vld [vmem:[#allocation8 + $0x20] sm:$0xff] }
0x13be   :  { %v12088_v30 = vpack.c.bf16 %v6801_v27, %v6801_v27  ;;  %v7122_v27 = vld [vmem:[#allocation9 + $0xe8] sm:$0xff] }
0x13bf   :  { %10904 = vrcp.f32 %v6228_v20  ;;  %v7071_v20 = vld [vmem:[#allocation8 + $0x58] sm:$0xff] }
0x13c0   :  { %6982 = vmatmul.mubr.bf16.vlgmr.msra.gmra.mrb[156].mxu0 %v12088_v30  ;;  %7023 = vmatmul.mubr.bf16.vlgmr.msra.gmra.mrb[188].mxu1 %v12088_v30 }
0x13c1   :  { %7126 = vmatpush1.bf16.msra.mxu0 %v7093_v19  ;;  %7167 = vmatpush1.bf16.msra.mxu1 %v7095_v37  ;;  %v7124_v19 = vld [vmem:[#allocation9 + $0xf8] sm:$0xff] }
0x13c2   :  { %7127 = vmatprep.subr.bf16.mxu0 %v7098_v1  ;;  %7168 = vmatprep.subr.bf16.mxu1 %v7100_v51  ;;  %v7121_v1 = vld [vmem:[#allocation9 + $0xe0] sm:$0xff]  ;;  %v7123_v51 = vld [vmem:[#allocation9 + $0xf0] sm:$0xff] }
0x13c3   :  { %7157 = vmatprep.mubr.bf16.mxu0 %v12400_v18  ;;  %7198 = vmatprep.mubr.bf16.mxu1 %v12400_v18 }
0x13c5   :  { %7128 = vmatpush1.bf16.msra.mxu0 %v7097_v17  ;;  %7169 = vmatpush1.bf16.msra.mxu1 %v7099_v40 }
0x13c6   :  { %7129 = vmatprep.subr.bf16.mxu0 %v7102_v47  ;;  %7170 = vmatprep.subr.bf16.mxu1 %v7104_v3  ;;  %v7061_v47 = vld [vmem:[#allocation8 + $0x8] sm:$0xff]  ;;  %v7063_v3 = vld [vmem:[#allocation8 + $0x18] sm:$0xff] }
0x13c9   :  { %7130 = vmatpush1.bf16.msra.mxu0 %v7101_v38  ;;  %7171 = vmatpush1.bf16.msra.mxu1 %v7103_v36  ;;  %v10905_v37 = vpop.eup %10904  ;;  %v7060_v38 = vld [vmem:[#allocation8] sm:$0xff]  ;;  %v7062_v36 = vld [vmem:[#allocation8 + $0x10] sm:$0xff] }
0x13ca   :  { %7131 = vmatprep.subr.bf16.mxu0 %v7106_v50  ;;  %7172 = vmatprep.subr.bf16.mxu1 %v7108_v29  ;;  %v12095_v17 = vmul.f32 %v10905_v37, %v10903_v35  ;;  %v7065_v50 = vld [vmem:[#allocation8 + $0x28] sm:$0xff]  ;;  %v7067_v29 = vld [vmem:[#allocation8 + $0x38] sm:$0xff]  ;;  %v7080_v35 = vld [vmem:[#allocation8 + $0xa0] sm:$0xff] }
0x13cb   :  { %v7087_v37 = vld [vmem:[#allocation8 + $0xd8] sm:$0xff] }
0x13cc   :  { %v7092_v40 = vpack.c.bf16 %v12095_v17, %v12095_v17 }
0x13cd   :  { %7132 = vmatpush1.bf16.msra.mxu0 %v7105_v25  ;;  %7173 = vmatpush1.bf16.msra.mxu1 %v7107_v6  ;;  %v7066_v25 = vld [vmem:[#allocation8 + $0x30] sm:$0xff]  ;;  %v7069_v6 = vld [vmem:[#allocation8 + $0x48] sm:$0xff] }
0x13ce   :  { %7133 = vmatprep.subr.bf16.mxu0 %v7110_v59  ;;  %7174 = vmatprep.subr.bf16.mxu1 %v7112_v24  ;;  %v7068_v59 = vld [vmem:[#allocation8 + $0x40] sm:$0xff]  ;;  %v7070_v24 = vld [vmem:[#allocation8 + $0x50] sm:$0xff] }
0x13d1   :  { %7134 = vmatpush1.bf16.msra.mxu0 %v7109_v0  ;;  %7175 = vmatpush1.bf16.msra.mxu1 %v7111_v34  ;;  %v7073_v0 = vld [vmem:[#allocation8 + $0x68] sm:$0xff]  ;;  %v7075_v34 = vld [vmem:[#allocation8 + $0x78] sm:$0xff] }
0x13d2   :  { %7135 = vmatprep.subr.bf16.mxu0 %v7114_v31  ;;  %7176 = vmatprep.subr.bf16.mxu1 %v7116_v28  ;;  %v7072_v31 = vld [vmem:[#allocation8 + $0x60] sm:$0xff]  ;;  %v7074_v28 = vld [vmem:[#allocation8 + $0x70] sm:$0xff] }
0x13d5   :  { %7136 = vmatpush1.bf16.msra.mxu0 %v7113_v44  ;;  %7177 = vmatpush1.bf16.msra.mxu1 %v7115_v32  ;;  %v7077_v44 = vld [vmem:[#allocation8 + $0x88] sm:$0xff]  ;;  %v7079_v32 = vld [vmem:[#allocation8 + $0x98] sm:$0xff] }
0x13d6   :  { %7137 = vmatprep.subr.bf16.mxu0 %v7118_v46  ;;  %7178 = vmatprep.subr.bf16.mxu1 %v7120_v2  ;;  %v7076_v46 = vld [vmem:[#allocation8 + $0x80] sm:$0xff]  ;;  %v7078_v2 = vld [vmem:[#allocation8 + $0x90] sm:$0xff] }
0x13d9   :  { %7138 = vmatpush1.bf16.msra.mxu0 %v7117_v21  ;;  %7179 = vmatpush1.bf16.msra.mxu1 %v7119_v26  ;;  %v7081_v21 = vld [vmem:[#allocation8 + $0xa8] sm:$0xff]  ;;  %v7083_v26 = vld [vmem:[#allocation8 + $0xb8] sm:$0xff] }
0x13da   :  { %7139 = vmatprep.subr.bf16.mxu0 %v7122_v27  ;;  %7180 = vmatprep.subr.bf16.mxu1 %v7124_v19  ;;  %v7082_v27 = vld [vmem:[#allocation8 + $0xb0] sm:$0xff]  ;;  %v7085_v19 = vld [vmem:[#allocation8 + $0xc8] sm:$0xff] }
0x13dd   :  { %7140 = vmatpush1.bf16.msra.mxu0 %v7121_v1  ;;  %7181 = vmatpush1.bf16.msra.mxu1 %v7123_v51  ;;  %v7084_v1 = vld [vmem:[#allocation8 + $0xc0] sm:$0xff]  ;;  %v7086_v51 = vld [vmem:[#allocation8 + $0xd0] sm:$0xff] }
0x13de   :  { %7207 = vmatprep.subr.bf16.mxu0 %v7061_v47  ;;  %7248 = vmatprep.subr.bf16.mxu1 %v7063_v3  ;;  %v7091_v47 = vld [vmem:[#allocation8 + $0xf8] sm:$0xff]  ;;  %v7088_v3 = vld [vmem:[#allocation8 + $0xe0] sm:$0xff] }
0x13e0   :  { %7158 = vmatmul.mubr.bf16.vlgmr.msra.gmra.mrb[160].mxu0 %v7092_v40  ;;  %7199 = vmatmul.mubr.bf16.vlgmr.msra.gmra.mrb[192].mxu1 %v7092_v40  ;;  %v7089_v40 = vld [vmem:[#allocation8 + $0xe8] sm:$0xff] }
0x13e1   :  { %7239 = vmatprep.mubr.bf16.mxu0 %v12400_v18  ;;  %7280 = vmatprep.mubr.bf16.mxu1 %v12400_v18 }
0x13e2   :  { %7208 = vmatpush1.bf16.msra.mxu0 %v7060_v38  ;;  %7249 = vmatpush1.bf16.msra.mxu1 %v7062_v36  ;;  %v7090_v38 = vld [vmem:[#allocation8 + $0xf0] sm:$0xff] }
0x13e3   :  { %7209 = vmatprep.subr.bf16.mxu0 %v7065_v50  ;;  %7250 = vmatprep.subr.bf16.mxu1 %v7067_v29  ;;  %v10460_v36 = vld [vmem:[#allocation14 + $0x4] ss:$16 sps:$4 sm:$0xff]   ;;  %v10463_v50 = vld [vmem:[#allocation14 + $0xc] ss:$16 sps:$4 sm:$0xff]  }
0x13e6   :  { %7210 = vmatpush1.bf16.msra.mxu0 %v7064_v33  ;;  %7251 = vmatpush1.bf16.msra.mxu1 %v7066_v25 }
0x13e7   :  { %7211 = vmatprep.subr.bf16.mxu0 %v7069_v6  ;;  %7252 = vmatprep.subr.bf16.mxu1 %v7071_v20 }
0x13ea   :  { %7212 = vmatpush1.bf16.msra.mxu0 %v7068_v59  ;;  %7253 = vmatpush1.bf16.msra.mxu1 %v7070_v24 }
0x13eb   :  { %7213 = vmatprep.subr.bf16.mxu0 %v7073_v0  ;;  %7254 = vmatprep.subr.bf16.mxu1 %v7075_v34 }
0x13ee   :  { %7214 = vmatpush1.bf16.msra.mxu0 %v7072_v31  ;;  %7255 = vmatpush1.bf16.msra.mxu1 %v7074_v28 }
0x13ef   :  { %7215 = vmatprep.subr.bf16.mxu0 %v7077_v44  ;;  %7256 = vmatprep.subr.bf16.mxu1 %v7079_v32 }
0x13f2   :  { %7216 = vmatpush1.bf16.msra.mxu0 %v7076_v46  ;;  %7257 = vmatpush1.bf16.msra.mxu1 %v7078_v2 }
0x13f3   :  { %7217 = vmatprep.subr.bf16.mxu0 %v7081_v21  ;;  %7258 = vmatprep.subr.bf16.mxu1 %v7083_v26 }
0x13f6   :  { %7218 = vmatpush1.bf16.msra.mxu0 %v7080_v35  ;;  %7259 = vmatpush1.bf16.msra.mxu1 %v7082_v27 }
0x13f7   :  { %7219 = vmatprep.subr.bf16.mxu0 %v7085_v19  ;;  %7260 = vmatprep.subr.bf16.mxu1 %v7087_v37 }
0x13fa   :  { %7220 = vmatpush1.bf16.msra.mxu0 %v7084_v1  ;;  %7261 = vmatpush1.bf16.msra.mxu1 %v7086_v51 }
0x13fb   :  { %7221 = vmatprep.subr.bf16.mxu0 %v7089_v40  ;;  %7262 = vmatprep.subr.bf16.mxu1 %v7091_v47 }
0x13fe   :  { %7222 = vmatpush1.bf16.msra.mxu0 %v7088_v3  ;;  %7263 = vmatpush1.bf16.msra.mxu1 %v7090_v38 }
0x13ff   :  { %7516 = vmatprep.subr.bf16.mxu0 %v10460_v36  ;;  %7557 = vmatprep.subr.bf16.mxu1 %v10463_v50 }
0x1493   :  { %v6983_v29 = vpop.f32.mrb[156].mxu0  ;;  %v7024_v33 = vpop.f32.mrb[188].mxu1 }
0x1494   :  { %v6984_v25 = vadd.f32 %v6983_v29, %v12075_v4  ;;  %v7025_v6 = vadd.f32 %v7024_v33, %v12077_v13  ;;  %v6985_v20 = vpop.f32.mrb[157].mxu0  ;;  %v7026_v59 = vpop.f32.mrb[189].mxu1 }
0x1495   :  { %v6986_v24 = vadd.f32 %v6985_v20, %v12079_v49  ;;  %v7027_v0 = vadd.f32 %v7026_v59, %v12081_v7  ;;  %v6987_v34 = vpop.f32.mrb[158].mxu0  ;;  %v7028_v31 = vpop.f32.mrb[190].mxu1 }
0x1496   :  { %v7031_v28 = vadd.f32 %v6984_v25, %v11415_v53  ;;  %v6988_v44 = vpop.f32.mrb[159].mxu0  ;;  %v7029_v32 = vpop.f32.mrb[191].mxu1  ;;  %v7033_v26 = vadd.f32 %v7025_v6, %v11427_v61  ;;  %v10458_v34 = vld [vmem:[#allocation14] ss:$16 sps:$4 sm:$0xff]   ;;  %v10461_v31 = vld [vmem:[#allocation14 + $0x8] ss:$16 sps:$4 sm:$0xff]  }
0x1497   :  { %v7032_v46 = vadd.f32 %v6986_v24, %v11421_v56  ;;  %v7034_v4 = vadd.f32 %v7027_v0, %v11433_v8  ;;  %v10466_v44 = vld [vmem:[#allocation14 + $0x24] ss:$16 sps:$4 sm:$0xff]   ;;  %v10469_v32 = vld [vmem:[#allocation14 + $0x2c] ss:$16 sps:$4 sm:$0xff]  }
0x1498   :  { %v9952_v2 = vmul.f32 -1.442695, %v7031_v28 }
0x1499   :  { %v9953_v21 = vmul.f32 -1.442695, %v7032_v46  ;;  %v9954_v13 = vmul.f32 -1.442695, %v7034_v4  ;;  %v10464_v46 = vld [vmem:[#allocation14 + $0x20] ss:$16 sps:$4 sm:$0xff]  }
0x149a   :  { %10906 = vpow2.f32 %v9952_v2  ;;  %v10467_v2 = vld [vmem:[#allocation14 + $0x28] ss:$16 sps:$4 sm:$0xff]   ;;  %v10475_v4 = vld [vmem:[#allocation14 + $0x4c] ss:$16 sps:$4 sm:$0xff]  }
0x149b   :  { %10908 = vpow2.f32 %v9953_v21  ;;  %v10472_v21 = vld [vmem:[#allocation14 + $0x44] ss:$16 sps:$4 sm:$0xff]  }
0x149c   :  { %10910 = vpow2.f32 %v9954_v13  ;;  %v10470_v13 = vld [vmem:[#allocation14 + $0x40] ss:$16 sps:$4 sm:$0xff]  }
0x149d   :  { %10912 = vtanh.f32 %v7033_v26  ;;  %v10473_v26 = vld [vmem:[#allocation14 + $0x48] ss:$16 sps:$4 sm:$0xff]  }
0x14a4   :  { %v10907_v49 = vpop.eup %10906 }
0x14a5   :  { %v10909_v35 = vpop.eup %10908  ;;  %v7038_v7 = vadd.f32 1.0, %v10907_v49  ;;  %v10478_v49 = vld [vmem:[#allocation14 + $0x64] ss:$16 sps:$4 sm:$0xff]  }
0x14a6   :  { %v7044_v27 = vadd.f32 1.0, %v10909_v35  ;;  %v10911_v19 = vpop.eup %10910  ;;  %v10481_v35 = vld [vmem:[#allocation14 + $0x6c] ss:$16 sps:$4 sm:$0xff]  }
0x14a7   :  { %10914 = vrcp.f32 %v7038_v7  ;;  %v10913_v37 = vpop.eup %10912  ;;  %v7051_v47 = vadd.f32 1.0, %v10911_v19  ;;  %v10476_v7 = vld [vmem:[#allocation14 + $0x60] ss:$16 sps:$4 sm:$0xff]   ;;  %v10484_v19 = vld [vmem:[#allocation14 + $0x84] ss:$16 sps:$4 sm:$0xff]  }
0x14a8   :  { %10916 = vrcp.f32 %v7044_v27  ;;  %v10479_v27 = vld [vmem:[#allocation14 + $0x68] ss:$16 sps:$4 sm:$0xff]  }
0x14a9   :  { %10918 = vrcp.f32 %v7051_v47  ;;  %v10493_v47 = vld [vmem:[#allocation14 + $0xac] ss:$16 sps:$4 sm:$0xff]  }
0x14b1   :  { %v10915_v1 = vpop.eup %10914 }
0x14b2   :  { %v10917_v51 = vpop.eup %10916  ;;  %v7055_v40 = vmul.f32 %v10915_v1, %v10913_v37  ;;  %v10487_v37 = vld [vmem:[#allocation14 + $0x8c] ss:$16 sps:$4 sm:$0xff]   ;;  %v10482_v1 = vld [vmem:[#allocation14 + $0x80] ss:$16 sps:$4 sm:$0xff]  }
0x14b3   :  { %v7054_v3 = vmul.f32 %v10917_v51, %v12011_v15  ;;  %v12110_v38 = vpop.f32.mrb[160].mxu0  ;;  %v12112_v36 = vpop.f32.mrb[192].mxu1  ;;  %v10485_v51 = vld [vmem:[#allocation14 + $0x88] ss:$16 sps:$4 sm:$0xff]  }
0x14b4   :  { %v12114_v50 = vpop.f32.mrb[161].mxu0  ;;  %v12116_v29 = vpop.f32.mrb[193].mxu1 }
0x14b5   :  { %v12118_v33 = vadd.f32 %v7055_v40, %v7054_v3  ;;  %v7163_v25 = vpop.f32.mrb[162].mxu0  ;;  %v7204_v6 = vpop.f32.mrb[194].mxu1  ;;  %v10490_v40 = vld [vmem:[#allocation14 + $0xa4] ss:$16 sps:$4 sm:$0xff]   ;;  %v10488_v3 = vld [vmem:[#allocation14 + $0xa0] ss:$16 sps:$4 sm:$0xff]  }
0x14b6   :  { %v7164_v20 = vpop.f32.mrb[163].mxu0  ;;  %v7205_v59 = vpop.f32.mrb[195].mxu1  ;;  %v10491_v25 = vld [vmem:[#allocation14 + $0xa8] ss:$16 sps:$4 sm:$0xff]   ;;  %v10496_v6 = vld [vmem:[#allocation14 + $0xc4] ss:$16 sps:$4 sm:$0xff]  }
0x14b7   :  { %10920 = vtanh.f32 %v12118_v33  ;;  %v10919_v24 = vpop.eup %10918  ;;  %v10499_v20 = vld [vmem:[#allocation14 + $0xcc] ss:$16 sps:$4 sm:$0xff]   ;;  %v10494_v59 = vld [vmem:[#allocation14 + $0xc0] ss:$16 sps:$4 sm:$0xff]  }
0x14c1   :  { %v10921_v0 = vpop.eup %10920 }
0x14c2   :  { %v7058_v15 = vmul.f32 %v10921_v0, %v10919_v24  ;;  %v10497_v24 = vld [vmem:[#allocation14 + $0xc8] ss:$16 sps:$4 sm:$0xff]   ;;  %v10502_v0 = vld [vmem:[#allocation14 + $0xe4] ss:$16 sps:$4 sm:$0xff]  }
0x14c4   :  { %v12121_v28 = vpack.c.bf16 %v7058_v15, %v7058_v15  ;;  %v10505_v15 = vld [vmem:[#allocation14 + $0xec] ss:$16 sps:$4 sm:$0xff]  }
0x14c6   :  { %7240 = vmatmul.mubr.bf16.vlgmr.msra.gmra.mrb[164].mxu0 %v12121_v28  ;;  %7281 = vmatmul.mubr.bf16.vlgmr.msra.gmra.mrb[196].mxu1 %v12121_v28 }
0x14c7   :  { %7517 = vmatpush1.bf16.msra.mxu0 %v10458_v34  ;;  %7558 = vmatpush1.bf16.msra.mxu1 %v10461_v31  ;;  %v10500_v34 = vld [vmem:[#allocation14 + $0xe0] ss:$16 sps:$4 sm:$0xff]   ;;  %v10503_v31 = vld [vmem:[#allocation14 + $0xe8] ss:$16 sps:$4 sm:$0xff]  }
0x14c8   :  { %7518 = vmatprep.subr.bf16.mxu0 %v10466_v44  ;;  %7559 = vmatprep.subr.bf16.mxu1 %v10469_v32  ;;  %v7660_v44 = vld [vmem:[#allocation5 + $0x8] sm:$0xff]  ;;  %v7662_v32 = vld [vmem:[#allocation5 + $0x18] sm:$0xff] }
0x14c9   :  { %7548 = vmatprep.mubr.bf16.mxu0 %v12400_v18  ;;  %7589 = vmatprep.mubr.bf16.mxu1 %v12400_v18 }
0x14cb   :  { %7519 = vmatpush1.bf16.msra.mxu0 %v10464_v46  ;;  %7560 = vmatpush1.bf16.msra.mxu1 %v10467_v2  ;;  %v7659_v46 = vld [vmem:[#allocation5] sm:$0xff]  ;;  %v7661_v2 = vld [vmem:[#allocation5 + $0x10] sm:$0xff] }
0x14cc   :  { %7520 = vmatprep.subr.bf16.mxu0 %v10472_v21  ;;  %7561 = vmatprep.subr.bf16.mxu1 %v10475_v4  ;;  %v7664_v21 = vld [vmem:[#allocation5 + $0x28] sm:$0xff]  ;;  %v7666_v4 = vld [vmem:[#allocation5 + $0x38] sm:$0xff] }
0x14cf   :  { %7521 = vmatpush1.bf16.msra.mxu0 %v10470_v13  ;;  %7562 = vmatpush1.bf16.msra.mxu1 %v10473_v26  ;;  %v7663_v13 = vld [vmem:[#allocation5 + $0x20] sm:$0xff]  ;;  %v7665_v26 = vld [vmem:[#allocation5 + $0x30] sm:$0xff] }
0x14d0   :  { %7522 = vmatprep.subr.bf16.mxu0 %v10478_v49  ;;  %7563 = vmatprep.subr.bf16.mxu1 %v10481_v35  ;;  %v7668_v49 = vld [vmem:[#allocation5 + $0x48] sm:$0xff]  ;;  %v7670_v35 = vld [vmem:[#allocation5 + $0x58] sm:$0xff] }
0x14d3   :  { %7523 = vmatpush1.bf16.msra.mxu0 %v10476_v7  ;;  %7564 = vmatpush1.bf16.msra.mxu1 %v10479_v27  ;;  %v7667_v7 = vld [vmem:[#allocation5 + $0x40] sm:$0xff]  ;;  %v7669_v27 = vld [vmem:[#allocation5 + $0x50] sm:$0xff] }
0x14d4   :  { %7524 = vmatprep.subr.bf16.mxu0 %v10484_v19  ;;  %7565 = vmatprep.subr.bf16.mxu1 %v10487_v37  ;;  %v7672_v19 = vld [vmem:[#allocation5 + $0x68] sm:$0xff]  ;;  %v7671_v37 = vld [vmem:[#allocation5 + $0x60] sm:$0xff] }
0x14d7   :  { %7525 = vmatpush1.bf16.msra.mxu0 %v10482_v1  ;;  %7566 = vmatpush1.bf16.msra.mxu1 %v10485_v51  ;;  %v7673_v1 = vld [vmem:[#allocation5 + $0x70] sm:$0xff]  ;;  %v7676_v51 = vld [vmem:[#allocation5 + $0x88] sm:$0xff] }
0x14d8   :  { %7526 = vmatprep.subr.bf16.mxu0 %v10490_v40  ;;  %7567 = vmatprep.subr.bf16.mxu1 %v10493_v47  ;;  %v7678_v40 = vld [vmem:[#allocation5 + $0x98] sm:$0xff]  ;;  %v7675_v47 = vld [vmem:[#allocation5 + $0x80] sm:$0xff] }
0x14db   :  { %7527 = vmatpush1.bf16.msra.mxu0 %v10488_v3  ;;  %7568 = vmatpush1.bf16.msra.mxu1 %v10491_v25  ;;  %v7677_v3 = vld [vmem:[#allocation5 + $0x90] sm:$0xff]  ;;  %v7680_v25 = vld [vmem:[#allocation5 + $0xa8] sm:$0xff] }
0x14dc   :  { %7528 = vmatprep.subr.bf16.mxu0 %v10496_v6  ;;  %7569 = vmatprep.subr.bf16.mxu1 %v10499_v20  ;;  %v7682_v6 = vld [vmem:[#allocation5 + $0xb8] sm:$0xff]  ;;  %v7679_v20 = vld [vmem:[#allocation5 + $0xa0] sm:$0xff] }
0x14df   :  { %7529 = vmatpush1.bf16.msra.mxu0 %v10494_v59  ;;  %7570 = vmatpush1.bf16.msra.mxu1 %v10497_v24  ;;  %v7681_v59 = vld [vmem:[#allocation5 + $0xb0] sm:$0xff]  ;;  %v7684_v24 = vld [vmem:[#allocation5 + $0xc8] sm:$0xff] }
0x14e0   :  { %7530 = vmatprep.subr.bf16.mxu0 %v10502_v0  ;;  %7571 = vmatprep.subr.bf16.mxu1 %v10505_v15  ;;  %v7686_v0 = vld [vmem:[#allocation5 + $0xd8] sm:$0xff]  ;;  %v7683_v15 = vld [vmem:[#allocation5 + $0xc0] sm:$0xff] }
0x14e3   :  { %7531 = vmatpush1.bf16.msra.mxu0 %v10500_v34  ;;  %7572 = vmatpush1.bf16.msra.mxu1 %v10503_v31  ;;  %v7685_v34 = vld [vmem:[#allocation5 + $0xd0] sm:$0xff]  ;;  %v7688_v31 = vld [vmem:[#allocation5 + $0xe8] sm:$0xff] }
0x14e4   :  { %7691 = vmatprep.subr.bf16.mxu0 %v7660_v44  ;;  %7732 = vmatprep.subr.bf16.mxu1 %v7662_v32  ;;  %v7690_v44 = vld [vmem:[#allocation5 + $0xf8] sm:$0xff]  ;;  %v7687_v32 = vld [vmem:[#allocation5 + $0xe0] sm:$0xff] }
0x14e6   :  { %7549 = vmatmul.mubr.bf16.vlgmr.msra.gmra.mrb[168].mxu0 %v12056_v12  ;;  %7590 = vmatmul.mubr.bf16.vlgmr.msra.gmra.mrb[200].mxu1 %v12056_v12  ;;  %v7674_v12 = vld [vmem:[#allocation5 + $0x78] sm:$0xff] }
0x14e7   :  { %7692 = vmatpush1.bf16.msra.mxu0 %v7659_v46  ;;  %7733 = vmatpush1.bf16.msra.mxu1 %v7661_v2  ;;  %v7689_v46 = vld [vmem:[#allocation5 + $0xf0] sm:$0xff]  ;;  %v7628_v2 = vld [vmem:[#allocation4 + $0x8] sm:$0xff] }
0x14e8   :  { %7693 = vmatprep.subr.bf16.mxu0 %v7664_v21  ;;  %7734 = vmatprep.subr.bf16.mxu1 %v7666_v4  ;;  %v7630_v21 = vld [vmem:[#allocation4 + $0x18] sm:$0xff]  ;;  %v7627_v4 = vld [vmem:[#allocation4] sm:$0xff] }
0x14e9   :  { %7723 = vmatprep.mubr.bf16.mxu0 %v12400_v18  ;;  %7764 = vmatprep.mubr.bf16.mxu1 %v12400_v18 }
0x14eb   :  { %7694 = vmatpush1.bf16.msra.mxu0 %v7663_v13  ;;  %7735 = vmatpush1.bf16.msra.mxu1 %v7665_v26  ;;  %v7629_v13 = vld [vmem:[#allocation4 + $0x10] sm:$0xff]  ;;  %v7632_v26 = vld [vmem:[#allocation4 + $0x28] sm:$0xff] }
0x14ec   :  { %7695 = vmatprep.subr.bf16.mxu0 %v7668_v49  ;;  %7736 = vmatprep.subr.bf16.mxu1 %v7670_v35  ;;  %v7634_v49 = vld [vmem:[#allocation4 + $0x38] sm:$0xff]  ;;  %v7631_v35 = vld [vmem:[#allocation4 + $0x20] sm:$0xff] }
0x14ef   :  { %7696 = vmatpush1.bf16.msra.mxu0 %v7667_v7  ;;  %7737 = vmatpush1.bf16.msra.mxu1 %v7669_v27  ;;  %v7633_v7 = vld [vmem:[#allocation4 + $0x30] sm:$0xff]  ;;  %v7638_v27 = vld [vmem:[#allocation4 + $0x58] sm:$0xff] }
0x14f0   :  { %7697 = vmatprep.subr.bf16.mxu0 %v7672_v19  ;;  %7738 = vmatprep.subr.bf16.mxu1 %v7674_v12  ;;  %v7635_v19 = vld [vmem:[#allocation4 + $0x40] sm:$0xff]  ;;  %v7637_v12 = vld [vmem:[#allocation4 + $0x50] sm:$0xff] }
0x14f3   :  { %7698 = vmatpush1.bf16.msra.mxu0 %v7671_v37  ;;  %7739 = vmatpush1.bf16.msra.mxu1 %v7673_v1  ;;  %v7640_v37 = vld [vmem:[#allocation4 + $0x68] sm:$0xff]  ;;  %v7642_v1 = vld [vmem:[#allocation4 + $0x78] sm:$0xff] }
0x14f4   :  { %7699 = vmatprep.subr.bf16.mxu0 %v7676_v51  ;;  %7740 = vmatprep.subr.bf16.mxu1 %v7678_v40  ;;  %v7639_v51 = vld [vmem:[#allocation4 + $0x60] sm:$0xff]  ;;  %v7641_v40 = vld [vmem:[#allocation4 + $0x70] sm:$0xff] }
0x14f7   :  { %7700 = vmatpush1.bf16.msra.mxu0 %v7675_v47  ;;  %7741 = vmatpush1.bf16.msra.mxu1 %v7677_v3  ;;  %v7644_v47 = vld [vmem:[#allocation4 + $0x88] sm:$0xff]  ;;  %v7646_v3 = vld [vmem:[#allocation4 + $0x98] sm:$0xff] }
0x14f8   :  { %7701 = vmatprep.subr.bf16.mxu0 %v7680_v25  ;;  %7742 = vmatprep.subr.bf16.mxu1 %v7682_v6  ;;  %v7643_v25 = vld [vmem:[#allocation4 + $0x80] sm:$0xff]  ;;  %v7645_v6 = vld [vmem:[#allocation4 + $0x90] sm:$0xff] }
0x14fb   :  { %7702 = vmatpush1.bf16.msra.mxu0 %v7679_v20  ;;  %7743 = vmatpush1.bf16.msra.mxu1 %v7681_v59  ;;  %v7648_v20 = vld [vmem:[#allocation4 + $0xa8] sm:$0xff]  ;;  %v7650_v59 = vld [vmem:[#allocation4 + $0xb8] sm:$0xff] }
0x14fc   :  { %7703 = vmatprep.subr.bf16.mxu0 %v7684_v24  ;;  %7744 = vmatprep.subr.bf16.mxu1 %v7686_v0  ;;  %v7647_v24 = vld [vmem:[#allocation4 + $0xa0] sm:$0xff]  ;;  %v7649_v0 = vld [vmem:[#allocation4 + $0xb0] sm:$0xff] }
0x14ff   :  { %7704 = vmatpush1.bf16.msra.mxu0 %v7683_v15  ;;  %7745 = vmatpush1.bf16.msra.mxu1 %v7685_v34  ;;  %v7652_v15 = vld [vmem:[#allocation4 + $0xc8] sm:$0xff]  ;;  %v7654_v34 = vld [vmem:[#allocation4 + $0xd8] sm:$0xff] }
0x1500   :  { %7705 = vmatprep.subr.bf16.mxu0 %v7688_v31  ;;  %7746 = vmatprep.subr.bf16.mxu1 %v7690_v44  ;;  %v7651_v31 = vld [vmem:[#allocation4 + $0xc0] sm:$0xff]  ;;  %v7653_v44 = vld [vmem:[#allocation4 + $0xd0] sm:$0xff] }
0x1503   :  { %7706 = vmatpush1.bf16.msra.mxu0 %v7687_v32  ;;  %7747 = vmatpush1.bf16.msra.mxu1 %v7689_v46  ;;  %v7656_v32 = vld [vmem:[#allocation4 + $0xe8] sm:$0xff]  ;;  %v7658_v46 = vld [vmem:[#allocation4 + $0xf8] sm:$0xff] }
0x1504   :  { %7773 = vmatprep.subr.bf16.mxu0 %v7628_v2  ;;  %7814 = vmatprep.subr.bf16.mxu1 %v7630_v21  ;;  %v7655_v2 = vld [vmem:[#allocation4 + $0xe0] sm:$0xff]  ;;  %v7657_v21 = vld [vmem:[#allocation4 + $0xf0] sm:$0xff] }
0x1506   :  { %7724 = vmatmul.mubr.bf16.vlgmr.msra.gmra.mrb[172].mxu0 %v12088_v30  ;;  %7765 = vmatmul.mubr.bf16.vlgmr.msra.gmra.mrb[204].mxu1 %v12088_v30  ;;  %v7636_v30 = vld [vmem:[#allocation4 + $0x48] sm:$0xff] }
0x1507   :  { %7805 = vmatprep.mubr.bf16.mxu0 %v12400_v18  ;;  %7846 = vmatprep.mubr.bf16.mxu1 %v12400_v18 }
0x1508   :  { %7774 = vmatpush1.bf16.msra.mxu0 %v7627_v4  ;;  %7815 = vmatpush1.bf16.msra.mxu1 %v7629_v13  ;;  %v7917_v4 = vld [vmem:[#allocation7 + $0x8] sm:$0xff]  ;;  %v7919_v13 = vld [vmem:[#allocation7 + $0x18] sm:$0xff] }
0x1509   :  { %7775 = vmatprep.subr.bf16.mxu0 %v7632_v26  ;;  %7816 = vmatprep.subr.bf16.mxu1 %v7634_v49 }
0x150c   :  { %7776 = vmatpush1.bf16.msra.mxu0 %v7631_v35  ;;  %7817 = vmatpush1.bf16.msra.mxu1 %v7633_v7 }
0x150d   :  { %7777 = vmatprep.subr.bf16.mxu0 %v7636_v30  ;;  %7818 = vmatprep.subr.bf16.mxu1 %v7638_v27 }
0x1510   :  { %7778 = vmatpush1.bf16.msra.mxu0 %v7635_v19  ;;  %7819 = vmatpush1.bf16.msra.mxu1 %v7637_v12 }
0x1511   :  { %7779 = vmatprep.subr.bf16.mxu0 %v7640_v37  ;;  %7820 = vmatprep.subr.bf16.mxu1 %v7642_v1 }
0x1514   :  { %7780 = vmatpush1.bf16.msra.mxu0 %v7639_v51  ;;  %7821 = vmatpush1.bf16.msra.mxu1 %v7641_v40 }
0x1515   :  { %7781 = vmatprep.subr.bf16.mxu0 %v7644_v47  ;;  %7822 = vmatprep.subr.bf16.mxu1 %v7646_v3 }
0x1518   :  { %7782 = vmatpush1.bf16.msra.mxu0 %v7643_v25  ;;  %7823 = vmatpush1.bf16.msra.mxu1 %v7645_v6 }
0x1519   :  { %7783 = vmatprep.subr.bf16.mxu0 %v7648_v20  ;;  %7824 = vmatprep.subr.bf16.mxu1 %v7650_v59 }
0x151c   :  { %7784 = vmatpush1.bf16.msra.mxu0 %v7647_v24  ;;  %7825 = vmatpush1.bf16.msra.mxu1 %v7649_v0 }
0x151d   :  { %7785 = vmatprep.subr.bf16.mxu0 %v7652_v15  ;;  %7826 = vmatprep.subr.bf16.mxu1 %v7654_v34 }
0x1520   :  { %7786 = vmatpush1.bf16.msra.mxu0 %v7651_v31  ;;  %7827 = vmatpush1.bf16.msra.mxu1 %v7653_v44 }
0x1521   :  { %7787 = vmatprep.subr.bf16.mxu0 %v7656_v32  ;;  %7828 = vmatprep.subr.bf16.mxu1 %v7658_v46 }
0x1524   :  { %7788 = vmatpush1.bf16.msra.mxu0 %v7655_v2  ;;  %7829 = vmatpush1.bf16.msra.mxu1 %v7657_v21 }
0x1525   :  { %7948 = vmatprep.subr.bf16.mxu0 %v7917_v4  ;;  %7989 = vmatprep.subr.bf16.mxu1 %v7919_v13 }
0x1599   :  { %v7241_v26 = vpop.f32.mrb[164].mxu0  ;;  %v7282_v49 = vpop.f32.mrb[196].mxu1 }
0x159a   :  { %v7242_v35 = vadd.f32 %v7241_v26, %v12110_v38  ;;  %v7283_v7 = vadd.f32 %v7282_v49, %v12112_v36  ;;  %v7243_v30 = vpop.f32.mrb[165].mxu0  ;;  %v7284_v27 = vpop.f32.mrb[197].mxu1 }
0x159b   :  { %v7244_v19 = vadd.f32 %v7243_v30, %v12114_v50  ;;  %v12139_v12 = vadd.f32 %v7284_v27, %v12116_v29  ;;  %v7245_v37 = vpop.f32.mrb[166].mxu0  ;;  %v7286_v1 = vpop.f32.mrb[198].mxu1 }
0x159c   :  { %v7289_v51 = vadd.f32 %v7242_v35, %v11417_v54  ;;  %v7246_v40 = vpop.f32.mrb[167].mxu0  ;;  %v7287_v47 = vpop.f32.mrb[199].mxu1  ;;  %v7291_v38 = vadd.f32 %v7283_v7, %v11429_v62 }
0x159d   :  { %v7290_v3 = vadd.f32 %v7244_v19, %v11423_v57 }
0x159e   :  { %v9955_v25 = vmul.f32 -1.442695, %v7289_v51 }
0x159f   :  { %v9956_v6 = vmul.f32 -1.442695, %v7290_v3 }
0x15a0   :  { %10922 = vpow2.f32 %v9955_v25 }
0x15a1   :  { %10924 = vpow2.f32 %v9956_v6 }
0x15a2   :  { %10926 = vtanh.f32 %v7291_v38 }
0x15aa   :  { %v10923_v36 = vpop.eup %10922 }
0x15ab   :  { %v10925_v20 = vpop.eup %10924  ;;  %v7296_v50 = vadd.f32 1.0, %v10923_v36 }
0x15ac   :  { %v7302_v29 = vadd.f32 1.0, %v10925_v20  ;;  %v10927_v59 = vpop.eup %10926 }
0x15ad   :  { %10928 = vrcp.f32 %v7296_v50 }
0x15ae   :  { %10930 = vrcp.f32 %v7302_v29 }
0x15b7   :  { %v10929_v24 = vpop.eup %10928 }
0x15b8   :  { %v10931_v0 = vpop.eup %10930  ;;  %v7313_v15 = vmul.f32 %v10929_v24, %v10927_v59 }
0x15b9   :  { %v7312_v34 = vmul.f32 %v10931_v0, %v12039_v11  ;;  %v7550_v31 = vpop.f32.mrb[168].mxu0  ;;  %v7591_v44 = vpop.f32.mrb[200].mxu1 }
0x15ba   :  { %v7598_v32 = vadd.f32 %v7550_v31, %v11464_v39  ;;  %v7552_v46 = vpop.f32.mrb[169].mxu0  ;;  %v7593_v2 = vpop.f32.mrb[201].mxu1  ;;  %v7600_v19 = vadd.f32 %v7591_v44, %v11496_v48  ;;  %v7916_v44 = vld [vmem:[#allocation7] sm:$0xff] }
0x15bb   :  { %v12146_v21 = vadd.f32 %v7313_v15, %v7312_v34  ;;  %v7599_v4 = vadd.f32 %v7552_v46, %v11466_v41  ;;  %v7554_v13 = vpop.f32.mrb[170].mxu0  ;;  %v7595_v26 = vpop.f32.mrb[202].mxu1  ;;  %v7601_v11 = vadd.f32 %v7593_v2, %v11498_v14  ;;  %v7921_v46 = vld [vmem:[#allocation7 + $0x28] sm:$0xff]  ;;  %v7923_v2 = vld [vmem:[#allocation7 + $0x38] sm:$0xff] }
0x15bc   :  { %v9990_v49 = vmul.f32 -1.442695, %v7598_v32  ;;  %v7555_v35 = vpop.f32.mrb[171].mxu0  ;;  %v7596_v7 = vpop.f32.mrb[203].mxu1  ;;  %v7918_v32 = vld [vmem:[#allocation7 + $0x10] sm:$0xff]  ;;  %v7925_v26 = vld [vmem:[#allocation7 + $0x48] sm:$0xff] }
0x15bd   :  { %v9991_v30 = vmul.f32 -1.442695, %v7599_v4  ;;  %v9992_v27 = vmul.f32 -1.442695, %v7601_v11  ;;  %v7920_v4 = vld [vmem:[#allocation7 + $0x20] sm:$0xff]  ;;  %v7922_v13 = vld [vmem:[#allocation7 + $0x30] sm:$0xff] }
0x15be   :  { %10932 = vpow2.f32 %v9990_v49  ;;  %v7927_v49 = vld [vmem:[#allocation7 + $0x58] sm:$0xff]  ;;  %v7924_v35 = vld [vmem:[#allocation7 + $0x40] sm:$0xff]  ;;  %v7926_v7 = vld [vmem:[#allocation7 + $0x50] sm:$0xff] }
0x15bf   :  { %10934 = vpow2.f32 %v9991_v30  ;;  %v7929_v30 = vld [vmem:[#allocation7 + $0x68] sm:$0xff]  ;;  %v7931_v11 = vld [vmem:[#allocation7 + $0x78] sm:$0xff] }
0x15c0   :  { %10936 = vpow2.f32 %v9992_v27  ;;  %v7928_v27 = vld [vmem:[#allocation7 + $0x60] sm:$0xff] }
0x15c1   :  { %10938 = vtanh.f32 %v7600_v19  ;;  %v7930_v19 = vld [vmem:[#allocation7 + $0x70] sm:$0xff] }
0x15c8   :  { %v10933_v39 = vpop.eup %10932 }
0x15c9   :  { %v10935_v37 = vpop.eup %10934  ;;  %v7605_v1 = vadd.f32 1.0, %v10933_v39  ;;  %v7933_v39 = vld [vmem:[#allocation7 + $0x88] sm:$0xff] }
0x15ca   :  { %v7611_v51 = vadd.f32 1.0, %v10935_v37  ;;  %v10937_v41 = vpop.eup %10936  ;;  %v7935_v37 = vld [vmem:[#allocation7 + $0x98] sm:$0xff] }
0x15cb   :  { %10940 = vrcp.f32 %v7605_v1  ;;  %v10939_v40 = vpop.eup %10938  ;;  %v7618_v6 = vadd.f32 1.0, %v10937_v41  ;;  %v7932_v1 = vld [vmem:[#allocation7 + $0x80] sm:$0xff]  ;;  %v7937_v41 = vld [vmem:[#allocation7 + $0xa8] sm:$0xff] }
0x15cc   :  { %10942 = vrcp.f32 %v7611_v51  ;;  %v7934_v51 = vld [vmem:[#allocation7 + $0x90] sm:$0xff] }
0x15cd   :  { %10944 = vrcp.f32 %v7618_v6  ;;  %v7943_v6 = vld [vmem:[#allocation7 + $0xd8] sm:$0xff] }
0x15d5   :  { %v10941_v47 = vpop.eup %10940 }
0x15d6   :  { %v10943_v3 = vpop.eup %10942  ;;  %v7622_v25 = vmul.f32 %v10941_v47, %v10939_v40  ;;  %v7939_v40 = vld [vmem:[#allocation7 + $0xb8] sm:$0xff]  ;;  %v7936_v47 = vld [vmem:[#allocation7 + $0xa0] sm:$0xff] }
0x15d7   :  { %v7621_v38 = vmul.f32 %v10943_v3, %v12045_v42  ;;  %v10945_v15 = vpop.eup %10944  ;;  %v7938_v3 = vld [vmem:[#allocation7 + $0xb0] sm:$0xff] }
0x15d9   :  { %v12152_v14 = vadd.f32 %v7622_v25, %v7621_v38  ;;  %v12154_v36 = vpop.f32.mrb[172].mxu0  ;;  %v12156_v48 = vpop.f32.mrb[204].mxu1  ;;  %v7941_v25 = vld [vmem:[#allocation7 + $0xc8] sm:$0xff]  ;;  %v7940_v38 = vld [vmem:[#allocation7 + $0xc0] sm:$0xff] }
0x15da   :  { %v12158_v20 = vpop.f32.mrb[173].mxu0  ;;  %v12160_v50 = vpop.f32.mrb[205].mxu1 }
0x15db   :  { %v7729_v29 = vpop.f32.mrb[174].mxu0  ;;  %v7770_v59 = vpop.f32.mrb[206].mxu1  ;;  %10946 = vtanh.f32 %v12152_v14 }
0x15dc   :  { %v7730_v24 = vpop.f32.mrb[175].mxu0  ;;  %v7771_v0 = vpop.f32.mrb[207].mxu1  ;;  %v7942_v29 = vld [vmem:[#allocation7 + $0xd0] sm:$0xff]  ;;  %v7945_v59 = vld [vmem:[#allocation7 + $0xe8] sm:$0xff] }
0x15dd   :  { %v7947_v24 = vld [vmem:[#allocation7 + $0xf8] sm:$0xff]  ;;  %v7944_v0 = vld [vmem:[#allocation7 + $0xe0] sm:$0xff] }
0x15e5   :  { %v10947_v34 = vpop.eup %10946 }
0x15e6   :  { %v7625_v42 = vmul.f32 %v10947_v34, %v10945_v15  ;;  %v7946_v15 = vld [vmem:[#allocation7 + $0xf0] sm:$0xff]  ;;  %v7885_v34 = vld [vmem:[#allocation6 + $0x8] sm:$0xff] }
0x15e8   :  { %v12163_v31 = vpack.c.bf16 %v7625_v42, %v7625_v42  ;;  %v7887_v42 = vld [vmem:[#allocation6 + $0x18] sm:$0xff] }
0x15ea   :  { %7806 = vmatmul.mubr.bf16.vlgmr.msra.gmra.mrb[176].mxu0 %v12163_v31  ;;  %7847 = vmatmul.mubr.bf16.vlgmr.msra.gmra.mrb[208].mxu1 %v12163_v31 }
0x15eb   :  { %7949 = vmatpush1.bf16.msra.mxu0 %v7916_v44  ;;  %7990 = vmatpush1.bf16.msra.mxu1 %v7918_v32  ;;  %v7884_v44 = vld [vmem:[#allocation6] sm:$0xff]  ;;  %v7886_v32 = vld [vmem:[#allocation6 + $0x10] sm:$0xff] }
0x15ec   :  { %7950 = vmatprep.subr.bf16.mxu0 %v7921_v46  ;;  %7991 = vmatprep.subr.bf16.mxu1 %v7923_v2  ;;  %v7889_v46 = vld [vmem:[#allocation6 + $0x28] sm:$0xff]  ;;  %v7891_v2 = vld [vmem:[#allocation6 + $0x38] sm:$0xff] }
0x15ed   :  { %7980 = vmatprep.mubr.bf16.mxu0 %v12400_v18  ;;  %8021 = vmatprep.mubr.bf16.mxu1 %v12400_v18 }
0x15ef   :  { %7951 = vmatpush1.bf16.msra.mxu0 %v7920_v4  ;;  %7992 = vmatpush1.bf16.msra.mxu1 %v7922_v13  ;;  %v7888_v4 = vld [vmem:[#allocation6 + $0x20] sm:$0xff]  ;;  %v7890_v13 = vld [vmem:[#allocation6 + $0x30] sm:$0xff] }
0x15f0   :  { %7952 = vmatprep.subr.bf16.mxu0 %v7925_v26  ;;  %7993 = vmatprep.subr.bf16.mxu1 %v7927_v49  ;;  %v7895_v26 = vld [vmem:[#allocation6 + $0x58] sm:$0xff]  ;;  %v7892_v49 = vld [vmem:[#allocation6 + $0x40] sm:$0xff] }
0x15f3   :  { %7953 = vmatpush1.bf16.msra.mxu0 %v7924_v35  ;;  %7994 = vmatpush1.bf16.msra.mxu1 %v7926_v7  ;;  %v7894_v35 = vld [vmem:[#allocation6 + $0x50] sm:$0xff]  ;;  %v7897_v7 = vld [vmem:[#allocation6 + $0x68] sm:$0xff] }
0x15f4   :  { %7954 = vmatprep.subr.bf16.mxu0 %v7929_v30  ;;  %7995 = vmatprep.subr.bf16.mxu1 %v7931_v11  ;;  %v7899_v30 = vld [vmem:[#allocation6 + $0x78] sm:$0xff]  ;;  %v7896_v11 = vld [vmem:[#allocation6 + $0x60] sm:$0xff] }
0x15f7   :  { %7955 = vmatpush1.bf16.msra.mxu0 %v7928_v27  ;;  %7996 = vmatpush1.bf16.msra.mxu1 %v7930_v19  ;;  %v7898_v27 = vld [vmem:[#allocation6 + $0x70] sm:$0xff]  ;;  %v7901_v19 = vld [vmem:[#allocation6 + $0x88] sm:$0xff] }
0x15f8   :  { %7956 = vmatprep.subr.bf16.mxu0 %v7933_v39  ;;  %7997 = vmatprep.subr.bf16.mxu1 %v7935_v37  ;;  %v7903_v39 = vld [vmem:[#allocation6 + $0x98] sm:$0xff]  ;;  %v7900_v37 = vld [vmem:[#allocation6 + $0x80] sm:$0xff] }
0x15fb   :  { %7957 = vmatpush1.bf16.msra.mxu0 %v7932_v1  ;;  %7998 = vmatpush1.bf16.msra.mxu1 %v7934_v51  ;;  %v7902_v1 = vld [vmem:[#allocation6 + $0x90] sm:$0xff]  ;;  %v7905_v51 = vld [vmem:[#allocation6 + $0xa8] sm:$0xff] }
0x15fc   :  { %7958 = vmatprep.subr.bf16.mxu0 %v7937_v41  ;;  %7999 = vmatprep.subr.bf16.mxu1 %v7939_v40  ;;  %v7907_v41 = vld [vmem:[#allocation6 + $0xb8] sm:$0xff]  ;;  %v7904_v40 = vld [vmem:[#allocation6 + $0xa0] sm:$0xff] }
0x15ff   :  { %7959 = vmatpush1.bf16.msra.mxu0 %v7936_v47  ;;  %8000 = vmatpush1.bf16.msra.mxu1 %v7938_v3  ;;  %v7906_v47 = vld [vmem:[#allocation6 + $0xb0] sm:$0xff]  ;;  %v7909_v3 = vld [vmem:[#allocation6 + $0xc8] sm:$0xff] }
0x1600   :  { %7960 = vmatprep.subr.bf16.mxu0 %v7941_v25  ;;  %8001 = vmatprep.subr.bf16.mxu1 %v7943_v6  ;;  %v7911_v25 = vld [vmem:[#allocation6 + $0xd8] sm:$0xff]  ;;  %v7908_v6 = vld [vmem:[#allocation6 + $0xc0] sm:$0xff] }
0x1603   :  { %7961 = vmatpush1.bf16.msra.mxu0 %v7940_v38  ;;  %8002 = vmatpush1.bf16.msra.mxu1 %v7942_v29  ;;  %v7910_v38 = vld [vmem:[#allocation6 + $0xd0] sm:$0xff]  ;;  %v7913_v29 = vld [vmem:[#allocation6 + $0xe8] sm:$0xff] }
0x1604   :  { %7962 = vmatprep.subr.bf16.mxu0 %v7945_v59  ;;  %8003 = vmatprep.subr.bf16.mxu1 %v7947_v24  ;;  %v7915_v59 = vld [vmem:[#allocation6 + $0xf8] sm:$0xff]  ;;  %v7912_v24 = vld [vmem:[#allocation6 + $0xe0] sm:$0xff] }
0x1607   :  { %7963 = vmatpush1.bf16.msra.mxu0 %v7944_v0  ;;  %8004 = vmatpush1.bf16.msra.mxu1 %v7946_v15  ;;  %v7914_v0 = vld [vmem:[#allocation6 + $0xf0] sm:$0xff]  ;;  %v8175_v15 = vld [vmem:[#allocation9 + $0x8] sm:$0xff] }
0x1608   :  { %8030 = vmatprep.subr.bf16.mxu0 %v7885_v34  ;;  %8071 = vmatprep.subr.bf16.mxu1 %v7887_v42  ;;  %v8177_v34 = vld [vmem:[#allocation9 + $0x18] sm:$0xff] }
0x160a   :  { %7981 = vmatmul.mubr.bf16.vlgmr.msra.gmra.mrb[180].mxu0 %v12121_v28  ;;  %8022 = vmatmul.mubr.bf16.vlgmr.msra.gmra.mrb[212].mxu1 %v12121_v28  ;;  %v7893_v28 = vld [vmem:[#allocation6 + $0x48] sm:$0xff] }
0x160b   :  { %8062 = vmatprep.mubr.bf16.mxu0 %v12400_v18  ;;  %8103 = vmatprep.mubr.bf16.mxu1 %v12400_v18 }
0x160c   :  { %8031 = vmatpush1.bf16.msra.mxu0 %v7884_v44  ;;  %8072 = vmatpush1.bf16.msra.mxu1 %v7886_v32 }
0x160d   :  { %8032 = vmatprep.subr.bf16.mxu0 %v7889_v46  ;;  %8073 = vmatprep.subr.bf16.mxu1 %v7891_v2 }
0x1610   :  { %8033 = vmatpush1.bf16.msra.mxu0 %v7888_v4  ;;  %8074 = vmatpush1.bf16.msra.mxu1 %v7890_v13 }
0x1611   :  { %8034 = vmatprep.subr.bf16.mxu0 %v7893_v28  ;;  %8075 = vmatprep.subr.bf16.mxu1 %v7895_v26 }
0x1614   :  { %8035 = vmatpush1.bf16.msra.mxu0 %v7892_v49  ;;  %8076 = vmatpush1.bf16.msra.mxu1 %v7894_v35 }
0x1615   :  { %8036 = vmatprep.subr.bf16.mxu0 %v7897_v7  ;;  %8077 = vmatprep.subr.bf16.mxu1 %v7899_v30 }
0x1618   :  { %8037 = vmatpush1.bf16.msra.mxu0 %v7896_v11  ;;  %8078 = vmatpush1.bf16.msra.mxu1 %v7898_v27 }
0x1619   :  { %8038 = vmatprep.subr.bf16.mxu0 %v7901_v19  ;;  %8079 = vmatprep.subr.bf16.mxu1 %v7903_v39 }
0x161c   :  { %8039 = vmatpush1.bf16.msra.mxu0 %v7900_v37  ;;  %8080 = vmatpush1.bf16.msra.mxu1 %v7902_v1 }
0x161d   :  { %8040 = vmatprep.subr.bf16.mxu0 %v7905_v51  ;;  %8081 = vmatprep.subr.bf16.mxu1 %v7907_v41 }
0x1620   :  { %8041 = vmatpush1.bf16.msra.mxu0 %v7904_v40  ;;  %8082 = vmatpush1.bf16.msra.mxu1 %v7906_v47 }
0x1621   :  { %8042 = vmatprep.subr.bf16.mxu0 %v7909_v3  ;;  %8083 = vmatprep.subr.bf16.mxu1 %v7911_v25 }
0x1624   :  { %8043 = vmatpush1.bf16.msra.mxu0 %v7908_v6  ;;  %8084 = vmatpush1.bf16.msra.mxu1 %v7910_v38 }
0x1625   :  { %8044 = vmatprep.subr.bf16.mxu0 %v7913_v29  ;;  %8085 = vmatprep.subr.bf16.mxu1 %v7915_v59 }
0x1628   :  { %8045 = vmatpush1.bf16.msra.mxu0 %v7912_v24  ;;  %8086 = vmatpush1.bf16.msra.mxu1 %v7914_v0 }
0x1629   :  { %8206 = vmatprep.subr.bf16.mxu0 %v8175_v15  ;;  %8247 = vmatprep.subr.bf16.mxu1 %v8177_v34 }
0x16bd   :  { %v7807_v42 = vpop.f32.mrb[176].mxu0  ;;  %v7848_v44 = vpop.f32.mrb[208].mxu1 }
0x16be   :  { %v7808_v32 = vadd.f32 %v7807_v42, %v12154_v36  ;;  %v7849_v46 = vadd.f32 %v7848_v44, %v12156_v48  ;;  %v7809_v2 = vpop.f32.mrb[177].mxu0  ;;  %v7850_v4 = vpop.f32.mrb[209].mxu1 }
0x16bf   :  { %v7810_v13 = vadd.f32 %v7809_v2, %v12158_v20  ;;  %v7851_v28 = vadd.f32 %v7850_v4, %v12160_v50  ;;  %v7811_v26 = vpop.f32.mrb[178].mxu0  ;;  %v7852_v49 = vpop.f32.mrb[210].mxu1 }
0x16c0   :  { %v7855_v35 = vadd.f32 %v7808_v32, %v11413_v52  ;;  %v7812_v7 = vpop.f32.mrb[179].mxu0  ;;  %v7853_v30 = vpop.f32.mrb[211].mxu1  ;;  %v7857_v39 = vadd.f32 %v7849_v46, %v11425_v60  ;;  %v8176_v26 = vld [vmem:[#allocation9 + $0x10] sm:$0xff]  ;;  %v8179_v49 = vld [vmem:[#allocation9 + $0x28] sm:$0xff] }
0x16c1   :  { %v7856_v11 = vadd.f32 %v7810_v13, %v11419_v55  ;;  %v7858_v36 = vadd.f32 %v7851_v28, %v11431_v63  ;;  %v8174_v28 = vld [vmem:[#allocation9] sm:$0xff]  ;;  %v8180_v7 = vld [vmem:[#allocation9 + $0x30] sm:$0xff]  ;;  %v8183_v30 = vld [vmem:[#allocation9 + $0x48] sm:$0xff] }
0x16c2   :  { %v9993_v27 = vmul.f32 -1.442695, %v7855_v35  ;;  %v8181_v35 = vld [vmem:[#allocation9 + $0x38] sm:$0xff] }
0x16c3   :  { %v9994_v19 = vmul.f32 -1.442695, %v7856_v11  ;;  %v9995_v48 = vmul.f32 -1.442695, %v7858_v36  ;;  %v8185_v11 = vld [vmem:[#allocation9 + $0x58] sm:$0xff]  ;;  %v8187_v36 = vld [vmem:[#allocation9 + $0x68] sm:$0xff] }
0x16c4   :  { %10948 = vpow2.f32 %v9993_v27  ;;  %v8182_v27 = vld [vmem:[#allocation9 + $0x40] sm:$0xff] }
0x16c5   :  { %10950 = vpow2.f32 %v9994_v19  ;;  %v8184_v19 = vld [vmem:[#allocation9 + $0x50] sm:$0xff] }
0x16c6   :  { %10952 = vpow2.f32 %v9995_v48  ;;  %v8189_v48 = vld [vmem:[#allocation9 + $0x78] sm:$0xff] }
0x16c7   :  { %10954 = vtanh.f32 %v7857_v39 }
0x16ce   :  { %v10949_v20 = vpop.eup %10948 }
0x16cf   :  { %v10951_v37 = vpop.eup %10950  ;;  %v7862_v50 = vadd.f32 1.0, %v10949_v20  ;;  %v8186_v20 = vld [vmem:[#allocation9 + $0x60] sm:$0xff] }
0x16d0   :  { %v7868_v1 = vadd.f32 1.0, %v10951_v37  ;;  %v10953_v51 = vpop.eup %10952  ;;  %v8188_v37 = vld [vmem:[#allocation9 + $0x70] sm:$0xff] }
0x16d1   :  { %10956 = vrcp.f32 %v7862_v50  ;;  %v10955_v41 = vpop.eup %10954  ;;  %v7875_v25 = vadd.f32 1.0, %v10953_v51  ;;  %v8193_v51 = vld [vmem:[#allocation9 + $0x98] sm:$0xff] }
0x16d2   :  { %10958 = vrcp.f32 %v7868_v1  ;;  %v8191_v1 = vld [vmem:[#allocation9 + $0x88] sm:$0xff] }
0x16d3   :  { %10960 = vrcp.f32 %v7875_v25  ;;  %v8194_v25 = vld [vmem:[#allocation9 + $0xa0] sm:$0xff] }
0x16db   :  { %v10957_v40 = vpop.eup %10956 }
0x16dc   :  { %v10959_v47 = vpop.eup %10958  ;;  %v7879_v3 = vmul.f32 %v10957_v40, %v10955_v41  ;;  %v8190_v41 = vld [vmem:[#allocation9 + $0x80] sm:$0xff]  ;;  %v8192_v40 = vld [vmem:[#allocation9 + $0x90] sm:$0xff] }
0x16dd   :  { %v7878_v6 = vmul.f32 %v10959_v47, %v12083_v23  ;;  %v12182_v38 = vpop.f32.mrb[180].mxu0  ;;  %v12184_v29 = vpop.f32.mrb[212].mxu1  ;;  %v7292_v23 = vadd.f32 %v12139_v12, %v11435_v9  ;;  %v8178_v12 = vld [vmem:[#allocation9 + $0x20] sm:$0xff]  ;;  %v8195_v47 = vld [vmem:[#allocation9 + $0xa8] sm:$0xff] }
0x16de   :  { %v12186_v59 = vpop.f32.mrb[181].mxu0  ;;  %v12188_v24 = vpop.f32.mrb[213].mxu1 }
0x16df   :  { %v12190_v0 = vadd.f32 %v7879_v3, %v7878_v6  ;;  %v7986_v15 = vpop.f32.mrb[182].mxu0  ;;  %v8027_v34 = vpop.f32.mrb[214].mxu1  ;;  %v9957_v46 = vmul.f32 -1.442695, %v7292_v23  ;;  %v8197_v3 = vld [vmem:[#allocation9 + $0xb8] sm:$0xff]  ;;  %v8196_v6 = vld [vmem:[#allocation9 + $0xb0] sm:$0xff] }
0x16e0   :  { %v7987_v42 = vpop.f32.mrb[183].mxu0  ;;  %v8028_v44 = vpop.f32.mrb[215].mxu1  ;;  %v8199_v15 = vld [vmem:[#allocation9 + $0xc8] sm:$0xff]  ;;  %v8201_v34 = vld [vmem:[#allocation9 + $0xd8] sm:$0xff] }
0x16e1   :  { %10962 = vtanh.f32 %v12190_v0  ;;  %v10961_v32 = vpop.eup %10960  ;;  %v8198_v42 = vld [vmem:[#allocation9 + $0xc0] sm:$0xff]  ;;  %v8200_v44 = vld [vmem:[#allocation9 + $0xd0] sm:$0xff] }
0x16e2   :  { %10964 = vpow2.f32 %v9957_v46  ;;  %v8205_v46 = vld [vmem:[#allocation9 + $0xf8] sm:$0xff] }
0x16e3   :  { %10966 = vtanh.f32 %v12146_v21 }
0x16eb   :  { %v10963_v2 = vpop.eup %10962 }
0x16ec   :  { %v7882_v4 = vmul.f32 %v10963_v2, %v10961_v32  ;;  %v10965_v39 = vpop.eup %10964  ;;  %v8203_v32 = vld [vmem:[#allocation9 + $0xe8] sm:$0xff] }
0x16ed   :  { %v7309_v50 = vadd.f32 1.0, %v10965_v39  ;;  %v10967_v23 = vpop.eup %10966  ;;  %v8152_v39 = vld [vmem:[#allocation8 + $0x58] sm:$0xff] }
0x16ee   :  { %v12195_v13 = vpack.c.bf16 %v7882_v4, %v7882_v4  ;;  %v8202_v4 = vld [vmem:[#allocation9 + $0xe0] sm:$0xff] }
0x16ef   :  { %10968 = vrcp.f32 %v7309_v50  ;;  %v8154_v50 = vld [vmem:[#allocation8 + $0x68] sm:$0xff] }
0x16f0   :  { %8063 = vmatmul.mubr.bf16.vlgmr.msra.gmra.mrb[184].mxu0 %v12195_v13  ;;  %8104 = vmatmul.mubr.bf16.vlgmr.msra.gmra.mrb[216].mxu1 %v12195_v13 }
0x16f1   :  { %8207 = vmatpush1.bf16.msra.mxu0 %v8174_v28  ;;  %8248 = vmatpush1.bf16.msra.mxu1 %v8176_v26  ;;  %v8204_v28 = vld [vmem:[#allocation9 + $0xf0] sm:$0xff] }
0x16f2   :  { %8208 = vmatprep.subr.bf16.mxu0 %v8179_v49  ;;  %8249 = vmatprep.subr.bf16.mxu1 %v8181_v35  ;;  %v8142_v35 = vld [vmem:[#allocation8 + $0x8] sm:$0xff] }
0x16f3   :  { %8238 = vmatprep.mubr.bf16.mxu0 %v12400_v18  ;;  %8279 = vmatprep.mubr.bf16.mxu1 %v12400_v18 }
0x16f5   :  { %8209 = vmatpush1.bf16.msra.mxu0 %v8178_v12  ;;  %8250 = vmatpush1.bf16.msra.mxu1 %v8180_v7  ;;  %v8144_v12 = vld [vmem:[#allocation8 + $0x18] sm:$0xff]  ;;  %v8141_v7 = vld [vmem:[#allocation8] sm:$0xff] }
0x16f6   :  { %8210 = vmatprep.subr.bf16.mxu0 %v8183_v30  ;;  %8251 = vmatprep.subr.bf16.mxu1 %v8185_v11  ;;  %v8143_v30 = vld [vmem:[#allocation8 + $0x10] sm:$0xff]  ;;  %v8146_v11 = vld [vmem:[#allocation8 + $0x28] sm:$0xff] }
0x16f9   :  { %8211 = vmatpush1.bf16.msra.mxu0 %v8182_v27  ;;  %8252 = vmatpush1.bf16.msra.mxu1 %v8184_v19  ;;  %v10969_v2 = vpop.eup %10968  ;;  %v8148_v27 = vld [vmem:[#allocation8 + $0x38] sm:$0xff]  ;;  %v8145_v19 = vld [vmem:[#allocation8 + $0x20] sm:$0xff] }
0x16fa   :  { %8212 = vmatprep.subr.bf16.mxu0 %v8187_v36  ;;  %8253 = vmatprep.subr.bf16.mxu1 %v8189_v48  ;;  %v12202_v26 = vmul.f32 %v10969_v2, %v10967_v23  ;;  %v8147_v36 = vld [vmem:[#allocation8 + $0x30] sm:$0xff]  ;;  %v8150_v48 = vld [vmem:[#allocation8 + $0x48] sm:$0xff]  ;;  %v8168_v23 = vld [vmem:[#allocation8 + $0xd8] sm:$0xff] }
0x16fb   :  { %v8170_v2 = vld [vmem:[#allocation8 + $0xe8] sm:$0xff] }
0x16fc   :  { %v8173_v49 = vpack.c.bf16 %v12202_v26, %v12202_v26 }
0x16fd   :  { %8213 = vmatpush1.bf16.msra.mxu0 %v8186_v20  ;;  %8254 = vmatpush1.bf16.msra.mxu1 %v8188_v37  ;;  %v8149_v20 = vld [vmem:[#allocation8 + $0x40] sm:$0xff]  ;;  %v8151_v37 = vld [vmem:[#allocation8 + $0x50] sm:$0xff] }
0x16fe   :  { %8214 = vmatprep.subr.bf16.mxu0 %v8191_v1  ;;  %8255 = vmatprep.subr.bf16.mxu1 %v8193_v51  ;;  %v8156_v1 = vld [vmem:[#allocation8 + $0x78] sm:$0xff]  ;;  %v8153_v51 = vld [vmem:[#allocation8 + $0x60] sm:$0xff] }
0x1701   :  { %8215 = vmatpush1.bf16.msra.mxu0 %v8190_v41  ;;  %8256 = vmatpush1.bf16.msra.mxu1 %v8192_v40  ;;  %v8155_v41 = vld [vmem:[#allocation8 + $0x70] sm:$0xff]  ;;  %v8158_v40 = vld [vmem:[#allocation8 + $0x88] sm:$0xff] }
0x1702   :  { %8216 = vmatprep.subr.bf16.mxu0 %v8195_v47  ;;  %8257 = vmatprep.subr.bf16.mxu1 %v8197_v3  ;;  %v8160_v47 = vld [vmem:[#allocation8 + $0x98] sm:$0xff]  ;;  %v8157_v3 = vld [vmem:[#allocation8 + $0x80] sm:$0xff] }
0x1705   :  { %8217 = vmatpush1.bf16.msra.mxu0 %v8194_v25  ;;  %8258 = vmatpush1.bf16.msra.mxu1 %v8196_v6  ;;  %v8159_v25 = vld [vmem:[#allocation8 + $0x90] sm:$0xff]  ;;  %v8162_v6 = vld [vmem:[#allocation8 + $0xa8] sm:$0xff] }
0x1706   :  { %8218 = vmatprep.subr.bf16.mxu0 %v8199_v15  ;;  %8259 = vmatprep.subr.bf16.mxu1 %v8201_v34  ;;  %v8164_v15 = vld [vmem:[#allocation8 + $0xb8] sm:$0xff]  ;;  %v8161_v34 = vld [vmem:[#allocation8 + $0xa0] sm:$0xff] }
0x1709   :  { %8219 = vmatpush1.bf16.msra.mxu0 %v8198_v42  ;;  %8260 = vmatpush1.bf16.msra.mxu1 %v8200_v44  ;;  %v8163_v42 = vld [vmem:[#allocation8 + $0xb0] sm:$0xff]  ;;  %v8166_v44 = vld [vmem:[#allocation8 + $0xc8] sm:$0xff] }
0x170a   :  { %8220 = vmatprep.subr.bf16.mxu0 %v8203_v32  ;;  %8261 = vmatprep.subr.bf16.mxu1 %v8205_v46  ;;  %v8165_v32 = vld [vmem:[#allocation8 + $0xc0] sm:$0xff]  ;;  %v8167_v46 = vld [vmem:[#allocation8 + $0xd0] sm:$0xff] }
0x170d   :  { %8221 = vmatpush1.bf16.msra.mxu0 %v8202_v4  ;;  %8262 = vmatpush1.bf16.msra.mxu1 %v8204_v28  ;;  %v8172_v4 = vld [vmem:[#allocation8 + $0xf8] sm:$0xff]  ;;  %v8169_v28 = vld [vmem:[#allocation8 + $0xe0] sm:$0xff] }
0x170e   :  { %8288 = vmatprep.subr.bf16.mxu0 %v8142_v35  ;;  %8329 = vmatprep.subr.bf16.mxu1 %v8144_v12  ;;  %v10508_v35 = vld [vmem:[#allocation14 + $0x4] ss:$16 sps:$4 sm:$0xff]   ;;  %v10511_v12 = vld [vmem:[#allocation14 + $0xc] ss:$16 sps:$4 sm:$0xff]  }
0x1710   :  { %8239 = vmatmul.mubr.bf16.vlgmr.msra.gmra.mrb[188].mxu0 %v8173_v49  ;;  %8280 = vmatmul.mubr.bf16.vlgmr.msra.gmra.mrb[220].mxu1 %v8173_v49  ;;  %v8171_v49 = vld [vmem:[#allocation8 + $0xf0] sm:$0xff] }
0x1711   :  { %8320 = vmatprep.mubr.bf16.mxu0 %v12400_v18  ;;  %8361 = vmatprep.mubr.bf16.mxu1 %v12400_v18 }
0x1712   :  { %8289 = vmatpush1.bf16.msra.mxu0 %v8141_v7  ;;  %8330 = vmatpush1.bf16.msra.mxu1 %v8143_v30 }
0x1713   :  { %8290 = vmatprep.subr.bf16.mxu0 %v8146_v11  ;;  %8331 = vmatprep.subr.bf16.mxu1 %v8148_v27 }
0x1716   :  { %8291 = vmatpush1.bf16.msra.mxu0 %v8145_v19  ;;  %8332 = vmatpush1.bf16.msra.mxu1 %v8147_v36 }
0x1717   :  { %8292 = vmatprep.subr.bf16.mxu0 %v8150_v48  ;;  %8333 = vmatprep.subr.bf16.mxu1 %v8152_v39 }
0x171a   :  { %8293 = vmatpush1.bf16.msra.mxu0 %v8149_v20  ;;  %8334 = vmatpush1.bf16.msra.mxu1 %v8151_v37 }
0x171b   :  { %8294 = vmatprep.subr.bf16.mxu0 %v8154_v50  ;;  %8335 = vmatprep.subr.bf16.mxu1 %v8156_v1 }
0x171e   :  { %8295 = vmatpush1.bf16.msra.mxu0 %v8153_v51  ;;  %8336 = vmatpush1.bf16.msra.mxu1 %v8155_v41 }
0x171f   :  { %8296 = vmatprep.subr.bf16.mxu0 %v8158_v40  ;;  %8337 = vmatprep.subr.bf16.mxu1 %v8160_v47 }
0x1722   :  { %8297 = vmatpush1.bf16.msra.mxu0 %v8157_v3  ;;  %8338 = vmatpush1.bf16.msra.mxu1 %v8159_v25 }
0x1723   :  { %8298 = vmatprep.subr.bf16.mxu0 %v8162_v6  ;;  %8339 = vmatprep.subr.bf16.mxu1 %v8164_v15 }
0x1726   :  { %8299 = vmatpush1.bf16.msra.mxu0 %v8161_v34  ;;  %8340 = vmatpush1.bf16.msra.mxu1 %v8163_v42 }
0x1727   :  { %8300 = vmatprep.subr.bf16.mxu0 %v8166_v44  ;;  %8341 = vmatprep.subr.bf16.mxu1 %v8168_v23 }
0x172a   :  { %8301 = vmatpush1.bf16.msra.mxu0 %v8165_v32  ;;  %8342 = vmatpush1.bf16.msra.mxu1 %v8167_v46 }
0x172b   :  { %8302 = vmatprep.subr.bf16.mxu0 %v8170_v2  ;;  %8343 = vmatprep.subr.bf16.mxu1 %v8172_v4 }
0x172e   :  { %8303 = vmatpush1.bf16.msra.mxu0 %v8169_v28  ;;  %8344 = vmatpush1.bf16.msra.mxu1 %v8171_v49 }
0x172f   :  { %8597 = vmatprep.subr.bf16.mxu0 %v10508_v35  ;;  %8638 = vmatprep.subr.bf16.mxu1 %v10511_v12 }
0x17c3   :  { %v8064_v7 = vpop.f32.mrb[184].mxu0  ;;  %v8105_v30 = vpop.f32.mrb[216].mxu1 }
0x17c4   :  { %v8065_v11 = vadd.f32 %v8064_v7, %v12182_v38  ;;  %v8106_v27 = vadd.f32 %v8105_v30, %v12184_v29  ;;  %v8066_v19 = vpop.f32.mrb[185].mxu0  ;;  %v8107_v36 = vpop.f32.mrb[217].mxu1 }
0x17c5   :  { %v8067_v48 = vadd.f32 %v8066_v19, %v12186_v59  ;;  %v8108_v39 = vadd.f32 %v8107_v36, %v12188_v24  ;;  %v8068_v20 = vpop.f32.mrb[186].mxu0  ;;  %v8109_v37 = vpop.f32.mrb[218].mxu1  ;;  %v10506_v36 = vld [vmem:[#allocation14] ss:$16 sps:$4 sm:$0xff]  }
0x17c6   :  { %v8112_v50 = vadd.f32 %v8065_v11, %v11415_v53  ;;  %v8069_v1 = vpop.f32.mrb[187].mxu0  ;;  %v8110_v51 = vpop.f32.mrb[219].mxu1  ;;  %v8114_v3 = vadd.f32 %v8106_v27, %v11427_v61  ;;  %v10514_v20 = vld [vmem:[#allocation14 + $0x24] ss:$16 sps:$4 sm:$0xff]   ;;  %v10517_v37 = vld [vmem:[#allocation14 + $0x2c] ss:$16 sps:$4 sm:$0xff]  }
0x17c7   :  { %v8113_v41 = vadd.f32 %v8067_v48, %v11421_v56  ;;  %v8115_v38 = vadd.f32 %v8108_v39, %v11433_v8  ;;  %v10509_v48 = vld [vmem:[#allocation14 + $0x8] ss:$16 sps:$4 sm:$0xff]   ;;  %v10520_v51 = vld [vmem:[#allocation14 + $0x44] ss:$16 sps:$4 sm:$0xff]  }
0x17c8   :  { %v9996_v40 = vmul.f32 -1.442695, %v8112_v50  ;;  %v10512_v50 = vld [vmem:[#allocation14 + $0x20] ss:$16 sps:$4 sm:$0xff]   ;;  %v10515_v1 = vld [vmem:[#allocation14 + $0x28] ss:$16 sps:$4 sm:$0xff]  }
0x17c9   :  { %v9997_v47 = vmul.f32 -1.442695, %v8113_v41  ;;  %v9998_v29 = vmul.f32 -1.442695, %v8115_v38  ;;  %v10523_v41 = vld [vmem:[#allocation14 + $0x4c] ss:$16 sps:$4 sm:$0xff]  }
0x17ca   :  { %10970 = vpow2.f32 %v9996_v40  ;;  %v10518_v40 = vld [vmem:[#allocation14 + $0x40] ss:$16 sps:$4 sm:$0xff]   ;;  %v10526_v38 = vld [vmem:[#allocation14 + $0x64] ss:$16 sps:$4 sm:$0xff]  }
0x17cb   :  { %10972 = vpow2.f32 %v9997_v47  ;;  %v10521_v47 = vld [vmem:[#allocation14 + $0x48] ss:$16 sps:$4 sm:$0xff]  }
0x17cc   :  { %10974 = vpow2.f32 %v9998_v29  ;;  %v10529_v29 = vld [vmem:[#allocation14 + $0x6c] ss:$16 sps:$4 sm:$0xff]  }
0x17cd   :  { %10976 = vtanh.f32 %v8114_v3  ;;  %v10524_v3 = vld [vmem:[#allocation14 + $0x60] ss:$16 sps:$4 sm:$0xff]  }
0x17d4   :  { %v10971_v59 = vpop.eup %10970 }
0x17d5   :  { %v10973_v25 = vpop.eup %10972  ;;  %v8119_v24 = vadd.f32 1.0, %v10971_v59  ;;  %v10527_v59 = vld [vmem:[#allocation14 + $0x68] ss:$16 sps:$4 sm:$0xff]  }
0x17d6   :  { %v8125_v6 = vadd.f32 1.0, %v10973_v25  ;;  %v10975_v15 = vpop.eup %10974  ;;  %v10532_v25 = vld [vmem:[#allocation14 + $0x84] ss:$16 sps:$4 sm:$0xff]  }
0x17d7   :  { %10978 = vrcp.f32 %v8119_v24  ;;  %v10977_v34 = vpop.eup %10976  ;;  %v8132_v32 = vadd.f32 1.0, %v10975_v15  ;;  %v10535_v24 = vld [vmem:[#allocation14 + $0x8c] ss:$16 sps:$4 sm:$0xff]   ;;  %v10533_v15 = vld [vmem:[#allocation14 + $0x88] ss:$16 sps:$4 sm:$0xff]  }
0x17d8   :  { %10980 = vrcp.f32 %v8125_v6  ;;  %v10530_v6 = vld [vmem:[#allocation14 + $0x80] ss:$16 sps:$4 sm:$0xff]  }
0x17d9   :  { %10982 = vrcp.f32 %v8132_v32  ;;  %v10544_v32 = vld [vmem:[#allocation14 + $0xc4] ss:$16 sps:$4 sm:$0xff]  }
0x17e1   :  { %v10979_v42 = vpop.eup %10978 }
0x17e2   :  { %v10981_v44 = vpop.eup %10980  ;;  %v8136_v23 = vmul.f32 %v10979_v42, %v10977_v34  ;;  %v10538_v34 = vld [vmem:[#allocation14 + $0xa4] ss:$16 sps:$4 sm:$0xff]   ;;  %v10541_v42 = vld [vmem:[#allocation14 + $0xac] ss:$16 sps:$4 sm:$0xff]  }
0x17e3   :  { %v8135_v46 = vmul.f32 %v10981_v44, %v12118_v33  ;;  %v12217_v2 = vpop.f32.mrb[188].mxu0  ;;  %v12219_v4 = vpop.f32.mrb[220].mxu1  ;;  %v10536_v44 = vld [vmem:[#allocation14 + $0xa0] ss:$16 sps:$4 sm:$0xff]  }
0x17e4   :  { %v12221_v28 = vpop.f32.mrb[189].mxu0  ;;  %v12223_v49 = vpop.f32.mrb[221].mxu1 }
0x17e5   :  { %v12225_v35 = vadd.f32 %v8136_v23, %v8135_v46  ;;  %v8244_v12 = vpop.f32.mrb[190].mxu0  ;;  %v8285_v7 = vpop.f32.mrb[222].mxu1  ;;  %v10539_v23 = vld [vmem:[#allocation14 + $0xa8] ss:$16 sps:$4 sm:$0xff]   ;;  %v10547_v46 = vld [vmem:[#allocation14 + $0xcc] ss:$16 sps:$4 sm:$0xff]  }
0x17e6   :  { %v8245_v30 = vpop.f32.mrb[191].mxu0  ;;  %v8286_v11 = vpop.f32.mrb[223].mxu1  ;;  %v10542_v12 = vld [vmem:[#allocation14 + $0xc0] ss:$16 sps:$4 sm:$0xff]   ;;  %v10545_v7 = vld [vmem:[#allocation14 + $0xc8] ss:$16 sps:$4 sm:$0xff]  }
0x17e7   :  { %10984 = vtanh.f32 %v12225_v35  ;;  %v10983_v27 = vpop.eup %10982  ;;  %v10550_v30 = vld [vmem:[#allocation14 + $0xe4] ss:$16 sps:$4 sm:$0xff]   ;;  %v10553_v11 = vld [vmem:[#allocation14 + $0xec] ss:$16 sps:$4 sm:$0xff]  }
0x17f1   :  { %v10985_v19 = vpop.eup %10984 }
0x17f2   :  { %v8139_v33 = vmul.f32 %v10985_v19, %v10983_v27  ;;  %v10548_v27 = vld [vmem:[#allocation14 + $0xe0] ss:$16 sps:$4 sm:$0xff]   ;;  %v10551_v19 = vld [vmem:[#allocation14 + $0xe8] ss:$16 sps:$4 sm:$0xff]  }
0x17f4   :  { %v12228_v39 = vpack.c.bf16 %v8139_v33, %v8139_v33  ;;  %v8741_v33 = vld [vmem:[#allocation5 + $0x8] sm:$0xff] }
0x17f6   :  { %8321 = vmatmul.mubr.bf16.vlgmr.msra.gmra.mrb[192].mxu0 %v12228_v39  ;;  %8362 = vmatmul.mubr.bf16.vlgmr.msra.gmra.mrb[224].mxu1 %v12228_v39 }
0x17f7   :  { %8598 = vmatpush1.bf16.msra.mxu0 %v10506_v36  ;;  %8639 = vmatpush1.bf16.msra.mxu1 %v10509_v48  ;;  %v8743_v36 = vld [vmem:[#allocation5 + $0x18] sm:$0xff]  ;;  %v8740_v48 = vld [vmem:[#allocation5] sm:$0xff] }
0x17f8   :  { %8599 = vmatprep.subr.bf16.mxu0 %v10514_v20  ;;  %8640 = vmatprep.subr.bf16.mxu1 %v10517_v37  ;;  %v8742_v20 = vld [vmem:[#allocation5 + $0x10] sm:$0xff]  ;;  %v8745_v37 = vld [vmem:[#allocation5 + $0x28] sm:$0xff] }
0x17f9   :  { %8629 = vmatprep.mubr.bf16.mxu0 %v12400_v18  ;;  %8670 = vmatprep.mubr.bf16.mxu1 %v12400_v18 }
0x17fb   :  { %8600 = vmatpush1.bf16.msra.mxu0 %v10512_v50  ;;  %8641 = vmatpush1.bf16.msra.mxu1 %v10515_v1  ;;  %v8747_v50 = vld [vmem:[#allocation5 + $0x38] sm:$0xff]  ;;  %v8744_v1 = vld [vmem:[#allocation5 + $0x20] sm:$0xff] }
0x17fc   :  { %8601 = vmatprep.subr.bf16.mxu0 %v10520_v51  ;;  %8642 = vmatprep.subr.bf16.mxu1 %v10523_v41  ;;  %v8746_v51 = vld [vmem:[#allocation5 + $0x30] sm:$0xff]  ;;  %v8749_v41 = vld [vmem:[#allocation5 + $0x48] sm:$0xff] }
0x17ff   :  { %8602 = vmatpush1.bf16.msra.mxu0 %v10518_v40  ;;  %8643 = vmatpush1.bf16.msra.mxu1 %v10521_v47  ;;  %v8751_v40 = vld [vmem:[#allocation5 + $0x58] sm:$0xff]  ;;  %v8748_v47 = vld [vmem:[#allocation5 + $0x40] sm:$0xff] }
0x1800   :  { %8603 = vmatprep.subr.bf16.mxu0 %v10526_v38  ;;  %8644 = vmatprep.subr.bf16.mxu1 %v10529_v29  ;;  %v8750_v38 = vld [vmem:[#allocation5 + $0x50] sm:$0xff]  ;;  %v8753_v29 = vld [vmem:[#allocation5 + $0x68] sm:$0xff] }
0x1803   :  { %8604 = vmatpush1.bf16.msra.mxu0 %v10524_v3  ;;  %8645 = vmatpush1.bf16.msra.mxu1 %v10527_v59  ;;  %v8752_v3 = vld [vmem:[#allocation5 + $0x60] sm:$0xff]  ;;  %v8754_v59 = vld [vmem:[#allocation5 + $0x70] sm:$0xff] }
0x1804   :  { %8605 = vmatprep.subr.bf16.mxu0 %v10532_v25  ;;  %8646 = vmatprep.subr.bf16.mxu1 %v10535_v24  ;;  %v8757_v25 = vld [vmem:[#allocation5 + $0x88] sm:$0xff]  ;;  %v8759_v24 = vld [vmem:[#allocation5 + $0x98] sm:$0xff] }
0x1807   :  { %8606 = vmatpush1.bf16.msra.mxu0 %v10530_v6  ;;  %8647 = vmatpush1.bf16.msra.mxu1 %v10533_v15  ;;  %v8756_v6 = vld [vmem:[#allocation5 + $0x80] sm:$0xff]  ;;  %v8758_v15 = vld [vmem:[#allocation5 + $0x90] sm:$0xff] }
0x1808   :  { %8607 = vmatprep.subr.bf16.mxu0 %v10538_v34  ;;  %8648 = vmatprep.subr.bf16.mxu1 %v10541_v42  ;;  %v8761_v34 = vld [vmem:[#allocation5 + $0xa8] sm:$0xff]  ;;  %v8763_v42 = vld [vmem:[#allocation5 + $0xb8] sm:$0xff] }
0x180b   :  { %8608 = vmatpush1.bf16.msra.mxu0 %v10536_v44  ;;  %8649 = vmatpush1.bf16.msra.mxu1 %v10539_v23  ;;  %v8760_v44 = vld [vmem:[#allocation5 + $0xa0] sm:$0xff]  ;;  %v8762_v23 = vld [vmem:[#allocation5 + $0xb0] sm:$0xff] }
0x180c   :  { %8609 = vmatprep.subr.bf16.mxu0 %v10544_v32  ;;  %8650 = vmatprep.subr.bf16.mxu1 %v10547_v46  ;;  %v8765_v32 = vld [vmem:[#allocation5 + $0xc8] sm:$0xff]  ;;  %v8767_v46 = vld [vmem:[#allocation5 + $0xd8] sm:$0xff] }
0x180f   :  { %8610 = vmatpush1.bf16.msra.mxu0 %v10542_v12  ;;  %8651 = vmatpush1.bf16.msra.mxu1 %v10545_v7  ;;  %v8764_v12 = vld [vmem:[#allocation5 + $0xc0] sm:$0xff]  ;;  %v8766_v7 = vld [vmem:[#allocation5 + $0xd0] sm:$0xff] }
0x1810   :  { %8611 = vmatprep.subr.bf16.mxu0 %v10550_v30  ;;  %8652 = vmatprep.subr.bf16.mxu1 %v10553_v11  ;;  %v8769_v30 = vld [vmem:[#allocation5 + $0xe8] sm:$0xff]  ;;  %v8771_v11 = vld [vmem:[#allocation5 + $0xf8] sm:$0xff] }
0x1813   :  { %8612 = vmatpush1.bf16.msra.mxu0 %v10548_v27  ;;  %8653 = vmatpush1.bf16.msra.mxu1 %v10551_v19  ;;  %v8768_v27 = vld [vmem:[#allocation5 + $0xe0] sm:$0xff]  ;;  %v8770_v19 = vld [vmem:[#allocation5 + $0xf0] sm:$0xff] }
0x1814   :  { %8772 = vmatprep.subr.bf16.mxu0 %v8741_v33  ;;  %8813 = vmatprep.subr.bf16.mxu1 %v8743_v36  ;;  %v8709_v33 = vld [vmem:[#allocation4 + $0x8] sm:$0xff]  ;;  %v8711_v36 = vld [vmem:[#allocation4 + $0x18] sm:$0xff] }
0x1816   :  { %8630 = vmatmul.mubr.bf16.vlgmr.msra.gmra.mrb[196].mxu0 %v12163_v31  ;;  %8671 = vmatmul.mubr.bf16.vlgmr.msra.gmra.mrb[228].mxu1 %v12163_v31  ;;  %v8755_v31 = vld [vmem:[#allocation5 + $0x78] sm:$0xff] }
0x1817   :  { %8773 = vmatpush1.bf16.msra.mxu0 %v8740_v48  ;;  %8814 = vmatpush1.bf16.msra.mxu1 %v8742_v20  ;;  %v8708_v48 = vld [vmem:[#allocation4] sm:$0xff]  ;;  %v8710_v20 = vld [vmem:[#allocation4 + $0x10] sm:$0xff] }
0x1818   :  { %8774 = vmatprep.subr.bf16.mxu0 %v8745_v37  ;;  %8815 = vmatprep.subr.bf16.mxu1 %v8747_v50  ;;  %v8713_v37 = vld [vmem:[#allocation4 + $0x28] sm:$0xff]  ;;  %v8715_v50 = vld [vmem:[#allocation4 + $0x38] sm:$0xff] }
0x1819   :  { %8804 = vmatprep.mubr.bf16.mxu0 %v12400_v18  ;;  %8845 = vmatprep.mubr.bf16.mxu1 %v12400_v18 }
0x181b   :  { %8775 = vmatpush1.bf16.msra.mxu0 %v8744_v1  ;;  %8816 = vmatpush1.bf16.msra.mxu1 %v8746_v51  ;;  %v8712_v1 = vld [vmem:[#allocation4 + $0x20] sm:$0xff]  ;;  %v8714_v51 = vld [vmem:[#allocation4 + $0x30] sm:$0xff] }
0x181c   :  { %8776 = vmatprep.subr.bf16.mxu0 %v8749_v41  ;;  %8817 = vmatprep.subr.bf16.mxu1 %v8751_v40  ;;  %v8719_v41 = vld [vmem:[#allocation4 + $0x58] sm:$0xff]  ;;  %v8716_v40 = vld [vmem:[#allocation4 + $0x40] sm:$0xff] }
0x181f   :  { %8777 = vmatpush1.bf16.msra.mxu0 %v8748_v47  ;;  %8818 = vmatpush1.bf16.msra.mxu1 %v8750_v38  ;;  %v8718_v47 = vld [vmem:[#allocation4 + $0x50] sm:$0xff]  ;;  %v8721_v38 = vld [vmem:[#allocation4 + $0x68] sm:$0xff] }
0x1820   :  { %8778 = vmatprep.subr.bf16.mxu0 %v8753_v29  ;;  %8819 = vmatprep.subr.bf16.mxu1 %v8755_v31  ;;  %v8723_v29 = vld [vmem:[#allocation4 + $0x78] sm:$0xff]  ;;  %v8720_v31 = vld [vmem:[#allocation4 + $0x60] sm:$0xff] }
0x1823   :  { %8779 = vmatpush1.bf16.msra.mxu0 %v8752_v3  ;;  %8820 = vmatpush1.bf16.msra.mxu1 %v8754_v59  ;;  %v8722_v3 = vld [vmem:[#allocation4 + $0x70] sm:$0xff]  ;;  %v8725_v59 = vld [vmem:[#allocation4 + $0x88] sm:$0xff] }
0x1824   :  { %8780 = vmatprep.subr.bf16.mxu0 %v8757_v25  ;;  %8821 = vmatprep.subr.bf16.mxu1 %v8759_v24  ;;  %v8727_v25 = vld [vmem:[#allocation4 + $0x98] sm:$0xff]  ;;  %v8724_v24 = vld [vmem:[#allocation4 + $0x80] sm:$0xff] }
0x1827   :  { %8781 = vmatpush1.bf16.msra.mxu0 %v8756_v6  ;;  %8822 = vmatpush1.bf16.msra.mxu1 %v8758_v15  ;;  %v8726_v6 = vld [vmem:[#allocation4 + $0x90] sm:$0xff]  ;;  %v8729_v15 = vld [vmem:[#allocation4 + $0xa8] sm:$0xff] }
0x1828   :  { %8782 = vmatprep.subr.bf16.mxu0 %v8761_v34  ;;  %8823 = vmatprep.subr.bf16.mxu1 %v8763_v42  ;;  %v8731_v34 = vld [vmem:[#allocation4 + $0xb8] sm:$0xff]  ;;  %v8728_v42 = vld [vmem:[#allocation4 + $0xa0] sm:$0xff] }
0x182b   :  { %8783 = vmatpush1.bf16.msra.mxu0 %v8760_v44  ;;  %8824 = vmatpush1.bf16.msra.mxu1 %v8762_v23  ;;  %v8730_v44 = vld [vmem:[#allocation4 + $0xb0] sm:$0xff]  ;;  %v8733_v23 = vld [vmem:[#allocation4 + $0xc8] sm:$0xff] }
0x182c   :  { %8784 = vmatprep.subr.bf16.mxu0 %v8765_v32  ;;  %8825 = vmatprep.subr.bf16.mxu1 %v8767_v46  ;;  %v8735_v32 = vld [vmem:[#allocation4 + $0xd8] sm:$0xff]  ;;  %v8732_v46 = vld [vmem:[#allocation4 + $0xc0] sm:$0xff] }
0x182f   :  { %8785 = vmatpush1.bf16.msra.mxu0 %v8764_v12  ;;  %8826 = vmatpush1.bf16.msra.mxu1 %v8766_v7  ;;  %v8734_v12 = vld [vmem:[#allocation4 + $0xd0] sm:$0xff]  ;;  %v8737_v7 = vld [vmem:[#allocation4 + $0xe8] sm:$0xff] }
0x1830   :  { %8786 = vmatprep.subr.bf16.mxu0 %v8769_v30  ;;  %8827 = vmatprep.subr.bf16.mxu1 %v8771_v11  ;;  %v8739_v30 = vld [vmem:[#allocation4 + $0xf8] sm:$0xff]  ;;  %v8736_v11 = vld [vmem:[#allocation4 + $0xe0] sm:$0xff] }
0x1833   :  { %8787 = vmatpush1.bf16.msra.mxu0 %v8768_v27  ;;  %8828 = vmatpush1.bf16.msra.mxu1 %v8770_v19  ;;  %v8738_v27 = vld [vmem:[#allocation4 + $0xf0] sm:$0xff]  ;;  %v8998_v19 = vld [vmem:[#allocation7 + $0x8] sm:$0xff] }
0x1834   :  { %8854 = vmatprep.subr.bf16.mxu0 %v8709_v33  ;;  %8895 = vmatprep.subr.bf16.mxu1 %v8711_v36  ;;  %v9000_v33 = vld [vmem:[#allocation7 + $0x18] sm:$0xff] }
0x1836   :  { %8805 = vmatmul.mubr.bf16.vlgmr.msra.gmra.mrb[200].mxu0 %v12195_v13  ;;  %8846 = vmatmul.mubr.bf16.vlgmr.msra.gmra.mrb[232].mxu1 %v12195_v13  ;;  %v8717_v13 = vld [vmem:[#allocation4 + $0x48] sm:$0xff] }
0x1837   :  { %8886 = vmatprep.mubr.bf16.mxu0 %v12400_v18  ;;  %8927 = vmatprep.mubr.bf16.mxu1 %v12400_v18 }
0x1838   :  { %8855 = vmatpush1.bf16.msra.mxu0 %v8708_v48  ;;  %8896 = vmatpush1.bf16.msra.mxu1 %v8710_v20 }
0x1839   :  { %8856 = vmatprep.subr.bf16.mxu0 %v8713_v37  ;;  %8897 = vmatprep.subr.bf16.mxu1 %v8715_v50 }
0x183c   :  { %8857 = vmatpush1.bf16.msra.mxu0 %v8712_v1  ;;  %8898 = vmatpush1.bf16.msra.mxu1 %v8714_v51 }
0x183d   :  { %8858 = vmatprep.subr.bf16.mxu0 %v8717_v13  ;;  %8899 = vmatprep.subr.bf16.mxu1 %v8719_v41 }
0x1840   :  { %8859 = vmatpush1.bf16.msra.mxu0 %v8716_v40  ;;  %8900 = vmatpush1.bf16.msra.mxu1 %v8718_v47 }
0x1841   :  { %8860 = vmatprep.subr.bf16.mxu0 %v8721_v38  ;;  %8901 = vmatprep.subr.bf16.mxu1 %v8723_v29 }
0x1844   :  { %8861 = vmatpush1.bf16.msra.mxu0 %v8720_v31  ;;  %8902 = vmatpush1.bf16.msra.mxu1 %v8722_v3 }
0x1845   :  { %8862 = vmatprep.subr.bf16.mxu0 %v8725_v59  ;;  %8903 = vmatprep.subr.bf16.mxu1 %v8727_v25 }
0x1848   :  { %8863 = vmatpush1.bf16.msra.mxu0 %v8724_v24  ;;  %8904 = vmatpush1.bf16.msra.mxu1 %v8726_v6 }
0x1849   :  { %8864 = vmatprep.subr.bf16.mxu0 %v8729_v15  ;;  %8905 = vmatprep.subr.bf16.mxu1 %v8731_v34 }
0x184c   :  { %8865 = vmatpush1.bf16.msra.mxu0 %v8728_v42  ;;  %8906 = vmatpush1.bf16.msra.mxu1 %v8730_v44 }
0x184d   :  { %8866 = vmatprep.subr.bf16.mxu0 %v8733_v23  ;;  %8907 = vmatprep.subr.bf16.mxu1 %v8735_v32 }
0x1850   :  { %8867 = vmatpush1.bf16.msra.mxu0 %v8732_v46  ;;  %8908 = vmatpush1.bf16.msra.mxu1 %v8734_v12 }
0x1851   :  { %8868 = vmatprep.subr.bf16.mxu0 %v8737_v7  ;;  %8909 = vmatprep.subr.bf16.mxu1 %v8739_v30 }
0x1854   :  { %8869 = vmatpush1.bf16.msra.mxu0 %v8736_v11  ;;  %8910 = vmatpush1.bf16.msra.mxu1 %v8738_v27 }
0x1855   :  { %9029 = vmatprep.subr.bf16.mxu0 %v8998_v19  ;;  %9070 = vmatprep.subr.bf16.mxu1 %v9000_v33 }
0x18c9   :  { %v8322_v36 = vpop.f32.mrb[192].mxu0  ;;  %v8363_v48 = vpop.f32.mrb[224].mxu1 }
0x18ca   :  { %v8323_v20 = vadd.f32 %v8322_v36, %v12217_v2  ;;  %v8364_v37 = vadd.f32 %v8363_v48, %v12219_v4  ;;  %v8324_v50 = vpop.f32.mrb[193].mxu0  ;;  %v8365_v1 = vpop.f32.mrb[225].mxu1 }
0x18cb   :  { %v8325_v51 = vadd.f32 %v8324_v50, %v12221_v28  ;;  %v12246_v13 = vadd.f32 %v8365_v1, %v12223_v49  ;;  %v8326_v41 = vpop.f32.mrb[194].mxu0  ;;  %v8367_v40 = vpop.f32.mrb[226].mxu1 }
0x18cc   :  { %v8370_v47 = vadd.f32 %v8323_v20, %v11417_v54  ;;  %v8327_v38 = vpop.f32.mrb[195].mxu0  ;;  %v8368_v29 = vpop.f32.mrb[227].mxu1  ;;  %v8372_v2 = vadd.f32 %v8364_v37, %v11429_v62  ;;  %v12401_v37 = vld [vmem:[#allocation46_spill] sm:$0xff] }
0x18cd   :  { %v8371_v31 = vadd.f32 %v8325_v51, %v11423_v57 }
0x18ce   :  { %v9999_v3 = vmul.f32 -1.442695, %v8370_v47 }
0x18cf   :  { %v10000_v59 = vmul.f32 -1.442695, %v8371_v31 }
0x18d0   :  { %10986 = vpow2.f32 %v9999_v3 }
0x18d1   :  { %10988 = vpow2.f32 %v10000_v59 }
0x18d2   :  { %10990 = vtanh.f32 %v8372_v2 }
0x18da   :  { %v10987_v4 = vpop.eup %10986 }
0x18db   :  { %v10989_v25 = vpop.eup %10988  ;;  %v8377_v28 = vadd.f32 1.0, %v10987_v4 }
0x18dc   :  { %v8383_v49 = vadd.f32 1.0, %v10989_v25  ;;  %v10991_v24 = vpop.eup %10990 }
0x18dd   :  { %10992 = vrcp.f32 %v8377_v28 }
0x18de   :  { %10994 = vrcp.f32 %v8383_v49 }
0x18e7   :  { %v10993_v6 = vpop.eup %10992 }
0x18e8   :  { %v10995_v15 = vpop.eup %10994  ;;  %v8394_v34 = vmul.f32 %v10993_v6, %v10991_v24 }
0x18e9   :  { %v8393_v42 = vmul.f32 %v10995_v15, %v12146_v21  ;;  %v8631_v44 = vpop.f32.mrb[196].mxu0  ;;  %v8672_v23 = vpop.f32.mrb[228].mxu1 }
0x18ea   :  { %v8679_v32 = vadd.f32 %v8631_v44, %v11468_v43  ;;  %v8633_v46 = vpop.f32.mrb[197].mxu0  ;;  %v8674_v12 = vpop.f32.mrb[229].mxu1  ;;  %v8681_v50 = vadd.f32 %v8672_v23, %v12401_v37  ;;  %v8999_v23 = vld [vmem:[#allocation7 + $0x10] sm:$0xff]  ;;  %v9014_v37 = vld [vmem:[#allocation7 + $0x88] sm:$0xff] }
0x18eb   :  { %v12253_v7 = vadd.f32 %v8394_v34, %v8393_v42  ;;  %v8680_v30 = vadd.f32 %v8633_v46, %v11470_v45  ;;  %v8635_v11 = vpop.f32.mrb[198].mxu0  ;;  %v8676_v27 = vpop.f32.mrb[230].mxu1  ;;  %v8682_v21 = vadd.f32 %v8674_v12, %v11502_v58  ;;  %v9004_v46 = vld [vmem:[#allocation7 + $0x38] sm:$0xff]  ;;  %v9001_v12 = vld [vmem:[#allocation7 + $0x20] sm:$0xff] }
0x18ec   :  { %v10034_v19 = vmul.f32 -1.442695, %v8679_v32  ;;  %v8636_v33 = vpop.f32.mrb[199].mxu0  ;;  %v8677_v36 = vpop.f32.mrb[231].mxu1  ;;  %v9002_v32 = vld [vmem:[#allocation7 + $0x28] sm:$0xff]  ;;  %v9008_v27 = vld [vmem:[#allocation7 + $0x58] sm:$0xff] }
0x18ed   :  { %v10035_v48 = vmul.f32 -1.442695, %v8680_v30  ;;  %v10036_v20 = vmul.f32 -1.442695, %v8682_v21  ;;  %v9003_v30 = vld [vmem:[#allocation7 + $0x30] sm:$0xff]  ;;  %v9006_v11 = vld [vmem:[#allocation7 + $0x48] sm:$0xff] }
0x18ee   :  { %10996 = vpow2.f32 %v10034_v19  ;;  %v9005_v19 = vld [vmem:[#allocation7 + $0x40] sm:$0xff]  ;;  %v9007_v33 = vld [vmem:[#allocation7 + $0x50] sm:$0xff]  ;;  %v9010_v36 = vld [vmem:[#allocation7 + $0x68] sm:$0xff] }
0x18ef   :  { %10998 = vpow2.f32 %v10035_v48  ;;  %v9012_v48 = vld [vmem:[#allocation7 + $0x78] sm:$0xff]  ;;  %v9009_v21 = vld [vmem:[#allocation7 + $0x60] sm:$0xff] }
0x18f0   :  { %11000 = vpow2.f32 %v10036_v20  ;;  %v9011_v20 = vld [vmem:[#allocation7 + $0x70] sm:$0xff] }
0x18f1   :  { %11002 = vtanh.f32 %v8681_v50  ;;  %v9016_v50 = vld [vmem:[#allocation7 + $0x98] sm:$0xff] }
0x18f8   :  { %v10997_v43 = vpop.eup %10996 }
0x18f9   :  { %v10999_v1 = vpop.eup %10998  ;;  %v8686_v51 = vadd.f32 1.0, %v10997_v43  ;;  %v9013_v43 = vld [vmem:[#allocation7 + $0x80] sm:$0xff] }
0x18fa   :  { %v8692_v41 = vadd.f32 1.0, %v10999_v1  ;;  %v11001_v45 = vpop.eup %11000  ;;  %v9015_v1 = vld [vmem:[#allocation7 + $0x90] sm:$0xff] }
0x18fb   :  { %11004 = vrcp.f32 %v8686_v51  ;;  %v11003_v40 = vpop.eup %11002  ;;  %v8699_v31 = vadd.f32 1.0, %v11001_v45  ;;  %v9018_v51 = vld [vmem:[#allocation7 + $0xa8] sm:$0xff]  ;;  %v9017_v45 = vld [vmem:[#allocation7 + $0xa0] sm:$0xff] }
0x18fc   :  { %11006 = vrcp.f32 %v8692_v41  ;;  %v9020_v41 = vld [vmem:[#allocation7 + $0xb8] sm:$0xff] }
0x18fd   :  { %11008 = vrcp.f32 %v8699_v31  ;;  %v9023_v31 = vld [vmem:[#allocation7 + $0xd0] sm:$0xff] }
0x1905   :  { %v11005_v47 = vpop.eup %11004 }
0x1906   :  { %v11007_v38 = vpop.eup %11006  ;;  %v8703_v29 = vmul.f32 %v11005_v47, %v11003_v40  ;;  %v9019_v40 = vld [vmem:[#allocation7 + $0xb0] sm:$0xff]  ;;  %v9022_v47 = vld [vmem:[#allocation7 + $0xc8] sm:$0xff] }
0x1907   :  { %v8702_v3 = vmul.f32 %v11007_v38, %v12152_v14  ;;  %v11009_v15 = vpop.eup %11008  ;;  %v8997_v14 = vld [vmem:[#allocation7] sm:$0xff]  ;;  %v9024_v38 = vld [vmem:[#allocation7 + $0xd8] sm:$0xff] }
0x1909   :  { %v8704_v58 = vadd.f32 %v8703_v29, %v8702_v3  ;;  %v12259_v59 = vpop.f32.mrb[200].mxu0  ;;  %v12261_v2 = vpop.f32.mrb[232].mxu1  ;;  %v9021_v29 = vld [vmem:[#allocation7 + $0xc0] sm:$0xff]  ;;  %v9026_v3 = vld [vmem:[#allocation7 + $0xe8] sm:$0xff] }
0x190a   :  { %v12263_v4 = vpop.f32.mrb[201].mxu0  ;;  %v12265_v25 = vpop.f32.mrb[233].mxu1 }
0x190b   :  { %11010 = vtanh.f32 %v8704_v58  ;;  %v8810_v28 = vpop.f32.mrb[202].mxu0  ;;  %v8851_v49 = vpop.f32.mrb[234].mxu1  ;;  %v9028_v58 = vld [vmem:[#allocation7 + $0xf8] sm:$0xff] }
0x190c   :  { %v8811_v24 = vpop.f32.mrb[203].mxu0  ;;  %v8852_v6 = vpop.f32.mrb[235].mxu1  ;;  %v9025_v28 = vld [vmem:[#allocation7 + $0xe0] sm:$0xff]  ;;  %v9027_v49 = vld [vmem:[#allocation7 + $0xf0] sm:$0xff] }
0x190d   :  { %v8966_v24 = vld [vmem:[#allocation6 + $0x8] sm:$0xff]  ;;  %v8968_v6 = vld [vmem:[#allocation6 + $0x18] sm:$0xff] }
0x1915   :  { %v11011_v34 = vpop.eup %11010 }
0x1916   :  { %v8706_v42 = vmul.f32 %v11011_v34, %v11009_v15  ;;  %v8965_v15 = vld [vmem:[#allocation6] sm:$0xff]  ;;  %v8967_v34 = vld [vmem:[#allocation6 + $0x10] sm:$0xff] }
0x1918   :  { %v8707_v44 = vpack.c.bf16 %v8706_v42, %v8706_v42  ;;  %v8970_v42 = vld [vmem:[#allocation6 + $0x28] sm:$0xff] }
0x191a   :  { %8887 = vmatmul.mubr.bf16.vlgmr.msra.gmra.mrb[204].mxu0 %v8707_v44  ;;  %8928 = vmatmul.mubr.bf16.vlgmr.msra.gmra.mrb[236].mxu1 %v8707_v44  ;;  %v8972_v44 = vld [vmem:[#allocation6 + $0x38] sm:$0xff] }
0x191b   :  { %9030 = vmatpush1.bf16.msra.mxu0 %v8997_v14  ;;  %9071 = vmatpush1.bf16.msra.mxu1 %v8999_v23  ;;  %v8969_v14 = vld [vmem:[#allocation6 + $0x20] sm:$0xff]  ;;  %v8971_v23 = vld [vmem:[#allocation6 + $0x30] sm:$0xff] }
0x191c   :  { %9031 = vmatprep.subr.bf16.mxu0 %v9002_v32  ;;  %9072 = vmatprep.subr.bf16.mxu1 %v9004_v46  ;;  %v8976_v32 = vld [vmem:[#allocation6 + $0x58] sm:$0xff]  ;;  %v8973_v46 = vld [vmem:[#allocation6 + $0x40] sm:$0xff] }
0x191d   :  { %9061 = vmatprep.mubr.bf16.mxu0 %v12400_v18  ;;  %9102 = vmatprep.mubr.bf16.mxu1 %v12400_v18 }
0x191f   :  { %9032 = vmatpush1.bf16.msra.mxu0 %v9001_v12  ;;  %9073 = vmatpush1.bf16.msra.mxu1 %v9003_v30  ;;  %v8975_v12 = vld [vmem:[#allocation6 + $0x50] sm:$0xff]  ;;  %v8978_v30 = vld [vmem:[#allocation6 + $0x68] sm:$0xff] }
0x1920   :  { %9033 = vmatprep.subr.bf16.mxu0 %v9006_v11  ;;  %9074 = vmatprep.subr.bf16.mxu1 %v9008_v27  ;;  %v8980_v11 = vld [vmem:[#allocation6 + $0x78] sm:$0xff]  ;;  %v8977_v27 = vld [vmem:[#allocation6 + $0x60] sm:$0xff] }
0x1923   :  { %9034 = vmatpush1.bf16.msra.mxu0 %v9005_v19  ;;  %9075 = vmatpush1.bf16.msra.mxu1 %v9007_v33  ;;  %v8979_v19 = vld [vmem:[#allocation6 + $0x70] sm:$0xff]  ;;  %v8982_v33 = vld [vmem:[#allocation6 + $0x88] sm:$0xff] }
0x1924   :  { %9035 = vmatprep.subr.bf16.mxu0 %v9010_v36  ;;  %9076 = vmatprep.subr.bf16.mxu1 %v9012_v48  ;;  %v8984_v36 = vld [vmem:[#allocation6 + $0x98] sm:$0xff]  ;;  %v8981_v48 = vld [vmem:[#allocation6 + $0x80] sm:$0xff] }
0x1927   :  { %9036 = vmatpush1.bf16.msra.mxu0 %v9009_v21  ;;  %9077 = vmatpush1.bf16.msra.mxu1 %v9011_v20  ;;  %v8983_v21 = vld [vmem:[#allocation6 + $0x90] sm:$0xff]  ;;  %v8986_v20 = vld [vmem:[#allocation6 + $0xa8] sm:$0xff] }
0x1928   :  { %9037 = vmatprep.subr.bf16.mxu0 %v9014_v37  ;;  %9078 = vmatprep.subr.bf16.mxu1 %v9016_v50  ;;  %v8988_v37 = vld [vmem:[#allocation6 + $0xb8] sm:$0xff]  ;;  %v8985_v50 = vld [vmem:[#allocation6 + $0xa0] sm:$0xff] }
0x192b   :  { %9038 = vmatpush1.bf16.msra.mxu0 %v9013_v43  ;;  %9079 = vmatpush1.bf16.msra.mxu1 %v9015_v1  ;;  %v8987_v43 = vld [vmem:[#allocation6 + $0xb0] sm:$0xff]  ;;  %v8990_v1 = vld [vmem:[#allocation6 + $0xc8] sm:$0xff] }
0x192c   :  { %9039 = vmatprep.subr.bf16.mxu0 %v9018_v51  ;;  %9080 = vmatprep.subr.bf16.mxu1 %v9020_v41  ;;  %v8992_v51 = vld [vmem:[#allocation6 + $0xd8] sm:$0xff]  ;;  %v8989_v41 = vld [vmem:[#allocation6 + $0xc0] sm:$0xff] }
0x192f   :  { %9040 = vmatpush1.bf16.msra.mxu0 %v9017_v45  ;;  %9081 = vmatpush1.bf16.msra.mxu1 %v9019_v40  ;;  %v8991_v45 = vld [vmem:[#allocation6 + $0xd0] sm:$0xff]  ;;  %v8994_v40 = vld [vmem:[#allocation6 + $0xe8] sm:$0xff] }
0x1930   :  { %9041 = vmatprep.subr.bf16.mxu0 %v9022_v47  ;;  %9082 = vmatprep.subr.bf16.mxu1 %v9024_v38  ;;  %v8996_v47 = vld [vmem:[#allocation6 + $0xf8] sm:$0xff]  ;;  %v8993_v38 = vld [vmem:[#allocation6 + $0xe0] sm:$0xff] }
0x1933   :  { %9042 = vmatpush1.bf16.msra.mxu0 %v9021_v29  ;;  %9083 = vmatpush1.bf16.msra.mxu1 %v9023_v31  ;;  %v8995_v29 = vld [vmem:[#allocation6 + $0xf0] sm:$0xff]  ;;  %v9256_v31 = vld [vmem:[#allocation9 + $0x8] sm:$0xff] }
0x1934   :  { %9043 = vmatprep.subr.bf16.mxu0 %v9026_v3  ;;  %9084 = vmatprep.subr.bf16.mxu1 %v9028_v58  ;;  %v9258_v3 = vld [vmem:[#allocation9 + $0x18] sm:$0xff] }
0x1937   :  { %9044 = vmatpush1.bf16.msra.mxu0 %v9025_v28  ;;  %9085 = vmatpush1.bf16.msra.mxu1 %v9027_v49 }
0x1938   :  { %9111 = vmatprep.subr.bf16.mxu0 %v8966_v24  ;;  %9152 = vmatprep.subr.bf16.mxu1 %v8968_v6 }
0x193a   :  { %9062 = vmatmul.mubr.bf16.vlgmr.msra.gmra.mrb[208].mxu0 %v12228_v39  ;;  %9103 = vmatmul.mubr.bf16.vlgmr.msra.gmra.mrb[240].mxu1 %v12228_v39  ;;  %v8974_v39 = vld [vmem:[#allocation6 + $0x48] sm:$0xff] }
0x193b   :  { %9143 = vmatprep.mubr.bf16.mxu0 %v12400_v18  ;;  %9184 = vmatprep.mubr.bf16.mxu1 %v12400_v18 }
0x193c   :  { %9112 = vmatpush1.bf16.msra.mxu0 %v8965_v15  ;;  %9153 = vmatpush1.bf16.msra.mxu1 %v8967_v34 }
0x193d   :  { %9113 = vmatprep.subr.bf16.mxu0 %v8970_v42  ;;  %9154 = vmatprep.subr.bf16.mxu1 %v8972_v44 }
0x1940   :  { %9114 = vmatpush1.bf16.msra.mxu0 %v8969_v14  ;;  %9155 = vmatpush1.bf16.msra.mxu1 %v8971_v23 }
0x1941   :  { %9115 = vmatprep.subr.bf16.mxu0 %v8974_v39  ;;  %9156 = vmatprep.subr.bf16.mxu1 %v8976_v32 }
0x1944   :  { %9116 = vmatpush1.bf16.msra.mxu0 %v8973_v46  ;;  %9157 = vmatpush1.bf16.msra.mxu1 %v8975_v12 }
0x1945   :  { %9117 = vmatprep.subr.bf16.mxu0 %v8978_v30  ;;  %9158 = vmatprep.subr.bf16.mxu1 %v8980_v11 }
0x1948   :  { %9118 = vmatpush1.bf16.msra.mxu0 %v8977_v27  ;;  %9159 = vmatpush1.bf16.msra.mxu1 %v8979_v19 }
0x1949   :  { %9119 = vmatprep.subr.bf16.mxu0 %v8982_v33  ;;  %9160 = vmatprep.subr.bf16.mxu1 %v8984_v36 }
0x194c   :  { %9120 = vmatpush1.bf16.msra.mxu0 %v8981_v48  ;;  %9161 = vmatpush1.bf16.msra.mxu1 %v8983_v21 }
0x194d   :  { %9121 = vmatprep.subr.bf16.mxu0 %v8986_v20  ;;  %9162 = vmatprep.subr.bf16.mxu1 %v8988_v37 }
0x1950   :  { %9122 = vmatpush1.bf16.msra.mxu0 %v8985_v50  ;;  %9163 = vmatpush1.bf16.msra.mxu1 %v8987_v43 }
0x1951   :  { %9123 = vmatprep.subr.bf16.mxu0 %v8990_v1  ;;  %9164 = vmatprep.subr.bf16.mxu1 %v8992_v51 }
0x1954   :  { %9124 = vmatpush1.bf16.msra.mxu0 %v8989_v41  ;;  %9165 = vmatpush1.bf16.msra.mxu1 %v8991_v45 }
0x1955   :  { %9125 = vmatprep.subr.bf16.mxu0 %v8994_v40  ;;  %9166 = vmatprep.subr.bf16.mxu1 %v8996_v47  ;;  %v8373_v40 = vadd.f32 %v12246_v13, %v11435_v9  ;;  %v9266_v13 = vld [vmem:[#allocation9 + $0x58] sm:$0xff] }
0x1958   :  { %9126 = vmatpush1.bf16.msra.mxu0 %v8993_v38  ;;  %9167 = vmatpush1.bf16.msra.mxu1 %v8995_v29 }
0x1959   :  { %9287 = vmatprep.subr.bf16.mxu0 %v9256_v31  ;;  %9328 = vmatprep.subr.bf16.mxu1 %v9258_v3  ;;  %v9255_v3 = vld [vmem:[#allocation9] sm:$0xff] }
0x19ed   :  { %v8888_v58 = vpop.f32.mrb[204].mxu0  ;;  %v8929_v28 = vpop.f32.mrb[236].mxu1 }
0x19ee   :  { %v8889_v49 = vadd.f32 %v8888_v58, %v12259_v59  ;;  %v8930_v24 = vadd.f32 %v8929_v28, %v12261_v2  ;;  %v8890_v6 = vpop.f32.mrb[205].mxu0  ;;  %v8931_v15 = vpop.f32.mrb[237].mxu1  ;;  %v9257_v58 = vld [vmem:[#allocation9 + $0x10] sm:$0xff]  ;;  %v9260_v28 = vld [vmem:[#allocation9 + $0x28] sm:$0xff] }
0x19ef   :  { %v8891_v34 = vadd.f32 %v8890_v6, %v12263_v4  ;;  %v8932_v42 = vadd.f32 %v8931_v15, %v12265_v25  ;;  %v8892_v44 = vpop.f32.mrb[206].mxu0  ;;  %v8933_v14 = vpop.f32.mrb[238].mxu1  ;;  %v9261_v6 = vld [vmem:[#allocation9 + $0x30] sm:$0xff]  ;;  %v9264_v15 = vld [vmem:[#allocation9 + $0x48] sm:$0xff] }
0x19f0   :  { %v8936_v23 = vadd.f32 %v8889_v49, %v11413_v52  ;;  %v8893_v39 = vpop.f32.mrb[207].mxu0  ;;  %v8934_v32 = vpop.f32.mrb[239].mxu1  ;;  %v8938_v11 = vadd.f32 %v8930_v24, %v11425_v60  ;;  %v9262_v49 = vld [vmem:[#allocation9 + $0x38] sm:$0xff]  ;;  %v9259_v24 = vld [vmem:[#allocation9 + $0x20] sm:$0xff]  ;;  %v9268_v44 = vld [vmem:[#allocation9 + $0x68] sm:$0xff] }
0x19f1   :  { %v8937_v46 = vadd.f32 %v8891_v34, %v11419_v55  ;;  %v8939_v59 = vadd.f32 %v8932_v42, %v11431_v63  ;;  %v9263_v34 = vld [vmem:[#allocation9 + $0x40] sm:$0xff]  ;;  %v9265_v42 = vld [vmem:[#allocation9 + $0x50] sm:$0xff]  ;;  %v9270_v14 = vld [vmem:[#allocation9 + $0x78] sm:$0xff] }
0x19f2   :  { %v10037_v12 = vmul.f32 -1.442695, %v8936_v23  ;;  %v9267_v39 = vld [vmem:[#allocation9 + $0x60] sm:$0xff]  ;;  %v9269_v32 = vld [vmem:[#allocation9 + $0x70] sm:$0xff] }
0x19f3   :  { %v10038_v30 = vmul.f32 -1.442695, %v8937_v46  ;;  %v10039_v2 = vmul.f32 -1.442695, %v8939_v59  ;;  %v9271_v59 = vld [vmem:[#allocation9 + $0x80] sm:$0xff] }
0x19f4   :  { %11012 = vpow2.f32 %v10037_v12  ;;  %v9272_v12 = vld [vmem:[#allocation9 + $0x88] sm:$0xff] }
0x19f5   :  { %11014 = vpow2.f32 %v10038_v30  ;;  %v9274_v30 = vld [vmem:[#allocation9 + $0x98] sm:$0xff] }
0x19f6   :  { %11016 = vpow2.f32 %v10039_v2  ;;  %v9273_v2 = vld [vmem:[#allocation9 + $0x90] sm:$0xff] }
0x19f7   :  { %11018 = vtanh.f32 %v8938_v11  ;;  %v9276_v11 = vld [vmem:[#allocation9 + $0xa8] sm:$0xff] }
0x19fe   :  { %v11013_v4 = vpop.eup %11012 }
0x19ff   :  { %v11015_v27 = vpop.eup %11014  ;;  %v8943_v25 = vadd.f32 1.0, %v11013_v4  ;;  %v9278_v4 = vld [vmem:[#allocation9 + $0xb8] sm:$0xff] }
0x1a00   :  { %v8949_v19 = vadd.f32 1.0, %v11015_v27  ;;  %v11017_v52 = vpop.eup %11016  ;;  %v9275_v27 = vld [vmem:[#allocation9 + $0xa0] sm:$0xff] }
0x1a01   :  { %11020 = vrcp.f32 %v8943_v25  ;;  %v11019_v33 = vpop.eup %11018  ;;  %v8956_v21 = vadd.f32 1.0, %v11017_v52  ;;  %v9277_v25 = vld [vmem:[#allocation9 + $0xb0] sm:$0xff]  ;;  %v9282_v52 = vld [vmem:[#allocation9 + $0xd8] sm:$0xff] }
0x1a02   :  { %11022 = vrcp.f32 %v8949_v19  ;;  %v9280_v19 = vld [vmem:[#allocation9 + $0xc8] sm:$0xff] }
0x1a03   :  { %11024 = vrcp.f32 %v8956_v21  ;;  %v9286_v21 = vld [vmem:[#allocation9 + $0xf8] sm:$0xff] }
0x1a0b   :  { %v11021_v55 = vpop.eup %11020 }
0x1a0c   :  { %v11023_v36 = vpop.eup %11022  ;;  %v8960_v48 = vmul.f32 %v11021_v55, %v11019_v33  ;;  %v9279_v33 = vld [vmem:[#allocation9 + $0xc0] sm:$0xff]  ;;  %v9281_v55 = vld [vmem:[#allocation9 + $0xd0] sm:$0xff] }
0x1a0d   :  { %v8959_v20 = vmul.f32 %v11023_v36, %v12190_v0  ;;  %v12282_v63 = vpop.f32.mrb[208].mxu0  ;;  %v12284_v37 = vpop.f32.mrb[240].mxu1  ;;  %v10001_v0 = vmul.f32 -1.442695, %v8373_v40  ;;  %v9225_v40 = vld [vmem:[#allocation8 + $0x18] sm:$0xff] }
0x1a0e   :  { %v12286_v60 = vpop.f32.mrb[209].mxu0  ;;  %v12288_v50 = vpop.f32.mrb[241].mxu1 }
0x1a0f   :  { %v8961_v43 = vadd.f32 %v8960_v48, %v8959_v20  ;;  %v9067_v1 = vpop.f32.mrb[210].mxu0  ;;  %v9108_v51 = vpop.f32.mrb[242].mxu1  ;;  %v9284_v48 = vld [vmem:[#allocation9 + $0xe8] sm:$0xff] }
0x1a10   :  { %v9068_v41 = vpop.f32.mrb[211].mxu0  ;;  %v9109_v45 = vpop.f32.mrb[243].mxu1  ;;  %v9285_v1 = vld [vmem:[#allocation9 + $0xf0] sm:$0xff] }
0x1a11   :  { %11026 = vtanh.f32 %v8961_v43  ;;  %v11025_v47 = vpop.eup %11024  ;;  %v9283_v43 = vld [vmem:[#allocation9 + $0xe0] sm:$0xff]  ;;  %v9223_v45 = vld [vmem:[#allocation8 + $0x8] sm:$0xff] }
0x1a12   :  { %11028 = vpow2.f32 %v10001_v0  ;;  %v9224_v0 = vld [vmem:[#allocation8 + $0x10] sm:$0xff] }
0x1a13   :  { %11030 = vtanh.f32 %v12253_v7 }
0x1a1b   :  { %v11027_v38 = vpop.eup %11026 }
0x1a1c   :  { %v8963_v29 = vmul.f32 %v11027_v38, %v11025_v47  ;;  %v11029_v23 = vpop.eup %11028  ;;  %v9222_v47 = vld [vmem:[#allocation8] sm:$0xff]  ;;  %v9227_v38 = vld [vmem:[#allocation8 + $0x28] sm:$0xff] }
0x1a1d   :  { %v8390_v46 = vadd.f32 1.0, %v11029_v23  ;;  %v11031_v36 = vpop.eup %11030  ;;  %v9243_v23 = vld [vmem:[#allocation8 + $0xa8] sm:$0xff] }
0x1a1e   :  { %v8964_v31 = vpack.c.bf16 %v8963_v29, %v8963_v29  ;;  %v9229_v29 = vld [vmem:[#allocation8 + $0x38] sm:$0xff] }
0x1a1f   :  { %11032 = vrcp.f32 %v8390_v46  ;;  %v9244_v46 = vld [vmem:[#allocation8 + $0xb0] sm:$0xff] }
0x1a20   :  { %9144 = vmatmul.mubr.bf16.vlgmr.msra.gmra.mrb[212].mxu0 %v8964_v31  ;;  %9185 = vmatmul.mubr.bf16.vlgmr.msra.gmra.mrb[244].mxu1 %v8964_v31  ;;  %v9226_v31 = vld [vmem:[#allocation8 + $0x20] sm:$0xff] }
0x1a21   :  { %9288 = vmatpush1.bf16.msra.mxu0 %v9255_v3  ;;  %9329 = vmatpush1.bf16.msra.mxu1 %v9257_v58  ;;  %v9228_v3 = vld [vmem:[#allocation8 + $0x30] sm:$0xff]  ;;  %v9231_v58 = vld [vmem:[#allocation8 + $0x48] sm:$0xff] }
0x1a22   :  { %9289 = vmatprep.subr.bf16.mxu0 %v9260_v28  ;;  %9330 = vmatprep.subr.bf16.mxu1 %v9262_v49  ;;  %v9233_v28 = vld [vmem:[#allocation8 + $0x58] sm:$0xff]  ;;  %v9232_v49 = vld [vmem:[#allocation8 + $0x50] sm:$0xff] }
0x1a23   :  { %9319 = vmatprep.mubr.bf16.mxu0 %v12400_v18  ;;  %9360 = vmatprep.mubr.bf16.mxu1 %v12400_v18 }
0x1a25   :  { %9290 = vmatpush1.bf16.msra.mxu0 %v9259_v24  ;;  %9331 = vmatpush1.bf16.msra.mxu1 %v9261_v6  ;;  %v9235_v24 = vld [vmem:[#allocation8 + $0x68] sm:$0xff]  ;;  %v9237_v6 = vld [vmem:[#allocation8 + $0x78] sm:$0xff] }
0x1a26   :  { %9291 = vmatprep.subr.bf16.mxu0 %v9264_v15  ;;  %9332 = vmatprep.subr.bf16.mxu1 %v9266_v13  ;;  %v9234_v15 = vld [vmem:[#allocation8 + $0x60] sm:$0xff]  ;;  %v9236_v13 = vld [vmem:[#allocation8 + $0x70] sm:$0xff] }
0x1a29   :  { %9292 = vmatpush1.bf16.msra.mxu0 %v9263_v34  ;;  %9333 = vmatpush1.bf16.msra.mxu1 %v9265_v42  ;;  %v11033_v20 = vpop.eup %11032  ;;  %v9239_v34 = vld [vmem:[#allocation8 + $0x88] sm:$0xff]  ;;  %v9241_v42 = vld [vmem:[#allocation8 + $0x98] sm:$0xff] }
0x1a2a   :  { %9293 = vmatprep.subr.bf16.mxu0 %v9268_v44  ;;  %9334 = vmatprep.subr.bf16.mxu1 %v9270_v14  ;;  %v12295_v51 = vmul.f32 %v11033_v20, %v11031_v36  ;;  %v9238_v44 = vld [vmem:[#allocation8 + $0x80] sm:$0xff]  ;;  %v9240_v14 = vld [vmem:[#allocation8 + $0x90] sm:$0xff] }
0x1a2c   :  { %v9254_v41 = vpack.c.bf16 %v12295_v51, %v12295_v51 }
0x1a2d   :  { %9294 = vmatpush1.bf16.msra.mxu0 %v9267_v39  ;;  %9335 = vmatpush1.bf16.msra.mxu1 %v9269_v32  ;;  %v9245_v39 = vld [vmem:[#allocation8 + $0xb8] sm:$0xff]  ;;  %v9242_v32 = vld [vmem:[#allocation8 + $0xa0] sm:$0xff] }
0x1a2e   :  { %9295 = vmatprep.subr.bf16.mxu0 %v9272_v12  ;;  %9336 = vmatprep.subr.bf16.mxu1 %v9274_v30  ;;  %v9247_v12 = vld [vmem:[#allocation8 + $0xc8] sm:$0xff]  ;;  %v9249_v30 = vld [vmem:[#allocation8 + $0xd8] sm:$0xff] }
0x1a31   :  { %9296 = vmatpush1.bf16.msra.mxu0 %v9271_v59  ;;  %9337 = vmatpush1.bf16.msra.mxu1 %v9273_v2  ;;  %v9246_v59 = vld [vmem:[#allocation8 + $0xc0] sm:$0xff]  ;;  %v9248_v2 = vld [vmem:[#allocation8 + $0xd0] sm:$0xff] }
0x1a32   :  { %9297 = vmatprep.subr.bf16.mxu0 %v9276_v11  ;;  %9338 = vmatprep.subr.bf16.mxu1 %v9278_v4  ;;  %v9251_v11 = vld [vmem:[#allocation8 + $0xe8] sm:$0xff]  ;;  %v9253_v4 = vld [vmem:[#allocation8 + $0xf8] sm:$0xff] }
0x1a35   :  { %9298 = vmatpush1.bf16.msra.mxu0 %v9275_v27  ;;  %9339 = vmatpush1.bf16.msra.mxu1 %v9277_v25  ;;  %v9250_v27 = vld [vmem:[#allocation8 + $0xe0] sm:$0xff]  ;;  %v9252_v25 = vld [vmem:[#allocation8 + $0xf0] sm:$0xff] }
0x1a36   :  { %9299 = vmatprep.subr.bf16.mxu0 %v9280_v19  ;;  %9340 = vmatprep.subr.bf16.mxu1 %v9282_v52 }
0x1a39   :  { %9300 = vmatpush1.bf16.msra.mxu0 %v9279_v33  ;;  %9341 = vmatpush1.bf16.msra.mxu1 %v9281_v55 }
0x1a3a   :  { %9301 = vmatprep.subr.bf16.mxu0 %v9284_v48  ;;  %9342 = vmatprep.subr.bf16.mxu1 %v9286_v21 }
0x1a3d   :  { %9302 = vmatpush1.bf16.msra.mxu0 %v9283_v43  ;;  %9343 = vmatpush1.bf16.msra.mxu1 %v9285_v1 }
0x1a3e   :  { %9369 = vmatprep.subr.bf16.mxu0 %v9223_v45  ;;  %9410 = vmatprep.subr.bf16.mxu1 %v9225_v40 }
0x1a40   :  { %9320 = vmatmul.mubr.bf16.vlgmr.msra.gmra.mrb[216].mxu0 %v9254_v41  ;;  %9361 = vmatmul.mubr.bf16.vlgmr.msra.gmra.mrb[248].mxu1 %v9254_v41 }
0x1a41   :  { %9401 = vmatprep.mubr.bf16.mxu0 %v12400_v18  ;;  %9442 = vmatprep.mubr.bf16.mxu1 %v12400_v18  ;;  %v9230_v18 = vld [vmem:[#allocation8 + $0x40] sm:$0xff] }
0x1a42   :  { %9370 = vmatpush1.bf16.msra.mxu0 %v9222_v47  ;;  %9411 = vmatpush1.bf16.msra.mxu1 %v9224_v0 }
0x1a43   :  { %9371 = vmatprep.subr.bf16.mxu0 %v9227_v38  ;;  %9412 = vmatprep.subr.bf16.mxu1 %v9229_v29 }
0x1a46   :  { %9372 = vmatpush1.bf16.msra.mxu0 %v9226_v31  ;;  %9413 = vmatpush1.bf16.msra.mxu1 %v9228_v3 }
0x1a47   :  { %9373 = vmatprep.subr.bf16.mxu0 %v9231_v58  ;;  %9414 = vmatprep.subr.bf16.mxu1 %v9233_v28 }
0x1a4a   :  { %9374 = vmatpush1.bf16.msra.mxu0 %v9230_v18  ;;  %9415 = vmatpush1.bf16.msra.mxu1 %v9232_v49 }
0x1a4b   :  { %9375 = vmatprep.subr.bf16.mxu0 %v9235_v24  ;;  %9416 = vmatprep.subr.bf16.mxu1 %v9237_v6 }
0x1a4e   :  { %9376 = vmatpush1.bf16.msra.mxu0 %v9234_v15  ;;  %9417 = vmatpush1.bf16.msra.mxu1 %v9236_v13 }
0x1a4f   :  { %9377 = vmatprep.subr.bf16.mxu0 %v9239_v34  ;;  %9418 = vmatprep.subr.bf16.mxu1 %v9241_v42 }
0x1a52   :  { %9378 = vmatpush1.bf16.msra.mxu0 %v9238_v44  ;;  %9419 = vmatpush1.bf16.msra.mxu1 %v9240_v14 }
0x1a53   :  { %9379 = vmatprep.subr.bf16.mxu0 %v9243_v23  ;;  %9420 = vmatprep.subr.bf16.mxu1 %v9245_v39 }
0x1a56   :  { %9380 = vmatpush1.bf16.msra.mxu0 %v9242_v32  ;;  %9421 = vmatpush1.bf16.msra.mxu1 %v9244_v46 }
0x1a57   :  { %9381 = vmatprep.subr.bf16.mxu0 %v9247_v12  ;;  %9422 = vmatprep.subr.bf16.mxu1 %v9249_v30 }
0x1a5a   :  { %9382 = vmatpush1.bf16.msra.mxu0 %v9246_v59  ;;  %9423 = vmatpush1.bf16.msra.mxu1 %v9248_v2 }
0x1a5b   :  { %9383 = vmatprep.subr.bf16.mxu0 %v9251_v11  ;;  %9424 = vmatprep.subr.bf16.mxu1 %v9253_v4 }
0x1a5e   :  { %9384 = vmatpush1.bf16.msra.mxu0 %v9250_v27  ;;  %9425 = vmatpush1.bf16.msra.mxu1 %v9252_v25 }
0x1af3   :  { %v9145_v19 = vpop.f32.mrb[212].mxu0  ;;  %v9186_v52 = vpop.f32.mrb[244].mxu1 }
0x1af4   :  { %v9146_v33 = vadd.f32 %v9145_v19, %v12282_v63  ;;  %v9187_v55 = vadd.f32 %v9186_v52, %v12284_v37  ;;  %v9147_v36 = vpop.f32.mrb[213].mxu0  ;;  %v9188_v48 = vpop.f32.mrb[245].mxu1 }
0x1af5   :  { %v9148_v21 = vadd.f32 %v9147_v36, %v12286_v60  ;;  %v9189_v20 = vadd.f32 %v9188_v48, %v12288_v50  ;;  %v9149_v43 = vpop.f32.mrb[214].mxu0  ;;  %v9190_v1 = vpop.f32.mrb[246].mxu1 }
0x1af6   :  { %v9193_v41 = vadd.f32 %v9146_v33, %v11415_v53  ;;  %v9150_v45 = vpop.f32.mrb[215].mxu0  ;;  %v9191_v40 = vpop.f32.mrb[247].mxu1  ;;  %v9195_v29 = vadd.f32 %v9187_v55, %v11427_v61 }
0x1af7   :  { %v9194_v47 = vadd.f32 %v9148_v21, %v11421_v56  ;;  %v9196_v63 = vadd.f32 %v9189_v20, %v11433_v8 }
0x1af8   :  { %v10040_v0 = vmul.f32 -1.442695, %v9193_v41 }
0x1af9   :  { %v10041_v38 = vmul.f32 -1.442695, %v9194_v47  ;;  %v10042_v37 = vmul.f32 -1.442695, %v9196_v63 }
0x1afa   :  { %11034 = vpow2.f32 %v10040_v0 }
0x1afb   :  { %11036 = vpow2.f32 %v10041_v38 }
0x1afc   :  { %11038 = vpow2.f32 %v10042_v37 }
0x1afd   :  { %11040 = vtanh.f32 %v9195_v29 }
0x1b04   :  { %v11035_v60 = vpop.eup %11034 }
0x1b05   :  { %v11037_v31 = vpop.eup %11036  ;;  %v9200_v50 = vadd.f32 1.0, %v11035_v60 }
0x1b06   :  { %v9206_v3 = vadd.f32 1.0, %v11037_v31  ;;  %v11039_v53 = vpop.eup %11038 }
0x1b07   :  { %11042 = vrcp.f32 %v9200_v50  ;;  %v11041_v58 = vpop.eup %11040  ;;  %v9213_v49 = vadd.f32 1.0, %v11039_v53  ;;  %v12402_v50 = vld [vmem:[#allocation38_spill] sm:$0xff] }
0x1b08   :  { %11044 = vrcp.f32 %v9206_v3  ;;  %10066 = vmatprep.subr.bf16.mxu0 %v12402_v50  ;;  %v9492_v3 = vpack.c.bf16 %v11774_v10, %v11667_v5 }
0x1b09   :  { %11046 = vrcp.f32 %v9213_v49 }
0x1b11   :  { %v11043_v56 = vpop.eup %11042 }
0x1b12   :  { %v11045_v28 = vpop.eup %11044  ;;  %v9217_v18 = vmul.f32 %v11043_v56, %v11041_v58 }
0x1b13   :  { %v9216_v24 = vmul.f32 %v11045_v28, %v12225_v35  ;;  %v9321_v8 = vpop.f32.mrb[216].mxu0  ;;  %v9362_v6 = vpop.f32.mrb[248].mxu1 }
0x1b14   :  { %v9323_v15 = vpop.f32.mrb[217].mxu0  ;;  %v9364_v61 = vpop.f32.mrb[249].mxu1 }
0x1b15   :  { %v9218_v13 = vadd.f32 %v9217_v18, %v9216_v24  ;;  %v9325_v34 = vpop.f32.mrb[218].mxu0  ;;  %v9366_v42 = vpop.f32.mrb[250].mxu1 }
0x1b16   :  { %v9326_v44 = vpop.f32.mrb[219].mxu0  ;;  %v9367_v14 = vpop.f32.mrb[251].mxu1 }
0x1b17   :  { %11048 = vtanh.f32 %v9218_v13  ;;  %v11047_v23 = vpop.eup %11046 }
0x1b21   :  { %v11049_v39 = vpop.eup %11048 }
0x1b22   :  { %v9220_v32 = vmul.f32 %v11049_v39, %v11047_v23 }
0x1b24   :  { %v9221_v46 = vpack.c.bf16 %v9220_v32, %v9220_v32 }
0x1b26   :  { %9402 = vmatmul.mubr.bf16.vlgmr.msra.gmra.mrb[220].mxu0 %v9221_v46  ;;  %9443 = vmatmul.mubr.bf16.vlgmr.msra.gmra.mrb[252].mxu1 %v9221_v46 }
0x1bf9   :  { %v9403_v12 = vpop.f32.mrb[220].mxu0  ;;  %v9444_v30 = vpop.f32.mrb[252].mxu1 }
0x1bfa   :  { %v9404_v35 = vadd.f32 %v9403_v12, %v9321_v8  ;;  %v9445_v59 = vadd.f32 %v9444_v30, %v9362_v6  ;;  %v9405_v2 = vpop.f32.mrb[221].mxu0  ;;  %v9446_v11 = vpop.f32.mrb[253].mxu1 }
0x1bfb   :  { %v9406_v4 = vadd.f32 %v9405_v2, %v9323_v15  ;;  %v9447_v27 = vadd.f32 %v9446_v11, %v9364_v61  ;;  %v9407_v25 = vpop.f32.mrb[222].mxu0  ;;  %v9448_v19 = vpop.f32.mrb[254].mxu1 }
0x1bfc   :  { %v9451_v52 = vadd.f32 %v9404_v35, %v11417_v54  ;;  %v9408_v33 = vpop.f32.mrb[223].mxu0  ;;  %v9449_v55 = vpop.f32.mrb[255].mxu1  ;;  %v9453_v1 = vadd.f32 %v9445_v59, %v11429_v62 }
0x1bfd   :  { %v9452_v36 = vadd.f32 %v9406_v4, %v11423_v57  ;;  %v9454_v20 = vadd.f32 %v9447_v27, %v11435_v9 }
0x1bfe   :  { %v10043_v48 = vmul.f32 -1.442695, %v9451_v52 }
0x1bff   :  { %v10044_v21 = vmul.f32 -1.442695, %v9452_v36  ;;  %v10045_v43 = vmul.f32 -1.442695, %v9454_v20 }
0x1c00   :  { %11050 = vpow2.f32 %v10043_v48 }
0x1c01   :  { %11052 = vpow2.f32 %v10044_v21 }
0x1c02   :  { %11054 = vpow2.f32 %v10045_v43 }
0x1c03   :  { %11056 = vtanh.f32 %v9453_v1 }
0x1c0a   :  { %v11051_v41 = vpop.eup %11050 }
0x1c0b   :  { %v11053_v45 = vpop.eup %11052  ;;  %v9458_v40 = vadd.f32 1.0, %v11051_v41 }
0x1c0c   :  { %v9464_v47 = vadd.f32 1.0, %v11053_v45  ;;  %v11055_v54 = vpop.eup %11054 }
0x1c0d   :  { %11058 = vrcp.f32 %v9458_v40  ;;  %v11057_v0 = vpop.eup %11056  ;;  %v9471_v37 = vadd.f32 1.0, %v11055_v54 }
0x1c0e   :  { %11060 = vrcp.f32 %v9464_v47 }
0x1c0f   :  { %11062 = vrcp.f32 %v9471_v37 }
0x1c17   :  { %v11059_v57 = vpop.eup %11058 }
0x1c18   :  { %v11061_v38 = vpop.eup %11060  ;;  %v9475_v63 = vmul.f32 %v11059_v57, %v11057_v0 }
0x1c19   :  { %v9474_v29 = vmul.f32 %v11061_v38, %v12253_v7  ;;  %v11063_v62 = vpop.eup %11062 }
0x1c1b   :  { %v9476_v9 = vadd.f32 %v9475_v63, %v9474_v29 }
0x1c1d   :  { %11064 = vtanh.f32 %v9476_v9 }
0x1c27   :  { %v11065_v60 = vpop.eup %11064 }
0x1c28   :  { %v9478_v31 = vmul.f32 %v11065_v60, %v11063_v62 }
0x1c29   :  { %11126 = dma.done.wait [#allocation11 + $0x6], 1024 }
0x1c2a   :  { %11127 = vsyncadd [#allocation11 + $0x6], 4294966272  ;;  %10067 = vmatpush3.bf16.msra.mxu0 %v12402_v50  ;;  %v12403_v53 = vld [vmem:[#allocation39_spill] sm:$0xff]  ;;  %10082 = vmatprep.mubr.bf16.mxu0 %v9492_v3  ;;  %v12404_v7 = vld [vmem:[#allocation40_spill] sm:$0xff]  ;;  %v9493_v18 = vpack.c.bf16 %v11988_v16, %v11881_v22  ;;  %v9494_v49 = vpack.c.bf16 %v12202_v26, %v12095_v17  ;;  %v9495_v24 = vpack.c.bf16 %v9478_v31, %v12295_v51 }
0x1c2b   :  { %10068 = vmatprep.subr.bf16.mxu0 %v12403_v53  ;;  %v12405_v58 = vld [vmem:[#allocation41_spill] sm:$0xff]  ;;  %v12406_v56 = vld [vmem:[#allocation42_spill] sm:$0xff]  ;;  %v12407_v5 = vld [vmem:[#allocation43_spill] sm:$0xff] }
0x1c2c   :  { %v12408_v10 = vld [vmem:[#allocation44_spill] sm:$0xff]  ;;  %v12409_v28 = vld [vmem:[#allocation45_spill] sm:$0xff]  ;;  %v10046_v8 = vld [vmem:[%s12379_s14] ss:$0 sm:$0xff] }
0x1c2e   :  { %10069 = vmatpush3.bf16.msra.mxu0 %v12403_v53 }
0x1c2f   :  { %10070 = vmatprep.subr.bf16.mxu0 %v12404_v7 }
0x1c32   :  { %10071 = vmatpush3.bf16.msra.mxu0 %v12404_v7 }
0x1c33   :  { %10072 = vmatprep.subr.bf16.mxu0 %v12405_v58 }
0x1c36   :  { %10073 = vmatpush3.bf16.msra.mxu0 %v12405_v58 }
0x1c37   :  { %10074 = vmatprep.subr.bf16.mxu0 %v12406_v56 }
0x1c3a   :  { %10075 = vmatpush3.bf16.msra.mxu0 %v12406_v56 }
0x1c3b   :  { %10076 = vmatprep.subr.bf16.mxu0 %v12407_v5 }
0x1c3e   :  { %10077 = vmatpush3.bf16.msra.mxu0 %v12407_v5 }
0x1c3f   :  { %10078 = vmatprep.subr.bf16.mxu0 %v12408_v10 }
0x1c42   :  { %10079 = vmatpush3.bf16.msra.mxu0 %v12408_v10 }
0x1c43   :  { %10080 = vmatprep.subr.bf16.mxu0 %v12409_v28 }
0x1c46   :  { %10081 = vmatpush3.bf16.msra.mxu0 %v12409_v28 }
0x1c49   :  { %10083 = vmatmul.mubr.bf16.vlgmr.msra.gmra.mrb[224].mxu0 %v9493_v18 }
0x1c4a   :  { %10086 = vmatprep.mubr.bf16.mxu0 %v9494_v49 }
0x1c51   :  { %10087 = vmatmul.mubr.bf16.gmra.mrb[228].mxu0 %v9495_v24 }
0x1d1c   :  { %v10084_v6 = vpop.f32.mrb[224].mxu0 }
0x1d1d   :  { %v9554_v15 = vadd.f32 %v10084_v6, %v10046_v8  ;;  %v9545_v61 = vpop.f32.mrb[225].mxu0 }
0x1d1e   :  { %v9546_v13 = vadd.f32 %v10046_v8, %v9545_v61  ;;  %v10085_v34 = vpop.f32.mrb[226].mxu0 }
0x1d1f   :  { %9578 = vst [vmem:[%s12380_s15 + $0x10] sm:$0xff] %v9554_v15  ;;  %v9557_v22 = vadd.f32 %v10085_v34, %v10046_v8  ;;  %v9548_v16 = vpop.f32.mrb[227].mxu0 }
0x1d20   :  { %9576 = vst [vmem:[%s12380_s15] sm:$0xff] %v9546_v13  ;;  %v9549_v17 = vadd.f32 %v10046_v8, %v9548_v16 }
0x1d21   :  { %9579 = vst [vmem:[%s12380_s15 + $0x18] sm:$0xff] %v9557_v22 }
0x1d22   :  { %9577 = vst [vmem:[%s12380_s15 + $0x8] sm:$0xff] %v9549_v17 }
0x1d24   :  { %v10088_v26 = vpop.f32.mrb[228].mxu0 }
0x1d25   :  { %v9570_v51 = vadd.f32 %v10088_v26, %v10046_v8  ;;  %v9561_v42 = vpop.f32.mrb[229].mxu0 }
0x1d26   :  { %v9562_v44 = vadd.f32 %v10046_v8, %v9561_v42  ;;  %v10089_v14 = vpop.f32.mrb[230].mxu0 }
0x1d27   :  { %9582 = vst [vmem:[%s12380_s15 + $0x30] sm:$0xff] %v9570_v51  ;;  %v9573_v23 = vadd.f32 %v10089_v14, %v10046_v8  ;;  %v9564_v39 = vpop.f32.mrb[231].mxu0 }
0x1d28   :  { %9580 = vst [vmem:[%s12380_s15 + $0x20] sm:$0xff] %v9562_v44  ;;  %v9565_v32 = vadd.f32 %v10046_v8, %v9564_v39 }
0x1d29   :  { %9583 = vst [vmem:[%s12380_s15 + $0x38] sm:$0xff] %v9573_v23 }
0x1d2a   :  { %9581 = vst [vmem:[%s12380_s15 + $0x28] sm:$0xff] %v9565_v32 }
0x1d2b   :  { %9588 = vsyncpa [#allocation13], 1 }
0x1d2c   :  { %9589 = vsyncpa [#allocation15], 1 }
0x1d2d   :  { %9590 = vsyncmov [#allocation11] }
0x1d30   :  { %s9591_s10 = vpop.sfrf %9590 }
0x1d31   :  { %p10047_p2 = scmp.ne.s32.totalorder %s9591_s10, 0 }
0x1d33   :  { %9595 = shalt.err (%p10047_p2)  }
0x1d34   :  { %9597 = vsyncmov [#allocation11 + $0x1] }
0x1d37   :  { %s9598_s1 = vpop.sfrf %9597 }
0x1d38   :  { %p10048_p3 = scmp.ne.s32.totalorder %s9598_s1, 0 }
0x1d3a   :  { %9602 = shalt.err (%p10048_p3)  }
0x1d3b   :  { %9604 = vsyncmov [#allocation11 + $0x2] }
0x1d3e   :  { %s9605_s16 = vpop.sfrf %9604 }
0x1d3f   :  { %p10049_p4 = scmp.ne.s32.totalorder %s9605_s16, 0 }
0x1d41   :  { %9609 = shalt.err (%p10049_p4)  }
0x1d42   :  { %9611 = vsyncmov [#allocation11 + $0x3] }
0x1d45   :  { %s9612_s19 = vpop.sfrf %9611 }
0x1d46   :  { %p10050_p5 = scmp.ne.s32.totalorder %s9612_s19, 0 }
0x1d48   :  { %9616 = shalt.err (%p10050_p5)  }
0x1d49   :  { %9618 = vsyncmov [#allocation11 + $0x4] }
0x1d4c   :  { %s9619_s15 = vpop.sfrf %9618 }
0x1d4d   :  { %p10051_p6 = scmp.ne.s32.totalorder %s9619_s15, 0 }
0x1d4f   :  { %9623 = shalt.err (%p10051_p6)  }
0x1d50   :  { %9625 = vsyncmov [#allocation11 + $0x5] }
0x1d53   :  { %s9626_s0 = vpop.sfrf %9625 }
0x1d54   :  { %p10052_p7 = scmp.ne.s32.totalorder %s9626_s0, 0 }
0x1d56   :  { %9630 = shalt.err (%p10052_p7)  }
0x1d57   :  { %9632 = vsyncmov [#allocation11 + $0x6] }
0x1d5a   :  { %s9633_s7 = vpop.sfrf %9632 }
0x1d5b   :  { %p10053_p8 = scmp.ne.s32.totalorder %s9633_s7, 0 }
0x1d5d   :  { %9637 = shalt.err (%p10053_p8)  }

</bundles_post_ra>
